<compile_context>
chip_gen: v7x
topology: tpu7x:2x2x1
jax: 0.10.0
libtpu: 0.0.40
codegen_flags: <defaults>
</compile_context>

<pallas_src>
import math

import numpy as np

import jax
import jax.numpy as jnp
from jax import lax
from jax.experimental import pallas as pl
from jax.experimental.pallas import tpu as pltpu


_SQRT_2_OVER_PI = 0.7978845608028654
_BN_EPS = 1e-5


# --------------------------- in-kernel helpers ------------------------------
def _bn_gelu_rows(z, aff, n):
    """Training-mode BatchNorm (biased var, one-pass stats) + tanh-GELU.

    z   : (C, M) f32 channel-major pre-activation, M = B*H*W columns.
    aff : (C, 2) f32, columns = (gamma, beta).
    """
    inv_n = 1.0 / n
    s1 = jnp.sum(z, axis=1, keepdims=True)
    s2 = jnp.sum(z * z, axis=1, keepdims=True)
    mu = s1 * inv_n
    var = jnp.maximum(s2 * inv_n - mu * mu, 0.0)
    scale = aff[:, 0:1] * lax.rsqrt(var + _BN_EPS)
    shift = aff[:, 1:2] - mu * scale
    y = z * scale + shift
    return 0.5 * y * (1.0 + jnp.tanh(_SQRT_2_OVER_PI * (y + 0.044715 * y * y * y)))


# ------------------------------ fused kernel --------------------------------
def _decoder_kernel(x_ref, w1_ref, w2_ref, w3_ref, w4_ref, w5_ref,
                    rs_ref, r5_ref, g6_hbm,
                    aff1, aff2, aff3, aff4, aff5, aff6,
                    out_ref,
                    g6_vmem, dma_sem):
    # Prefetch the PostProcess operator (largest input) while layers 1-5 run.
    g6_copy = pltpu.make_async_copy(g6_hbm, g6_vmem, dma_sem.at[0])
    g6_copy.start()

    def conv_bn_gelu(y_bf16, w_ref, r_ref, aff_ref):
        # y_bf16 : (Cin, M_in) bf16        channel-major activation
        # w_ref  : (9, Cout, Cin) bf16     W_t^T per tap
        # r_ref  : (9, M_in, M_out) bf16   shift (x upsample) operator per tap
        cout = w_ref.shape[1]
        m_out = r_ref.shape[2]
        acc = jnp.zeros((cout, m_out), jnp.float32)
        for t in range(9):                       # 9 taps, kept unrolled (MXU work)
            h = jnp.dot(w_ref[t], y_bf16, preferred_element_type=jnp.float32)
            acc = acc + jnp.dot(h.astype(jnp.bfloat16), r_ref[t],
                                preferred_element_type=jnp.float32)
        return _bn_gelu_rows(acc, aff_ref[...], float(m_out))

    y = x_ref[...]                                                   # (256, B*16)
    # ---- Convolutional_Layer2: 256->128->64->32->16 on (2, 8) spatial -------
    y = conv_bn_gelu(y, w1_ref, rs_ref, aff1).astype(jnp.bfloat16)   # (128, B*16)
    y = conv_bn_gelu(y, w2_ref, rs_ref, aff2).astype(jnp.bfloat16)   # ( 64, B*16)
    y = conv_bn_gelu(y, w3_ref, rs_ref, aff3).astype(jnp.bfloat16)   # ( 32, B*16)
    y = conv_bn_gelu(y, w4_ref, rs_ref, aff4).astype(jnp.bfloat16)   # ( 16, B*16)
    # ---- bilinear x2 + Convolutional_Layer1 (upsample folded into r5) -------
    y = conv_bn_gelu(y, w5_ref, r5_ref, aff5).astype(jnp.bfloat16)   # (  4, B*64)

    # ---- bilinear x2 + PostProcess conv, folded into G[c] -------------------
    g6_copy.wait()
    m6 = g6_vmem.shape[2]                                            # B*320
    acc = jnp.zeros((1, m6), jnp.float32)
    for c in range(4):
        acc = acc + jnp.dot(y[c:c + 1, :], g6_vmem[c],
                            preferred_element_type=jnp.float32)
    out_ref[...] = _bn_gelu_rows(acc, aff6[...], float(m6))          # lane-dense


# --------------------- host-side constant spatial operators ------------------
def _lin_interp_matrix(n):
    """(2n, n) align_corners=True linear 2x upsample matrix (exact, numpy)."""
    no = 2 * n
    src = np.arange(no, dtype=np.float64) * (n - 1) / (no - 1)
    i0 = np.minimum(np.floor(src).astype(np.int64), n - 1)
    i1 = np.minimum(i0 + 1, n - 1)
    t = src - i0
    u = np.zeros((no, n), dtype=np.float64)
    u[np.arange(no), i0] += 1.0 - t
    u[np.arange(no), i1] += t
    return u


def _upsample2_matrix(h, w):
    """Per-sample bilinear 2x upsample on the flattened (h, w) grid."""
    return np.kron(_lin_interp_matrix(h), _lin_interp_matrix(w))     # (4hw, hw)


def _shift_matrix(h, w, ph, pw, kh, kw):
    """0/1 matrix: out(ho,wo) <- in(ho+kh-ph, wo+kw-pw), zero outside."""
    ho_n, wo_n = h + 2 * ph - 2, w + 2 * pw - 2
    s = np.zeros((ho_n * wo_n, h * w), dtype=np.float64)
    for ho in range(ho_n):
        hi = ho + kh - ph
        if hi < 0 or hi >= h:
            continue
        for wo in range(wo_n):
            wi = wo + kw - pw
            if 0 <= wi < w:
                s[ho * wo_n + wo, hi * w + wi] = 1.0
    return s


def _tap_operators(batch, h, w, ph, pw, pre_up=None):
    """R_t = (I_B kron (s_t @ pre_up))^T, stacked -> (9, M_in, M_out) f32."""
    taps = []
    for kh in range(3):
        for kw in range(3):
            s = _shift_matrix(h, w, ph, pw, kh, kw)
            if pre_up is not None:
                s = s @ pre_up                   # fold bilinear 2x upsample in
            taps.append(np.kron(np.eye(batch), s).T)
    return np.stack(taps, axis=0).astype(np.float32)


# ------------------------------ JAX wrappers ---------------------------------
def init_params(key):
    # (Cin, Cout) for: Conv5, Conv4, Conv3, Conv2, Conv1, PostProcess.Conv
    dims = [(256, 128), (128, 64), (64, 32), (32, 16), (16, 4), (4, 1)]
    params = []
    for cin, cout in dims:
        k1, k2, k3, k4, key = jax.random.split(key, 5)
        bound = 1.0 / math.sqrt(cin * 9)         # PyTorch Conv2d default init range
        w = jax.random.uniform(k1, (3, 3, cin, cout), jnp.float32, -bound, bound)
        b = jax.random.uniform(k2, (cout,), jnp.float32, -bound, bound)
        gamma = 1.0 + 0.1 * jax.random.normal(k3, (cout,), jnp.float32)
        beta = 0.1 * jax.random.normal(k4, (cout,), jnp.float32)
        params.append((w, b, gamma, beta))
    return params


def decoder_forward(features, params):
    B = features.shape[0]

    # features.view(B, 256, 2, 8) (NCHW) -> channel-major (256, B*2*8),
    # columns ordered (b, h, w).
    x = features.reshape(B, 256, 16).transpose(1, 0, 2).reshape(256, B * 16)
    x = x.astype(jnp.bfloat16)

    # Constant spatial operators (built in numpy at trace time).
    rs_np = _tap_operators(B, 2, 8, 1, 1)                                    # (9, B*16,  B*16)
    r5_np = _tap_operators(B, 4, 16, 1, 1, pre_up=_upsample2_matrix(2, 8))   # (9, B*16,  B*64)
    r6_np = _tap_operators(B, 8, 32, 2, 1, pre_up=_upsample2_matrix(4, 16))  # (9, B*64,  B*320)
    # TODO(synk): the I_B kron carries O(B^2) zeros; restructure to a per-sample
    # loop before scaling B on v7x (fine at B=2: < 3 MiB total).
    rs = jnp.asarray(rs_np, jnp.bfloat16)
    r5 = jnp.asarray(r5_np, jnp.bfloat16)

    w_in, affs = [], []
    for i, (w, b, gamma, beta) in enumerate(params):
        cout, cin = w.shape[3], w.shape[2]
        # Conv bias is dropped: training-mode BatchNorm subtracts the batch mean,
        # so a per-channel constant cancels exactly (no effect on the output).
        affs.append(jnp.stack([gamma, beta], axis=1).astype(jnp.float32))    # (Cout, 2)
        if i < 5:
            w_in.append(jnp.transpose(w, (0, 1, 3, 2))
                        .reshape(9, cout, cin).astype(jnp.bfloat16))         # (9, Cout, Cin)

    # PostProcess (Cin=4, Cout=1): fold taps and weights into G[c] = sum_t w6[t,c] R6_t.
    w6_taps = params[5][0].reshape(9, 4).astype(jnp.float32)
    g6 = jnp.einsum('tc,tmn->cmn', w6_taps, jnp.asarray(r6_np, jnp.float32))
    g6 = g6.astype(jnp.bfloat16)                                             # (4, B*64, B*320)

    n_out = B * 10 * 32
    kernel_inputs = [x] + w_in + [rs, r5, g6] + affs

    def _vspec(arr):
        nd = arr.ndim
        return pl.BlockSpec(arr.shape, lambda i, _n=nd: (0,) * _n)

    in_specs = ([_vspec(a) for a in ([x] + w_in + [rs, r5])]
                + [pl.BlockSpec(memory_space=pl.ANY)]            # g6 -> manual DMA
                + [_vspec(a) for a in affs])

    out = pl.pallas_call(
        _decoder_kernel,
        out_shape=jax.ShapeDtypeStruct((1, n_out), jnp.float32),
        grid=(1,),
        in_specs=in_specs,
        out_specs=pl.BlockSpec((1, n_out), lambda i: (0, 0)),
        scratch_shapes=[pltpu.VMEM((4, B * 64, B * 320), jnp.bfloat16),
                        pltpu.SemaphoreType.DMA((1,))],
        compiler_params=pltpu.CompilerParams(
            dimension_semantics=("arbitrary",)),
    )(*kernel_inputs)

    # (1, B*10*32) columns ordered (b, h, w) -> NCHW (B, 1, 10, 32)
    return out.reshape(B, 10, 32)[:, None, :, :]


if __name__ == "__main__":
    key = jax.random.PRNGKey(0)
    kx, kp = jax.random.split(key)
    # features must be view-able as (B, 256, 2, 8)
    features = jax.random.normal(kx, (2, 256 * 2 * 8), jnp.float32)
    params = init_params(kp)

    out = jax.jit(decoder_forward)(features, params)
    out = jax.block_until_ready(out)
    assert out.shape == (2, 1, 10, 32), out.shape
    assert bool(jnp.all(jnp.isfinite(out)))
    print("KERNEL_OK")
</pallas_src>

<mosaic_0001>
module attributes {stable_mosaic.version = 11 : i64} {
  func.func @_decoder_kernel(%arg0: i32, %arg1: memref<256x32xbf16, #tpu.memory_space<vmem>>, %arg2: memref<9x128x256xbf16, #tpu.memory_space<vmem>>, %arg3: memref<9x64x128xbf16, #tpu.memory_space<vmem>>, %arg4: memref<9x32x64xbf16, #tpu.memory_space<vmem>>, %arg5: memref<9x16x32xbf16, #tpu.memory_space<vmem>>, %arg6: memref<9x4x16xbf16, #tpu.memory_space<vmem>>, %arg7: memref<9x32x32xbf16, #tpu.memory_space<vmem>>, %arg8: memref<9x32x128xbf16, #tpu.memory_space<vmem>>, %arg9: memref<4x128x640xbf16, #tpu.memory_space<any>>, %arg10: memref<128x2xf32, #tpu.memory_space<vmem>>, %arg11: memref<64x2xf32, #tpu.memory_space<vmem>>, %arg12: memref<32x2xf32, #tpu.memory_space<vmem>>, %arg13: memref<16x2xf32, #tpu.memory_space<vmem>>, %arg14: memref<4x2xf32, #tpu.memory_space<vmem>>, %arg15: memref<1x2xf32, #tpu.memory_space<vmem>>, %arg16: memref<1x640xf32, #tpu.memory_space<vmem>>, %arg17: memref<4x128x640xbf16, #tpu.memory_space<vmem>>, %arg18: memref<1x!tpu.dma_semaphore, #tpu.memory_space<semaphore_mem>>) attributes {dimension_semantics = [#tpu.dimension_semantics<arbitrary>], iteration_bounds = array<i64: 1>, scalar_prefetch = 0 : i64, scratch_operands = 2 : i64, tpu.core_type = #tpu.core_type<tc>, window_params = [{pipeline_mode = #tpu.pipeline_mode<synchronous>, transform_indices = @transform_0, window_bounds = array<i64: 256, 32>}, {pipeline_mode = #tpu.pipeline_mode<synchronous>, transform_indices = @transform_1, window_bounds = array<i64: 9, 128, 256>}, {pipeline_mode = #tpu.pipeline_mode<synchronous>, transform_indices = @transform_2, window_bounds = array<i64: 9, 64, 128>}, {pipeline_mode = #tpu.pipeline_mode<synchronous>, transform_indices = @transform_3, window_bounds = array<i64: 9, 32, 64>}, {pipeline_mode = #tpu.pipeline_mode<synchronous>, transform_indices = @transform_4, window_bounds = array<i64: 9, 16, 32>}, {pipeline_mode = #tpu.pipeline_mode<synchronous>, transform_indices = @transform_5, window_bounds = array<i64: 9, 4, 16>}, {pipeline_mode = #tpu.pipeline_mode<synchronous>, transform_indices = @transform_6, window_bounds = array<i64: 9, 32, 32>}, {pipeline_mode = #tpu.pipeline_mode<synchronous>, transform_indices = @transform_7, window_bounds = array<i64: 9, 32, 128>}, {}, {pipeline_mode = #tpu.pipeline_mode<synchronous>, transform_indices = @transform_9, window_bounds = array<i64: 128, 2>}, {pipeline_mode = #tpu.pipeline_mode<synchronous>, transform_indices = @transform_10, window_bounds = array<i64: 64, 2>}, {pipeline_mode = #tpu.pipeline_mode<synchronous>, transform_indices = @transform_11, window_bounds = array<i64: 32, 2>}, {pipeline_mode = #tpu.pipeline_mode<synchronous>, transform_indices = @transform_12, window_bounds = array<i64: 16, 2>}, {pipeline_mode = #tpu.pipeline_mode<synchronous>, transform_indices = @transform_13, window_bounds = array<i64: 4, 2>}, {pipeline_mode = #tpu.pipeline_mode<synchronous>, transform_indices = @transform_14, window_bounds = array<i64: 1, 2>}, {pipeline_mode = #tpu.pipeline_mode<synchronous>, transform_indices = @transform_15, window_bounds = array<i64: 1, 640>}]} {
    %c0_i32 = arith.constant 0 : i32
    %0 = tpu.memref_slice %arg18[%c0_i32] : memref<1x!tpu.dma_semaphore, #tpu.memory_space<semaphore_mem>> -> memref<1x!tpu.dma_semaphore, #tpu.memory_space<semaphore_mem>>
    %1 = tpu.memref_squeeze %0 : memref<1x!tpu.dma_semaphore, #tpu.memory_space<semaphore_mem>> -> memref<!tpu.dma_semaphore, #tpu.memory_space<semaphore_mem>>
    tpu.enqueue_dma source(%arg9 : memref<4x128x640xbf16, #tpu.memory_space<any>>) target(%arg17 : memref<4x128x640xbf16, #tpu.memory_space<vmem>>) target_semaphore(%1 : memref<!tpu.dma_semaphore, #tpu.memory_space<semaphore_mem>>)
    %c0 = arith.constant 0 : index
    %c0_0 = arith.constant 0 : index
    %2 = vector.load %arg1[%c0, %c0_0] : memref<256x32xbf16, #tpu.memory_space<vmem>>, vector<256x32xbf16>
    %cst = arith.constant 0.000000e+00 : f32
    %3 = vector.broadcast %cst : f32 to vector<128x32xf32>
    %c0_1 = arith.constant 0 : index
    %c0_2 = arith.constant 0 : index
    %c0_3 = arith.constant 0 : index
    %4 = vector.load %arg2[%c0_1, %c0_2, %c0_3] : memref<9x128x256xbf16, #tpu.memory_space<vmem>>, vector<1x128x256xbf16>
    %5 = vector.shape_cast %4 : vector<1x128x256xbf16> to vector<128x256xbf16>
    %cst_4 = arith.constant dense<0.000000e+00> : vector<128x32xf32>
    %6 = tpu.matmul %5, %2, %cst_4 {dimension_numbers = #tpu.dot_dimension_numbers<[1], [0], [0], [1], [0, 0, 1, 1], [], []>} : vector<128x256xbf16>, vector<256x32xbf16>, vector<128x32xf32> -> vector<128x32xf32>
    %7 = arith.truncf %6 : vector<128x32xf32> to vector<128x32xbf16>
    %c0_5 = arith.constant 0 : index
    %c0_6 = arith.constant 0 : index
    %c0_7 = arith.constant 0 : index
    %8 = vector.load %arg7[%c0_5, %c0_6, %c0_7] : memref<9x32x32xbf16, #tpu.memory_space<vmem>>, vector<1x32x32xbf16>
    %9 = vector.shape_cast %8 : vector<1x32x32xbf16> to vector<32x32xbf16>
    %cst_8 = arith.constant dense<0.000000e+00> : vector<128x32xf32>
    %10 = tpu.matmul %7, %9, %cst_8 {dimension_numbers = #tpu.dot_dimension_numbers<[1], [0], [0], [1], [0, 0, 1, 1], [], []>} : vector<128x32xbf16>, vector<32x32xbf16>, vector<128x32xf32> -> vector<128x32xf32>
    %11 = arith.addf %3, %10 : vector<128x32xf32>
    %c1 = arith.constant 1 : index
    %c0_9 = arith.constant 0 : index
    %c0_10 = arith.constant 0 : index
    %12 = vector.load %arg2[%c1, %c0_9, %c0_10] : memref<9x128x256xbf16, #tpu.memory_space<vmem>>, vector<1x128x256xbf16>
    %13 = vector.shape_cast %12 : vector<1x128x256xbf16> to vector<128x256xbf16>
    %cst_11 = arith.constant dense<0.000000e+00> : vector<128x32xf32>
    %14 = tpu.matmul %13, %2, %cst_11 {dimension_numbers = #tpu.dot_dimension_numbers<[1], [0], [0], [1], [0, 0, 1, 1], [], []>} : vector<128x256xbf16>, vector<256x32xbf16>, vector<128x32xf32> -> vector<128x32xf32>
    %15 = arith.truncf %14 : vector<128x32xf32> to vector<128x32xbf16>
    %c1_12 = arith.constant 1 : index
    %c0_13 = arith.constant 0 : index
    %c0_14 = arith.constant 0 : index
    %16 = vector.load %arg7[%c1_12, %c0_13, %c0_14] : memref<9x32x32xbf16, #tpu.memory_space<vmem>>, vector<1x32x32xbf16>
    %17 = vector.shape_cast %16 : vector<1x32x32xbf16> to vector<32x32xbf16>
    %cst_15 = arith.constant dense<0.000000e+00> : vector<128x32xf32>
    %18 = tpu.matmul %15, %17, %cst_15 {dimension_numbers = #tpu.dot_dimension_numbers<[1], [0], [0], [1], [0, 0, 1, 1], [], []>} : vector<128x32xbf16>, vector<32x32xbf16>, vector<128x32xf32> -> vector<128x32xf32>
    %19 = arith.addf %11, %18 : vector<128x32xf32>
    %c2 = arith.constant 2 : index
    %c0_16 = arith.constant 0 : index
    %c0_17 = arith.constant 0 : index
    %20 = vector.load %arg2[%c2, %c0_16, %c0_17] : memref<9x128x256xbf16, #tpu.memory_space<vmem>>, vector<1x128x256xbf16>
    %21 = vector.shape_cast %20 : vector<1x128x256xbf16> to vector<128x256xbf16>
    %cst_18 = arith.constant dense<0.000000e+00> : vector<128x32xf32>
    %22 = tpu.matmul %21, %2, %cst_18 {dimension_numbers = #tpu.dot_dimension_numbers<[1], [0], [0], [1], [0, 0, 1, 1], [], []>} : vector<128x256xbf16>, vector<256x32xbf16>, vector<128x32xf32> -> vector<128x32xf32>
    %23 = arith.truncf %22 : vector<128x32xf32> to vector<128x32xbf16>
    %c2_19 = arith.constant 2 : index
    %c0_20 = arith.constant 0 : index
    %c0_21 = arith.constant 0 : index
    %24 = vector.load %arg7[%c2_19, %c0_20, %c0_21] : memref<9x32x32xbf16, #tpu.memory_space<vmem>>, vector<1x32x32xbf16>
    %25 = vector.shape_cast %24 : vector<1x32x32xbf16> to vector<32x32xbf16>
    %cst_22 = arith.constant dense<0.000000e+00> : vector<128x32xf32>
    %26 = tpu.matmul %23, %25, %cst_22 {dimension_numbers = #tpu.dot_dimension_numbers<[1], [0], [0], [1], [0, 0, 1, 1], [], []>} : vector<128x32xbf16>, vector<32x32xbf16>, vector<128x32xf32> -> vector<128x32xf32>
    %27 = arith.addf %19, %26 : vector<128x32xf32>
    %c3 = arith.constant 3 : index
    %c0_23 = arith.constant 0 : index
    %c0_24 = arith.constant 0 : index
    %28 = vector.load %arg2[%c3, %c0_23, %c0_24] : memref<9x128x256xbf16, #tpu.memory_space<vmem>>, vector<1x128x256xbf16>
    %29 = vector.shape_cast %28 : vector<1x128x256xbf16> to vector<128x256xbf16>
    %cst_25 = arith.constant dense<0.000000e+00> : vector<128x32xf32>
    %30 = tpu.matmul %29, %2, %cst_25 {dimension_numbers = #tpu.dot_dimension_numbers<[1], [0], [0], [1], [0, 0, 1, 1], [], []>} : vector<128x256xbf16>, vector<256x32xbf16>, vector<128x32xf32> -> vector<128x32xf32>
    %31 = arith.truncf %30 : vector<128x32xf32> to vector<128x32xbf16>
    %c3_26 = arith.constant 3 : index
    %c0_27 = arith.constant 0 : index
    %c0_28 = arith.constant 0 : index
    %32 = vector.load %arg7[%c3_26, %c0_27, %c0_28] : memref<9x32x32xbf16, #tpu.memory_space<vmem>>, vector<1x32x32xbf16>
    %33 = vector.shape_cast %32 : vector<1x32x32xbf16> to vector<32x32xbf16>
    %cst_29 = arith.constant dense<0.000000e+00> : vector<128x32xf32>
    %34 = tpu.matmul %31, %33, %cst_29 {dimension_numbers = #tpu.dot_dimension_numbers<[1], [0], [0], [1], [0, 0, 1, 1], [], []>} : vector<128x32xbf16>, vector<32x32xbf16>, vector<128x32xf32> -> vector<128x32xf32>
    %35 = arith.addf %27, %34 : vector<128x32xf32>
    %c4 = arith.constant 4 : index
    %c0_30 = arith.constant 0 : index
    %c0_31 = arith.constant 0 : index
    %36 = vector.load %arg2[%c4, %c0_30, %c0_31] : memref<9x128x256xbf16, #tpu.memory_space<vmem>>, vector<1x128x256xbf16>
    %37 = vector.shape_cast %36 : vector<1x128x256xbf16> to vector<128x256xbf16>
    %cst_32 = arith.constant dense<0.000000e+00> : vector<128x32xf32>
    %38 = tpu.matmul %37, %2, %cst_32 {dimension_numbers = #tpu.dot_dimension_numbers<[1], [0], [0], [1], [0, 0, 1, 1], [], []>} : vector<128x256xbf16>, vector<256x32xbf16>, vector<128x32xf32> -> vector<128x32xf32>
    %39 = arith.truncf %38 : vector<128x32xf32> to vector<128x32xbf16>
    %c4_33 = arith.constant 4 : index
    %c0_34 = arith.constant 0 : index
    %c0_35 = arith.constant 0 : index
    %40 = vector.load %arg7[%c4_33, %c0_34, %c0_35] : memref<9x32x32xbf16, #tpu.memory_space<vmem>>, vector<1x32x32xbf16>
    %41 = vector.shape_cast %40 : vector<1x32x32xbf16> to vector<32x32xbf16>
    %cst_36 = arith.constant dense<0.000000e+00> : vector<128x32xf32>
    %42 = tpu.matmul %39, %41, %cst_36 {dimension_numbers = #tpu.dot_dimension_numbers<[1], [0], [0], [1], [0, 0, 1, 1], [], []>} : vector<128x32xbf16>, vector<32x32xbf16>, vector<128x32xf32> -> vector<128x32xf32>
    %43 = arith.addf %35, %42 : vector<128x32xf32>
    %c5 = arith.constant 5 : index
    %c0_37 = arith.constant 0 : index
    %c0_38 = arith.constant 0 : index
    %44 = vector.load %arg2[%c5, %c0_37, %c0_38] : memref<9x128x256xbf16, #tpu.memory_space<vmem>>, vector<1x128x256xbf16>
    %45 = vector.shape_cast %44 : vector<1x128x256xbf16> to vector<128x256xbf16>
    %cst_39 = arith.constant dense<0.000000e+00> : vector<128x32xf32>
    %46 = tpu.matmul %45, %2, %cst_39 {dimension_numbers = #tpu.dot_dimension_numbers<[1], [0], [0], [1], [0, 0, 1, 1], [], []>} : vector<128x256xbf16>, vector<256x32xbf16>, vector<128x32xf32> -> vector<128x32xf32>
    %47 = arith.truncf %46 : vector<128x32xf32> to vector<128x32xbf16>
    %c5_40 = arith.constant 5 : index
    %c0_41 = arith.constant 0 : index
    %c0_42 = arith.constant 0 : index
    %48 = vector.load %arg7[%c5_40, %c0_41, %c0_42] : memref<9x32x32xbf16, #tpu.memory_space<vmem>>, vector<1x32x32xbf16>
    %49 = vector.shape_cast %48 : vector<1x32x32xbf16> to vector<32x32xbf16>
    %cst_43 = arith.constant dense<0.000000e+00> : vector<128x32xf32>
    %50 = tpu.matmul %47, %49, %cst_43 {dimension_numbers = #tpu.dot_dimension_numbers<[1], [0], [0], [1], [0, 0, 1, 1], [], []>} : vector<128x32xbf16>, vector<32x32xbf16>, vector<128x32xf32> -> vector<128x32xf32>
    %51 = arith.addf %43, %50 : vector<128x32xf32>
    %c6 = arith.constant 6 : index
    %c0_44 = arith.constant 0 : index
    %c0_45 = arith.constant 0 : index
    %52 = vector.load %arg2[%c6, %c0_44, %c0_45] : memref<9x128x256xbf16, #tpu.memory_space<vmem>>, vector<1x128x256xbf16>
    %53 = vector.shape_cast %52 : vector<1x128x256xbf16> to vector<128x256xbf16>
    %cst_46 = arith.constant dense<0.000000e+00> : vector<128x32xf32>
    %54 = tpu.matmul %53, %2, %cst_46 {dimension_numbers = #tpu.dot_dimension_numbers<[1], [0], [0], [1], [0, 0, 1, 1], [], []>} : vector<128x256xbf16>, vector<256x32xbf16>, vector<128x32xf32> -> vector<128x32xf32>
    %55 = arith.truncf %54 : vector<128x32xf32> to vector<128x32xbf16>
    %c6_47 = arith.constant 6 : index
    %c0_48 = arith.constant 0 : index
    %c0_49 = arith.constant 0 : index
    %56 = vector.load %arg7[%c6_47, %c0_48, %c0_49] : memref<9x32x32xbf16, #tpu.memory_space<vmem>>, vector<1x32x32xbf16>
    %57 = vector.shape_cast %56 : vector<1x32x32xbf16> to vector<32x32xbf16>
    %cst_50 = arith.constant dense<0.000000e+00> : vector<128x32xf32>
    %58 = tpu.matmul %55, %57, %cst_50 {dimension_numbers = #tpu.dot_dimension_numbers<[1], [0], [0], [1], [0, 0, 1, 1], [], []>} : vector<128x32xbf16>, vector<32x32xbf16>, vector<128x32xf32> -> vector<128x32xf32>
    %59 = arith.addf %51, %58 : vector<128x32xf32>
    %c7 = arith.constant 7 : index
    %c0_51 = arith.constant 0 : index
    %c0_52 = arith.constant 0 : index
    %60 = vector.load %arg2[%c7, %c0_51, %c0_52] : memref<9x128x256xbf16, #tpu.memory_space<vmem>>, vector<1x128x256xbf16>
    %61 = vector.shape_cast %60 : vector<1x128x256xbf16> to vector<128x256xbf16>
    %cst_53 = arith.constant dense<0.000000e+00> : vector<128x32xf32>
    %62 = tpu.matmul %61, %2, %cst_53 {dimension_numbers = #tpu.dot_dimension_numbers<[1], [0], [0], [1], [0, 0, 1, 1], [], []>} : vector<128x256xbf16>, vector<256x32xbf16>, vector<128x32xf32> -> vector<128x32xf32>
    %63 = arith.truncf %62 : vector<128x32xf32> to vector<128x32xbf16>
    %c7_54 = arith.constant 7 : index
    %c0_55 = arith.constant 0 : index
    %c0_56 = arith.constant 0 : index
    %64 = vector.load %arg7[%c7_54, %c0_55, %c0_56] : memref<9x32x32xbf16, #tpu.memory_space<vmem>>, vector<1x32x32xbf16>
    %65 = vector.shape_cast %64 : vector<1x32x32xbf16> to vector<32x32xbf16>
    %cst_57 = arith.constant dense<0.000000e+00> : vector<128x32xf32>
    %66 = tpu.matmul %63, %65, %cst_57 {dimension_numbers = #tpu.dot_dimension_numbers<[1], [0], [0], [1], [0, 0, 1, 1], [], []>} : vector<128x32xbf16>, vector<32x32xbf16>, vector<128x32xf32> -> vector<128x32xf32>
    %67 = arith.addf %59, %66 : vector<128x32xf32>
    %c8 = arith.constant 8 : index
    %c0_58 = arith.constant 0 : index
    %c0_59 = arith.constant 0 : index
    %68 = vector.load %arg2[%c8, %c0_58, %c0_59] : memref<9x128x256xbf16, #tpu.memory_space<vmem>>, vector<1x128x256xbf16>
    %69 = vector.shape_cast %68 : vector<1x128x256xbf16> to vector<128x256xbf16>
    %cst_60 = arith.constant dense<0.000000e+00> : vector<128x32xf32>
    %70 = tpu.matmul %69, %2, %cst_60 {dimension_numbers = #tpu.dot_dimension_numbers<[1], [0], [0], [1], [0, 0, 1, 1], [], []>} : vector<128x256xbf16>, vector<256x32xbf16>, vector<128x32xf32> -> vector<128x32xf32>
    %71 = arith.truncf %70 : vector<128x32xf32> to vector<128x32xbf16>
    %c8_61 = arith.constant 8 : index
    %c0_62 = arith.constant 0 : index
    %c0_63 = arith.constant 0 : index
    %72 = vector.load %arg7[%c8_61, %c0_62, %c0_63] : memref<9x32x32xbf16, #tpu.memory_space<vmem>>, vector<1x32x32xbf16>
    %73 = vector.shape_cast %72 : vector<1x32x32xbf16> to vector<32x32xbf16>
    %cst_64 = arith.constant dense<0.000000e+00> : vector<128x32xf32>
    %74 = tpu.matmul %71, %73, %cst_64 {dimension_numbers = #tpu.dot_dimension_numbers<[1], [0], [0], [1], [0, 0, 1, 1], [], []>} : vector<128x32xbf16>, vector<32x32xbf16>, vector<128x32xf32> -> vector<128x32xf32>
    %75 = arith.addf %67, %74 : vector<128x32xf32>
    %c0_65 = arith.constant 0 : index
    %c0_66 = arith.constant 0 : index
    %76 = vector.load %arg10[%c0_65, %c0_66] : memref<128x2xf32, #tpu.memory_space<vmem>>, vector<128x2xf32>
    %cst_67 = arith.constant dense<0.000000e+00> : vector<128xf32>
    %77 = vector.multi_reduction <add>, %75, %cst_67 [1] : vector<128x32xf32> to vector<128xf32>
    %78 = vector.shape_cast %77 : vector<128xf32> to vector<128x1xf32>
    %79 = arith.mulf %75, %75 : vector<128x32xf32>
    %cst_68 = arith.constant dense<0.000000e+00> : vector<128xf32>
    %80 = vector.multi_reduction <add>, %79, %cst_68 [1] : vector<128x32xf32> to vector<128xf32>
    %81 = vector.shape_cast %80 : vector<128xf32> to vector<128x1xf32>
    %cst_69 = arith.constant 3.125000e-02 : f32
    %82 = vector.broadcast %cst_69 : f32 to vector<128x1xf32>
    %83 = arith.mulf %78, %82 : vector<128x1xf32>
    %cst_70 = arith.constant 3.125000e-02 : f32
    %84 = vector.broadcast %cst_70 : f32 to vector<128x1xf32>
    %85 = arith.mulf %81, %84 : vector<128x1xf32>
    %86 = arith.mulf %83, %83 : vector<128x1xf32>
    %87 = arith.subf %85, %86 : vector<128x1xf32>
    %cst_71 = arith.constant 0.000000e+00 : f32
    %88 = vector.broadcast %cst_71 : f32 to vector<128x1xf32>
    %89 = arith.maximumf %87, %88 : vector<128x1xf32>
    %90 = vector.extract_strided_slice %76 {offsets = [0, 0], sizes = [128, 1], strides = [1, 1]} : vector<128x2xf32> to vector<128x1xf32>
    %cst_72 = arith.constant 9.99999974E-6 : f32
    %91 = vector.broadcast %cst_72 : f32 to vector<128x1xf32>
    %92 = arith.addf %89, %91 : vector<128x1xf32>
    %93 = math.rsqrt %92 : vector<128x1xf32>
    %94 = arith.mulf %90, %93 : vector<128x1xf32>
    %95 = vector.extract_strided_slice %76 {offsets = [0, 1], sizes = [128, 1], strides = [1, 1]} : vector<128x2xf32> to vector<128x1xf32>
    %96 = arith.mulf %83, %94 : vector<128x1xf32>
    %97 = arith.subf %95, %96 : vector<128x1xf32>
    %98 = vector.broadcast %94 : vector<128x1xf32> to vector<128x32xf32>
    %99 = arith.mulf %75, %98 : vector<128x32xf32>
    %100 = vector.broadcast %97 : vector<128x1xf32> to vector<128x32xf32>
    %101 = arith.addf %99, %100 : vector<128x32xf32>
    %cst_73 = arith.constant 5.000000e-01 : f32
    %102 = vector.broadcast %cst_73 : f32 to vector<128x32xf32>
    %103 = arith.mulf %102, %101 : vector<128x32xf32>
    %cst_74 = arith.constant 4.471500e-02 : f32
    %104 = vector.broadcast %cst_74 : f32 to vector<128x32xf32>
    %105 = arith.mulf %104, %101 : vector<128x32xf32>
    %106 = arith.mulf %105, %101 : vector<128x32xf32>
    %107 = arith.mulf %106, %101 : vector<128x32xf32>
    %108 = arith.addf %101, %107 : vector<128x32xf32>
    %cst_75 = arith.constant 0.797884583 : f32
    %109 = vector.broadcast %cst_75 : f32 to vector<128x32xf32>
    %110 = arith.mulf %109, %108 : vector<128x32xf32>
    %111 = math.tanh %110 : vector<128x32xf32>
    %cst_76 = arith.constant 1.000000e+00 : f32
    %112 = vector.broadcast %cst_76 : f32 to vector<128x32xf32>
    %113 = arith.addf %112, %111 : vector<128x32xf32>
    %114 = arith.mulf %103, %113 : vector<128x32xf32>
    %115 = arith.truncf %114 : vector<128x32xf32> to vector<128x32xbf16>
    %cst_77 = arith.constant 0.000000e+00 : f32
    %116 = vector.broadcast %cst_77 : f32 to vector<64x32xf32>
    %c0_78 = arith.constant 0 : index
    %c0_79 = arith.constant 0 : index
    %c0_80 = arith.constant 0 : index
    %117 = vector.load %arg3[%c0_78, %c0_79, %c0_80] : memref<9x64x128xbf16, #tpu.memory_space<vmem>>, vector<1x64x128xbf16>
    %118 = vector.shape_cast %117 : vector<1x64x128xbf16> to vector<64x128xbf16>
    %cst_81 = arith.constant dense<0.000000e+00> : vector<64x32xf32>
    %119 = tpu.matmul %118, %115, %cst_81 {dimension_numbers = #tpu.dot_dimension_numbers<[1], [0], [0], [1], [0, 0, 1, 1], [], []>} : vector<64x128xbf16>, vector<128x32xbf16>, vector<64x32xf32> -> vector<64x32xf32>
    %120 = arith.truncf %119 : vector<64x32xf32> to vector<64x32xbf16>
    %c0_82 = arith.constant 0 : index
    %c0_83 = arith.constant 0 : index
    %c0_84 = arith.constant 0 : index
    %121 = vector.load %arg7[%c0_82, %c0_83, %c0_84] : memref<9x32x32xbf16, #tpu.memory_space<vmem>>, vector<1x32x32xbf16>
    %122 = vector.shape_cast %121 : vector<1x32x32xbf16> to vector<32x32xbf16>
    %cst_85 = arith.constant dense<0.000000e+00> : vector<64x32xf32>
    %123 = tpu.matmul %120, %122, %cst_85 {dimension_numbers = #tpu.dot_dimension_numbers<[1], [0], [0], [1], [0, 0, 1, 1], [], []>} : vector<64x32xbf16>, vector<32x32xbf16>, vector<64x32xf32> -> vector<64x32xf32>
    %124 = arith.addf %116, %123 : vector<64x32xf32>
    %c1_86 = arith.constant 1 : index
    %c0_87 = arith.constant 0 : index
    %c0_88 = arith.constant 0 : index
    %125 = vector.load %arg3[%c1_86, %c0_87, %c0_88] : memref<9x64x128xbf16, #tpu.memory_space<vmem>>, vector<1x64x128xbf16>
    %126 = vector.shape_cast %125 : vector<1x64x128xbf16> to vector<64x128xbf16>
    %cst_89 = arith.constant dense<0.000000e+00> : vector<64x32xf32>
    %127 = tpu.matmul %126, %115, %cst_89 {dimension_numbers = #tpu.dot_dimension_numbers<[1], [0], [0], [1], [0, 0, 1, 1], [], []>} : vector<64x128xbf16>, vector<128x32xbf16>, vector<64x32xf32> -> vector<64x32xf32>
    %128 = arith.truncf %127 : vector<64x32xf32> to vector<64x32xbf16>
    %c1_90 = arith.constant 1 : index
    %c0_91 = arith.constant 0 : index
    %c0_92 = arith.constant 0 : index
    %129 = vector.load %arg7[%c1_90, %c0_91, %c0_92] : memref<9x32x32xbf16, #tpu.memory_space<vmem>>, vector<1x32x32xbf16>
    %130 = vector.shape_cast %129 : vector<1x32x32xbf16> to vector<32x32xbf16>
    %cst_93 = arith.constant dense<0.000000e+00> : vector<64x32xf32>
    %131 = tpu.matmul %128, %130, %cst_93 {dimension_numbers = #tpu.dot_dimension_numbers<[1], [0], [0], [1], [0, 0, 1, 1], [], []>} : vector<64x32xbf16>, vector<32x32xbf16>, vector<64x32xf32> -> vector<64x32xf32>
    %132 = arith.addf %124, %131 : vector<64x32xf32>
    %c2_94 = arith.constant 2 : index
    %c0_95 = arith.constant 0 : index
    %c0_96 = arith.constant 0 : index
    %133 = vector.load %arg3[%c2_94, %c0_95, %c0_96] : memref<9x64x128xbf16, #tpu.memory_space<vmem>>, vector<1x64x128xbf16>
    %134 = vector.shape_cast %133 : vector<1x64x128xbf16> to vector<64x128xbf16>
    %cst_97 = arith.constant dense<0.000000e+00> : vector<64x32xf32>
    %135 = tpu.matmul %134, %115, %cst_97 {dimension_numbers = #tpu.dot_dimension_numbers<[1], [0], [0], [1], [0, 0, 1, 1], [], []>} : vector<64x128xbf16>, vector<128x32xbf16>, vector<64x32xf32> -> vector<64x32xf32>
    %136 = arith.truncf %135 : vector<64x32xf32> to vector<64x32xbf16>
    %c2_98 = arith.constant 2 : index
    %c0_99 = arith.constant 0 : index
    %c0_100 = arith.constant 0 : index
    %137 = vector.load %arg7[%c2_98, %c0_99, %c0_100] : memref<9x32x32xbf16, #tpu.memory_space<vmem>>, vector<1x32x32xbf16>
    %138 = vector.shape_cast %137 : vector<1x32x32xbf16> to vector<32x32xbf16>
    %cst_101 = arith.constant dense<0.000000e+00> : vector<64x32xf32>
    %139 = tpu.matmul %136, %138, %cst_101 {dimension_numbers = #tpu.dot_dimension_numbers<[1], [0], [0], [1], [0, 0, 1, 1], [], []>} : vector<64x32xbf16>, vector<32x32xbf16>, vector<64x32xf32> -> vector<64x32xf32>
    %140 = arith.addf %132, %139 : vector<64x32xf32>
    %c3_102 = arith.constant 3 : index
    %c0_103 = arith.constant 0 : index
    %c0_104 = arith.constant 0 : index
    %141 = vector.load %arg3[%c3_102, %c0_103, %c0_104] : memref<9x64x128xbf16, #tpu.memory_space<vmem>>, vector<1x64x128xbf16>
    %142 = vector.shape_cast %141 : vector<1x64x128xbf16> to vector<64x128xbf16>
    %cst_105 = arith.constant dense<0.000000e+00> : vector<64x32xf32>
    %143 = tpu.matmul %142, %115, %cst_105 {dimension_numbers = #tpu.dot_dimension_numbers<[1], [0], [0], [1], [0, 0, 1, 1], [], []>} : vector<64x128xbf16>, vector<128x32xbf16>, vector<64x32xf32> -> vector<64x32xf32>
    %144 = arith.truncf %143 : vector<64x32xf32> to vector<64x32xbf16>
    %c3_106 = arith.constant 3 : index
    %c0_107 = arith.constant 0 : index
    %c0_108 = arith.constant 0 : index
    %145 = vector.load %arg7[%c3_106, %c0_107, %c0_108] : memref<9x32x32xbf16, #tpu.memory_space<vmem>>, vector<1x32x32xbf16>
    %146 = vector.shape_cast %145 : vector<1x32x32xbf16> to vector<32x32xbf16>
    %cst_109 = arith.constant dense<0.000000e+00> : vector<64x32xf32>
    %147 = tpu.matmul %144, %146, %cst_109 {dimension_numbers = #tpu.dot_dimension_numbers<[1], [0], [0], [1], [0, 0, 1, 1], [], []>} : vector<64x32xbf16>, vector<32x32xbf16>, vector<64x32xf32> -> vector<64x32xf32>
    %148 = arith.addf %140, %147 : vector<64x32xf32>
    %c4_110 = arith.constant 4 : index
    %c0_111 = arith.constant 0 : index
    %c0_112 = arith.constant 0 : index
    %149 = vector.load %arg3[%c4_110, %c0_111, %c0_112] : memref<9x64x128xbf16, #tpu.memory_space<vmem>>, vector<1x64x128xbf16>
    %150 = vector.shape_cast %149 : vector<1x64x128xbf16> to vector<64x128xbf16>
    %cst_113 = arith.constant dense<0.000000e+00> : vector<64x32xf32>
    %151 = tpu.matmul %150, %115, %cst_113 {dimension_numbers = #tpu.dot_dimension_numbers<[1], [0], [0], [1], [0, 0, 1, 1], [], []>} : vector<64x128xbf16>, vector<128x32xbf16>, vector<64x32xf32> -> vector<64x32xf32>
    %152 = arith.truncf %151 : vector<64x32xf32> to vector<64x32xbf16>
    %c4_114 = arith.constant 4 : index
    %c0_115 = arith.constant 0 : index
    %c0_116 = arith.constant 0 : index
    %153 = vector.load %arg7[%c4_114, %c0_115, %c0_116] : memref<9x32x32xbf16, #tpu.memory_space<vmem>>, vector<1x32x32xbf16>
    %154 = vector.shape_cast %153 : vector<1x32x32xbf16> to vector<32x32xbf16>
    %cst_117 = arith.constant dense<0.000000e+00> : vector<64x32xf32>
    %155 = tpu.matmul %152, %154, %cst_117 {dimension_numbers = #tpu.dot_dimension_numbers<[1], [0], [0], [1], [0, 0, 1, 1], [], []>} : vector<64x32xbf16>, vector<32x32xbf16>, vector<64x32xf32> -> vector<64x32xf32>
    %156 = arith.addf %148, %155 : vector<64x32xf32>
    %c5_118 = arith.constant 5 : index
    %c0_119 = arith.constant 0 : index
    %c0_120 = arith.constant 0 : index
    %157 = vector.load %arg3[%c5_118, %c0_119, %c0_120] : memref<9x64x128xbf16, #tpu.memory_space<vmem>>, vector<1x64x128xbf16>
    %158 = vector.shape_cast %157 : vector<1x64x128xbf16> to vector<64x128xbf16>
    %cst_121 = arith.constant dense<0.000000e+00> : vector<64x32xf32>
    %159 = tpu.matmul %158, %115, %cst_121 {dimension_numbers = #tpu.dot_dimension_numbers<[1], [0], [0], [1], [0, 0, 1, 1], [], []>} : vector<64x128xbf16>, vector<128x32xbf16>, vector<64x32xf32> -> vector<64x32xf32>
    %160 = arith.truncf %159 : vector<64x32xf32> to vector<64x32xbf16>
    %c5_122 = arith.constant 5 : index
    %c0_123 = arith.constant 0 : index
    %c0_124 = arith.constant 0 : index
    %161 = vector.load %arg7[%c5_122, %c0_123, %c0_124] : memref<9x32x32xbf16, #tpu.memory_space<vmem>>, vector<1x32x32xbf16>
    %162 = vector.shape_cast %161 : vector<1x32x32xbf16> to vector<32x32xbf16>
    %cst_125 = arith.constant dense<0.000000e+00> : vector<64x32xf32>
    %163 = tpu.matmul %160, %162, %cst_125 {dimension_numbers = #tpu.dot_dimension_numbers<[1], [0], [0], [1], [0, 0, 1, 1], [], []>} : vector<64x32xbf16>, vector<32x32xbf16>, vector<64x32xf32> -> vector<64x32xf32>
    %164 = arith.addf %156, %163 : vector<64x32xf32>
    %c6_126 = arith.constant 6 : index
    %c0_127 = arith.constant 0 : index
    %c0_128 = arith.constant 0 : index
    %165 = vector.load %arg3[%c6_126, %c0_127, %c0_128] : memref<9x64x128xbf16, #tpu.memory_space<vmem>>, vector<1x64x128xbf16>
    %166 = vector.shape_cast %165 : vector<1x64x128xbf16> to vector<64x128xbf16>
    %cst_129 = arith.constant dense<0.000000e+00> : vector<64x32xf32>
    %167 = tpu.matmul %166, %115, %cst_129 {dimension_numbers = #tpu.dot_dimension_numbers<[1], [0], [0], [1], [0, 0, 1, 1], [], []>} : vector<64x128xbf16>, vector<128x32xbf16>, vector<64x32xf32> -> vector<64x32xf32>
    %168 = arith.truncf %167 : vector<64x32xf32> to vector<64x32xbf16>
    %c6_130 = arith.constant 6 : index
    %c0_131 = arith.constant 0 : index
    %c0_132 = arith.constant 0 : index
    %169 = vector.load %arg7[%c6_130, %c0_131, %c0_132] : memref<9x32x32xbf16, #tpu.memory_space<vmem>>, vector<1x32x32xbf16>
    %170 = vector.shape_cast %169 : vector<1x32x32xbf16> to vector<32x32xbf16>
    %cst_133 = arith.constant dense<0.000000e+00> : vector<64x32xf32>
    %171 = tpu.matmul %168, %170, %cst_133 {dimension_numbers = #tpu.dot_dimension_numbers<[1], [0], [0], [1], [0, 0, 1, 1], [], []>} : vector<64x32xbf16>, vector<32x32xbf16>, vector<64x32xf32> -> vector<64x32xf32>
    %172 = arith.addf %164, %171 : vector<64x32xf32>
    %c7_134 = arith.constant 7 : index
    %c0_135 = arith.constant 0 : index
    %c0_136 = arith.constant 0 : index
    %173 = vector.load %arg3[%c7_134, %c0_135, %c0_136] : memref<9x64x128xbf16, #tpu.memory_space<vmem>>, vector<1x64x128xbf16>
    %174 = vector.shape_cast %173 : vector<1x64x128xbf16> to vector<64x128xbf16>
    %cst_137 = arith.constant dense<0.000000e+00> : vector<64x32xf32>
    %175 = tpu.matmul %174, %115, %cst_137 {dimension_numbers = #tpu.dot_dimension_numbers<[1], [0], [0], [1], [0, 0, 1, 1], [], []>} : vector<64x128xbf16>, vector<128x32xbf16>, vector<64x32xf32> -> vector<64x32xf32>
    %176 = arith.truncf %175 : vector<64x32xf32> to vector<64x32xbf16>
    %c7_138 = arith.constant 7 : index
    %c0_139 = arith.constant 0 : index
    %c0_140 = arith.constant 0 : index
    %177 = vector.load %arg7[%c7_138, %c0_139, %c0_140] : memref<9x32x32xbf16, #tpu.memory_space<vmem>>, vector<1x32x32xbf16>
    %178 = vector.shape_cast %177 : vector<1x32x32xbf16> to vector<32x32xbf16>
    %cst_141 = arith.constant dense<0.000000e+00> : vector<64x32xf32>
    %179 = tpu.matmul %176, %178, %cst_141 {dimension_numbers = #tpu.dot_dimension_numbers<[1], [0], [0], [1], [0, 0, 1, 1], [], []>} : vector<64x32xbf16>, vector<32x32xbf16>, vector<64x32xf32> -> vector<64x32xf32>
    %180 = arith.addf %172, %179 : vector<64x32xf32>
    %c8_142 = arith.constant 8 : index
    %c0_143 = arith.constant 0 : index
    %c0_144 = arith.constant 0 : index
    %181 = vector.load %arg3[%c8_142, %c0_143, %c0_144] : memref<9x64x128xbf16, #tpu.memory_space<vmem>>, vector<1x64x128xbf16>
    %182 = vector.shape_cast %181 : vector<1x64x128xbf16> to vector<64x128xbf16>
    %cst_145 = arith.constant dense<0.000000e+00> : vector<64x32xf32>
    %183 = tpu.matmul %182, %115, %cst_145 {dimension_numbers = #tpu.dot_dimension_numbers<[1], [0], [0], [1], [0, 0, 1, 1], [], []>} : vector<64x128xbf16>, vector<128x32xbf16>, vector<64x32xf32> -> vector<64x32xf32>
    %184 = arith.truncf %183 : vector<64x32xf32> to vector<64x32xbf16>
    %c8_146 = arith.constant 8 : index
    %c0_147 = arith.constant 0 : index
    %c0_148 = arith.constant 0 : index
    %185 = vector.load %arg7[%c8_146, %c0_147, %c0_148] : memref<9x32x32xbf16, #tpu.memory_space<vmem>>, vector<1x32x32xbf16>
    %186 = vector.shape_cast %185 : vector<1x32x32xbf16> to vector<32x32xbf16>
    %cst_149 = arith.constant dense<0.000000e+00> : vector<64x32xf32>
    %187 = tpu.matmul %184, %186, %cst_149 {dimension_numbers = #tpu.dot_dimension_numbers<[1], [0], [0], [1], [0, 0, 1, 1], [], []>} : vector<64x32xbf16>, vector<32x32xbf16>, vector<64x32xf32> -> vector<64x32xf32>
    %188 = arith.addf %180, %187 : vector<64x32xf32>
    %c0_150 = arith.constant 0 : index
    %c0_151 = arith.constant 0 : index
    %189 = vector.load %arg11[%c0_150, %c0_151] : memref<64x2xf32, #tpu.memory_space<vmem>>, vector<64x2xf32>
    %cst_152 = arith.constant dense<0.000000e+00> : vector<64xf32>
    %190 = vector.multi_reduction <add>, %188, %cst_152 [1] : vector<64x32xf32> to vector<64xf32>
    %191 = vector.shape_cast %190 : vector<64xf32> to vector<64x1xf32>
    %192 = arith.mulf %188, %188 : vector<64x32xf32>
    %cst_153 = arith.constant dense<0.000000e+00> : vector<64xf32>
    %193 = vector.multi_reduction <add>, %192, %cst_153 [1] : vector<64x32xf32> to vector<64xf32>
    %194 = vector.shape_cast %193 : vector<64xf32> to vector<64x1xf32>
    %cst_154 = arith.constant 3.125000e-02 : f32
    %195 = vector.broadcast %cst_154 : f32 to vector<64x1xf32>
    %196 = arith.mulf %191, %195 : vector<64x1xf32>
    %cst_155 = arith.constant 3.125000e-02 : f32
    %197 = vector.broadcast %cst_155 : f32 to vector<64x1xf32>
    %198 = arith.mulf %194, %197 : vector<64x1xf32>
    %199 = arith.mulf %196, %196 : vector<64x1xf32>
    %200 = arith.subf %198, %199 : vector<64x1xf32>
    %cst_156 = arith.constant 0.000000e+00 : f32
    %201 = vector.broadcast %cst_156 : f32 to vector<64x1xf32>
    %202 = arith.maximumf %200, %201 : vector<64x1xf32>
    %203 = vector.extract_strided_slice %189 {offsets = [0, 0], sizes = [64, 1], strides = [1, 1]} : vector<64x2xf32> to vector<64x1xf32>
    %cst_157 = arith.constant 9.99999974E-6 : f32
    %204 = vector.broadcast %cst_157 : f32 to vector<64x1xf32>
    %205 = arith.addf %202, %204 : vector<64x1xf32>
    %206 = math.rsqrt %205 : vector<64x1xf32>
    %207 = arith.mulf %203, %206 : vector<64x1xf32>
    %208 = vector.extract_strided_slice %189 {offsets = [0, 1], sizes = [64, 1], strides = [1, 1]} : vector<64x2xf32> to vector<64x1xf32>
    %209 = arith.mulf %196, %207 : vector<64x1xf32>
    %210 = arith.subf %208, %209 : vector<64x1xf32>
    %211 = vector.broadcast %207 : vector<64x1xf32> to vector<64x32xf32>
    %212 = arith.mulf %188, %211 : vector<64x32xf32>
    %213 = vector.broadcast %210 : vector<64x1xf32> to vector<64x32xf32>
    %214 = arith.addf %212, %213 : vector<64x32xf32>
    %cst_158 = arith.constant 5.000000e-01 : f32
    %215 = vector.broadcast %cst_158 : f32 to vector<64x32xf32>
    %216 = arith.mulf %215, %214 : vector<64x32xf32>
    %cst_159 = arith.constant 4.471500e-02 : f32
    %217 = vector.broadcast %cst_159 : f32 to vector<64x32xf32>
    %218 = arith.mulf %217, %214 : vector<64x32xf32>
    %219 = arith.mulf %218, %214 : vector<64x32xf32>
    %220 = arith.mulf %219, %214 : vector<64x32xf32>
    %221 = arith.addf %214, %220 : vector<64x32xf32>
    %cst_160 = arith.constant 0.797884583 : f32
    %222 = vector.broadcast %cst_160 : f32 to vector<64x32xf32>
    %223 = arith.mulf %222, %221 : vector<64x32xf32>
    %224 = math.tanh %223 : vector<64x32xf32>
    %cst_161 = arith.constant 1.000000e+00 : f32
    %225 = vector.broadcast %cst_161 : f32 to vector<64x32xf32>
    %226 = arith.addf %225, %224 : vector<64x32xf32>
    %227 = arith.mulf %216, %226 : vector<64x32xf32>
    %228 = arith.truncf %227 : vector<64x32xf32> to vector<64x32xbf16>
    %cst_162 = arith.constant 0.000000e+00 : f32
    %229 = vector.broadcast %cst_162 : f32 to vector<32x32xf32>
    %c0_163 = arith.constant 0 : index
    %c0_164 = arith.constant 0 : index
    %c0_165 = arith.constant 0 : index
    %230 = vector.load %arg4[%c0_163, %c0_164, %c0_165] : memref<9x32x64xbf16, #tpu.memory_space<vmem>>, vector<1x32x64xbf16>
    %231 = vector.shape_cast %230 : vector<1x32x64xbf16> to vector<32x64xbf16>
    %cst_166 = arith.constant dense<0.000000e+00> : vector<32x32xf32>
    %232 = tpu.matmul %231, %228, %cst_166 {dimension_numbers = #tpu.dot_dimension_numbers<[1], [0], [0], [1], [0, 0, 1, 1], [], []>} : vector<32x64xbf16>, vector<64x32xbf16>, vector<32x32xf32> -> vector<32x32xf32>
    %233 = arith.truncf %232 : vector<32x32xf32> to vector<32x32xbf16>
    %c0_167 = arith.constant 0 : index
    %c0_168 = arith.constant 0 : index
    %c0_169 = arith.constant 0 : index
    %234 = vector.load %arg7[%c0_167, %c0_168, %c0_169] : memref<9x32x32xbf16, #tpu.memory_space<vmem>>, vector<1x32x32xbf16>
    %235 = vector.shape_cast %234 : vector<1x32x32xbf16> to vector<32x32xbf16>
    %cst_170 = arith.constant dense<0.000000e+00> : vector<32x32xf32>
    %236 = tpu.matmul %233, %235, %cst_170 {dimension_numbers = #tpu.dot_dimension_numbers<[1], [0], [0], [1], [0, 0, 1, 1], [], []>} : vector<32x32xbf16>, vector<32x32xbf16>, vector<32x32xf32> -> vector<32x32xf32>
    %237 = arith.addf %229, %236 : vector<32x32xf32>
    %c1_171 = arith.constant 1 : index
    %c0_172 = arith.constant 0 : index
    %c0_173 = arith.constant 0 : index
    %238 = vector.load %arg4[%c1_171, %c0_172, %c0_173] : memref<9x32x64xbf16, #tpu.memory_space<vmem>>, vector<1x32x64xbf16>
    %239 = vector.shape_cast %238 : vector<1x32x64xbf16> to vector<32x64xbf16>
    %cst_174 = arith.constant dense<0.000000e+00> : vector<32x32xf32>
    %240 = tpu.matmul %239, %228, %cst_174 {dimension_numbers = #tpu.dot_dimension_numbers<[1], [0], [0], [1], [0, 0, 1, 1], [], []>} : vector<32x64xbf16>, vector<64x32xbf16>, vector<32x32xf32> -> vector<32x32xf32>
    %241 = arith.truncf %240 : vector<32x32xf32> to vector<32x32xbf16>
    %c1_175 = arith.constant 1 : index
    %c0_176 = arith.constant 0 : index
    %c0_177 = arith.constant 0 : index
    %242 = vector.load %arg7[%c1_175, %c0_176, %c0_177] : memref<9x32x32xbf16, #tpu.memory_space<vmem>>, vector<1x32x32xbf16>
    %243 = vector.shape_cast %242 : vector<1x32x32xbf16> to vector<32x32xbf16>
    %cst_178 = arith.constant dense<0.000000e+00> : vector<32x32xf32>
    %244 = tpu.matmul %241, %243, %cst_178 {dimension_numbers = #tpu.dot_dimension_numbers<[1], [0], [0], [1], [0, 0, 1, 1], [], []>} : vector<32x32xbf16>, vector<32x32xbf16>, vector<32x32xf32> -> vector<32x32xf32>
    %245 = arith.addf %237, %244 : vector<32x32xf32>
    %c2_179 = arith.constant 2 : index
    %c0_180 = arith.constant 0 : index
    %c0_181 = arith.constant 0 : index
    %246 = vector.load %arg4[%c2_179, %c0_180, %c0_181] : memref<9x32x64xbf16, #tpu.memory_space<vmem>>, vector<1x32x64xbf16>
    %247 = vector.shape_cast %246 : vector<1x32x64xbf16> to vector<32x64xbf16>
    %cst_182 = arith.constant dense<0.000000e+00> : vector<32x32xf32>
    %248 = tpu.matmul %247, %228, %cst_182 {dimension_numbers = #tpu.dot_dimension_numbers<[1], [0], [0], [1], [0, 0, 1, 1], [], []>} : vector<32x64xbf16>, vector<64x32xbf16>, vector<32x32xf32> -> vector<32x32xf32>
    %249 = arith.truncf %248 : vector<32x32xf32> to vector<32x32xbf16>
    %c2_183 = arith.constant 2 : index
    %c0_184 = arith.constant 0 : index
    %c0_185 = arith.constant 0 : index
    %250 = vector.load %arg7[%c2_183, %c0_184, %c0_185] : memref<9x32x32xbf16, #tpu.memory_space<vmem>>, vector<1x32x32xbf16>
    %251 = vector.shape_cast %250 : vector<1x32x32xbf16> to vector<32x32xbf16>
    %cst_186 = arith.constant dense<0.000000e+00> : vector<32x32xf32>
    %252 = tpu.matmul %249, %251, %cst_186 {dimension_numbers = #tpu.dot_dimension_numbers<[1], [0], [0], [1], [0, 0, 1, 1], [], []>} : vector<32x32xbf16>, vector<32x32xbf16>, vector<32x32xf32> -> vector<32x32xf32>
    %253 = arith.addf %245, %252 : vector<32x32xf32>
    %c3_187 = arith.constant 3 : index
    %c0_188 = arith.constant 0 : index
    %c0_189 = arith.constant 0 : index
    %254 = vector.load %arg4[%c3_187, %c0_188, %c0_189] : memref<9x32x64xbf16, #tpu.memory_space<vmem>>, vector<1x32x64xbf16>
    %255 = vector.shape_cast %254 : vector<1x32x64xbf16> to vector<32x64xbf16>
    %cst_190 = arith.constant dense<0.000000e+00> : vector<32x32xf32>
    %256 = tpu.matmul %255, %228, %cst_190 {dimension_numbers = #tpu.dot_dimension_numbers<[1], [0], [0], [1], [0, 0, 1, 1], [], []>} : vector<32x64xbf16>, vector<64x32xbf16>, vector<32x32xf32> -> vector<32x32xf32>
    %257 = arith.truncf %256 : vector<32x32xf32> to vector<32x32xbf16>
    %c3_191 = arith.constant 3 : index
    %c0_192 = arith.constant 0 : index
    %c0_193 = arith.constant 0 : index
    %258 = vector.load %arg7[%c3_191, %c0_192, %c0_193] : memref<9x32x32xbf16, #tpu.memory_space<vmem>>, vector<1x32x32xbf16>
    %259 = vector.shape_cast %258 : vector<1x32x32xbf16> to vector<32x32xbf16>
    %cst_194 = arith.constant dense<0.000000e+00> : vector<32x32xf32>
    %260 = tpu.matmul %257, %259, %cst_194 {dimension_numbers = #tpu.dot_dimension_numbers<[1], [0], [0], [1], [0, 0, 1, 1], [], []>} : vector<32x32xbf16>, vector<32x32xbf16>, vector<32x32xf32> -> vector<32x32xf32>
    %261 = arith.addf %253, %260 : vector<32x32xf32>
    %c4_195 = arith.constant 4 : index
    %c0_196 = arith.constant 0 : index
    %c0_197 = arith.constant 0 : index
    %262 = vector.load %arg4[%c4_195, %c0_196, %c0_197] : memref<9x32x64xbf16, #tpu.memory_space<vmem>>, vector<1x32x64xbf16>
    %263 = vector.shape_cast %262 : vector<1x32x64xbf16> to vector<32x64xbf16>
    %cst_198 = arith.constant dense<0.000000e+00> : vector<32x32xf32>
    %264 = tpu.matmul %263, %228, %cst_198 {dimension_numbers = #tpu.dot_dimension_numbers<[1], [0], [0], [1], [0, 0, 1, 1], [], []>} : vector<32x64xbf16>, vector<64x32xbf16>, vector<32x32xf32> -> vector<32x32xf32>
    %265 = arith.truncf %264 : vector<32x32xf32> to vector<32x32xbf16>
    %c4_199 = arith.constant 4 : index
    %c0_200 = arith.constant 0 : index
    %c0_201 = arith.constant 0 : index
    %266 = vector.load %arg7[%c4_199, %c0_200, %c0_201] : memref<9x32x32xbf16, #tpu.memory_space<vmem>>, vector<1x32x32xbf16>
    %267 = vector.shape_cast %266 : vector<1x32x32xbf16> to vector<32x32xbf16>
    %cst_202 = arith.constant dense<0.000000e+00> : vector<32x32xf32>
    %268 = tpu.matmul %265, %267, %cst_202 {dimension_numbers = #tpu.dot_dimension_numbers<[1], [0], [0], [1], [0, 0, 1, 1], [], []>} : vector<32x32xbf16>, vector<32x32xbf16>, vector<32x32xf32> -> vector<32x32xf32>
    %269 = arith.addf %261, %268 : vector<32x32xf32>
    %c5_203 = arith.constant 5 : index
    %c0_204 = arith.constant 0 : index
    %c0_205 = arith.constant 0 : index
    %270 = vector.load %arg4[%c5_203, %c0_204, %c0_205] : memref<9x32x64xbf16, #tpu.memory_space<vmem>>, vector<1x32x64xbf16>
    %271 = vector.shape_cast %270 : vector<1x32x64xbf16> to vector<32x64xbf16>
    %cst_206 = arith.constant dense<0.000000e+00> : vector<32x32xf32>
    %272 = tpu.matmul %271, %228, %cst_206 {dimension_numbers = #tpu.dot_dimension_numbers<[1], [0], [0], [1], [0, 0, 1, 1], [], []>} : vector<32x64xbf16>, vector<64x32xbf16>, vector<32x32xf32> -> vector<32x32xf32>
    %273 = arith.truncf %272 : vector<32x32xf32> to vector<32x32xbf16>
    %c5_207 = arith.constant 5 : index
    %c0_208 = arith.constant 0 : index
    %c0_209 = arith.constant 0 : index
    %274 = vector.load %arg7[%c5_207, %c0_208, %c0_209] : memref<9x32x32xbf16, #tpu.memory_space<vmem>>, vector<1x32x32xbf16>
    %275 = vector.shape_cast %274 : vector<1x32x32xbf16> to vector<32x32xbf16>
    %cst_210 = arith.constant dense<0.000000e+00> : vector<32x32xf32>
    %276 = tpu.matmul %273, %275, %cst_210 {dimension_numbers = #tpu.dot_dimension_numbers<[1], [0], [0], [1], [0, 0, 1, 1], [], []>} : vector<32x32xbf16>, vector<32x32xbf16>, vector<32x32xf32> -> vector<32x32xf32>
    %277 = arith.addf %269, %276 : vector<32x32xf32>
    %c6_211 = arith.constant 6 : index
    %c0_212 = arith.constant 0 : index
    %c0_213 = arith.constant 0 : index
    %278 = vector.load %arg4[%c6_211, %c0_212, %c0_213] : memref<9x32x64xbf16, #tpu.memory_space<vmem>>, vector<1x32x64xbf16>
    %279 = vector.shape_cast %278 : vector<1x32x64xbf16> to vector<32x64xbf16>
    %cst_214 = arith.constant dense<0.000000e+00> : vector<32x32xf32>
    %280 = tpu.matmul %279, %228, %cst_214 {dimension_numbers = #tpu.dot_dimension_numbers<[1], [0], [0], [1], [0, 0, 1, 1], [], []>} : vector<32x64xbf16>, vector<64x32xbf16>, vector<32x32xf32> -> vector<32x32xf32>
    %281 = arith.truncf %280 : vector<32x32xf32> to vector<32x32xbf16>
    %c6_215 = arith.constant 6 : index
    %c0_216 = arith.constant 0 : index
    %c0_217 = arith.constant 0 : index
    %282 = vector.load %arg7[%c6_215, %c0_216, %c0_217] : memref<9x32x32xbf16, #tpu.memory_space<vmem>>, vector<1x32x32xbf16>
    %283 = vector.shape_cast %282 : vector<1x32x32xbf16> to vector<32x32xbf16>
    %cst_218 = arith.constant dense<0.000000e+00> : vector<32x32xf32>
    %284 = tpu.matmul %281, %283, %cst_218 {dimension_numbers = #tpu.dot_dimension_numbers<[1], [0], [0], [1], [0, 0, 1, 1], [], []>} : vector<32x32xbf16>, vector<32x32xbf16>, vector<32x32xf32> -> vector<32x32xf32>
    %285 = arith.addf %277, %284 : vector<32x32xf32>
    %c7_219 = arith.constant 7 : index
    %c0_220 = arith.constant 0 : index
    %c0_221 = arith.constant 0 : index
    %286 = vector.load %arg4[%c7_219, %c0_220, %c0_221] : memref<9x32x64xbf16, #tpu.memory_space<vmem>>, vector<1x32x64xbf16>
    %287 = vector.shape_cast %286 : vector<1x32x64xbf16> to vector<32x64xbf16>
    %cst_222 = arith.constant dense<0.000000e+00> : vector<32x32xf32>
    %288 = tpu.matmul %287, %228, %cst_222 {dimension_numbers = #tpu.dot_dimension_numbers<[1], [0], [0], [1], [0, 0, 1, 1], [], []>} : vector<32x64xbf16>, vector<64x32xbf16>, vector<32x32xf32> -> vector<32x32xf32>
    %289 = arith.truncf %288 : vector<32x32xf32> to vector<32x32xbf16>
    %c7_223 = arith.constant 7 : index
    %c0_224 = arith.constant 0 : index
    %c0_225 = arith.constant 0 : index
    %290 = vector.load %arg7[%c7_223, %c0_224, %c0_225] : memref<9x32x32xbf16, #tpu.memory_space<vmem>>, vector<1x32x32xbf16>
    %291 = vector.shape_cast %290 : vector<1x32x32xbf16> to vector<32x32xbf16>
    %cst_226 = arith.constant dense<0.000000e+00> : vector<32x32xf32>
    %292 = tpu.matmul %289, %291, %cst_226 {dimension_numbers = #tpu.dot_dimension_numbers<[1], [0], [0], [1], [0, 0, 1, 1], [], []>} : vector<32x32xbf16>, vector<32x32xbf16>, vector<32x32xf32> -> vector<32x32xf32>
    %293 = arith.addf %285, %292 : vector<32x32xf32>
    %c8_227 = arith.constant 8 : index
    %c0_228 = arith.constant 0 : index
    %c0_229 = arith.constant 0 : index
    %294 = vector.load %arg4[%c8_227, %c0_228, %c0_229] : memref<9x32x64xbf16, #tpu.memory_space<vmem>>, vector<1x32x64xbf16>
    %295 = vector.shape_cast %294 : vector<1x32x64xbf16> to vector<32x64xbf16>
    %cst_230 = arith.constant dense<0.000000e+00> : vector<32x32xf32>
    %296 = tpu.matmul %295, %228, %cst_230 {dimension_numbers = #tpu.dot_dimension_numbers<[1], [0], [0], [1], [0, 0, 1, 1], [], []>} : vector<32x64xbf16>, vector<64x32xbf16>, vector<32x32xf32> -> vector<32x32xf32>
    %297 = arith.truncf %296 : vector<32x32xf32> to vector<32x32xbf16>
    %c8_231 = arith.constant 8 : index
    %c0_232 = arith.constant 0 : index
    %c0_233 = arith.constant 0 : index
    %298 = vector.load %arg7[%c8_231, %c0_232, %c0_233] : memref<9x32x32xbf16, #tpu.memory_space<vmem>>, vector<1x32x32xbf16>
    %299 = vector.shape_cast %298 : vector<1x32x32xbf16> to vector<32x32xbf16>
    %cst_234 = arith.constant dense<0.000000e+00> : vector<32x32xf32>
    %300 = tpu.matmul %297, %299, %cst_234 {dimension_numbers = #tpu.dot_dimension_numbers<[1], [0], [0], [1], [0, 0, 1, 1], [], []>} : vector<32x32xbf16>, vector<32x32xbf16>, vector<32x32xf32> -> vector<32x32xf32>
    %301 = arith.addf %293, %300 : vector<32x32xf32>
    %c0_235 = arith.constant 0 : index
    %c0_236 = arith.constant 0 : index
    %302 = vector.load %arg12[%c0_235, %c0_236] : memref<32x2xf32, #tpu.memory_space<vmem>>, vector<32x2xf32>
    %cst_237 = arith.constant dense<0.000000e+00> : vector<32xf32>
    %303 = vector.multi_reduction <add>, %301, %cst_237 [1] : vector<32x32xf32> to vector<32xf32>
    %304 = vector.shape_cast %303 : vector<32xf32> to vector<32x1xf32>
    %305 = arith.mulf %301, %301 : vector<32x32xf32>
    %cst_238 = arith.constant dense<0.000000e+00> : vector<32xf32>
    %306 = vector.multi_reduction <add>, %305, %cst_238 [1] : vector<32x32xf32> to vector<32xf32>
    %307 = vector.shape_cast %306 : vector<32xf32> to vector<32x1xf32>
    %cst_239 = arith.constant 3.125000e-02 : f32
    %308 = vector.broadcast %cst_239 : f32 to vector<32x1xf32>
    %309 = arith.mulf %304, %308 : vector<32x1xf32>
    %cst_240 = arith.constant 3.125000e-02 : f32
    %310 = vector.broadcast %cst_240 : f32 to vector<32x1xf32>
    %311 = arith.mulf %307, %310 : vector<32x1xf32>
    %312 = arith.mulf %309, %309 : vector<32x1xf32>
    %313 = arith.subf %311, %312 : vector<32x1xf32>
    %cst_241 = arith.constant 0.000000e+00 : f32
    %314 = vector.broadcast %cst_241 : f32 to vector<32x1xf32>
    %315 = arith.maximumf %313, %314 : vector<32x1xf32>
    %316 = vector.extract_strided_slice %302 {offsets = [0, 0], sizes = [32, 1], strides = [1, 1]} : vector<32x2xf32> to vector<32x1xf32>
    %cst_242 = arith.constant 9.99999974E-6 : f32
    %317 = vector.broadcast %cst_242 : f32 to vector<32x1xf32>
    %318 = arith.addf %315, %317 : vector<32x1xf32>
    %319 = math.rsqrt %318 : vector<32x1xf32>
    %320 = arith.mulf %316, %319 : vector<32x1xf32>
    %321 = vector.extract_strided_slice %302 {offsets = [0, 1], sizes = [32, 1], strides = [1, 1]} : vector<32x2xf32> to vector<32x1xf32>
    %322 = arith.mulf %309, %320 : vector<32x1xf32>
    %323 = arith.subf %321, %322 : vector<32x1xf32>
    %324 = vector.broadcast %320 : vector<32x1xf32> to vector<32x32xf32>
    %325 = arith.mulf %301, %324 : vector<32x32xf32>
    %326 = vector.broadcast %323 : vector<32x1xf32> to vector<32x32xf32>
    %327 = arith.addf %325, %326 : vector<32x32xf32>
    %cst_243 = arith.constant 5.000000e-01 : f32
    %328 = vector.broadcast %cst_243 : f32 to vector<32x32xf32>
    %329 = arith.mulf %328, %327 : vector<32x32xf32>
    %cst_244 = arith.constant 4.471500e-02 : f32
    %330 = vector.broadcast %cst_244 : f32 to vector<32x32xf32>
    %331 = arith.mulf %330, %327 : vector<32x32xf32>
    %332 = arith.mulf %331, %327 : vector<32x32xf32>
    %333 = arith.mulf %332, %327 : vector<32x32xf32>
    %334 = arith.addf %327, %333 : vector<32x32xf32>
    %cst_245 = arith.constant 0.797884583 : f32
    %335 = vector.broadcast %cst_245 : f32 to vector<32x32xf32>
    %336 = arith.mulf %335, %334 : vector<32x32xf32>
    %337 = math.tanh %336 : vector<32x32xf32>
    %cst_246 = arith.constant 1.000000e+00 : f32
    %338 = vector.broadcast %cst_246 : f32 to vector<32x32xf32>
    %339 = arith.addf %338, %337 : vector<32x32xf32>
    %340 = arith.mulf %329, %339 : vector<32x32xf32>
    %341 = arith.truncf %340 : vector<32x32xf32> to vector<32x32xbf16>
    %cst_247 = arith.constant 0.000000e+00 : f32
    %342 = vector.broadcast %cst_247 : f32 to vector<16x32xf32>
    %c0_248 = arith.constant 0 : index
    %c0_249 = arith.constant 0 : index
    %c0_250 = arith.constant 0 : index
    %343 = vector.load %arg5[%c0_248, %c0_249, %c0_250] : memref<9x16x32xbf16, #tpu.memory_space<vmem>>, vector<1x16x32xbf16>
    %344 = vector.shape_cast %343 : vector<1x16x32xbf16> to vector<16x32xbf16>
    %cst_251 = arith.constant dense<0.000000e+00> : vector<16x32xf32>
    %345 = tpu.matmul %344, %341, %cst_251 {dimension_numbers = #tpu.dot_dimension_numbers<[1], [0], [0], [1], [0, 0, 1, 1], [], []>} : vector<16x32xbf16>, vector<32x32xbf16>, vector<16x32xf32> -> vector<16x32xf32>
    %346 = arith.truncf %345 : vector<16x32xf32> to vector<16x32xbf16>
    %c0_252 = arith.constant 0 : index
    %c0_253 = arith.constant 0 : index
    %c0_254 = arith.constant 0 : index
    %347 = vector.load %arg7[%c0_252, %c0_253, %c0_254] : memref<9x32x32xbf16, #tpu.memory_space<vmem>>, vector<1x32x32xbf16>
    %348 = vector.shape_cast %347 : vector<1x32x32xbf16> to vector<32x32xbf16>
    %cst_255 = arith.constant dense<0.000000e+00> : vector<16x32xf32>
    %349 = tpu.matmul %346, %348, %cst_255 {dimension_numbers = #tpu.dot_dimension_numbers<[1], [0], [0], [1], [0, 0, 1, 1], [], []>} : vector<16x32xbf16>, vector<32x32xbf16>, vector<16x32xf32> -> vector<16x32xf32>
    %350 = arith.addf %342, %349 : vector<16x32xf32>
    %c1_256 = arith.constant 1 : index
    %c0_257 = arith.constant 0 : index
    %c0_258 = arith.constant 0 : index
    %351 = vector.load %arg5[%c1_256, %c0_257, %c0_258] : memref<9x16x32xbf16, #tpu.memory_space<vmem>>, vector<1x16x32xbf16>
    %352 = vector.shape_cast %351 : vector<1x16x32xbf16> to vector<16x32xbf16>
    %cst_259 = arith.constant dense<0.000000e+00> : vector<16x32xf32>
    %353 = tpu.matmul %352, %341, %cst_259 {dimension_numbers = #tpu.dot_dimension_numbers<[1], [0], [0], [1], [0, 0, 1, 1], [], []>} : vector<16x32xbf16>, vector<32x32xbf16>, vector<16x32xf32> -> vector<16x32xf32>
    %354 = arith.truncf %353 : vector<16x32xf32> to vector<16x32xbf16>
    %c1_260 = arith.constant 1 : index
    %c0_261 = arith.constant 0 : index
    %c0_262 = arith.constant 0 : index
    %355 = vector.load %arg7[%c1_260, %c0_261, %c0_262] : memref<9x32x32xbf16, #tpu.memory_space<vmem>>, vector<1x32x32xbf16>
    %356 = vector.shape_cast %355 : vector<1x32x32xbf16> to vector<32x32xbf16>
    %cst_263 = arith.constant dense<0.000000e+00> : vector<16x32xf32>
    %357 = tpu.matmul %354, %356, %cst_263 {dimension_numbers = #tpu.dot_dimension_numbers<[1], [0], [0], [1], [0, 0, 1, 1], [], []>} : vector<16x32xbf16>, vector<32x32xbf16>, vector<16x32xf32> -> vector<16x32xf32>
    %358 = arith.addf %350, %357 : vector<16x32xf32>
    %c2_264 = arith.constant 2 : index
    %c0_265 = arith.constant 0 : index
    %c0_266 = arith.constant 0 : index
    %359 = vector.load %arg5[%c2_264, %c0_265, %c0_266] : memref<9x16x32xbf16, #tpu.memory_space<vmem>>, vector<1x16x32xbf16>
    %360 = vector.shape_cast %359 : vector<1x16x32xbf16> to vector<16x32xbf16>
    %cst_267 = arith.constant dense<0.000000e+00> : vector<16x32xf32>
    %361 = tpu.matmul %360, %341, %cst_267 {dimension_numbers = #tpu.dot_dimension_numbers<[1], [0], [0], [1], [0, 0, 1, 1], [], []>} : vector<16x32xbf16>, vector<32x32xbf16>, vector<16x32xf32> -> vector<16x32xf32>
    %362 = arith.truncf %361 : vector<16x32xf32> to vector<16x32xbf16>
    %c2_268 = arith.constant 2 : index
    %c0_269 = arith.constant 0 : index
    %c0_270 = arith.constant 0 : index
    %363 = vector.load %arg7[%c2_268, %c0_269, %c0_270] : memref<9x32x32xbf16, #tpu.memory_space<vmem>>, vector<1x32x32xbf16>
    %364 = vector.shape_cast %363 : vector<1x32x32xbf16> to vector<32x32xbf16>
    %cst_271 = arith.constant dense<0.000000e+00> : vector<16x32xf32>
    %365 = tpu.matmul %362, %364, %cst_271 {dimension_numbers = #tpu.dot_dimension_numbers<[1], [0], [0], [1], [0, 0, 1, 1], [], []>} : vector<16x32xbf16>, vector<32x32xbf16>, vector<16x32xf32> -> vector<16x32xf32>
    %366 = arith.addf %358, %365 : vector<16x32xf32>
    %c3_272 = arith.constant 3 : index
    %c0_273 = arith.constant 0 : index
    %c0_274 = arith.constant 0 : index
    %367 = vector.load %arg5[%c3_272, %c0_273, %c0_274] : memref<9x16x32xbf16, #tpu.memory_space<vmem>>, vector<1x16x32xbf16>
    %368 = vector.shape_cast %367 : vector<1x16x32xbf16> to vector<16x32xbf16>
    %cst_275 = arith.constant dense<0.000000e+00> : vector<16x32xf32>
    %369 = tpu.matmul %368, %341, %cst_275 {dimension_numbers = #tpu.dot_dimension_numbers<[1], [0], [0], [1], [0, 0, 1, 1], [], []>} : vector<16x32xbf16>, vector<32x32xbf16>, vector<16x32xf32> -> vector<16x32xf32>
    %370 = arith.truncf %369 : vector<16x32xf32> to vector<16x32xbf16>
    %c3_276 = arith.constant 3 : index
    %c0_277 = arith.constant 0 : index
    %c0_278 = arith.constant 0 : index
    %371 = vector.load %arg7[%c3_276, %c0_277, %c0_278] : memref<9x32x32xbf16, #tpu.memory_space<vmem>>, vector<1x32x32xbf16>
    %372 = vector.shape_cast %371 : vector<1x32x32xbf16> to vector<32x32xbf16>
    %cst_279 = arith.constant dense<0.000000e+00> : vector<16x32xf32>
    %373 = tpu.matmul %370, %372, %cst_279 {dimension_numbers = #tpu.dot_dimension_numbers<[1], [0], [0], [1], [0, 0, 1, 1], [], []>} : vector<16x32xbf16>, vector<32x32xbf16>, vector<16x32xf32> -> vector<16x32xf32>
    %374 = arith.addf %366, %373 : vector<16x32xf32>
    %c4_280 = arith.constant 4 : index
    %c0_281 = arith.constant 0 : index
    %c0_282 = arith.constant 0 : index
    %375 = vector.load %arg5[%c4_280, %c0_281, %c0_282] : memref<9x16x32xbf16, #tpu.memory_space<vmem>>, vector<1x16x32xbf16>
    %376 = vector.shape_cast %375 : vector<1x16x32xbf16> to vector<16x32xbf16>
    %cst_283 = arith.constant dense<0.000000e+00> : vector<16x32xf32>
    %377 = tpu.matmul %376, %341, %cst_283 {dimension_numbers = #tpu.dot_dimension_numbers<[1], [0], [0], [1], [0, 0, 1, 1], [], []>} : vector<16x32xbf16>, vector<32x32xbf16>, vector<16x32xf32> -> vector<16x32xf32>
    %378 = arith.truncf %377 : vector<16x32xf32> to vector<16x32xbf16>
    %c4_284 = arith.constant 4 : index
    %c0_285 = arith.constant 0 : index
    %c0_286 = arith.constant 0 : index
    %379 = vector.load %arg7[%c4_284, %c0_285, %c0_286] : memref<9x32x32xbf16, #tpu.memory_space<vmem>>, vector<1x32x32xbf16>
    %380 = vector.shape_cast %379 : vector<1x32x32xbf16> to vector<32x32xbf16>
    %cst_287 = arith.constant dense<0.000000e+00> : vector<16x32xf32>
    %381 = tpu.matmul %378, %380, %cst_287 {dimension_numbers = #tpu.dot_dimension_numbers<[1], [0], [0], [1], [0, 0, 1, 1], [], []>} : vector<16x32xbf16>, vector<32x32xbf16>, vector<16x32xf32> -> vector<16x32xf32>
    %382 = arith.addf %374, %381 : vector<16x32xf32>
    %c5_288 = arith.constant 5 : index
    %c0_289 = arith.constant 0 : index
    %c0_290 = arith.constant 0 : index
    %383 = vector.load %arg5[%c5_288, %c0_289, %c0_290] : memref<9x16x32xbf16, #tpu.memory_space<vmem>>, vector<1x16x32xbf16>
    %384 = vector.shape_cast %383 : vector<1x16x32xbf16> to vector<16x32xbf16>
    %cst_291 = arith.constant dense<0.000000e+00> : vector<16x32xf32>
    %385 = tpu.matmul %384, %341, %cst_291 {dimension_numbers = #tpu.dot_dimension_numbers<[1], [0], [0], [1], [0, 0, 1, 1], [], []>} : vector<16x32xbf16>, vector<32x32xbf16>, vector<16x32xf32> -> vector<16x32xf32>
    %386 = arith.truncf %385 : vector<16x32xf32> to vector<16x32xbf16>
    %c5_292 = arith.constant 5 : index
    %c0_293 = arith.constant 0 : index
    %c0_294 = arith.constant 0 : index
    %387 = vector.load %arg7[%c5_292, %c0_293, %c0_294] : memref<9x32x32xbf16, #tpu.memory_space<vmem>>, vector<1x32x32xbf16>
    %388 = vector.shape_cast %387 : vector<1x32x32xbf16> to vector<32x32xbf16>
    %cst_295 = arith.constant dense<0.000000e+00> : vector<16x32xf32>
    %389 = tpu.matmul %386, %388, %cst_295 {dimension_numbers = #tpu.dot_dimension_numbers<[1], [0], [0], [1], [0, 0, 1, 1], [], []>} : vector<16x32xbf16>, vector<32x32xbf16>, vector<16x32xf32> -> vector<16x32xf32>
    %390 = arith.addf %382, %389 : vector<16x32xf32>
    %c6_296 = arith.constant 6 : index
    %c0_297 = arith.constant 0 : index
    %c0_298 = arith.constant 0 : index
    %391 = vector.load %arg5[%c6_296, %c0_297, %c0_298] : memref<9x16x32xbf16, #tpu.memory_space<vmem>>, vector<1x16x32xbf16>
    %392 = vector.shape_cast %391 : vector<1x16x32xbf16> to vector<16x32xbf16>
    %cst_299 = arith.constant dense<0.000000e+00> : vector<16x32xf32>
    %393 = tpu.matmul %392, %341, %cst_299 {dimension_numbers = #tpu.dot_dimension_numbers<[1], [0], [0], [1], [0, 0, 1, 1], [], []>} : vector<16x32xbf16>, vector<32x32xbf16>, vector<16x32xf32> -> vector<16x32xf32>
    %394 = arith.truncf %393 : vector<16x32xf32> to vector<16x32xbf16>
    %c6_300 = arith.constant 6 : index
    %c0_301 = arith.constant 0 : index
    %c0_302 = arith.constant 0 : index
    %395 = vector.load %arg7[%c6_300, %c0_301, %c0_302] : memref<9x32x32xbf16, #tpu.memory_space<vmem>>, vector<1x32x32xbf16>
    %396 = vector.shape_cast %395 : vector<1x32x32xbf16> to vector<32x32xbf16>
    %cst_303 = arith.constant dense<0.000000e+00> : vector<16x32xf32>
    %397 = tpu.matmul %394, %396, %cst_303 {dimension_numbers = #tpu.dot_dimension_numbers<[1], [0], [0], [1], [0, 0, 1, 1], [], []>} : vector<16x32xbf16>, vector<32x32xbf16>, vector<16x32xf32> -> vector<16x32xf32>
    %398 = arith.addf %390, %397 : vector<16x32xf32>
    %c7_304 = arith.constant 7 : index
    %c0_305 = arith.constant 0 : index
    %c0_306 = arith.constant 0 : index
    %399 = vector.load %arg5[%c7_304, %c0_305, %c0_306] : memref<9x16x32xbf16, #tpu.memory_space<vmem>>, vector<1x16x32xbf16>
    %400 = vector.shape_cast %399 : vector<1x16x32xbf16> to vector<16x32xbf16>
    %cst_307 = arith.constant dense<0.000000e+00> : vector<16x32xf32>
    %401 = tpu.matmul %400, %341, %cst_307 {dimension_numbers = #tpu.dot_dimension_numbers<[1], [0], [0], [1], [0, 0, 1, 1], [], []>} : vector<16x32xbf16>, vector<32x32xbf16>, vector<16x32xf32> -> vector<16x32xf32>
    %402 = arith.truncf %401 : vector<16x32xf32> to vector<16x32xbf16>
    %c7_308 = arith.constant 7 : index
    %c0_309 = arith.constant 0 : index
    %c0_310 = arith.constant 0 : index
    %403 = vector.load %arg7[%c7_308, %c0_309, %c0_310] : memref<9x32x32xbf16, #tpu.memory_space<vmem>>, vector<1x32x32xbf16>
    %404 = vector.shape_cast %403 : vector<1x32x32xbf16> to vector<32x32xbf16>
    %cst_311 = arith.constant dense<0.000000e+00> : vector<16x32xf32>
    %405 = tpu.matmul %402, %404, %cst_311 {dimension_numbers = #tpu.dot_dimension_numbers<[1], [0], [0], [1], [0, 0, 1, 1], [], []>} : vector<16x32xbf16>, vector<32x32xbf16>, vector<16x32xf32> -> vector<16x32xf32>
    %406 = arith.addf %398, %405 : vector<16x32xf32>
    %c8_312 = arith.constant 8 : index
    %c0_313 = arith.constant 0 : index
    %c0_314 = arith.constant 0 : index
    %407 = vector.load %arg5[%c8_312, %c0_313, %c0_314] : memref<9x16x32xbf16, #tpu.memory_space<vmem>>, vector<1x16x32xbf16>
    %408 = vector.shape_cast %407 : vector<1x16x32xbf16> to vector<16x32xbf16>
    %cst_315 = arith.constant dense<0.000000e+00> : vector<16x32xf32>
    %409 = tpu.matmul %408, %341, %cst_315 {dimension_numbers = #tpu.dot_dimension_numbers<[1], [0], [0], [1], [0, 0, 1, 1], [], []>} : vector<16x32xbf16>, vector<32x32xbf16>, vector<16x32xf32> -> vector<16x32xf32>
    %410 = arith.truncf %409 : vector<16x32xf32> to vector<16x32xbf16>
    %c8_316 = arith.constant 8 : index
    %c0_317 = arith.constant 0 : index
    %c0_318 = arith.constant 0 : index
    %411 = vector.load %arg7[%c8_316, %c0_317, %c0_318] : memref<9x32x32xbf16, #tpu.memory_space<vmem>>, vector<1x32x32xbf16>
    %412 = vector.shape_cast %411 : vector<1x32x32xbf16> to vector<32x32xbf16>
    %cst_319 = arith.constant dense<0.000000e+00> : vector<16x32xf32>
    %413 = tpu.matmul %410, %412, %cst_319 {dimension_numbers = #tpu.dot_dimension_numbers<[1], [0], [0], [1], [0, 0, 1, 1], [], []>} : vector<16x32xbf16>, vector<32x32xbf16>, vector<16x32xf32> -> vector<16x32xf32>
    %414 = arith.addf %406, %413 : vector<16x32xf32>
    %c0_320 = arith.constant 0 : index
    %c0_321 = arith.constant 0 : index
    %415 = vector.load %arg13[%c0_320, %c0_321] : memref<16x2xf32, #tpu.memory_space<vmem>>, vector<16x2xf32>
    %cst_322 = arith.constant dense<0.000000e+00> : vector<16xf32>
    %416 = vector.multi_reduction <add>, %414, %cst_322 [1] : vector<16x32xf32> to vector<16xf32>
    %417 = vector.shape_cast %416 : vector<16xf32> to vector<16x1xf32>
    %418 = arith.mulf %414, %414 : vector<16x32xf32>
    %cst_323 = arith.constant dense<0.000000e+00> : vector<16xf32>
    %419 = vector.multi_reduction <add>, %418, %cst_323 [1] : vector<16x32xf32> to vector<16xf32>
    %420 = vector.shape_cast %419 : vector<16xf32> to vector<16x1xf32>
    %cst_324 = arith.constant 3.125000e-02 : f32
    %421 = vector.broadcast %cst_324 : f32 to vector<16x1xf32>
    %422 = arith.mulf %417, %421 : vector<16x1xf32>
    %cst_325 = arith.constant 3.125000e-02 : f32
    %423 = vector.broadcast %cst_325 : f32 to vector<16x1xf32>
    %424 = arith.mulf %420, %423 : vector<16x1xf32>
    %425 = arith.mulf %422, %422 : vector<16x1xf32>
    %426 = arith.subf %424, %425 : vector<16x1xf32>
    %cst_326 = arith.constant 0.000000e+00 : f32
    %427 = vector.broadcast %cst_326 : f32 to vector<16x1xf32>
    %428 = arith.maximumf %426, %427 : vector<16x1xf32>
    %429 = vector.extract_strided_slice %415 {offsets = [0, 0], sizes = [16, 1], strides = [1, 1]} : vector<16x2xf32> to vector<16x1xf32>
    %cst_327 = arith.constant 9.99999974E-6 : f32
    %430 = vector.broadcast %cst_327 : f32 to vector<16x1xf32>
    %431 = arith.addf %428, %430 : vector<16x1xf32>
    %432 = math.rsqrt %431 : vector<16x1xf32>
    %433 = arith.mulf %429, %432 : vector<16x1xf32>
    %434 = vector.extract_strided_slice %415 {offsets = [0, 1], sizes = [16, 1], strides = [1, 1]} : vector<16x2xf32> to vector<16x1xf32>
    %435 = arith.mulf %422, %433 : vector<16x1xf32>
    %436 = arith.subf %434, %435 : vector<16x1xf32>
    %437 = vector.broadcast %433 : vector<16x1xf32> to vector<16x32xf32>
    %438 = arith.mulf %414, %437 : vector<16x32xf32>
    %439 = vector.broadcast %436 : vector<16x1xf32> to vector<16x32xf32>
    %440 = arith.addf %438, %439 : vector<16x32xf32>
    %cst_328 = arith.constant 5.000000e-01 : f32
    %441 = vector.broadcast %cst_328 : f32 to vector<16x32xf32>
    %442 = arith.mulf %441, %440 : vector<16x32xf32>
    %cst_329 = arith.constant 4.471500e-02 : f32
    %443 = vector.broadcast %cst_329 : f32 to vector<16x32xf32>
    %444 = arith.mulf %443, %440 : vector<16x32xf32>
    %445 = arith.mulf %444, %440 : vector<16x32xf32>
    %446 = arith.mulf %445, %440 : vector<16x32xf32>
    %447 = arith.addf %440, %446 : vector<16x32xf32>
    %cst_330 = arith.constant 0.797884583 : f32
    %448 = vector.broadcast %cst_330 : f32 to vector<16x32xf32>
    %449 = arith.mulf %448, %447 : vector<16x32xf32>
    %450 = math.tanh %449 : vector<16x32xf32>
    %cst_331 = arith.constant 1.000000e+00 : f32
    %451 = vector.broadcast %cst_331 : f32 to vector<16x32xf32>
    %452 = arith.addf %451, %450 : vector<16x32xf32>
    %453 = arith.mulf %442, %452 : vector<16x32xf32>
    %454 = arith.truncf %453 : vector<16x32xf32> to vector<16x32xbf16>
    %cst_332 = arith.constant 0.000000e+00 : f32
    %455 = vector.broadcast %cst_332 : f32 to vector<4x128xf32>
    %c0_333 = arith.constant 0 : index
    %c0_334 = arith.constant 0 : index
    %c0_335 = arith.constant 0 : index
    %456 = vector.load %arg6[%c0_333, %c0_334, %c0_335] : memref<9x4x16xbf16, #tpu.memory_space<vmem>>, vector<1x4x16xbf16>
    %457 = vector.shape_cast %456 : vector<1x4x16xbf16> to vector<4x16xbf16>
    %cst_336 = arith.constant dense<0.000000e+00> : vector<4x32xf32>
    %458 = tpu.matmul %457, %454, %cst_336 {dimension_numbers = #tpu.dot_dimension_numbers<[1], [0], [0], [1], [0, 0, 1, 1], [], []>} : vector<4x16xbf16>, vector<16x32xbf16>, vector<4x32xf32> -> vector<4x32xf32>
    %459 = arith.truncf %458 : vector<4x32xf32> to vector<4x32xbf16>
    %c0_337 = arith.constant 0 : index
    %c0_338 = arith.constant 0 : index
    %c0_339 = arith.constant 0 : index
    %460 = vector.load %arg8[%c0_337, %c0_338, %c0_339] : memref<9x32x128xbf16, #tpu.memory_space<vmem>>, vector<1x32x128xbf16>
    %461 = vector.shape_cast %460 : vector<1x32x128xbf16> to vector<32x128xbf16>
    %cst_340 = arith.constant dense<0.000000e+00> : vector<4x128xf32>
    %462 = tpu.matmul %459, %461, %cst_340 {dimension_numbers = #tpu.dot_dimension_numbers<[1], [0], [0], [1], [0, 0, 1, 1], [], []>} : vector<4x32xbf16>, vector<32x128xbf16>, vector<4x128xf32> -> vector<4x128xf32>
    %463 = arith.addf %455, %462 : vector<4x128xf32>
    %c1_341 = arith.constant 1 : index
    %c0_342 = arith.constant 0 : index
    %c0_343 = arith.constant 0 : index
    %464 = vector.load %arg6[%c1_341, %c0_342, %c0_343] : memref<9x4x16xbf16, #tpu.memory_space<vmem>>, vector<1x4x16xbf16>
    %465 = vector.shape_cast %464 : vector<1x4x16xbf16> to vector<4x16xbf16>
    %cst_344 = arith.constant dense<0.000000e+00> : vector<4x32xf32>
    %466 = tpu.matmul %465, %454, %cst_344 {dimension_numbers = #tpu.dot_dimension_numbers<[1], [0], [0], [1], [0, 0, 1, 1], [], []>} : vector<4x16xbf16>, vector<16x32xbf16>, vector<4x32xf32> -> vector<4x32xf32>
    %467 = arith.truncf %466 : vector<4x32xf32> to vector<4x32xbf16>
    %c1_345 = arith.constant 1 : index
    %c0_346 = arith.constant 0 : index
    %c0_347 = arith.constant 0 : index
    %468 = vector.load %arg8[%c1_345, %c0_346, %c0_347] : memref<9x32x128xbf16, #tpu.memory_space<vmem>>, vector<1x32x128xbf16>
    %469 = vector.shape_cast %468 : vector<1x32x128xbf16> to vector<32x128xbf16>
    %cst_348 = arith.constant dense<0.000000e+00> : vector<4x128xf32>
    %470 = tpu.matmul %467, %469, %cst_348 {dimension_numbers = #tpu.dot_dimension_numbers<[1], [0], [0], [1], [0, 0, 1, 1], [], []>} : vector<4x32xbf16>, vector<32x128xbf16>, vector<4x128xf32> -> vector<4x128xf32>
    %471 = arith.addf %463, %470 : vector<4x128xf32>
    %c2_349 = arith.constant 2 : index
    %c0_350 = arith.constant 0 : index
    %c0_351 = arith.constant 0 : index
    %472 = vector.load %arg6[%c2_349, %c0_350, %c0_351] : memref<9x4x16xbf16, #tpu.memory_space<vmem>>, vector<1x4x16xbf16>
    %473 = vector.shape_cast %472 : vector<1x4x16xbf16> to vector<4x16xbf16>
    %cst_352 = arith.constant dense<0.000000e+00> : vector<4x32xf32>
    %474 = tpu.matmul %473, %454, %cst_352 {dimension_numbers = #tpu.dot_dimension_numbers<[1], [0], [0], [1], [0, 0, 1, 1], [], []>} : vector<4x16xbf16>, vector<16x32xbf16>, vector<4x32xf32> -> vector<4x32xf32>
    %475 = arith.truncf %474 : vector<4x32xf32> to vector<4x32xbf16>
    %c2_353 = arith.constant 2 : index
    %c0_354 = arith.constant 0 : index
    %c0_355 = arith.constant 0 : index
    %476 = vector.load %arg8[%c2_353, %c0_354, %c0_355] : memref<9x32x128xbf16, #tpu.memory_space<vmem>>, vector<1x32x128xbf16>
    %477 = vector.shape_cast %476 : vector<1x32x128xbf16> to vector<32x128xbf16>
    %cst_356 = arith.constant dense<0.000000e+00> : vector<4x128xf32>
    %478 = tpu.matmul %475, %477, %cst_356 {dimension_numbers = #tpu.dot_dimension_numbers<[1], [0], [0], [1], [0, 0, 1, 1], [], []>} : vector<4x32xbf16>, vector<32x128xbf16>, vector<4x128xf32> -> vector<4x128xf32>
    %479 = arith.addf %471, %478 : vector<4x128xf32>
    %c3_357 = arith.constant 3 : index
    %c0_358 = arith.constant 0 : index
    %c0_359 = arith.constant 0 : index
    %480 = vector.load %arg6[%c3_357, %c0_358, %c0_359] : memref<9x4x16xbf16, #tpu.memory_space<vmem>>, vector<1x4x16xbf16>
    %481 = vector.shape_cast %480 : vector<1x4x16xbf16> to vector<4x16xbf16>
    %cst_360 = arith.constant dense<0.000000e+00> : vector<4x32xf32>
    %482 = tpu.matmul %481, %454, %cst_360 {dimension_numbers = #tpu.dot_dimension_numbers<[1], [0], [0], [1], [0, 0, 1, 1], [], []>} : vector<4x16xbf16>, vector<16x32xbf16>, vector<4x32xf32> -> vector<4x32xf32>
    %483 = arith.truncf %482 : vector<4x32xf32> to vector<4x32xbf16>
    %c3_361 = arith.constant 3 : index
    %c0_362 = arith.constant 0 : index
    %c0_363 = arith.constant 0 : index
    %484 = vector.load %arg8[%c3_361, %c0_362, %c0_363] : memref<9x32x128xbf16, #tpu.memory_space<vmem>>, vector<1x32x128xbf16>
    %485 = vector.shape_cast %484 : vector<1x32x128xbf16> to vector<32x128xbf16>
    %cst_364 = arith.constant dense<0.000000e+00> : vector<4x128xf32>
    %486 = tpu.matmul %483, %485, %cst_364 {dimension_numbers = #tpu.dot_dimension_numbers<[1], [0], [0], [1], [0, 0, 1, 1], [], []>} : vector<4x32xbf16>, vector<32x128xbf16>, vector<4x128xf32> -> vector<4x128xf32>
    %487 = arith.addf %479, %486 : vector<4x128xf32>
    %c4_365 = arith.constant 4 : index
    %c0_366 = arith.constant 0 : index
    %c0_367 = arith.constant 0 : index
    %488 = vector.load %arg6[%c4_365, %c0_366, %c0_367] : memref<9x4x16xbf16, #tpu.memory_space<vmem>>, vector<1x4x16xbf16>
    %489 = vector.shape_cast %488 : vector<1x4x16xbf16> to vector<4x16xbf16>
    %cst_368 = arith.constant dense<0.000000e+00> : vector<4x32xf32>
    %490 = tpu.matmul %489, %454, %cst_368 {dimension_numbers = #tpu.dot_dimension_numbers<[1], [0], [0], [1], [0, 0, 1, 1], [], []>} : vector<4x16xbf16>, vector<16x32xbf16>, vector<4x32xf32> -> vector<4x32xf32>
    %491 = arith.truncf %490 : vector<4x32xf32> to vector<4x32xbf16>
    %c4_369 = arith.constant 4 : index
    %c0_370 = arith.constant 0 : index
    %c0_371 = arith.constant 0 : index
    %492 = vector.load %arg8[%c4_369, %c0_370, %c0_371] : memref<9x32x128xbf16, #tpu.memory_space<vmem>>, vector<1x32x128xbf16>
    %493 = vector.shape_cast %492 : vector<1x32x128xbf16> to vector<32x128xbf16>
    %cst_372 = arith.constant dense<0.000000e+00> : vector<4x128xf32>
    %494 = tpu.matmul %491, %493, %cst_372 {dimension_numbers = #tpu.dot_dimension_numbers<[1], [0], [0], [1], [0, 0, 1, 1], [], []>} : vector<4x32xbf16>, vector<32x128xbf16>, vector<4x128xf32> -> vector<4x128xf32>
    %495 = arith.addf %487, %494 : vector<4x128xf32>
    %c5_373 = arith.constant 5 : index
    %c0_374 = arith.constant 0 : index
    %c0_375 = arith.constant 0 : index
    %496 = vector.load %arg6[%c5_373, %c0_374, %c0_375] : memref<9x4x16xbf16, #tpu.memory_space<vmem>>, vector<1x4x16xbf16>
    %497 = vector.shape_cast %496 : vector<1x4x16xbf16> to vector<4x16xbf16>
    %cst_376 = arith.constant dense<0.000000e+00> : vector<4x32xf32>
    %498 = tpu.matmul %497, %454, %cst_376 {dimension_numbers = #tpu.dot_dimension_numbers<[1], [0], [0], [1], [0, 0, 1, 1], [], []>} : vector<4x16xbf16>, vector<16x32xbf16>, vector<4x32xf32> -> vector<4x32xf32>
    %499 = arith.truncf %498 : vector<4x32xf32> to vector<4x32xbf16>
    %c5_377 = arith.constant 5 : index
    %c0_378 = arith.constant 0 : index
    %c0_379 = arith.constant 0 : index
    %500 = vector.load %arg8[%c5_377, %c0_378, %c0_379] : memref<9x32x128xbf16, #tpu.memory_space<vmem>>, vector<1x32x128xbf16>
    %501 = vector.shape_cast %500 : vector<1x32x128xbf16> to vector<32x128xbf16>
    %cst_380 = arith.constant dense<0.000000e+00> : vector<4x128xf32>
    %502 = tpu.matmul %499, %501, %cst_380 {dimension_numbers = #tpu.dot_dimension_numbers<[1], [0], [0], [1], [0, 0, 1, 1], [], []>} : vector<4x32xbf16>, vector<32x128xbf16>, vector<4x128xf32> -> vector<4x128xf32>
    %503 = arith.addf %495, %502 : vector<4x128xf32>
    %c6_381 = arith.constant 6 : index
    %c0_382 = arith.constant 0 : index
    %c0_383 = arith.constant 0 : index
    %504 = vector.load %arg6[%c6_381, %c0_382, %c0_383] : memref<9x4x16xbf16, #tpu.memory_space<vmem>>, vector<1x4x16xbf16>
    %505 = vector.shape_cast %504 : vector<1x4x16xbf16> to vector<4x16xbf16>
    %cst_384 = arith.constant dense<0.000000e+00> : vector<4x32xf32>
    %506 = tpu.matmul %505, %454, %cst_384 {dimension_numbers = #tpu.dot_dimension_numbers<[1], [0], [0], [1], [0, 0, 1, 1], [], []>} : vector<4x16xbf16>, vector<16x32xbf16>, vector<4x32xf32> -> vector<4x32xf32>
    %507 = arith.truncf %506 : vector<4x32xf32> to vector<4x32xbf16>
    %c6_385 = arith.constant 6 : index
    %c0_386 = arith.constant 0 : index
    %c0_387 = arith.constant 0 : index
    %508 = vector.load %arg8[%c6_385, %c0_386, %c0_387] : memref<9x32x128xbf16, #tpu.memory_space<vmem>>, vector<1x32x128xbf16>
    %509 = vector.shape_cast %508 : vector<1x32x128xbf16> to vector<32x128xbf16>
    %cst_388 = arith.constant dense<0.000000e+00> : vector<4x128xf32>
    %510 = tpu.matmul %507, %509, %cst_388 {dimension_numbers = #tpu.dot_dimension_numbers<[1], [0], [0], [1], [0, 0, 1, 1], [], []>} : vector<4x32xbf16>, vector<32x128xbf16>, vector<4x128xf32> -> vector<4x128xf32>
    %511 = arith.addf %503, %510 : vector<4x128xf32>
    %c7_389 = arith.constant 7 : index
    %c0_390 = arith.constant 0 : index
    %c0_391 = arith.constant 0 : index
    %512 = vector.load %arg6[%c7_389, %c0_390, %c0_391] : memref<9x4x16xbf16, #tpu.memory_space<vmem>>, vector<1x4x16xbf16>
    %513 = vector.shape_cast %512 : vector<1x4x16xbf16> to vector<4x16xbf16>
    %cst_392 = arith.constant dense<0.000000e+00> : vector<4x32xf32>
    %514 = tpu.matmul %513, %454, %cst_392 {dimension_numbers = #tpu.dot_dimension_numbers<[1], [0], [0], [1], [0, 0, 1, 1], [], []>} : vector<4x16xbf16>, vector<16x32xbf16>, vector<4x32xf32> -> vector<4x32xf32>
    %515 = arith.truncf %514 : vector<4x32xf32> to vector<4x32xbf16>
    %c7_393 = arith.constant 7 : index
    %c0_394 = arith.constant 0 : index
    %c0_395 = arith.constant 0 : index
    %516 = vector.load %arg8[%c7_393, %c0_394, %c0_395] : memref<9x32x128xbf16, #tpu.memory_space<vmem>>, vector<1x32x128xbf16>
    %517 = vector.shape_cast %516 : vector<1x32x128xbf16> to vector<32x128xbf16>
    %cst_396 = arith.constant dense<0.000000e+00> : vector<4x128xf32>
    %518 = tpu.matmul %515, %517, %cst_396 {dimension_numbers = #tpu.dot_dimension_numbers<[1], [0], [0], [1], [0, 0, 1, 1], [], []>} : vector<4x32xbf16>, vector<32x128xbf16>, vector<4x128xf32> -> vector<4x128xf32>
    %519 = arith.addf %511, %518 : vector<4x128xf32>
    %c8_397 = arith.constant 8 : index
    %c0_398 = arith.constant 0 : index
    %c0_399 = arith.constant 0 : index
    %520 = vector.load %arg6[%c8_397, %c0_398, %c0_399] : memref<9x4x16xbf16, #tpu.memory_space<vmem>>, vector<1x4x16xbf16>
    %521 = vector.shape_cast %520 : vector<1x4x16xbf16> to vector<4x16xbf16>
    %cst_400 = arith.constant dense<0.000000e+00> : vector<4x32xf32>
    %522 = tpu.matmul %521, %454, %cst_400 {dimension_numbers = #tpu.dot_dimension_numbers<[1], [0], [0], [1], [0, 0, 1, 1], [], []>} : vector<4x16xbf16>, vector<16x32xbf16>, vector<4x32xf32> -> vector<4x32xf32>
    %523 = arith.truncf %522 : vector<4x32xf32> to vector<4x32xbf16>
    %c8_401 = arith.constant 8 : index
    %c0_402 = arith.constant 0 : index
    %c0_403 = arith.constant 0 : index
    %524 = vector.load %arg8[%c8_401, %c0_402, %c0_403] : memref<9x32x128xbf16, #tpu.memory_space<vmem>>, vector<1x32x128xbf16>
    %525 = vector.shape_cast %524 : vector<1x32x128xbf16> to vector<32x128xbf16>
    %cst_404 = arith.constant dense<0.000000e+00> : vector<4x128xf32>
    %526 = tpu.matmul %523, %525, %cst_404 {dimension_numbers = #tpu.dot_dimension_numbers<[1], [0], [0], [1], [0, 0, 1, 1], [], []>} : vector<4x32xbf16>, vector<32x128xbf16>, vector<4x128xf32> -> vector<4x128xf32>
    %527 = arith.addf %519, %526 : vector<4x128xf32>
    %c0_405 = arith.constant 0 : index
    %c0_406 = arith.constant 0 : index
    %528 = vector.load %arg14[%c0_405, %c0_406] : memref<4x2xf32, #tpu.memory_space<vmem>>, vector<4x2xf32>
    %cst_407 = arith.constant dense<0.000000e+00> : vector<4xf32>
    %529 = vector.multi_reduction <add>, %527, %cst_407 [1] : vector<4x128xf32> to vector<4xf32>
    %530 = vector.shape_cast %529 : vector<4xf32> to vector<4x1xf32>
    %531 = arith.mulf %527, %527 : vector<4x128xf32>
    %cst_408 = arith.constant dense<0.000000e+00> : vector<4xf32>
    %532 = vector.multi_reduction <add>, %531, %cst_408 [1] : vector<4x128xf32> to vector<4xf32>
    %533 = vector.shape_cast %532 : vector<4xf32> to vector<4x1xf32>
    %cst_409 = arith.constant 7.812500e-03 : f32
    %534 = vector.broadcast %cst_409 : f32 to vector<4x1xf32>
    %535 = arith.mulf %530, %534 : vector<4x1xf32>
    %cst_410 = arith.constant 7.812500e-03 : f32
    %536 = vector.broadcast %cst_410 : f32 to vector<4x1xf32>
    %537 = arith.mulf %533, %536 : vector<4x1xf32>
    %538 = arith.mulf %535, %535 : vector<4x1xf32>
    %539 = arith.subf %537, %538 : vector<4x1xf32>
    %cst_411 = arith.constant 0.000000e+00 : f32
    %540 = vector.broadcast %cst_411 : f32 to vector<4x1xf32>
    %541 = arith.maximumf %539, %540 : vector<4x1xf32>
    %542 = vector.extract_strided_slice %528 {offsets = [0, 0], sizes = [4, 1], strides = [1, 1]} : vector<4x2xf32> to vector<4x1xf32>
    %cst_412 = arith.constant 9.99999974E-6 : f32
    %543 = vector.broadcast %cst_412 : f32 to vector<4x1xf32>
    %544 = arith.addf %541, %543 : vector<4x1xf32>
    %545 = math.rsqrt %544 : vector<4x1xf32>
    %546 = arith.mulf %542, %545 : vector<4x1xf32>
    %547 = vector.extract_strided_slice %528 {offsets = [0, 1], sizes = [4, 1], strides = [1, 1]} : vector<4x2xf32> to vector<4x1xf32>
    %548 = arith.mulf %535, %546 : vector<4x1xf32>
    %549 = arith.subf %547, %548 : vector<4x1xf32>
    %550 = vector.broadcast %546 : vector<4x1xf32> to vector<4x128xf32>
    %551 = arith.mulf %527, %550 : vector<4x128xf32>
    %552 = vector.broadcast %549 : vector<4x1xf32> to vector<4x128xf32>
    %553 = arith.addf %551, %552 : vector<4x128xf32>
    %cst_413 = arith.constant 5.000000e-01 : f32
    %554 = vector.broadcast %cst_413 : f32 to vector<4x128xf32>
    %555 = arith.mulf %554, %553 : vector<4x128xf32>
    %cst_414 = arith.constant 4.471500e-02 : f32
    %556 = vector.broadcast %cst_414 : f32 to vector<4x128xf32>
    %557 = arith.mulf %556, %553 : vector<4x128xf32>
    %558 = arith.mulf %557, %553 : vector<4x128xf32>
    %559 = arith.mulf %558, %553 : vector<4x128xf32>
    %560 = arith.addf %553, %559 : vector<4x128xf32>
    %cst_415 = arith.constant 0.797884583 : f32
    %561 = vector.broadcast %cst_415 : f32 to vector<4x128xf32>
    %562 = arith.mulf %561, %560 : vector<4x128xf32>
    %563 = math.tanh %562 : vector<4x128xf32>
    %cst_416 = arith.constant 1.000000e+00 : f32
    %564 = vector.broadcast %cst_416 : f32 to vector<4x128xf32>
    %565 = arith.addf %564, %563 : vector<4x128xf32>
    %566 = arith.mulf %555, %565 : vector<4x128xf32>
    %567 = arith.truncf %566 : vector<4x128xf32> to vector<4x128xbf16>
    %c0_i32_417 = arith.constant 0 : i32
    %568 = tpu.memref_slice %arg18[%c0_i32_417] : memref<1x!tpu.dma_semaphore, #tpu.memory_space<semaphore_mem>> -> memref<1x!tpu.dma_semaphore, #tpu.memory_space<semaphore_mem>>
    %569 = tpu.memref_squeeze %568 : memref<1x!tpu.dma_semaphore, #tpu.memory_space<semaphore_mem>> -> memref<!tpu.dma_semaphore, #tpu.memory_space<semaphore_mem>>
    tpu.wait_dma2 semaphore(%569 : memref<!tpu.dma_semaphore, #tpu.memory_space<semaphore_mem>>) src(%arg9 : memref<4x128x640xbf16, #tpu.memory_space<any>>) dst(%arg17 : memref<4x128x640xbf16, #tpu.memory_space<vmem>>)
    %cst_418 = arith.constant 0.000000e+00 : f32
    %570 = vector.broadcast %cst_418 : f32 to vector<1x640xf32>
    %571 = vector.extract_strided_slice %567 {offsets = [0, 0], sizes = [1, 128], strides = [1, 1]} : vector<4x128xbf16> to vector<1x128xbf16>
    %c0_419 = arith.constant 0 : index
    %c0_420 = arith.constant 0 : index
    %c0_421 = arith.constant 0 : index
    %572 = vector.load %arg17[%c0_419, %c0_420, %c0_421] : memref<4x128x640xbf16, #tpu.memory_space<vmem>>, vector<1x128x640xbf16>
    %573 = vector.shape_cast %572 : vector<1x128x640xbf16> to vector<128x640xbf16>
    %cst_422 = arith.constant dense<0.000000e+00> : vector<1x640xf32>
    %574 = tpu.matmul %571, %573, %cst_422 {dimension_numbers = #tpu.dot_dimension_numbers<[1], [0], [0], [1], [0, 0, 1, 1], [], []>} : vector<1x128xbf16>, vector<128x640xbf16>, vector<1x640xf32> -> vector<1x640xf32>
    %575 = arith.addf %570, %574 : vector<1x640xf32>
    %576 = vector.extract_strided_slice %567 {offsets = [1, 0], sizes = [1, 128], strides = [1, 1]} : vector<4x128xbf16> to vector<1x128xbf16>
    %c1_423 = arith.constant 1 : index
    %c0_424 = arith.constant 0 : index
    %c0_425 = arith.constant 0 : index
    %577 = vector.load %arg17[%c1_423, %c0_424, %c0_425] : memref<4x128x640xbf16, #tpu.memory_space<vmem>>, vector<1x128x640xbf16>
    %578 = vector.shape_cast %577 : vector<1x128x640xbf16> to vector<128x640xbf16>
    %cst_426 = arith.constant dense<0.000000e+00> : vector<1x640xf32>
    %579 = tpu.matmul %576, %578, %cst_426 {dimension_numbers = #tpu.dot_dimension_numbers<[1], [0], [0], [1], [0, 0, 1, 1], [], []>} : vector<1x128xbf16>, vector<128x640xbf16>, vector<1x640xf32> -> vector<1x640xf32>
    %580 = arith.addf %575, %579 : vector<1x640xf32>
    %581 = vector.extract_strided_slice %567 {offsets = [2, 0], sizes = [1, 128], strides = [1, 1]} : vector<4x128xbf16> to vector<1x128xbf16>
    %c2_427 = arith.constant 2 : index
    %c0_428 = arith.constant 0 : index
    %c0_429 = arith.constant 0 : index
    %582 = vector.load %arg17[%c2_427, %c0_428, %c0_429] : memref<4x128x640xbf16, #tpu.memory_space<vmem>>, vector<1x128x640xbf16>
    %583 = vector.shape_cast %582 : vector<1x128x640xbf16> to vector<128x640xbf16>
    %cst_430 = arith.constant dense<0.000000e+00> : vector<1x640xf32>
    %584 = tpu.matmul %581, %583, %cst_430 {dimension_numbers = #tpu.dot_dimension_numbers<[1], [0], [0], [1], [0, 0, 1, 1], [], []>} : vector<1x128xbf16>, vector<128x640xbf16>, vector<1x640xf32> -> vector<1x640xf32>
    %585 = arith.addf %580, %584 : vector<1x640xf32>
    %586 = vector.extract_strided_slice %567 {offsets = [3, 0], sizes = [1, 128], strides = [1, 1]} : vector<4x128xbf16> to vector<1x128xbf16>
    %c3_431 = arith.constant 3 : index
    %c0_432 = arith.constant 0 : index
    %c0_433 = arith.constant 0 : index
    %587 = vector.load %arg17[%c3_431, %c0_432, %c0_433] : memref<4x128x640xbf16, #tpu.memory_space<vmem>>, vector<1x128x640xbf16>
    %588 = vector.shape_cast %587 : vector<1x128x640xbf16> to vector<128x640xbf16>
    %cst_434 = arith.constant dense<0.000000e+00> : vector<1x640xf32>
    %589 = tpu.matmul %586, %588, %cst_434 {dimension_numbers = #tpu.dot_dimension_numbers<[1], [0], [0], [1], [0, 0, 1, 1], [], []>} : vector<1x128xbf16>, vector<128x640xbf16>, vector<1x640xf32> -> vector<1x640xf32>
    %590 = arith.addf %585, %589 : vector<1x640xf32>
    %c0_435 = arith.constant 0 : index
    %c0_436 = arith.constant 0 : index
    %591 = vector.load %arg15[%c0_435, %c0_436] : memref<1x2xf32, #tpu.memory_space<vmem>>, vector<1x2xf32>
    %cst_437 = arith.constant dense<0.000000e+00> : vector<1xf32>
    %592 = vector.multi_reduction <add>, %590, %cst_437 [1] : vector<1x640xf32> to vector<1xf32>
    %593 = vector.shape_cast %592 : vector<1xf32> to vector<1x1xf32>
    %594 = arith.mulf %590, %590 : vector<1x640xf32>
    %cst_438 = arith.constant dense<0.000000e+00> : vector<1xf32>
    %595 = vector.multi_reduction <add>, %594, %cst_438 [1] : vector<1x640xf32> to vector<1xf32>
    %596 = vector.shape_cast %595 : vector<1xf32> to vector<1x1xf32>
    %cst_439 = arith.constant 1.562500e-03 : f32
    %597 = vector.broadcast %cst_439 : f32 to vector<1x1xf32>
    %598 = arith.mulf %593, %597 : vector<1x1xf32>
    %cst_440 = arith.constant 1.562500e-03 : f32
    %599 = vector.broadcast %cst_440 : f32 to vector<1x1xf32>
    %600 = arith.mulf %596, %599 : vector<1x1xf32>
    %601 = arith.mulf %598, %598 : vector<1x1xf32>
    %602 = arith.subf %600, %601 : vector<1x1xf32>
    %cst_441 = arith.constant 0.000000e+00 : f32
    %603 = vector.broadcast %cst_441 : f32 to vector<1x1xf32>
    %604 = arith.maximumf %602, %603 : vector<1x1xf32>
    %605 = vector.extract_strided_slice %591 {offsets = [0, 0], sizes = [1, 1], strides = [1, 1]} : vector<1x2xf32> to vector<1x1xf32>
    %cst_442 = arith.constant 9.99999974E-6 : f32
    %606 = vector.broadcast %cst_442 : f32 to vector<1x1xf32>
    %607 = arith.addf %604, %606 : vector<1x1xf32>
    %608 = math.rsqrt %607 : vector<1x1xf32>
    %609 = arith.mulf %605, %608 : vector<1x1xf32>
    %610 = vector.extract_strided_slice %591 {offsets = [0, 1], sizes = [1, 1], strides = [1, 1]} : vector<1x2xf32> to vector<1x1xf32>
    %611 = arith.mulf %598, %609 : vector<1x1xf32>
    %612 = arith.subf %610, %611 : vector<1x1xf32>
    %613 = vector.broadcast %609 : vector<1x1xf32> to vector<1x640xf32>
    %614 = arith.mulf %590, %613 : vector<1x640xf32>
    %615 = vector.broadcast %612 : vector<1x1xf32> to vector<1x640xf32>
    %616 = arith.addf %614, %615 : vector<1x640xf32>
    %cst_443 = arith.constant 5.000000e-01 : f32
    %617 = vector.broadcast %cst_443 : f32 to vector<1x640xf32>
    %618 = arith.mulf %617, %616 : vector<1x640xf32>
    %cst_444 = arith.constant 4.471500e-02 : f32
    %619 = vector.broadcast %cst_444 : f32 to vector<1x640xf32>
    %620 = arith.mulf %619, %616 : vector<1x640xf32>
    %621 = arith.mulf %620, %616 : vector<1x640xf32>
    %622 = arith.mulf %621, %616 : vector<1x640xf32>
    %623 = arith.addf %616, %622 : vector<1x640xf32>
    %cst_445 = arith.constant 0.797884583 : f32
    %624 = vector.broadcast %cst_445 : f32 to vector<1x640xf32>
    %625 = arith.mulf %624, %623 : vector<1x640xf32>
    %626 = math.tanh %625 : vector<1x640xf32>
    %cst_446 = arith.constant 1.000000e+00 : f32
    %627 = vector.broadcast %cst_446 : f32 to vector<1x640xf32>
    %628 = arith.addf %627, %626 : vector<1x640xf32>
    %629 = arith.mulf %618, %628 : vector<1x640xf32>
    %c0_447 = arith.constant 0 : index
    %c0_448 = arith.constant 0 : index
    %630 = vector.load %arg16[%c0_447, %c0_448] : memref<1x640xf32, #tpu.memory_space<vmem>>, vector<1x640xf32>
    tpu.vector_store %arg16[%c0_447, %c0_448], %629 {strides = array<i32>} : memref<1x640xf32, #tpu.memory_space<vmem>>, vector<1x640xf32>,
    return
  }
  func.func @transform_0(%arg0: i32) -> (i32, i32) {
    %c0_i32 = arith.constant 0 : i32
    %c0_i32_0 = arith.constant 0 : i32
    %c0_i32_1 = arith.constant 0 : i32
    return %c0_i32, %c0_i32_0 : i32, i32
  }
  func.func @transform_1(%arg0: i32) -> (i32, i32, i32) {
    %c0_i32 = arith.constant 0 : i32
    %c0_i32_0 = arith.constant 0 : i32
    %c0_i32_1 = arith.constant 0 : i32
    %c0_i32_2 = arith.constant 0 : i32
    return %c0_i32, %c0_i32_0, %c0_i32_1 : i32, i32, i32
  }
  func.func @transform_2(%arg0: i32) -> (i32, i32, i32) {
    %c0_i32 = arith.constant 0 : i32
    %c0_i32_0 = arith.constant 0 : i32
    %c0_i32_1 = arith.constant 0 : i32
    %c0_i32_2 = arith.constant 0 : i32
    return %c0_i32, %c0_i32_0, %c0_i32_1 : i32, i32, i32
  }
  func.func @transform_3(%arg0: i32) -> (i32, i32, i32) {
    %c0_i32 = arith.constant 0 : i32
    %c0_i32_0 = arith.constant 0 : i32
    %c0_i32_1 = arith.constant 0 : i32
    %c0_i32_2 = arith.constant 0 : i32
    return %c0_i32, %c0_i32_0, %c0_i32_1 : i32, i32, i32
  }
  func.func @transform_4(%arg0: i32) -> (i32, i32, i32) {
    %c0_i32 = arith.constant 0 : i32
    %c0_i32_0 = arith.constant 0 : i32
    %c0_i32_1 = arith.constant 0 : i32
    %c0_i32_2 = arith.constant 0 : i32
    return %c0_i32, %c0_i32_0, %c0_i32_1 : i32, i32, i32
  }
  func.func @transform_5(%arg0: i32) -> (i32, i32, i32) {
    %c0_i32 = arith.constant 0 : i32
    %c0_i32_0 = arith.constant 0 : i32
    %c0_i32_1 = arith.constant 0 : i32
    %c0_i32_2 = arith.constant 0 : i32
    return %c0_i32, %c0_i32_0, %c0_i32_1 : i32, i32, i32
  }
  func.func @transform_6(%arg0: i32) -> (i32, i32, i32) {
    %c0_i32 = arith.constant 0 : i32
    %c0_i32_0 = arith.constant 0 : i32
    %c0_i32_1 = arith.constant 0 : i32
    %c0_i32_2 = arith.constant 0 : i32
    return %c0_i32, %c0_i32_0, %c0_i32_1 : i32, i32, i32
  }
  func.func @transform_7(%arg0: i32) -> (i32, i32, i32) {
    %c0_i32 = arith.constant 0 : i32
    %c0_i32_0 = arith.constant 0 : i32
    %c0_i32_1 = arith.constant 0 : i32
    %c0_i32_2 = arith.constant 0 : i32
    return %c0_i32, %c0_i32_0, %c0_i32_1 : i32, i32, i32
  }
  func.func @transform_9(%arg0: i32) -> (i32, i32) {
    %c0_i32 = arith.constant 0 : i32
    %c0_i32_0 = arith.constant 0 : i32
    %c0_i32_1 = arith.constant 0 : i32
    return %c0_i32, %c0_i32_0 : i32, i32
  }
  func.func @transform_10(%arg0: i32) -> (i32, i32) {
    %c0_i32 = arith.constant 0 : i32
    %c0_i32_0 = arith.constant 0 : i32
    %c0_i32_1 = arith.constant 0 : i32
    return %c0_i32, %c0_i32_0 : i32, i32
  }
  func.func @transform_11(%arg0: i32) -> (i32, i32) {
    %c0_i32 = arith.constant 0 : i32
    %c0_i32_0 = arith.constant 0 : i32
    %c0_i32_1 = arith.constant 0 : i32
    return %c0_i32, %c0_i32_0 : i32, i32
  }
  func.func @transform_12(%arg0: i32) -> (i32, i32) {
    %c0_i32 = arith.constant 0 : i32
    %c0_i32_0 = arith.constant 0 : i32
    %c0_i32_1 = arith.constant 0 : i32
    return %c0_i32, %c0_i32_0 : i32, i32
  }
  func.func @transform_13(%arg0: i32) -> (i32, i32) {
    %c0_i32 = arith.constant 0 : i32
    %c0_i32_0 = arith.constant 0 : i32
    %c0_i32_1 = arith.constant 0 : i32
    return %c0_i32, %c0_i32_0 : i32, i32
  }
  func.func @transform_14(%arg0: i32) -> (i32, i32) {
    %c0_i32 = arith.constant 0 : i32
    %c0_i32_0 = arith.constant 0 : i32
    %c0_i32_1 = arith.constant 0 : i32
    return %c0_i32, %c0_i32_0 : i32, i32
  }
  func.func @transform_15(%arg0: i32) -> (i32, i32) {
    %c0_i32 = arith.constant 0 : i32
    %c0_i32_0 = arith.constant 0 : i32
    %c0_i32_1 = arith.constant 0 : i32
    return %c0_i32, %c0_i32_0 : i32, i32
  }
}

</mosaic_0001>

<bundles_post_ra>
// kernel: decoder_forward.1
= control target key start
LH: loop header
LB: loop body
LE: loop exit
PB: predicated region body
PF: predicated region fallthrough
CT: control target
= control target key end

     0   :  { %s19263_s0 = inlined_call_operand.vmem [shape: bf16[256,32], index: 0, kind: input, shape index: {}]   ;;  %s19264_s1 = inlined_call_operand.vmem [shape: bf16[9,128,256], index: 1, kind: input, shape index: {}]   ;;  %s19265_s2 = inlined_call_operand.vmem [shape: bf16[9,64,128], index: 2, kind: input, shape index: {}]   ;;  %s19266_s3 = inlined_call_operand.vmem [shape: bf16[9,32,64], index: 3, kind: input, shape index: {}]   ;;  %s19267_s4 = inlined_call_operand.vmem [shape: bf16[9,16,32], index: 4, kind: input, shape index: {}]   ;;  %s19268_s5 = inlined_call_operand.vmem [shape: bf16[9,4,16], index: 5, kind: input, shape index: {}]   ;;  %s19269_s6 = inlined_call_operand.vmem [shape: bf16[9,32,32], index: 6, kind: input, shape index: {}]   ;;  %s19270_s7 = inlined_call_operand.vmem [shape: bf16[9,32,128], index: 7, kind: input, shape index: {}]   ;;  %s19271_s8 = inlined_call_operand.vmem [shape: bf16[4,128,640], index: 8, kind: input, shape index: {}]   ;;  %s19272_s9 = inlined_call_operand.vmem [shape: f32[128,2], index: 9, kind: input, shape index: {}]   ;;  %s19273_s10 = inlined_call_operand.vmem [shape: f32[64,2], index: 10, kind: input, shape index: {}]   ;;  %s19274_s11 = inlined_call_operand.vmem [shape: f32[32,2], index: 11, kind: input, shape index: {}]   ;;  %s19275_s12 = inlined_call_operand.vmem [shape: f32[16,2], index: 12, kind: input, shape index: {}]   ;;  %s19276_s13 = inlined_call_operand.vmem [shape: f32[4,2], index: 13, kind: input, shape index: {}]   ;;  %s19277_s14 = inlined_call_operand.vmem [shape: f32[1,2], index: 14, kind: input, shape index: {}]   ;;  %s19278_s15 = inlined_call_operand.vmem [shape: f32[1,640], index: 15, kind: output, shape index: {}]  }
   0x1   :  { %v66_v0 = vld [vmem:[%s19271_s8] sm:$0xf]  ;;  %v68_v1 = vld [vmem:[%s19271_s8 + $0x14] sm:$0xf]  ;;  %v70_v2 = vld [vmem:[%s19271_s8 + $0x4] sm:$0xf] }
   0x2   :  { %67 = vst [vmem:[#allocation2] sm:$0xf] %v66_v0  ;;  %69 = vst [vmem:[#allocation2 + $0x4] sm:$0xf] %v68_v1  ;;  %v72_v3 = vld [vmem:[%s19271_s8 + $0x18] sm:$0xf] }
   0x3   :  { %71 = vst [vmem:[#allocation2 + $0x8] sm:$0xf] %v70_v2  ;;  %v74_v4 = vld [vmem:[%s19271_s8 + $0x8] sm:$0xf]  ;;  %v76_v5 = vld [vmem:[%s19271_s8 + $0x1c] sm:$0xf] }
   0x4   :  { %73 = vst [vmem:[#allocation2 + $0xc] sm:$0xf] %v72_v3  ;;  %75 = vst [vmem:[#allocation2 + $0x10] sm:$0xf] %v74_v4  ;;  %v78_v6 = vld [vmem:[%s19271_s8 + $0xc] sm:$0xf] }
   0x5   :  { %77 = vst [vmem:[#allocation2 + $0x14] sm:$0xf] %v76_v5  ;;  %v80_v7 = vld [vmem:[%s19271_s8 + $0x20] sm:$0xf]  ;;  %v82_v8 = vld [vmem:[%s19271_s8 + $0x10] sm:$0xf] }
   0x6   :  { %79 = vst [vmem:[#allocation2 + $0x18] sm:$0xf] %v78_v6  ;;  %81 = vst [vmem:[#allocation2 + $0x1c] sm:$0xf] %v80_v7  ;;  %v84_v9 = vld [vmem:[%s19271_s8 + $0x24] sm:$0xff]   ;;  %v104_v18 = vld [vmem:[%s19271_s8 + $0x4c] sm:$0xff]  }
   0x7   :  { %83 = vst [vmem:[#allocation2 + $0x20] sm:$0xf] %v82_v8  ;;  %v88_v10 = vld [vmem:[%s19271_s8 + $0x3c] sm:$0xf]  ;;  %v90_v11 = vld [vmem:[%s19271_s8 + $0x2c] sm:$0xf] }
   0x8   :  { %85 = vst [vmem:[#allocation2 + $0x24] sm:$0xff] %v84_v9   ;;  %89 = vst [vmem:[#allocation2 + $0x2c] sm:$0xf] %v88_v10  ;;  %v92_v12 = vld [vmem:[%s19271_s8 + $0x40] sm:$0xf]  ;;  %v124_v27 = vld [vmem:[%s19271_s8 + $0x74] sm:$0xff]  }
   0x9   :  { %91 = vst [vmem:[#allocation2 + $0x30] sm:$0xf] %v90_v11  ;;  %v94_v13 = vld [vmem:[%s19271_s8 + $0x30] sm:$0xf]  ;;  %v96_v14 = vld [vmem:[%s19271_s8 + $0x44] sm:$0xf] }
   0xa   :  { %93 = vst [vmem:[#allocation2 + $0x34] sm:$0xf] %v92_v12  ;;  %95 = vst [vmem:[#allocation2 + $0x38] sm:$0xf] %v94_v13  ;;  %v98_v15 = vld [vmem:[%s19271_s8 + $0x34] sm:$0xf] }
   0xb   :  { %97 = vst [vmem:[#allocation2 + $0x3c] sm:$0xf] %v96_v14  ;;  %v100_v16 = vld [vmem:[%s19271_s8 + $0x48] sm:$0xf]  ;;  %v102_v17 = vld [vmem:[%s19271_s8 + $0x38] sm:$0xf] }
   0xc   :  { %99 = vst [vmem:[#allocation2 + $0x40] sm:$0xf] %v98_v15  ;;  %101 = vst [vmem:[#allocation2 + $0x44] sm:$0xf] %v100_v16  ;;  %v108_v19 = vld [vmem:[%s19271_s8 + $0x64] sm:$0xf] }
   0xd   :  { %103 = vst [vmem:[#allocation2 + $0x48] sm:$0xf] %v102_v17  ;;  %v110_v20 = vld [vmem:[%s19271_s8 + $0x54] sm:$0xf]  ;;  %105 = vst [vmem:[#allocation2 + $0x4c] sm:$0xff] %v104_v18   ;;  %v144_v36 = vld [vmem:[%s19271_s8 + $0x9c] sm:$0xff]  }
   0xe   :  { %109 = vst [vmem:[#allocation2 + $0x54] sm:$0xf] %v108_v19  ;;  %111 = vst [vmem:[#allocation2 + $0x58] sm:$0xf] %v110_v20  ;;  %v112_v21 = vld [vmem:[%s19271_s8 + $0x68] sm:$0xf] }
   0xf   :  { %v114_v22 = vld [vmem:[%s19271_s8 + $0x58] sm:$0xf]  ;;  %v116_v23 = vld [vmem:[%s19271_s8 + $0x6c] sm:$0xf]  ;;  %113 = vst [vmem:[#allocation2 + $0x5c] sm:$0xf] %v112_v21 }
  0x10   :  { %115 = vst [vmem:[#allocation2 + $0x60] sm:$0xf] %v114_v22  ;;  %117 = vst [vmem:[#allocation2 + $0x64] sm:$0xf] %v116_v23  ;;  %v118_v24 = vld [vmem:[%s19271_s8 + $0x5c] sm:$0xf] }
  0x11   :  { %v120_v25 = vld [vmem:[%s19271_s8 + $0x70] sm:$0xf]  ;;  %v122_v26 = vld [vmem:[%s19271_s8 + $0x60] sm:$0xf]  ;;  %119 = vst [vmem:[#allocation2 + $0x68] sm:$0xf] %v118_v24 }
  0x12   :  { %121 = vst [vmem:[#allocation2 + $0x6c] sm:$0xf] %v120_v25  ;;  %123 = vst [vmem:[#allocation2 + $0x70] sm:$0xf] %v122_v26  ;;  %v128_v28 = vld [vmem:[%s19271_s8 + $0x8c] sm:$0xf] }
  0x13   :  { %v130_v29 = vld [vmem:[%s19271_s8 + $0x7c] sm:$0xf]  ;;  %125 = vst [vmem:[#allocation2 + $0x74] sm:$0xff] %v124_v27   ;;  %129 = vst [vmem:[#allocation2 + $0x7c] sm:$0xf] %v128_v28  ;;  %v164_v45 = vld [vmem:[%s19271_s8 + $0xc4] sm:$0xff]  }
  0x14   :  { %131 = vst [vmem:[#allocation2 + $0x80] sm:$0xf] %v130_v29  ;;  %v132_v30 = vld [vmem:[%s19271_s8 + $0x90] sm:$0xf]  ;;  %v134_v31 = vld [vmem:[%s19271_s8 + $0x80] sm:$0xf] }
  0x15   :  { %v136_v32 = vld [vmem:[%s19271_s8 + $0x94] sm:$0xf]  ;;  %133 = vst [vmem:[#allocation2 + $0x84] sm:$0xf] %v132_v30  ;;  %135 = vst [vmem:[#allocation2 + $0x88] sm:$0xf] %v134_v31 }
  0x16   :  { %137 = vst [vmem:[#allocation2 + $0x8c] sm:$0xf] %v136_v32  ;;  %v138_v33 = vld [vmem:[%s19271_s8 + $0x84] sm:$0xf]  ;;  %v140_v34 = vld [vmem:[%s19271_s8 + $0x98] sm:$0xf] }
  0x17   :  { %v142_v35 = vld [vmem:[%s19271_s8 + $0x88] sm:$0xf]  ;;  %139 = vst [vmem:[#allocation2 + $0x90] sm:$0xf] %v138_v33  ;;  %141 = vst [vmem:[#allocation2 + $0x94] sm:$0xf] %v140_v34 }
  0x18   :  { %143 = vst [vmem:[#allocation2 + $0x98] sm:$0xf] %v142_v35  ;;  %v148_v37 = vld [vmem:[%s19271_s8 + $0xb4] sm:$0xf]  ;;  %v150_v38 = vld [vmem:[%s19271_s8 + $0xa4] sm:$0xf] }
  0x19   :  { %145 = vst [vmem:[#allocation2 + $0x9c] sm:$0xff] %v144_v36   ;;  %149 = vst [vmem:[#allocation2 + $0xa4] sm:$0xf] %v148_v37  ;;  %v152_v39 = vld [vmem:[%s19271_s8 + $0xb8] sm:$0xf]  ;;  %v184_v54 = vld [vmem:[%s19271_s8 + $0xec] sm:$0xff]  }
  0x1a   :  { %151 = vst [vmem:[#allocation2 + $0xa8] sm:$0xf] %v150_v38  ;;  %v154_v40 = vld [vmem:[%s19271_s8 + $0xa8] sm:$0xf]  ;;  %v156_v41 = vld [vmem:[%s19271_s8 + $0xbc] sm:$0xf] }
  0x1b   :  { %153 = vst [vmem:[#allocation2 + $0xac] sm:$0xf] %v152_v39  ;;  %155 = vst [vmem:[#allocation2 + $0xb0] sm:$0xf] %v154_v40  ;;  %v158_v42 = vld [vmem:[%s19271_s8 + $0xac] sm:$0xf] }
  0x1c   :  { %157 = vst [vmem:[#allocation2 + $0xb4] sm:$0xf] %v156_v41  ;;  %v160_v43 = vld [vmem:[%s19271_s8 + $0xc0] sm:$0xf]  ;;  %v162_v44 = vld [vmem:[%s19271_s8 + $0xb0] sm:$0xf] }
  0x1d   :  { %159 = vst [vmem:[#allocation2 + $0xb8] sm:$0xf] %v158_v42  ;;  %161 = vst [vmem:[#allocation2 + $0xbc] sm:$0xf] %v160_v43  ;;  %v168_v46 = vld [vmem:[%s19271_s8 + $0xdc] sm:$0xf] }
  0x1e   :  { %163 = vst [vmem:[#allocation2 + $0xc0] sm:$0xf] %v162_v44  ;;  %v170_v47 = vld [vmem:[%s19271_s8 + $0xcc] sm:$0xf]  ;;  %165 = vst [vmem:[#allocation2 + $0xc4] sm:$0xff] %v164_v45   ;;  %v204_v63 = vld [vmem:[%s19271_s8 + $0x114] sm:$0xff]  }
  0x1f   :  { %169 = vst [vmem:[#allocation2 + $0xcc] sm:$0xf] %v168_v46  ;;  %171 = vst [vmem:[#allocation2 + $0xd0] sm:$0xf] %v170_v47  ;;  %v172_v48 = vld [vmem:[%s19271_s8 + $0xe0] sm:$0xf] }
  0x20   :  { %v174_v49 = vld [vmem:[%s19271_s8 + $0xd0] sm:$0xf]  ;;  %v176_v50 = vld [vmem:[%s19271_s8 + $0xe4] sm:$0xf]  ;;  %173 = vst [vmem:[#allocation2 + $0xd4] sm:$0xf] %v172_v48 }
  0x21   :  { %175 = vst [vmem:[#allocation2 + $0xd8] sm:$0xf] %v174_v49  ;;  %177 = vst [vmem:[#allocation2 + $0xdc] sm:$0xf] %v176_v50  ;;  %v178_v51 = vld [vmem:[%s19271_s8 + $0xd4] sm:$0xf] }
  0x22   :  { %v180_v52 = vld [vmem:[%s19271_s8 + $0xe8] sm:$0xf]  ;;  %v182_v53 = vld [vmem:[%s19271_s8 + $0xd8] sm:$0xf]  ;;  %179 = vst [vmem:[#allocation2 + $0xe0] sm:$0xf] %v178_v51 }
  0x23   :  { %181 = vst [vmem:[#allocation2 + $0xe4] sm:$0xf] %v180_v52  ;;  %183 = vst [vmem:[#allocation2 + $0xe8] sm:$0xf] %v182_v53  ;;  %v188_v55 = vld [vmem:[%s19271_s8 + $0x104] sm:$0xf] }
  0x24   :  { %v190_v56 = vld [vmem:[%s19271_s8 + $0xf4] sm:$0xf]  ;;  %185 = vst [vmem:[#allocation2 + $0xec] sm:$0xff] %v184_v54   ;;  %189 = vst [vmem:[#allocation2 + $0xf4] sm:$0xf] %v188_v55  ;;  %v224_v8 = vld [vmem:[%s19271_s8 + $0x13c] sm:$0xff]  }
  0x25   :  { %191 = vst [vmem:[#allocation2 + $0xf8] sm:$0xf] %v190_v56  ;;  %v192_v57 = vld [vmem:[%s19271_s8 + $0x108] sm:$0xf]  ;;  %v194_v58 = vld [vmem:[%s19271_s8 + $0xf8] sm:$0xf] }
  0x26   :  { %v196_v59 = vld [vmem:[%s19271_s8 + $0x10c] sm:$0xf]  ;;  %193 = vst [vmem:[#allocation2 + $0xfc] sm:$0xf] %v192_v57  ;;  %195 = vst [vmem:[#allocation2 + $0x100] sm:$0xf] %v194_v58 }
  0x27   :  { %197 = vst [vmem:[#allocation2 + $0x104] sm:$0xf] %v196_v59  ;;  %v198_v60 = vld [vmem:[%s19271_s8 + $0xfc] sm:$0xf]  ;;  %v200_v61 = vld [vmem:[%s19271_s8 + $0x110] sm:$0xf] }
  0x28   :  { %v202_v62 = vld [vmem:[%s19271_s8 + $0x100] sm:$0xf]  ;;  %199 = vst [vmem:[#allocation2 + $0x108] sm:$0xf] %v198_v60  ;;  %201 = vst [vmem:[#allocation2 + $0x10c] sm:$0xf] %v200_v61 }
  0x29   :  { %203 = vst [vmem:[#allocation2 + $0x110] sm:$0xf] %v202_v62  ;;  %v208_v0 = vld [vmem:[%s19271_s8 + $0x12c] sm:$0xf]  ;;  %v210_v1 = vld [vmem:[%s19271_s8 + $0x11c] sm:$0xf] }
  0x2a   :  { %205 = vst [vmem:[#allocation2 + $0x114] sm:$0xff] %v204_v63   ;;  %209 = vst [vmem:[#allocation2 + $0x11c] sm:$0xf] %v208_v0  ;;  %v212_v2 = vld [vmem:[%s19271_s8 + $0x130] sm:$0xf]  ;;  %v244_v17 = vld [vmem:[%s19271_s8 + $0x164] sm:$0xff]  }
  0x2b   :  { %211 = vst [vmem:[#allocation2 + $0x120] sm:$0xf] %v210_v1  ;;  %v214_v3 = vld [vmem:[%s19271_s8 + $0x120] sm:$0xf]  ;;  %v216_v4 = vld [vmem:[%s19271_s8 + $0x134] sm:$0xf] }
  0x2c   :  { %213 = vst [vmem:[#allocation2 + $0x124] sm:$0xf] %v212_v2  ;;  %215 = vst [vmem:[#allocation2 + $0x128] sm:$0xf] %v214_v3  ;;  %v218_v5 = vld [vmem:[%s19271_s8 + $0x124] sm:$0xf] }
  0x2d   :  { %217 = vst [vmem:[#allocation2 + $0x12c] sm:$0xf] %v216_v4  ;;  %v220_v6 = vld [vmem:[%s19271_s8 + $0x138] sm:$0xf]  ;;  %v222_v7 = vld [vmem:[%s19271_s8 + $0x128] sm:$0xf] }
  0x2e   :  { %219 = vst [vmem:[#allocation2 + $0x130] sm:$0xf] %v218_v5  ;;  %221 = vst [vmem:[#allocation2 + $0x134] sm:$0xf] %v220_v6  ;;  %v228_v9 = vld [vmem:[%s19271_s8 + $0x154] sm:$0xf] }
  0x2f   :  { %223 = vst [vmem:[#allocation2 + $0x138] sm:$0xf] %v222_v7  ;;  %v230_v10 = vld [vmem:[%s19271_s8 + $0x144] sm:$0xf]  ;;  %225 = vst [vmem:[#allocation2 + $0x13c] sm:$0xff] %v224_v8   ;;  %v264_v26 = vld [vmem:[%s19271_s8 + $0x18c] sm:$0xff]  }
  0x30   :  { %229 = vst [vmem:[#allocation2 + $0x144] sm:$0xf] %v228_v9  ;;  %231 = vst [vmem:[#allocation2 + $0x148] sm:$0xf] %v230_v10  ;;  %v232_v11 = vld [vmem:[%s19271_s8 + $0x158] sm:$0xf] }
  0x31   :  { %v234_v12 = vld [vmem:[%s19271_s8 + $0x148] sm:$0xf]  ;;  %v236_v13 = vld [vmem:[%s19271_s8 + $0x15c] sm:$0xf]  ;;  %233 = vst [vmem:[#allocation2 + $0x14c] sm:$0xf] %v232_v11 }
  0x32   :  { %235 = vst [vmem:[#allocation2 + $0x150] sm:$0xf] %v234_v12  ;;  %237 = vst [vmem:[#allocation2 + $0x154] sm:$0xf] %v236_v13  ;;  %v238_v14 = vld [vmem:[%s19271_s8 + $0x14c] sm:$0xf] }
  0x33   :  { %v240_v15 = vld [vmem:[%s19271_s8 + $0x160] sm:$0xf]  ;;  %v242_v16 = vld [vmem:[%s19271_s8 + $0x150] sm:$0xf]  ;;  %239 = vst [vmem:[#allocation2 + $0x158] sm:$0xf] %v238_v14 }
  0x34   :  { %241 = vst [vmem:[#allocation2 + $0x15c] sm:$0xf] %v240_v15  ;;  %243 = vst [vmem:[#allocation2 + $0x160] sm:$0xf] %v242_v16  ;;  %v248_v18 = vld [vmem:[%s19271_s8 + $0x17c] sm:$0xf] }
  0x35   :  { %v250_v19 = vld [vmem:[%s19271_s8 + $0x16c] sm:$0xf]  ;;  %245 = vst [vmem:[#allocation2 + $0x164] sm:$0xff] %v244_v17   ;;  %249 = vst [vmem:[#allocation2 + $0x16c] sm:$0xf] %v248_v18  ;;  %v284_v35 = vld [vmem:[%s19271_s8 + $0x1b4] sm:$0xff]  }
  0x36   :  { %251 = vst [vmem:[#allocation2 + $0x170] sm:$0xf] %v250_v19  ;;  %v252_v20 = vld [vmem:[%s19271_s8 + $0x180] sm:$0xf]  ;;  %v254_v21 = vld [vmem:[%s19271_s8 + $0x170] sm:$0xf] }
  0x37   :  { %v256_v22 = vld [vmem:[%s19271_s8 + $0x184] sm:$0xf]  ;;  %253 = vst [vmem:[#allocation2 + $0x174] sm:$0xf] %v252_v20  ;;  %255 = vst [vmem:[#allocation2 + $0x178] sm:$0xf] %v254_v21 }
  0x38   :  { %257 = vst [vmem:[#allocation2 + $0x17c] sm:$0xf] %v256_v22  ;;  %v258_v23 = vld [vmem:[%s19271_s8 + $0x174] sm:$0xf]  ;;  %v260_v24 = vld [vmem:[%s19271_s8 + $0x188] sm:$0xf] }
  0x39   :  { %v262_v25 = vld [vmem:[%s19271_s8 + $0x178] sm:$0xf]  ;;  %259 = vst [vmem:[#allocation2 + $0x180] sm:$0xf] %v258_v23  ;;  %261 = vst [vmem:[#allocation2 + $0x184] sm:$0xf] %v260_v24 }
  0x3a   :  { %263 = vst [vmem:[#allocation2 + $0x188] sm:$0xf] %v262_v25  ;;  %v268_v27 = vld [vmem:[%s19271_s8 + $0x1a4] sm:$0xf]  ;;  %v270_v28 = vld [vmem:[%s19271_s8 + $0x194] sm:$0xf] }
  0x3b   :  { %265 = vst [vmem:[#allocation2 + $0x18c] sm:$0xff] %v264_v26   ;;  %269 = vst [vmem:[#allocation2 + $0x194] sm:$0xf] %v268_v27  ;;  %v272_v29 = vld [vmem:[%s19271_s8 + $0x1a8] sm:$0xf]  ;;  %v304_v44 = vld [vmem:[%s19271_s8 + $0x1dc] sm:$0xff]  }
  0x3c   :  { %271 = vst [vmem:[#allocation2 + $0x198] sm:$0xf] %v270_v28  ;;  %v274_v30 = vld [vmem:[%s19271_s8 + $0x198] sm:$0xf]  ;;  %v276_v31 = vld [vmem:[%s19271_s8 + $0x1ac] sm:$0xf] }
  0x3d   :  { %273 = vst [vmem:[#allocation2 + $0x19c] sm:$0xf] %v272_v29  ;;  %275 = vst [vmem:[#allocation2 + $0x1a0] sm:$0xf] %v274_v30  ;;  %v278_v32 = vld [vmem:[%s19271_s8 + $0x19c] sm:$0xf] }
  0x3e   :  { %277 = vst [vmem:[#allocation2 + $0x1a4] sm:$0xf] %v276_v31  ;;  %v280_v33 = vld [vmem:[%s19271_s8 + $0x1b0] sm:$0xf]  ;;  %v282_v34 = vld [vmem:[%s19271_s8 + $0x1a0] sm:$0xf] }
  0x3f   :  { %279 = vst [vmem:[#allocation2 + $0x1a8] sm:$0xf] %v278_v32  ;;  %281 = vst [vmem:[#allocation2 + $0x1ac] sm:$0xf] %v280_v33  ;;  %v288_v36 = vld [vmem:[%s19271_s8 + $0x1cc] sm:$0xf] }
  0x40   :  { %283 = vst [vmem:[#allocation2 + $0x1b0] sm:$0xf] %v282_v34  ;;  %v290_v37 = vld [vmem:[%s19271_s8 + $0x1bc] sm:$0xf]  ;;  %285 = vst [vmem:[#allocation2 + $0x1b4] sm:$0xff] %v284_v35   ;;  %v324_v53 = vld [vmem:[%s19271_s8 + $0x204] sm:$0xff]  }
  0x41   :  { %289 = vst [vmem:[#allocation2 + $0x1bc] sm:$0xf] %v288_v36  ;;  %291 = vst [vmem:[#allocation2 + $0x1c0] sm:$0xf] %v290_v37  ;;  %v292_v38 = vld [vmem:[%s19271_s8 + $0x1d0] sm:$0xf] }
  0x42   :  { %v294_v39 = vld [vmem:[%s19271_s8 + $0x1c0] sm:$0xf]  ;;  %v296_v40 = vld [vmem:[%s19271_s8 + $0x1d4] sm:$0xf]  ;;  %293 = vst [vmem:[#allocation2 + $0x1c4] sm:$0xf] %v292_v38 }
  0x43   :  { %295 = vst [vmem:[#allocation2 + $0x1c8] sm:$0xf] %v294_v39  ;;  %297 = vst [vmem:[#allocation2 + $0x1cc] sm:$0xf] %v296_v40  ;;  %v298_v41 = vld [vmem:[%s19271_s8 + $0x1c4] sm:$0xf] }
  0x44   :  { %v300_v42 = vld [vmem:[%s19271_s8 + $0x1d8] sm:$0xf]  ;;  %v302_v43 = vld [vmem:[%s19271_s8 + $0x1c8] sm:$0xf]  ;;  %299 = vst [vmem:[#allocation2 + $0x1d0] sm:$0xf] %v298_v41 }
  0x45   :  { %301 = vst [vmem:[#allocation2 + $0x1d4] sm:$0xf] %v300_v42  ;;  %303 = vst [vmem:[#allocation2 + $0x1d8] sm:$0xf] %v302_v43  ;;  %v308_v45 = vld [vmem:[%s19271_s8 + $0x1f4] sm:$0xf] }
  0x46   :  { %v310_v46 = vld [vmem:[%s19271_s8 + $0x1e4] sm:$0xf]  ;;  %305 = vst [vmem:[#allocation2 + $0x1dc] sm:$0xff] %v304_v44   ;;  %309 = vst [vmem:[#allocation2 + $0x1e4] sm:$0xf] %v308_v45  ;;  %v344_v62 = vld [vmem:[%s19271_s8 + $0x22c] sm:$0xff]  }
  0x47   :  { %311 = vst [vmem:[#allocation2 + $0x1e8] sm:$0xf] %v310_v46  ;;  %v312_v47 = vld [vmem:[%s19271_s8 + $0x1f8] sm:$0xf]  ;;  %v314_v48 = vld [vmem:[%s19271_s8 + $0x1e8] sm:$0xf] }
  0x48   :  { %v316_v49 = vld [vmem:[%s19271_s8 + $0x1fc] sm:$0xf]  ;;  %313 = vst [vmem:[#allocation2 + $0x1ec] sm:$0xf] %v312_v47  ;;  %315 = vst [vmem:[#allocation2 + $0x1f0] sm:$0xf] %v314_v48 }
  0x49   :  { %317 = vst [vmem:[#allocation2 + $0x1f4] sm:$0xf] %v316_v49  ;;  %v318_v50 = vld [vmem:[%s19271_s8 + $0x1ec] sm:$0xf]  ;;  %v320_v51 = vld [vmem:[%s19271_s8 + $0x200] sm:$0xf] }
  0x4a   :  { %v322_v52 = vld [vmem:[%s19271_s8 + $0x1f0] sm:$0xf]  ;;  %319 = vst [vmem:[#allocation2 + $0x1f8] sm:$0xf] %v318_v50  ;;  %321 = vst [vmem:[#allocation2 + $0x1fc] sm:$0xf] %v320_v51 }
  0x4b   :  { %323 = vst [vmem:[#allocation2 + $0x200] sm:$0xf] %v322_v52  ;;  %v328_v54 = vld [vmem:[%s19271_s8 + $0x21c] sm:$0xf]  ;;  %v330_v55 = vld [vmem:[%s19271_s8 + $0x20c] sm:$0xf] }
  0x4c   :  { %325 = vst [vmem:[#allocation2 + $0x204] sm:$0xff] %v324_v53   ;;  %329 = vst [vmem:[#allocation2 + $0x20c] sm:$0xf] %v328_v54  ;;  %v332_v56 = vld [vmem:[%s19271_s8 + $0x220] sm:$0xf]  ;;  %v364_v7 = vld [vmem:[%s19271_s8 + $0x254] sm:$0xff]  }
  0x4d   :  { %331 = vst [vmem:[#allocation2 + $0x210] sm:$0xf] %v330_v55  ;;  %v334_v57 = vld [vmem:[%s19271_s8 + $0x210] sm:$0xf]  ;;  %v336_v58 = vld [vmem:[%s19271_s8 + $0x224] sm:$0xf] }
  0x4e   :  { %333 = vst [vmem:[#allocation2 + $0x214] sm:$0xf] %v332_v56  ;;  %335 = vst [vmem:[#allocation2 + $0x218] sm:$0xf] %v334_v57  ;;  %v338_v59 = vld [vmem:[%s19271_s8 + $0x214] sm:$0xf] }
  0x4f   :  { %337 = vst [vmem:[#allocation2 + $0x21c] sm:$0xf] %v336_v58  ;;  %v340_v60 = vld [vmem:[%s19271_s8 + $0x228] sm:$0xf]  ;;  %v342_v61 = vld [vmem:[%s19271_s8 + $0x218] sm:$0xf] }
  0x50   :  { %339 = vst [vmem:[#allocation2 + $0x220] sm:$0xf] %v338_v59  ;;  %341 = vst [vmem:[#allocation2 + $0x224] sm:$0xf] %v340_v60  ;;  %v348_v63 = vld [vmem:[%s19271_s8 + $0x244] sm:$0xf] }
  0x51   :  { %343 = vst [vmem:[#allocation2 + $0x228] sm:$0xf] %v342_v61  ;;  %v350_v0 = vld [vmem:[%s19271_s8 + $0x234] sm:$0xf]  ;;  %345 = vst [vmem:[#allocation2 + $0x22c] sm:$0xff] %v344_v62   ;;  %v384_v16 = vld [vmem:[%s19271_s8 + $0x27c] sm:$0xff]  }
  0x52   :  { %349 = vst [vmem:[#allocation2 + $0x234] sm:$0xf] %v348_v63  ;;  %351 = vst [vmem:[#allocation2 + $0x238] sm:$0xf] %v350_v0  ;;  %v352_v1 = vld [vmem:[%s19271_s8 + $0x248] sm:$0xf] }
  0x53   :  { %v354_v2 = vld [vmem:[%s19271_s8 + $0x238] sm:$0xf]  ;;  %v356_v3 = vld [vmem:[%s19271_s8 + $0x24c] sm:$0xf]  ;;  %353 = vst [vmem:[#allocation2 + $0x23c] sm:$0xf] %v352_v1 }
  0x54   :  { %355 = vst [vmem:[#allocation2 + $0x240] sm:$0xf] %v354_v2  ;;  %357 = vst [vmem:[#allocation2 + $0x244] sm:$0xf] %v356_v3  ;;  %v358_v4 = vld [vmem:[%s19271_s8 + $0x23c] sm:$0xf] }
  0x55   :  { %v360_v5 = vld [vmem:[%s19271_s8 + $0x250] sm:$0xf]  ;;  %v362_v6 = vld [vmem:[%s19271_s8 + $0x240] sm:$0xf]  ;;  %359 = vst [vmem:[#allocation2 + $0x248] sm:$0xf] %v358_v4 }
  0x56   :  { %361 = vst [vmem:[#allocation2 + $0x24c] sm:$0xf] %v360_v5  ;;  %363 = vst [vmem:[#allocation2 + $0x250] sm:$0xf] %v362_v6  ;;  %v368_v8 = vld [vmem:[%s19271_s8 + $0x26c] sm:$0xf] }
  0x57   :  { %v370_v9 = vld [vmem:[%s19271_s8 + $0x25c] sm:$0xf]  ;;  %365 = vst [vmem:[#allocation2 + $0x254] sm:$0xff] %v364_v7   ;;  %369 = vst [vmem:[#allocation2 + $0x25c] sm:$0xf] %v368_v8  ;;  %v404_v25 = vld [vmem:[%s19271_s8 + $0x2a4] sm:$0xff]  }
  0x58   :  { %371 = vst [vmem:[#allocation2 + $0x260] sm:$0xf] %v370_v9  ;;  %v372_v10 = vld [vmem:[%s19271_s8 + $0x270] sm:$0xf]  ;;  %v374_v11 = vld [vmem:[%s19271_s8 + $0x260] sm:$0xf] }
  0x59   :  { %v376_v12 = vld [vmem:[%s19271_s8 + $0x274] sm:$0xf]  ;;  %373 = vst [vmem:[#allocation2 + $0x264] sm:$0xf] %v372_v10  ;;  %375 = vst [vmem:[#allocation2 + $0x268] sm:$0xf] %v374_v11 }
  0x5a   :  { %377 = vst [vmem:[#allocation2 + $0x26c] sm:$0xf] %v376_v12  ;;  %v378_v13 = vld [vmem:[%s19271_s8 + $0x264] sm:$0xf]  ;;  %v380_v14 = vld [vmem:[%s19271_s8 + $0x278] sm:$0xf] }
  0x5b   :  { %v382_v15 = vld [vmem:[%s19271_s8 + $0x268] sm:$0xf]  ;;  %379 = vst [vmem:[#allocation2 + $0x270] sm:$0xf] %v378_v13  ;;  %381 = vst [vmem:[#allocation2 + $0x274] sm:$0xf] %v380_v14 }
  0x5c   :  { %383 = vst [vmem:[#allocation2 + $0x278] sm:$0xf] %v382_v15  ;;  %v388_v17 = vld [vmem:[%s19271_s8 + $0x294] sm:$0xf]  ;;  %v390_v18 = vld [vmem:[%s19271_s8 + $0x284] sm:$0xf] }
  0x5d   :  { %385 = vst [vmem:[#allocation2 + $0x27c] sm:$0xff] %v384_v16   ;;  %389 = vst [vmem:[#allocation2 + $0x284] sm:$0xf] %v388_v17  ;;  %v392_v19 = vld [vmem:[%s19271_s8 + $0x298] sm:$0xf]  ;;  %v424_v34 = vld [vmem:[%s19271_s8 + $0x2cc] sm:$0xff]  }
  0x5e   :  { %391 = vst [vmem:[#allocation2 + $0x288] sm:$0xf] %v390_v18  ;;  %v394_v20 = vld [vmem:[%s19271_s8 + $0x288] sm:$0xf]  ;;  %v396_v21 = vld [vmem:[%s19271_s8 + $0x29c] sm:$0xf] }
  0x5f   :  { %393 = vst [vmem:[#allocation2 + $0x28c] sm:$0xf] %v392_v19  ;;  %395 = vst [vmem:[#allocation2 + $0x290] sm:$0xf] %v394_v20  ;;  %v398_v22 = vld [vmem:[%s19271_s8 + $0x28c] sm:$0xf] }
  0x60   :  { %397 = vst [vmem:[#allocation2 + $0x294] sm:$0xf] %v396_v21  ;;  %v400_v23 = vld [vmem:[%s19271_s8 + $0x2a0] sm:$0xf]  ;;  %v402_v24 = vld [vmem:[%s19271_s8 + $0x290] sm:$0xf] }
  0x61   :  { %399 = vst [vmem:[#allocation2 + $0x298] sm:$0xf] %v398_v22  ;;  %401 = vst [vmem:[#allocation2 + $0x29c] sm:$0xf] %v400_v23  ;;  %v408_v26 = vld [vmem:[%s19271_s8 + $0x2bc] sm:$0xf] }
  0x62   :  { %403 = vst [vmem:[#allocation2 + $0x2a0] sm:$0xf] %v402_v24  ;;  %v410_v27 = vld [vmem:[%s19271_s8 + $0x2ac] sm:$0xf]  ;;  %405 = vst [vmem:[#allocation2 + $0x2a4] sm:$0xff] %v404_v25   ;;  %v444_v43 = vld [vmem:[%s19271_s8 + $0x2f4] sm:$0xff]  }
  0x63   :  { %409 = vst [vmem:[#allocation2 + $0x2ac] sm:$0xf] %v408_v26  ;;  %411 = vst [vmem:[#allocation2 + $0x2b0] sm:$0xf] %v410_v27  ;;  %v412_v28 = vld [vmem:[%s19271_s8 + $0x2c0] sm:$0xf] }
  0x64   :  { %v414_v29 = vld [vmem:[%s19271_s8 + $0x2b0] sm:$0xf]  ;;  %v416_v30 = vld [vmem:[%s19271_s8 + $0x2c4] sm:$0xf]  ;;  %413 = vst [vmem:[#allocation2 + $0x2b4] sm:$0xf] %v412_v28 }
  0x65   :  { %415 = vst [vmem:[#allocation2 + $0x2b8] sm:$0xf] %v414_v29  ;;  %417 = vst [vmem:[#allocation2 + $0x2bc] sm:$0xf] %v416_v30  ;;  %v418_v31 = vld [vmem:[%s19271_s8 + $0x2b4] sm:$0xf] }
  0x66   :  { %v420_v32 = vld [vmem:[%s19271_s8 + $0x2c8] sm:$0xf]  ;;  %v422_v33 = vld [vmem:[%s19271_s8 + $0x2b8] sm:$0xf]  ;;  %419 = vst [vmem:[#allocation2 + $0x2c0] sm:$0xf] %v418_v31 }
  0x67   :  { %421 = vst [vmem:[#allocation2 + $0x2c4] sm:$0xf] %v420_v32  ;;  %423 = vst [vmem:[#allocation2 + $0x2c8] sm:$0xf] %v422_v33  ;;  %v428_v35 = vld [vmem:[%s19271_s8 + $0x2e4] sm:$0xf] }
  0x68   :  { %v430_v36 = vld [vmem:[%s19271_s8 + $0x2d4] sm:$0xf]  ;;  %425 = vst [vmem:[#allocation2 + $0x2cc] sm:$0xff] %v424_v34   ;;  %429 = vst [vmem:[#allocation2 + $0x2d4] sm:$0xf] %v428_v35  ;;  %v464_v52 = vld [vmem:[%s19271_s8 + $0x31c] sm:$0xff]  }
  0x69   :  { %431 = vst [vmem:[#allocation2 + $0x2d8] sm:$0xf] %v430_v36  ;;  %v432_v37 = vld [vmem:[%s19271_s8 + $0x2e8] sm:$0xf]  ;;  %v434_v38 = vld [vmem:[%s19271_s8 + $0x2d8] sm:$0xf] }
  0x6a   :  { %v436_v39 = vld [vmem:[%s19271_s8 + $0x2ec] sm:$0xf]  ;;  %433 = vst [vmem:[#allocation2 + $0x2dc] sm:$0xf] %v432_v37  ;;  %435 = vst [vmem:[#allocation2 + $0x2e0] sm:$0xf] %v434_v38 }
  0x6b   :  { %437 = vst [vmem:[#allocation2 + $0x2e4] sm:$0xf] %v436_v39  ;;  %v438_v40 = vld [vmem:[%s19271_s8 + $0x2dc] sm:$0xf]  ;;  %v440_v41 = vld [vmem:[%s19271_s8 + $0x2f0] sm:$0xf] }
  0x6c   :  { %v442_v42 = vld [vmem:[%s19271_s8 + $0x2e0] sm:$0xf]  ;;  %439 = vst [vmem:[#allocation2 + $0x2e8] sm:$0xf] %v438_v40  ;;  %441 = vst [vmem:[#allocation2 + $0x2ec] sm:$0xf] %v440_v41 }
  0x6d   :  { %443 = vst [vmem:[#allocation2 + $0x2f0] sm:$0xf] %v442_v42  ;;  %v448_v44 = vld [vmem:[%s19271_s8 + $0x30c] sm:$0xf]  ;;  %v450_v45 = vld [vmem:[%s19271_s8 + $0x2fc] sm:$0xf] }
  0x6e   :  { %445 = vst [vmem:[#allocation2 + $0x2f4] sm:$0xff] %v444_v43   ;;  %449 = vst [vmem:[#allocation2 + $0x2fc] sm:$0xf] %v448_v44  ;;  %v452_v46 = vld [vmem:[%s19271_s8 + $0x310] sm:$0xf]  ;;  %v484_v61 = vld [vmem:[%s19271_s8 + $0x344] sm:$0xff]  }
  0x6f   :  { %451 = vst [vmem:[#allocation2 + $0x300] sm:$0xf] %v450_v45  ;;  %v454_v47 = vld [vmem:[%s19271_s8 + $0x300] sm:$0xf]  ;;  %v456_v48 = vld [vmem:[%s19271_s8 + $0x314] sm:$0xf] }
  0x70   :  { %453 = vst [vmem:[#allocation2 + $0x304] sm:$0xf] %v452_v46  ;;  %455 = vst [vmem:[#allocation2 + $0x308] sm:$0xf] %v454_v47  ;;  %v458_v49 = vld [vmem:[%s19271_s8 + $0x304] sm:$0xf] }
  0x71   :  { %457 = vst [vmem:[#allocation2 + $0x30c] sm:$0xf] %v456_v48  ;;  %v460_v50 = vld [vmem:[%s19271_s8 + $0x318] sm:$0xf]  ;;  %v462_v51 = vld [vmem:[%s19271_s8 + $0x308] sm:$0xf] }
  0x72   :  { %459 = vst [vmem:[#allocation2 + $0x310] sm:$0xf] %v458_v49  ;;  %461 = vst [vmem:[#allocation2 + $0x314] sm:$0xf] %v460_v50  ;;  %v468_v53 = vld [vmem:[%s19271_s8 + $0x334] sm:$0xf] }
  0x73   :  { %463 = vst [vmem:[#allocation2 + $0x318] sm:$0xf] %v462_v51  ;;  %v470_v54 = vld [vmem:[%s19271_s8 + $0x324] sm:$0xf]  ;;  %465 = vst [vmem:[#allocation2 + $0x31c] sm:$0xff] %v464_v52   ;;  %v504_v6 = vld [vmem:[%s19271_s8 + $0x36c] sm:$0xff]  }
  0x74   :  { %469 = vst [vmem:[#allocation2 + $0x324] sm:$0xf] %v468_v53  ;;  %471 = vst [vmem:[#allocation2 + $0x328] sm:$0xf] %v470_v54  ;;  %v472_v55 = vld [vmem:[%s19271_s8 + $0x338] sm:$0xf] }
  0x75   :  { %v474_v56 = vld [vmem:[%s19271_s8 + $0x328] sm:$0xf]  ;;  %v476_v57 = vld [vmem:[%s19271_s8 + $0x33c] sm:$0xf]  ;;  %473 = vst [vmem:[#allocation2 + $0x32c] sm:$0xf] %v472_v55 }
  0x76   :  { %475 = vst [vmem:[#allocation2 + $0x330] sm:$0xf] %v474_v56  ;;  %477 = vst [vmem:[#allocation2 + $0x334] sm:$0xf] %v476_v57  ;;  %v478_v58 = vld [vmem:[%s19271_s8 + $0x32c] sm:$0xf] }
  0x77   :  { %v480_v59 = vld [vmem:[%s19271_s8 + $0x340] sm:$0xf]  ;;  %v482_v60 = vld [vmem:[%s19271_s8 + $0x330] sm:$0xf]  ;;  %479 = vst [vmem:[#allocation2 + $0x338] sm:$0xf] %v478_v58 }
  0x78   :  { %481 = vst [vmem:[#allocation2 + $0x33c] sm:$0xf] %v480_v59  ;;  %483 = vst [vmem:[#allocation2 + $0x340] sm:$0xf] %v482_v60  ;;  %v488_v62 = vld [vmem:[%s19271_s8 + $0x35c] sm:$0xf] }
  0x79   :  { %v490_v63 = vld [vmem:[%s19271_s8 + $0x34c] sm:$0xf]  ;;  %485 = vst [vmem:[#allocation2 + $0x344] sm:$0xff] %v484_v61   ;;  %489 = vst [vmem:[#allocation2 + $0x34c] sm:$0xf] %v488_v62  ;;  %v524_v15 = vld [vmem:[%s19271_s8 + $0x394] sm:$0xff]  }
  0x7a   :  { %491 = vst [vmem:[#allocation2 + $0x350] sm:$0xf] %v490_v63  ;;  %v492_v0 = vld [vmem:[%s19271_s8 + $0x360] sm:$0xf]  ;;  %v494_v1 = vld [vmem:[%s19271_s8 + $0x350] sm:$0xf] }
  0x7b   :  { %v496_v2 = vld [vmem:[%s19271_s8 + $0x364] sm:$0xf]  ;;  %493 = vst [vmem:[#allocation2 + $0x354] sm:$0xf] %v492_v0  ;;  %495 = vst [vmem:[#allocation2 + $0x358] sm:$0xf] %v494_v1 }
  0x7c   :  { %497 = vst [vmem:[#allocation2 + $0x35c] sm:$0xf] %v496_v2  ;;  %v498_v3 = vld [vmem:[%s19271_s8 + $0x354] sm:$0xf]  ;;  %v500_v4 = vld [vmem:[%s19271_s8 + $0x368] sm:$0xf] }
  0x7d   :  { %v502_v5 = vld [vmem:[%s19271_s8 + $0x358] sm:$0xf]  ;;  %499 = vst [vmem:[#allocation2 + $0x360] sm:$0xf] %v498_v3  ;;  %501 = vst [vmem:[#allocation2 + $0x364] sm:$0xf] %v500_v4 }
  0x7e   :  { %503 = vst [vmem:[#allocation2 + $0x368] sm:$0xf] %v502_v5  ;;  %v508_v7 = vld [vmem:[%s19271_s8 + $0x384] sm:$0xf]  ;;  %v510_v8 = vld [vmem:[%s19271_s8 + $0x374] sm:$0xf] }
  0x7f   :  { %505 = vst [vmem:[#allocation2 + $0x36c] sm:$0xff] %v504_v6   ;;  %509 = vst [vmem:[#allocation2 + $0x374] sm:$0xf] %v508_v7  ;;  %v512_v9 = vld [vmem:[%s19271_s8 + $0x388] sm:$0xf]  ;;  %v544_v24 = vld [vmem:[%s19271_s8 + $0x3bc] sm:$0xff]  }
  0x80   :  { %511 = vst [vmem:[#allocation2 + $0x378] sm:$0xf] %v510_v8  ;;  %v514_v10 = vld [vmem:[%s19271_s8 + $0x378] sm:$0xf]  ;;  %v516_v11 = vld [vmem:[%s19271_s8 + $0x38c] sm:$0xf] }
  0x81   :  { %513 = vst [vmem:[#allocation2 + $0x37c] sm:$0xf] %v512_v9  ;;  %515 = vst [vmem:[#allocation2 + $0x380] sm:$0xf] %v514_v10  ;;  %v518_v12 = vld [vmem:[%s19271_s8 + $0x37c] sm:$0xf] }
  0x82   :  { %517 = vst [vmem:[#allocation2 + $0x384] sm:$0xf] %v516_v11  ;;  %v520_v13 = vld [vmem:[%s19271_s8 + $0x390] sm:$0xf]  ;;  %v522_v14 = vld [vmem:[%s19271_s8 + $0x380] sm:$0xf] }
  0x83   :  { %519 = vst [vmem:[#allocation2 + $0x388] sm:$0xf] %v518_v12  ;;  %521 = vst [vmem:[#allocation2 + $0x38c] sm:$0xf] %v520_v13  ;;  %v528_v16 = vld [vmem:[%s19271_s8 + $0x3ac] sm:$0xf] }
  0x84   :  { %523 = vst [vmem:[#allocation2 + $0x390] sm:$0xf] %v522_v14  ;;  %v530_v17 = vld [vmem:[%s19271_s8 + $0x39c] sm:$0xf]  ;;  %525 = vst [vmem:[#allocation2 + $0x394] sm:$0xff] %v524_v15   ;;  %v564_v33 = vld [vmem:[%s19271_s8 + $0x3e4] sm:$0xff]  }
  0x85   :  { %529 = vst [vmem:[#allocation2 + $0x39c] sm:$0xf] %v528_v16  ;;  %531 = vst [vmem:[#allocation2 + $0x3a0] sm:$0xf] %v530_v17  ;;  %v532_v18 = vld [vmem:[%s19271_s8 + $0x3b0] sm:$0xf] }
  0x86   :  { %v534_v19 = vld [vmem:[%s19271_s8 + $0x3a0] sm:$0xf]  ;;  %v536_v20 = vld [vmem:[%s19271_s8 + $0x3b4] sm:$0xf]  ;;  %533 = vst [vmem:[#allocation2 + $0x3a4] sm:$0xf] %v532_v18 }
  0x87   :  { %535 = vst [vmem:[#allocation2 + $0x3a8] sm:$0xf] %v534_v19  ;;  %537 = vst [vmem:[#allocation2 + $0x3ac] sm:$0xf] %v536_v20  ;;  %v538_v21 = vld [vmem:[%s19271_s8 + $0x3a4] sm:$0xf] }
  0x88   :  { %v540_v22 = vld [vmem:[%s19271_s8 + $0x3b8] sm:$0xf]  ;;  %v542_v23 = vld [vmem:[%s19271_s8 + $0x3a8] sm:$0xf]  ;;  %539 = vst [vmem:[#allocation2 + $0x3b0] sm:$0xf] %v538_v21 }
  0x89   :  { %541 = vst [vmem:[#allocation2 + $0x3b4] sm:$0xf] %v540_v22  ;;  %543 = vst [vmem:[#allocation2 + $0x3b8] sm:$0xf] %v542_v23  ;;  %v548_v25 = vld [vmem:[%s19271_s8 + $0x3d4] sm:$0xf] }
  0x8a   :  { %v550_v26 = vld [vmem:[%s19271_s8 + $0x3c4] sm:$0xf]  ;;  %545 = vst [vmem:[#allocation2 + $0x3bc] sm:$0xff] %v544_v24   ;;  %549 = vst [vmem:[#allocation2 + $0x3c4] sm:$0xf] %v548_v25  ;;  %v584_v42 = vld [vmem:[%s19271_s8 + $0x40c] sm:$0xff]  }
  0x8b   :  { %551 = vst [vmem:[#allocation2 + $0x3c8] sm:$0xf] %v550_v26  ;;  %v552_v27 = vld [vmem:[%s19271_s8 + $0x3d8] sm:$0xf]  ;;  %v554_v28 = vld [vmem:[%s19271_s8 + $0x3c8] sm:$0xf] }
  0x8c   :  { %v556_v29 = vld [vmem:[%s19271_s8 + $0x3dc] sm:$0xf]  ;;  %553 = vst [vmem:[#allocation2 + $0x3cc] sm:$0xf] %v552_v27  ;;  %555 = vst [vmem:[#allocation2 + $0x3d0] sm:$0xf] %v554_v28 }
  0x8d   :  { %557 = vst [vmem:[#allocation2 + $0x3d4] sm:$0xf] %v556_v29  ;;  %v558_v30 = vld [vmem:[%s19271_s8 + $0x3cc] sm:$0xf]  ;;  %v560_v31 = vld [vmem:[%s19271_s8 + $0x3e0] sm:$0xf] }
  0x8e   :  { %v562_v32 = vld [vmem:[%s19271_s8 + $0x3d0] sm:$0xf]  ;;  %559 = vst [vmem:[#allocation2 + $0x3d8] sm:$0xf] %v558_v30  ;;  %561 = vst [vmem:[#allocation2 + $0x3dc] sm:$0xf] %v560_v31 }
  0x8f   :  { %563 = vst [vmem:[#allocation2 + $0x3e0] sm:$0xf] %v562_v32  ;;  %v568_v34 = vld [vmem:[%s19271_s8 + $0x3fc] sm:$0xf]  ;;  %v570_v35 = vld [vmem:[%s19271_s8 + $0x3ec] sm:$0xf] }
  0x90   :  { %565 = vst [vmem:[#allocation2 + $0x3e4] sm:$0xff] %v564_v33   ;;  %569 = vst [vmem:[#allocation2 + $0x3ec] sm:$0xf] %v568_v34  ;;  %v572_v36 = vld [vmem:[%s19271_s8 + $0x400] sm:$0xf]  ;;  %v604_v51 = vld [vmem:[%s19271_s8 + $0x434] sm:$0xff]  }
  0x91   :  { %571 = vst [vmem:[#allocation2 + $0x3f0] sm:$0xf] %v570_v35  ;;  %v574_v37 = vld [vmem:[%s19271_s8 + $0x3f0] sm:$0xf]  ;;  %v576_v38 = vld [vmem:[%s19271_s8 + $0x404] sm:$0xf] }
  0x92   :  { %573 = vst [vmem:[#allocation2 + $0x3f4] sm:$0xf] %v572_v36  ;;  %575 = vst [vmem:[#allocation2 + $0x3f8] sm:$0xf] %v574_v37  ;;  %v578_v39 = vld [vmem:[%s19271_s8 + $0x3f4] sm:$0xf] }
  0x93   :  { %577 = vst [vmem:[#allocation2 + $0x3fc] sm:$0xf] %v576_v38  ;;  %v580_v40 = vld [vmem:[%s19271_s8 + $0x408] sm:$0xf]  ;;  %v582_v41 = vld [vmem:[%s19271_s8 + $0x3f8] sm:$0xf] }
  0x94   :  { %579 = vst [vmem:[#allocation2 + $0x400] sm:$0xf] %v578_v39  ;;  %581 = vst [vmem:[#allocation2 + $0x404] sm:$0xf] %v580_v40  ;;  %v588_v43 = vld [vmem:[%s19271_s8 + $0x424] sm:$0xf] }
  0x95   :  { %583 = vst [vmem:[#allocation2 + $0x408] sm:$0xf] %v582_v41  ;;  %v590_v44 = vld [vmem:[%s19271_s8 + $0x414] sm:$0xf]  ;;  %585 = vst [vmem:[#allocation2 + $0x40c] sm:$0xff] %v584_v42   ;;  %v624_v60 = vld [vmem:[%s19271_s8 + $0x45c] sm:$0xff]  }
  0x96   :  { %589 = vst [vmem:[#allocation2 + $0x414] sm:$0xf] %v588_v43  ;;  %591 = vst [vmem:[#allocation2 + $0x418] sm:$0xf] %v590_v44  ;;  %v592_v45 = vld [vmem:[%s19271_s8 + $0x428] sm:$0xf] }
  0x97   :  { %v594_v46 = vld [vmem:[%s19271_s8 + $0x418] sm:$0xf]  ;;  %v596_v47 = vld [vmem:[%s19271_s8 + $0x42c] sm:$0xf]  ;;  %593 = vst [vmem:[#allocation2 + $0x41c] sm:$0xf] %v592_v45 }
  0x98   :  { %595 = vst [vmem:[#allocation2 + $0x420] sm:$0xf] %v594_v46  ;;  %597 = vst [vmem:[#allocation2 + $0x424] sm:$0xf] %v596_v47  ;;  %v598_v48 = vld [vmem:[%s19271_s8 + $0x41c] sm:$0xf] }
  0x99   :  { %v600_v49 = vld [vmem:[%s19271_s8 + $0x430] sm:$0xf]  ;;  %v602_v50 = vld [vmem:[%s19271_s8 + $0x420] sm:$0xf]  ;;  %599 = vst [vmem:[#allocation2 + $0x428] sm:$0xf] %v598_v48 }
  0x9a   :  { %601 = vst [vmem:[#allocation2 + $0x42c] sm:$0xf] %v600_v49  ;;  %603 = vst [vmem:[#allocation2 + $0x430] sm:$0xf] %v602_v50  ;;  %v608_v52 = vld [vmem:[%s19271_s8 + $0x44c] sm:$0xf] }
  0x9b   :  { %v610_v53 = vld [vmem:[%s19271_s8 + $0x43c] sm:$0xf]  ;;  %605 = vst [vmem:[#allocation2 + $0x434] sm:$0xff] %v604_v51   ;;  %609 = vst [vmem:[#allocation2 + $0x43c] sm:$0xf] %v608_v52  ;;  %v644_v5 = vld [vmem:[%s19271_s8 + $0x484] sm:$0xff]  }
  0x9c   :  { %611 = vst [vmem:[#allocation2 + $0x440] sm:$0xf] %v610_v53  ;;  %v612_v54 = vld [vmem:[%s19271_s8 + $0x450] sm:$0xf]  ;;  %v614_v55 = vld [vmem:[%s19271_s8 + $0x440] sm:$0xf] }
  0x9d   :  { %v616_v56 = vld [vmem:[%s19271_s8 + $0x454] sm:$0xf]  ;;  %613 = vst [vmem:[#allocation2 + $0x444] sm:$0xf] %v612_v54  ;;  %615 = vst [vmem:[#allocation2 + $0x448] sm:$0xf] %v614_v55 }
  0x9e   :  { %617 = vst [vmem:[#allocation2 + $0x44c] sm:$0xf] %v616_v56  ;;  %v618_v57 = vld [vmem:[%s19271_s8 + $0x444] sm:$0xf]  ;;  %v620_v58 = vld [vmem:[%s19271_s8 + $0x458] sm:$0xf] }
  0x9f   :  { %v622_v59 = vld [vmem:[%s19271_s8 + $0x448] sm:$0xf]  ;;  %619 = vst [vmem:[#allocation2 + $0x450] sm:$0xf] %v618_v57  ;;  %621 = vst [vmem:[#allocation2 + $0x454] sm:$0xf] %v620_v58 }
  0xa0   :  { %623 = vst [vmem:[#allocation2 + $0x458] sm:$0xf] %v622_v59  ;;  %v628_v61 = vld [vmem:[%s19271_s8 + $0x474] sm:$0xf]  ;;  %v630_v62 = vld [vmem:[%s19271_s8 + $0x464] sm:$0xf] }
  0xa1   :  { %625 = vst [vmem:[#allocation2 + $0x45c] sm:$0xff] %v624_v60   ;;  %629 = vst [vmem:[#allocation2 + $0x464] sm:$0xf] %v628_v61  ;;  %v632_v63 = vld [vmem:[%s19271_s8 + $0x478] sm:$0xf]  ;;  %v664_v14 = vld [vmem:[%s19271_s8 + $0x4ac] sm:$0xff]  }
  0xa2   :  { %631 = vst [vmem:[#allocation2 + $0x468] sm:$0xf] %v630_v62  ;;  %v634_v0 = vld [vmem:[%s19271_s8 + $0x468] sm:$0xf]  ;;  %v636_v1 = vld [vmem:[%s19271_s8 + $0x47c] sm:$0xf] }
  0xa3   :  { %633 = vst [vmem:[#allocation2 + $0x46c] sm:$0xf] %v632_v63  ;;  %635 = vst [vmem:[#allocation2 + $0x470] sm:$0xf] %v634_v0  ;;  %v638_v2 = vld [vmem:[%s19271_s8 + $0x46c] sm:$0xf] }
  0xa4   :  { %637 = vst [vmem:[#allocation2 + $0x474] sm:$0xf] %v636_v1  ;;  %v640_v3 = vld [vmem:[%s19271_s8 + $0x480] sm:$0xf]  ;;  %v642_v4 = vld [vmem:[%s19271_s8 + $0x470] sm:$0xf] }
  0xa5   :  { %639 = vst [vmem:[#allocation2 + $0x478] sm:$0xf] %v638_v2  ;;  %641 = vst [vmem:[#allocation2 + $0x47c] sm:$0xf] %v640_v3  ;;  %v648_v6 = vld [vmem:[%s19271_s8 + $0x49c] sm:$0xf] }
  0xa6   :  { %643 = vst [vmem:[#allocation2 + $0x480] sm:$0xf] %v642_v4  ;;  %v650_v7 = vld [vmem:[%s19271_s8 + $0x48c] sm:$0xf]  ;;  %645 = vst [vmem:[#allocation2 + $0x484] sm:$0xff] %v644_v5   ;;  %v684_v23 = vld [vmem:[%s19271_s8 + $0x4d4] sm:$0xff]  }
  0xa7   :  { %649 = vst [vmem:[#allocation2 + $0x48c] sm:$0xf] %v648_v6  ;;  %651 = vst [vmem:[#allocation2 + $0x490] sm:$0xf] %v650_v7  ;;  %v652_v8 = vld [vmem:[%s19271_s8 + $0x4a0] sm:$0xf] }
  0xa8   :  { %v654_v9 = vld [vmem:[%s19271_s8 + $0x490] sm:$0xf]  ;;  %v656_v10 = vld [vmem:[%s19271_s8 + $0x4a4] sm:$0xf]  ;;  %653 = vst [vmem:[#allocation2 + $0x494] sm:$0xf] %v652_v8 }
  0xa9   :  { %655 = vst [vmem:[#allocation2 + $0x498] sm:$0xf] %v654_v9  ;;  %657 = vst [vmem:[#allocation2 + $0x49c] sm:$0xf] %v656_v10  ;;  %v658_v11 = vld [vmem:[%s19271_s8 + $0x494] sm:$0xf] }
  0xaa   :  { %v660_v12 = vld [vmem:[%s19271_s8 + $0x4a8] sm:$0xf]  ;;  %v662_v13 = vld [vmem:[%s19271_s8 + $0x498] sm:$0xf]  ;;  %659 = vst [vmem:[#allocation2 + $0x4a0] sm:$0xf] %v658_v11 }
  0xab   :  { %661 = vst [vmem:[#allocation2 + $0x4a4] sm:$0xf] %v660_v12  ;;  %663 = vst [vmem:[#allocation2 + $0x4a8] sm:$0xf] %v662_v13  ;;  %v668_v15 = vld [vmem:[%s19271_s8 + $0x4c4] sm:$0xf] }
  0xac   :  { %v670_v16 = vld [vmem:[%s19271_s8 + $0x4b4] sm:$0xf]  ;;  %665 = vst [vmem:[#allocation2 + $0x4ac] sm:$0xff] %v664_v14   ;;  %669 = vst [vmem:[#allocation2 + $0x4b4] sm:$0xf] %v668_v15 }
  0xad   :  { %671 = vst [vmem:[#allocation2 + $0x4b8] sm:$0xf] %v670_v16  ;;  %v672_v17 = vld [vmem:[%s19271_s8 + $0x4c8] sm:$0xf]  ;;  %v674_v18 = vld [vmem:[%s19271_s8 + $0x4b8] sm:$0xf] }
  0xae   :  { %v676_v19 = vld [vmem:[%s19271_s8 + $0x4cc] sm:$0xf]  ;;  %673 = vst [vmem:[#allocation2 + $0x4bc] sm:$0xf] %v672_v17  ;;  %675 = vst [vmem:[#allocation2 + $0x4c0] sm:$0xf] %v674_v18 }
  0xaf   :  { %677 = vst [vmem:[#allocation2 + $0x4c4] sm:$0xf] %v676_v19  ;;  %v678_v20 = vld [vmem:[%s19271_s8 + $0x4bc] sm:$0xf]  ;;  %v680_v21 = vld [vmem:[%s19271_s8 + $0x4d0] sm:$0xf] }
  0xb0   :  { %v682_v22 = vld [vmem:[%s19271_s8 + $0x4c0] sm:$0xf]  ;;  %679 = vst [vmem:[#allocation2 + $0x4c8] sm:$0xf] %v678_v20  ;;  %681 = vst [vmem:[#allocation2 + $0x4cc] sm:$0xf] %v680_v21 }
  0xb1   :  { %683 = vst [vmem:[#allocation2 + $0x4d0] sm:$0xf] %v682_v22  ;;  %v688_v24 = vld [vmem:[%s19271_s8 + $0x4ec] sm:$0xf]  ;;  %v690_v25 = vld [vmem:[%s19271_s8 + $0x4dc] sm:$0xf] }
  0xb2   :  { %685 = vst [vmem:[#allocation2 + $0x4d4] sm:$0xff] %v684_v23   ;;  %689 = vst [vmem:[#allocation2 + $0x4dc] sm:$0xf] %v688_v24  ;;  %v692_v26 = vld [vmem:[%s19271_s8 + $0x4f0] sm:$0xf] }
  0xb3   :  { %691 = vst [vmem:[#allocation2 + $0x4e0] sm:$0xf] %v690_v25  ;;  %v694_v27 = vld [vmem:[%s19271_s8 + $0x4e0] sm:$0xf]  ;;  %v696_v28 = vld [vmem:[%s19271_s8 + $0x4f4] sm:$0xf] }
  0xb4   :  { %693 = vst [vmem:[#allocation2 + $0x4e4] sm:$0xf] %v692_v26  ;;  %695 = vst [vmem:[#allocation2 + $0x4e8] sm:$0xf] %v694_v27  ;;  %v698_v29 = vld [vmem:[%s19271_s8 + $0x4e4] sm:$0xf] }
  0xb5   :  { %697 = vst [vmem:[#allocation2 + $0x4ec] sm:$0xf] %v696_v28  ;;  %v700_v30 = vld [vmem:[%s19271_s8 + $0x4f8] sm:$0xf]  ;;  %v702_v31 = vld [vmem:[%s19271_s8 + $0x4e8] sm:$0xf] }
  0xb6   :  { %699 = vst [vmem:[#allocation2 + $0x4f0] sm:$0xf] %v698_v29  ;;  %701 = vst [vmem:[#allocation2 + $0x4f4] sm:$0xf] %v700_v30  ;;  %v704_v32 = vld [vmem:[%s19271_s8 + $0x4fc] sm:$0xf] }
  0xb7   :  { %703 = vst [vmem:[#allocation2 + $0x4f8] sm:$0xf] %v702_v31  ;;  %705 = vst [vmem:[#allocation2 + $0x4fc] sm:$0xf] %v704_v32 }
  0xb8   :  { %1376 = vsyncadd [#allocation3], 20480  ;;  %v16287_v33 = vld [vmem:[%s19263_s0 + $0x40] sm:$0xff]   ;;  %v14794_v35 = vld [vmem:[%s19263_s0 + $0x48] sm:$0xff]   ;;  %vm1929_vm0 = vcmask 261120   ;;  %s15332_s8 = smov 1  }
  0xb9   :  { %v14793_v34 = vld [vmem:[%s19263_s0] sm:$0xff]   ;;  %12340 = vmatprep.subr.bf16.mxu0 %v16287_v33  ;;  %v14795_v36 = vld [vmem:[%s19263_s0 + $0x8] sm:$0xff]   ;;  %v16302_v37 = vld [vmem:[%s19263_s0 + $0x50] sm:$0xff]   ;;  %vm7400_vm1 = vcmask 523264   ;;  %vm15335_vm2 = vmmov 0   ;;  %vm9705_vm3 = vcmask 130048  }
  0xba   :  { %12341 = vmatpush3.bf16.msra.mxu0 %v14793_v34  ;;  %v16307_v38 = vld [vmem:[%s19263_s0 + $0x10] sm:$0xff]   ;;  %v16313_v39 = vld [vmem:[%s19263_s0 + $0x58] sm:$0xff]   ;;  %v16325_v41 = vld [vmem:[%s19263_s0 + $0x60] sm:$0xff]   ;;  %vm10665_vm4 = vcmask 1043456  }
  0xbb   :  { %12342 = vmatprep.subr.bf16.mxu0 %v14794_v35  ;;  %v16319_v40 = vld [vmem:[%s19263_s0 + $0x18] sm:$0xff]   ;;  %v16331_v42 = vld [vmem:[%s19263_s0 + $0x20] sm:$0xff]   ;;  %v16337_v43 = vld [vmem:[%s19263_s0 + $0x68] sm:$0xff]  }
  0xbc   :  { %v14810_v44 = vld [vmem:[%s19264_s1 + $0x4] ss:$8 sps:$4 sm:$0xff]   ;;  %v16352_v46 = vld [vmem:[%s19263_s0 + $0x70] sm:$0xff]   ;;  %v16364_v48 = vld [vmem:[%s19263_s0 + $0x78] sm:$0xff]  }
  0xbd   :  { %1633 = vmatprep.mubr.bf16.mxu0 %v14810_v44  ;;  %v16346_v45 = vld [vmem:[%s19263_s0 + $0x28] sm:$0xff]   ;;  %v16358_v47 = vld [vmem:[%s19263_s0 + $0x30] sm:$0xff]   ;;  %v16370_v49 = vld [vmem:[%s19263_s0 + $0x38] sm:$0xff]  }
  0xbe   :  { %12343 = vmatpush3.bf16.msra.mxu0 %v14795_v36  ;;  %v14808_v50 = vld [vmem:[%s19264_s1] ss:$8 sps:$4 sm:$0xff]   ;;  %v14811_v51 = vld [vmem:[%s19264_s1 + $0x14] ss:$8 sps:$4 sm:$0xff]   ;;  %v14813_v52 = vld [vmem:[%s19264_s1 + $0x10] ss:$8 sps:$4 sm:$0xff]  }
  0xbf   :  { %12344 = vmatprep.subr.bf16.mxu0 %v16302_v37  ;;  %v14814_v53 = vld [vmem:[%s19264_s1 + $0x24] ss:$8 sps:$4 sm:$0xff]   ;;  %v14816_v54 = vld [vmem:[%s19264_s1 + $0x20] ss:$8 sps:$4 sm:$0xff]   ;;  %v14817_v55 = vld [vmem:[%s19264_s1 + $0x34] ss:$8 sps:$4 sm:$0xff]  }
  0xc0   :  { %v14819_v56 = vld [vmem:[%s19264_s1 + $0x30] ss:$8 sps:$4 sm:$0xff]   ;;  %v14820_v57 = vld [vmem:[%s19264_s1 + $0x44] ss:$8 sps:$4 sm:$0xff]   ;;  %v14822_v58 = vld [vmem:[%s19264_s1 + $0x40] ss:$8 sps:$4 sm:$0xff]  }
  0xc1   :  { %v14823_v59 = vld [vmem:[%s19264_s1 + $0x54] ss:$8 sps:$4 sm:$0xff]   ;;  %v14825_v60 = vld [vmem:[%s19264_s1 + $0x50] ss:$8 sps:$4 sm:$0xff]   ;;  %v14826_v61 = vld [vmem:[%s19264_s1 + $0x64] ss:$8 sps:$4 sm:$0xff]  }
  0xc2   :  { %12345 = vmatpush3.bf16.msra.mxu0 %v16307_v38  ;;  %v14828_v62 = vld [vmem:[%s19264_s1 + $0x60] ss:$8 sps:$4 sm:$0xff]   ;;  %v14829_v63 = vld [vmem:[%s19264_s1 + $0x74] ss:$8 sps:$4 sm:$0xff]   ;;  %v14831_v0 = vld [vmem:[%s19264_s1 + $0x70] ss:$8 sps:$4 sm:$0xff]  }
  0xc3   :  { %12346 = vmatprep.subr.bf16.mxu0 %v16313_v39  ;;  %v14834_v1 = vld [vmem:[%s19264_s1 + $0x84] ss:$8 sps:$4 sm:$0xff]   ;;  %v14832_v2 = vld [vmem:[%s19264_s1 + $0x80] ss:$8 sps:$4 sm:$0xff]   ;;  %v14835_v3 = vld [vmem:[%s19264_s1 + $0x94] ss:$8 sps:$4 sm:$0xff]  }
  0xc4   :  { %v14837_v4 = vld [vmem:[%s19264_s1 + $0x90] ss:$8 sps:$4 sm:$0xff]   ;;  %v14838_v5 = vld [vmem:[%s19264_s1 + $0xa4] ss:$8 sps:$4 sm:$0xff]   ;;  %v14840_v6 = vld [vmem:[%s19264_s1 + $0xa0] ss:$8 sps:$4 sm:$0xff]  }
  0xc5   :  { %v14841_v7 = vld [vmem:[%s19264_s1 + $0xb4] ss:$8 sps:$4 sm:$0xff]   ;;  %v14843_v8 = vld [vmem:[%s19264_s1 + $0xb0] ss:$8 sps:$4 sm:$0xff]   ;;  %v14844_v9 = vld [vmem:[%s19264_s1 + $0xc4] ss:$8 sps:$4 sm:$0xff]  }
  0xc6   :  { %12347 = vmatpush3.bf16.msra.mxu0 %v16319_v40  ;;  %v14856_v10 = vld [vmem:[%s19269_s6] sm:$0xff]   ;;  %v14847_v12 = vld [vmem:[%s19264_s1 + $0xd4] ss:$8 sps:$4 sm:$0xff]   ;;  %v14857_v13 = vld [vmem:[%s19269_s6 + $0x8] sm:$0xff]  }
  0xc7   :  { %12348 = vmatprep.subr.bf16.mxu0 %v16325_v41  ;;  %v14846_v11 = vld [vmem:[%s19264_s1 + $0xc0] ss:$8 sps:$4 sm:$0xff]   ;;  %v14849_v14 = vld [vmem:[%s19264_s1 + $0xd0] ss:$8 sps:$4 sm:$0xff]   ;;  %v14850_v15 = vld [vmem:[%s19264_s1 + $0xe4] ss:$8 sps:$4 sm:$0xff]  }
  0xc8   :  { %v14852_v16 = vld [vmem:[%s19264_s1 + $0xe0] ss:$8 sps:$4 sm:$0xff]   ;;  %v14853_v17 = vld [vmem:[%s19264_s1 + $0xf4] ss:$8 sps:$4 sm:$0xff]   ;;  %v14855_v18 = vld [vmem:[%s19264_s1 + $0xf0] ss:$8 sps:$4 sm:$0xff]  }
  0xc9   :  { %v14858_v19 = vld [vmem:[%s19269_s6 + $0x10] sm:$0xff]   ;;  %v14859_v20 = vld [vmem:[%s19269_s6 + $0x18] sm:$0xff]   ;;  %v16499_v44 = vld [vmem:[%s19263_s0] sm:$0xff]  }
  0xca   :  { %12349 = vmatpush3.bf16.msra.mxu0 %v16331_v42  ;;  %13393 = vmatprep.subr.bf16.mxu1 %v14858_v19 }
  0xcb   :  { %12350 = vmatprep.subr.bf16.mxu0 %v16337_v43  ;;  %13394 = vmatpush3.bf16.msra.mxu1 %v14858_v19 }
  0xcc   :  { %13395 = vmatprep.subr.bf16.mxu1 %v14859_v20 }
  0xce   :  { %12351 = vmatpush3.bf16.msra.mxu0 %v16346_v45 }
  0xcf   :  { %12352 = vmatprep.subr.bf16.mxu0 %v16352_v46  ;;  %13396 = vmatpush3.bf16.msra.mxu1 %v14859_v20 }
  0xd0   :  { %14427 = vmatprep.subr.bf16.mxu1 %v16287_v33 }
  0xd2   :  { %12353 = vmatpush3.bf16.msra.mxu0 %v16358_v47 }
  0xd3   :  { %12354 = vmatprep.subr.bf16.mxu0 %v16364_v48 }
  0xd6   :  { %12355 = vmatpush3.bf16.msra.mxu0 %v16370_v49 }
  0xd7   :  { %12404 = vmatprep.subr.bf16.mxu0 %v16287_v33 }
  0xd9   :  { %1634 = vmatmul.mubr.bf16.vlgmr.msra.gmra.mrb[0].mxu0 %v14808_v50 }
  0xda   :  { %1641 = vmatprep.mubr.bf16.mxu0 %v14811_v51  ;;  %12405 = vmatpush3.bf16.msra.mxu0 %v14793_v34 }
  0xdb   :  { %12406 = vmatprep.subr.bf16.mxu0 %v14794_v35 }
  0xde   :  { %12407 = vmatpush3.bf16.msra.mxu0 %v14795_v36 }
  0xdf   :  { %12408 = vmatprep.subr.bf16.mxu0 %v16302_v37 }
  0xe1   :  { %1642 = vmatmul.mubr.bf16.gmra.mrb[4].mxu0 %v14813_v52  ;;  %v16505_v52 = vld [vmem:[%s19263_s0 + $0x48] sm:$0xff]  }
  0xe2   :  { %1649 = vmatprep.mubr.bf16.mxu0 %v14814_v53  ;;  %12409 = vmatpush3.bf16.msra.mxu0 %v16307_v38 }
  0xe3   :  { %12410 = vmatprep.subr.bf16.mxu0 %v16313_v39 }
  0xe6   :  { %12411 = vmatpush3.bf16.msra.mxu0 %v16319_v40 }
  0xe7   :  { %12412 = vmatprep.subr.bf16.mxu0 %v16325_v41 }
  0xe9   :  { %1650 = vmatmul.mubr.bf16.gmra.mrb[8].mxu0 %v14816_v54 }
  0xea   :  { %1657 = vmatprep.mubr.bf16.mxu0 %v14817_v55  ;;  %12413 = vmatpush3.bf16.msra.mxu0 %v16331_v42  ;;  %v16511_v55 = vld [vmem:[%s19263_s0 + $0x8] sm:$0xff]  }
  0xeb   :  { %12414 = vmatprep.subr.bf16.mxu0 %v16337_v43 }
  0xee   :  { %12415 = vmatpush3.bf16.msra.mxu0 %v16346_v45 }
  0xef   :  { %12416 = vmatprep.subr.bf16.mxu0 %v16352_v46 }
  0xf1   :  { %1658 = vmatmul.mubr.bf16.gmra.mrb[12].mxu0 %v14819_v56 }
  0xf2   :  { %1665 = vmatprep.mubr.bf16.mxu0 %v14820_v57  ;;  %12417 = vmatpush3.bf16.msra.mxu0 %v16358_v47 }
  0xf3   :  { %12418 = vmatprep.subr.bf16.mxu0 %v16364_v48 }
  0xf6   :  { %12419 = vmatpush3.bf16.msra.mxu0 %v16370_v49 }
  0xf7   :  { %13413 = vmatprep.subr.bf16.mxu0 %v14856_v10 }
  0xf9   :  { %1666 = vmatmul.mubr.bf16.gmra.mrb[16].mxu0 %v14822_v58 }
  0xfa   :  { %1673 = vmatprep.mubr.bf16.mxu0 %v14823_v59 }
 0x101   :  { %1674 = vmatmul.mubr.bf16.gmra.mrb[20].mxu0 %v14825_v60 }
 0x102   :  { %1681 = vmatprep.mubr.bf16.mxu0 %v14826_v61 }
 0x109   :  { %1682 = vmatmul.mubr.bf16.gmra.mrb[24].mxu0 %v14828_v62 }
 0x10a   :  { %1689 = vmatprep.mubr.bf16.mxu0 %v14829_v63 }
 0x111   :  { %1690 = vmatmul.mubr.bf16.gmra.mrb[28].mxu0 %v14831_v0 }
 0x112   :  { %1839 = vmatprep.mubr.bf16.mxu0 %v14834_v1 }
 0x119   :  { %1840 = vmatmul.mubr.bf16.vlgmr.msra.gmra.mrb[32].mxu0 %v14832_v2 }
 0x11a   :  { %1847 = vmatprep.mubr.bf16.mxu0 %v14835_v3  ;;  %13414 = vmatpush3.bf16.msra.mxu0 %v14856_v10 }
 0x11b   :  { %13415 = vmatprep.subr.bf16.mxu0 %v14857_v13 }
 0x11e   :  { %13416 = vmatpush3.bf16.msra.mxu0 %v14857_v13 }
 0x11f   :  { %12488 = vmatprep.subr.bf16.mxu0 %v16287_v33 }
 0x121   :  { %1848 = vmatmul.mubr.bf16.gmra.mrb[36].mxu0 %v14837_v4 }
 0x122   :  { %1855 = vmatprep.mubr.bf16.mxu0 %v14838_v5 }
 0x129   :  { %1856 = vmatmul.mubr.bf16.gmra.mrb[40].mxu0 %v14840_v6 }
 0x12a   :  { %1863 = vmatprep.mubr.bf16.mxu0 %v14841_v7 }
 0x131   :  { %1864 = vmatmul.mubr.bf16.gmra.mrb[44].mxu0 %v14843_v8 }
 0x132   :  { %1871 = vmatprep.mubr.bf16.mxu0 %v14844_v9 }
 0x139   :  { %1872 = vmatmul.mubr.bf16.gmra.mrb[48].mxu0 %v14846_v11 }
 0x13a   :  { %1879 = vmatprep.mubr.bf16.mxu0 %v14847_v12 }
 0x141   :  { %1880 = vmatmul.mubr.bf16.gmra.mrb[52].mxu0 %v14849_v14 }
 0x142   :  { %1887 = vmatprep.mubr.bf16.mxu0 %v14850_v15 }
 0x149   :  { %1888 = vmatmul.mubr.bf16.gmra.mrb[56].mxu0 %v14852_v16 }
 0x14a   :  { %1895 = vmatprep.mubr.bf16.mxu0 %v14853_v17 }
 0x151   :  { %1896 = vmatmul.mubr.bf16.gmra.mrb[60].mxu0 %v14855_v18 }
 0x1ac   :  { %v12356_v21 = vpop.f32.mrb[0].mxu0 }
 0x1ad   :  { %v12357_v22 = vpop.f32.mrb[1].mxu0 }
 0x1ae   :  { %v12358_v23 = vadd.f32 %v12357_v22, %v12356_v21  ;;  %v12359_v24 = vpop.f32.mrb[2].mxu0 }
 0x1af   :  { %v12360_v25 = vpop.f32.mrb[3].mxu0 }
 0x1b0   :  { %v12361_v26 = vadd.f32 %v12360_v25, %v12359_v24 }
 0x1b2   :  { %v1698_v27 = vpack.c.bf16 %v12361_v26, %v12358_v23  ;;  %v14860_v23 = vld [vmem:[%s19264_s1 + $0x100] ss:$8 sps:$4 sm:$0xff]  }
 0x1b4   :  { %v12362_v28 = vpop.f32.mrb[4].mxu0  ;;  %13417 = vmatprep.mubr.msk.bf16.mxu0 %vm1929_vm0, %v1698_v27 }
 0x1b5   :  { %v12363_v29 = vpop.f32.mrb[5].mxu0 }
 0x1b6   :  { %v12364_v30 = vadd.f32 %v12363_v29, %v12362_v28  ;;  %v12365_v31 = vpop.f32.mrb[6].mxu0 }
 0x1b7   :  { %v12366_v32 = vpop.f32.mrb[7].mxu0 }
 0x1b8   :  { %v12367_v34 = vadd.f32 %v12366_v32, %v12365_v31 }
 0x1ba   :  { %v1699_v35 = vpack.c.bf16 %v12367_v34, %v12364_v30 }
 0x1bc   :  { %v12368_v36 = vpop.f32.mrb[8].mxu0  ;;  %13418 = vmatmul.mubr.msk.bf16.vlgmr.msra.gmra.mrb[64].mxu0 %vm1929_vm0, %v1699_v35 }
 0x1bd   :  { %v12369_v33 = vpop.f32.mrb[9].mxu0  ;;  %12489 = vmatpush3.bf16.msra.mxu0 %v16499_v44 }
 0x1be   :  { %v12370_v50 = vadd.f32 %v12369_v33, %v12368_v36  ;;  %v12371_v51 = vpop.f32.mrb[10].mxu0  ;;  %12490 = vmatprep.subr.bf16.mxu0 %v16505_v52 }
 0x1bf   :  { %v12372_v53 = vpop.f32.mrb[11].mxu0 }
 0x1c0   :  { %v12373_v54 = vadd.f32 %v12372_v53, %v12371_v51  ;;  %v16546_v53 = vld [vmem:[%s19263_s0 + $0x50] sm:$0xff]  }
 0x1c1   :  { %12491 = vmatpush3.bf16.msra.mxu0 %v16511_v55 }
 0x1c2   :  { %v1700_v56 = vpack.c.bf16 %v12373_v54, %v12370_v50  ;;  %12492 = vmatprep.subr.bf16.mxu0 %v16302_v37 }
 0x1c4   :  { %v12374_v57 = vpop.f32.mrb[12].mxu0  ;;  %13421 = vmatprep.mubr.msk.bf16.mxu0 %vm1929_vm0, %v1700_v56 }
 0x1c5   :  { %v12375_v58 = vpop.f32.mrb[13].mxu0  ;;  %12493 = vmatpush3.bf16.msra.mxu0 %v16307_v38 }
 0x1c6   :  { %v12376_v59 = vadd.f32 %v12375_v58, %v12374_v57  ;;  %v12377_v60 = vpop.f32.mrb[14].mxu0  ;;  %12494 = vmatprep.subr.bf16.mxu0 %v16313_v39  ;;  %v16553_v57 = vld [vmem:[%s19263_s0 + $0x10] sm:$0xff]  }
 0x1c7   :  { %v12378_v61 = vpop.f32.mrb[15].mxu0 }
 0x1c8   :  { %v12379_v62 = vadd.f32 %v12378_v61, %v12377_v60  ;;  %v16559_v60 = vld [vmem:[%s19263_s0 + $0x58] sm:$0xff]  }
 0x1c9   :  { %12495 = vmatpush3.bf16.msra.mxu0 %v16319_v40 }
 0x1ca   :  { %v1701_v63 = vpack.c.bf16 %v12379_v62, %v12376_v59  ;;  %12496 = vmatprep.subr.bf16.mxu0 %v16325_v41 }
 0x1cc   :  { %v12380_v0 = vpop.f32.mrb[16].mxu0  ;;  %13422 = vmatmul.mubr.msk.bf16.gmra.mrb[68].mxu0 %vm1929_vm0, %v1701_v63  ;;  %v16565_v63 = vld [vmem:[%s19263_s0 + $0x18] sm:$0xff]  }
 0x1cd   :  { %v12381_v37 = vpop.f32.mrb[17].mxu0  ;;  %12497 = vmatpush3.bf16.msra.mxu0 %v16331_v42 }
 0x1ce   :  { %v12382_v1 = vadd.f32 %v12381_v37, %v12380_v0  ;;  %v12383_v2 = vpop.f32.mrb[18].mxu0  ;;  %12498 = vmatprep.subr.bf16.mxu0 %v16337_v43  ;;  %v16571_v37 = vld [vmem:[%s19263_s0 + $0x60] sm:$0xff]  }
 0x1cf   :  { %v12384_v38 = vpop.f32.mrb[19].mxu0 }
 0x1d0   :  { %v12385_v3 = vadd.f32 %v12384_v38, %v12383_v2  ;;  %v16578_v38 = vld [vmem:[%s19263_s0 + $0x20] sm:$0xff]  }
 0x1d1   :  { %12499 = vmatpush3.bf16.msra.mxu0 %v16346_v45 }
 0x1d2   :  { %v1702_v39 = vpack.c.bf16 %v12385_v3, %v12382_v1  ;;  %12500 = vmatprep.subr.bf16.mxu0 %v16352_v46 }
 0x1d4   :  { %v12386_v40 = vpop.f32.mrb[20].mxu0  ;;  %13425 = vmatprep.mubr.msk.bf16.mxu0 %vm1929_vm0, %v1702_v39 }
 0x1d5   :  { %v12387_v41 = vpop.f32.mrb[21].mxu0  ;;  %12501 = vmatpush3.bf16.msra.mxu0 %v16358_v47 }
 0x1d6   :  { %v12388_v4 = vadd.f32 %v12387_v41, %v12386_v40  ;;  %v12389_v5 = vpop.f32.mrb[22].mxu0  ;;  %12502 = vmatprep.subr.bf16.mxu0 %v16364_v48  ;;  %v16584_v40 = vld [vmem:[%s19263_s0 + $0x68] sm:$0xff]  }
 0x1d7   :  { %v12390_v42 = vpop.f32.mrb[23].mxu0 }
 0x1d8   :  { %v12391_v6 = vadd.f32 %v12390_v42, %v12389_v5  ;;  %v16590_v5 = vld [vmem:[%s19263_s0 + $0x28] sm:$0xff]  }
 0x1d9   :  { %12503 = vmatpush3.bf16.msra.mxu0 %v16370_v49  ;;  %v14862_v49 = vld [vmem:[%s19264_s1 + $0x104] ss:$8 sps:$4 sm:$0xff]  }
 0x1da   :  { %v1703_v43 = vpack.c.bf16 %v12391_v6, %v12388_v4  ;;  %v16596_v6 = vld [vmem:[%s19263_s0 + $0x70] sm:$0xff]  }
 0x1dc   :  { %v12392_v7 = vpop.f32.mrb[24].mxu0  ;;  %13426 = vmatmul.mubr.msk.bf16.gmra.mrb[72].mxu0 %vm1929_vm0, %v1703_v43 }
 0x1dd   :  { %v12393_v45 = vpop.f32.mrb[25].mxu0 }
 0x1de   :  { %v12394_v46 = vadd.f32 %v12393_v45, %v12392_v7  ;;  %v12395_v8 = vpop.f32.mrb[26].mxu0  ;;  %v16603_v45 = vld [vmem:[%s19263_s0 + $0x30] sm:$0xff]  }
 0x1df   :  { %v12396_v9 = vpop.f32.mrb[27].mxu0 }
 0x1e0   :  { %v12397_v10 = vadd.f32 %v12396_v9, %v12395_v8  ;;  %v16609_v9 = vld [vmem:[%s19263_s0 + $0x78] sm:$0xff]  }
 0x1e2   :  { %v1704_v11 = vpack.c.bf16 %v12397_v10, %v12394_v46 }
 0x1e4   :  { %v12398_v12 = vpop.f32.mrb[28].mxu0  ;;  %13429 = vmatprep.mubr.msk.bf16.mxu0 %vm1929_vm0, %v1704_v11 }
 0x1e5   :  { %v12399_v47 = vpop.f32.mrb[29].mxu0 }
 0x1e6   :  { %v12400_v13 = vadd.f32 %v12399_v47, %v12398_v12  ;;  %v12401_v48 = vpop.f32.mrb[30].mxu0  ;;  %v16615_v12 = vld [vmem:[%s19263_s0 + $0x38] sm:$0xff]  }
 0x1e7   :  { %v12402_v14 = vpop.f32.mrb[31].mxu0 }
 0x1e8   :  { %v12403_v15 = vadd.f32 %v12402_v14, %v12401_v48 }
 0x1ea   :  { %v1705_v16 = vpack.c.bf16 %v12403_v15, %v12400_v13  ;;  %v16621_v13 = vld [vmem:[%s19263_s0 + $0x40] sm:$0xff]  }
 0x1ec   :  { %v12420_v17 = vpop.f32.mrb[32].mxu0  ;;  %13430 = vmatmul.mubr.msk.bf16.gmra.mrb[76].mxu0 %vm1929_vm0, %v1705_v16 }
 0x1ed   :  { %v12421_v18 = vpop.f32.mrb[33].mxu0  ;;  %2313 = vmatprep.mubr.bf16.mxu0 %v14862_v49 }
 0x1ee   :  { %v12422_v19 = vadd.f32 %v12421_v18, %v12420_v17  ;;  %v12423_v20 = vpop.f32.mrb[34].mxu0 }
 0x1ef   :  { %v12424_v21 = vpop.f32.mrb[35].mxu0 }
 0x1f0   :  { %v12425_v22 = vadd.f32 %v12424_v21, %v12423_v20 }
 0x1f2   :  { %v1904_v24 = vpack.c.bf16 %v12425_v22, %v12422_v19 }
 0x1f4   :  { %v12426_v25 = vpop.f32.mrb[36].mxu0  ;;  %13397 = vmatprep.mubr.msk.bf16.mxu1 %vm1929_vm0, %v1904_v24  ;;  %2314 = vmatmul.mubr.bf16.vlgmr.msra.gmra.mrb[80].mxu0 %v14860_v23 }
 0x1f5   :  { %v12427_v26 = vpop.f32.mrb[37].mxu0 }
 0x1f6   :  { %v12428_v27 = vadd.f32 %v12427_v26, %v12426_v25  ;;  %v12429_v28 = vpop.f32.mrb[38].mxu0  ;;  %v14865_v25 = vld [vmem:[%s19264_s1 + $0x114] ss:$8 sps:$4 sm:$0xff]  }
 0x1f7   :  { %v12430_v29 = vpop.f32.mrb[39].mxu0 }
 0x1f8   :  { %v12431_v30 = vadd.f32 %v12430_v29, %v12429_v28  ;;  %v14866_v28 = vld [vmem:[%s19264_s1 + $0x124] ss:$8 sps:$4 sm:$0xff]   ;;  %v14868_v29 = vld [vmem:[%s19264_s1 + $0x120] ss:$8 sps:$4 sm:$0xff]  }
 0x1fa   :  { %v1905_v31 = vpack.c.bf16 %v12431_v30, %v12428_v27  ;;  %v14863_v27 = vld [vmem:[%s19264_s1 + $0x110] ss:$8 sps:$4 sm:$0xff]   ;;  %v14869_v30 = vld [vmem:[%s19264_s1 + $0x134] ss:$8 sps:$4 sm:$0xff]  }
 0x1fc   :  { %v12432_v32 = vpop.f32.mrb[40].mxu0  ;;  %13398 = vmatmul.mubr.msk.bf16.vlgmr.msra.gmra.mrb[0].mxu1 %vm1929_vm0, %v1905_v31  ;;  %v14871_v31 = vld [vmem:[%s19264_s1 + $0x130] ss:$8 sps:$4 sm:$0xff]  }
 0x1fd   :  { %v12433_v34 = vpop.f32.mrb[41].mxu0  ;;  %14435 = vmatpush3.bf16.msra.mxu1 %v16499_v44 }
 0x1fe   :  { %v12434_v35 = vadd.f32 %v12433_v34, %v12432_v32  ;;  %v12435_v36 = vpop.f32.mrb[42].mxu0  ;;  %14428 = vmatprep.subr.bf16.mxu1 %v16505_v52  ;;  %v14872_v32 = vld [vmem:[%s19264_s1 + $0x144] ss:$8 sps:$4 sm:$0xff]   ;;  %v14874_v34 = vld [vmem:[%s19264_s1 + $0x140] ss:$8 sps:$4 sm:$0xff]  }
 0x1ff   :  { %v12436_v33 = vpop.f32.mrb[43].mxu0 }
 0x200   :  { %v12437_v50 = vadd.f32 %v12436_v33, %v12435_v36  ;;  %v14877_v36 = vld [vmem:[%s19264_s1 + $0x150] ss:$8 sps:$4 sm:$0xff]   ;;  %v14878_v33 = vld [vmem:[%s19264_s1 + $0x164] ss:$8 sps:$4 sm:$0xff]  }
 0x201   :  { %14436 = vmatpush3.bf16.msra.mxu1 %v16511_v55 }
 0x202   :  { %v1906_v51 = vpack.c.bf16 %v12437_v50, %v12434_v35  ;;  %14429 = vmatprep.subr.bf16.mxu1 %v16546_v53  ;;  %v14875_v35 = vld [vmem:[%s19264_s1 + $0x154] ss:$8 sps:$4 sm:$0xff]   ;;  %v14880_v50 = vld [vmem:[%s19264_s1 + $0x160] ss:$8 sps:$4 sm:$0xff]  }
 0x204   :  { %v12438_v54 = vpop.f32.mrb[44].mxu0  ;;  %13401 = vmatprep.mubr.msk.bf16.mxu1 %vm1929_vm0, %v1906_v51  ;;  %v14881_v51 = vld [vmem:[%s19264_s1 + $0x174] ss:$8 sps:$4 sm:$0xff]  }
 0x205   :  { %v12439_v56 = vpop.f32.mrb[45].mxu0  ;;  %14437 = vmatpush3.bf16.msra.mxu1 %v16553_v57 }
 0x206   :  { %v12440_v58 = vadd.f32 %v12439_v56, %v12438_v54  ;;  %v12441_v59 = vpop.f32.mrb[46].mxu0  ;;  %14430 = vmatprep.subr.bf16.mxu1 %v16559_v60  ;;  %v14883_v54 = vld [vmem:[%s19264_s1 + $0x170] ss:$8 sps:$4 sm:$0xff]   ;;  %v14886_v56 = vld [vmem:[%s19264_s1 + $0x184] ss:$8 sps:$4 sm:$0xff]  }
 0x207   :  { %v12442_v61 = vpop.f32.mrb[47].mxu0 }
 0x208   :  { %v12443_v62 = vadd.f32 %v12442_v61, %v12441_v59  ;;  %v14887_v59 = vld [vmem:[%s19264_s1 + $0x194] ss:$8 sps:$4 sm:$0xff]   ;;  %v14889_v61 = vld [vmem:[%s19264_s1 + $0x190] ss:$8 sps:$4 sm:$0xff]  }
 0x209   :  { %14438 = vmatpush3.bf16.msra.mxu1 %v16565_v63 }
 0x20a   :  { %v1907_v0 = vpack.c.bf16 %v12443_v62, %v12440_v58  ;;  %14431 = vmatprep.subr.bf16.mxu1 %v16571_v37  ;;  %v14884_v58 = vld [vmem:[%s19264_s1 + $0x180] ss:$8 sps:$4 sm:$0xff]   ;;  %v14890_v62 = vld [vmem:[%s19264_s1 + $0x1a4] ss:$8 sps:$4 sm:$0xff]  }
 0x20c   :  { %v12444_v1 = vpop.f32.mrb[48].mxu0  ;;  %13402 = vmatmul.mubr.msk.bf16.gmra.mrb[4].mxu1 %vm1929_vm0, %v1907_v0  ;;  %v14892_v0 = vld [vmem:[%s19264_s1 + $0x1a0] ss:$8 sps:$4 sm:$0xff]  }
 0x20d   :  { %v12445_v2 = vpop.f32.mrb[49].mxu0  ;;  %14439 = vmatpush3.bf16.msra.mxu1 %v16578_v38 }
 0x20e   :  { %v12446_v3 = vadd.f32 %v12445_v2, %v12444_v1  ;;  %v12447_v39 = vpop.f32.mrb[50].mxu0  ;;  %14432 = vmatprep.subr.bf16.mxu1 %v16584_v40  ;;  %v14893_v1 = vld [vmem:[%s19264_s1 + $0x1b4] ss:$8 sps:$4 sm:$0xff]   ;;  %v14895_v2 = vld [vmem:[%s19264_s1 + $0x1b0] ss:$8 sps:$4 sm:$0xff]  }
 0x20f   :  { %v12448_v41 = vpop.f32.mrb[51].mxu0 }
 0x210   :  { %v12449_v4 = vadd.f32 %v12448_v41, %v12447_v39  ;;  %v14908_v39 = vld [vmem:[%s19269_s6 + $0x20] sm:$0xff]  }
 0x211   :  { %14440 = vmatpush3.bf16.msra.mxu1 %v16590_v5  ;;  %13433 = vmatprep.subr.bf16.mxu0 %v14908_v39  ;;  %v14898_v41 = vld [vmem:[%s19264_s1 + $0x1c0] ss:$8 sps:$4 sm:$0xff]  }
 0x212   :  { %v1908_v42 = vpack.c.bf16 %v12449_v4, %v12446_v3  ;;  %14433 = vmatprep.subr.bf16.mxu1 %v16596_v6  ;;  %v14896_v3 = vld [vmem:[%s19264_s1 + $0x1c4] ss:$8 sps:$4 sm:$0xff]   ;;  %13434 = vmatpush3.bf16.msra.mxu0 %v14908_v39  ;;  %v14899_v4 = vld [vmem:[%s19264_s1 + $0x1d4] ss:$8 sps:$4 sm:$0xff]  }
 0x214   :  { %v12450_v43 = vpop.f32.mrb[52].mxu0  ;;  %13405 = vmatprep.mubr.msk.bf16.mxu1 %vm1929_vm0, %v1908_v42  ;;  %v14909_v42 = vld [vmem:[%s19269_s6 + $0x28] sm:$0xff]  }
 0x215   :  { %v12451_v7 = vpop.f32.mrb[53].mxu0  ;;  %14441 = vmatpush3.bf16.msra.mxu1 %v16603_v45  ;;  %13435 = vmatprep.subr.bf16.mxu0 %v14909_v42 }
 0x216   :  { %v12452_v46 = vadd.f32 %v12451_v7, %v12450_v43  ;;  %v12453_v8 = vpop.f32.mrb[54].mxu0  ;;  %14434 = vmatprep.subr.bf16.mxu1 %v16609_v9  ;;  %13436 = vmatpush3.bf16.msra.mxu0 %v14909_v42  ;;  %v14901_v43 = vld [vmem:[%s19264_s1 + $0x1d0] ss:$8 sps:$4 sm:$0xff]   ;;  %v14902_v7 = vld [vmem:[%s19264_s1 + $0x1e4] ss:$8 sps:$4 sm:$0xff]  }
 0x217   :  { %v12454_v10 = vpop.f32.mrb[55].mxu0 }
 0x218   :  { %v12455_v11 = vadd.f32 %v12454_v10, %v12453_v8  ;;  %v14905_v8 = vld [vmem:[%s19264_s1 + $0x1f4] ss:$8 sps:$4 sm:$0xff]   ;;  %v14907_v10 = vld [vmem:[%s19264_s1 + $0x1f0] ss:$8 sps:$4 sm:$0xff]  }
 0x219   :  { %14442 = vmatpush3.bf16.msra.mxu1 %v16615_v12 }
 0x21a   :  { %v1909_v47 = vpack.c.bf16 %v12455_v11, %v12452_v46  ;;  %12562 = vmatprep.subr.bf16.mxu1 %v16621_v13  ;;  %v14904_v46 = vld [vmem:[%s19264_s1 + $0x1e0] ss:$8 sps:$4 sm:$0xff]   ;;  %v16758_v11 = vld [vmem:[%s19269_s6 + $0x30] sm:$0xff]  }
 0x21b   :  { %13453 = vmatprep.subr.bf16.mxu0 %v16758_v11 }
 0x21c   :  { %v12456_v48 = vpop.f32.mrb[56].mxu0  ;;  %13406 = vmatmul.mubr.msk.bf16.gmra.mrb[8].mxu1 %vm1929_vm0, %v1909_v47 }
 0x21d   :  { %v12457_v14 = vpop.f32.mrb[57].mxu0 }
 0x21e   :  { %v12458_v15 = vadd.f32 %v12457_v14, %v12456_v48  ;;  %v12459_v49 = vpop.f32.mrb[58].mxu0 }
 0x21f   :  { %v12460_v16 = vpop.f32.mrb[59].mxu0 }
 0x220   :  { %v12461_v17 = vadd.f32 %v12460_v16, %v12459_v49 }
 0x222   :  { %v1910_v18 = vpack.c.bf16 %v12461_v17, %v12458_v15 }
 0x224   :  { %v12462_v19 = vpop.f32.mrb[60].mxu0  ;;  %13409 = vmatprep.mubr.msk.bf16.mxu1 %vm1929_vm0, %v1910_v18 }
 0x225   :  { %v12463_v20 = vpop.f32.mrb[61].mxu0 }
 0x226   :  { %v12464_v21 = vadd.f32 %v12463_v20, %v12462_v19  ;;  %v12465_v22 = vpop.f32.mrb[62].mxu0 }
 0x227   :  { %v12466_v23 = vpop.f32.mrb[63].mxu0 }
 0x228   :  { %v12467_v24 = vadd.f32 %v12466_v23, %v12465_v22 }
 0x22a   :  { %v1911_v26 = vpack.c.bf16 %v12467_v24, %v12464_v21 }
 0x22c   :  { %13410 = vmatmul.mubr.msk.bf16.gmra.mrb[12].mxu1 %vm1929_vm0, %v1911_v26 }
 0x22d   :  { %2321 = vmatprep.mubr.bf16.mxu1 %v14865_v25  ;;  %v14914_v25 = vld [vmem:[%s19264_s1 + $0x284] ss:$8 sps:$4 sm:$0xff]  }
 0x234   :  { %2322 = vmatmul.mubr.bf16.vlgmr.msra.gmra.mrb[16].mxu1 %v14863_v27  ;;  %v14912_v27 = vld [vmem:[%s19264_s1 + $0x280] ss:$8 sps:$4 sm:$0xff]  }
 0x235   :  { %2329 = vmatprep.mubr.bf16.mxu1 %v14866_v28  ;;  %12563 = vmatpush3.bf16.msra.mxu1 %v16499_v44  ;;  %v14915_v28 = vld [vmem:[%s19264_s1 + $0x294] ss:$8 sps:$4 sm:$0xff]  }
 0x236   :  { %12564 = vmatprep.subr.bf16.mxu1 %v16505_v52 }
 0x239   :  { %12565 = vmatpush3.bf16.msra.mxu1 %v16511_v55 }
 0x23a   :  { %12566 = vmatprep.subr.bf16.mxu1 %v16546_v53 }
 0x23c   :  { %2330 = vmatmul.mubr.bf16.gmra.mrb[20].mxu1 %v14868_v29  ;;  %v14917_v29 = vld [vmem:[%s19264_s1 + $0x290] ss:$8 sps:$4 sm:$0xff]  }
 0x23d   :  { %2337 = vmatprep.mubr.bf16.mxu1 %v14869_v30  ;;  %12567 = vmatpush3.bf16.msra.mxu1 %v16553_v57 }
 0x23e   :  { %12568 = vmatprep.subr.bf16.mxu1 %v16559_v60 }
 0x241   :  { %12569 = vmatpush3.bf16.msra.mxu1 %v16565_v63 }
 0x242   :  { %12570 = vmatprep.subr.bf16.mxu1 %v16571_v37 }
 0x244   :  { %2338 = vmatmul.mubr.bf16.gmra.mrb[24].mxu1 %v14871_v31 }
 0x245   :  { %2345 = vmatprep.mubr.bf16.mxu1 %v14872_v32  ;;  %12571 = vmatpush3.bf16.msra.mxu1 %v16578_v38 }
 0x246   :  { %12572 = vmatprep.subr.bf16.mxu1 %v16584_v40 }
 0x249   :  { %12573 = vmatpush3.bf16.msra.mxu1 %v16590_v5 }
 0x24a   :  { %12574 = vmatprep.subr.bf16.mxu1 %v16596_v6 }
 0x24c   :  { %2346 = vmatmul.mubr.bf16.gmra.mrb[28].mxu1 %v14874_v34  ;;  %v14918_v34 = vld [vmem:[%s19264_s1 + $0x2a4] ss:$8 sps:$4 sm:$0xff]  }
 0x24d   :  { %2353 = vmatprep.mubr.bf16.mxu1 %v14875_v35  ;;  %12575 = vmatpush3.bf16.msra.mxu1 %v16603_v45 }
 0x24e   :  { %12576 = vmatprep.subr.bf16.mxu1 %v16609_v9 }
 0x251   :  { %12577 = vmatpush3.bf16.msra.mxu1 %v16615_v12 }
 0x252   :  { %12710 = vmatprep.subr.bf16.mxu1 %v16621_v13 }
 0x254   :  { %2354 = vmatmul.mubr.bf16.gmra.mrb[32].mxu1 %v14877_v36  ;;  %v14920_v36 = vld [vmem:[%s19264_s1 + $0x2a0] ss:$8 sps:$4 sm:$0xff]  }
 0x255   :  { %2361 = vmatprep.mubr.bf16.mxu1 %v14878_v33  ;;  %v14921_v33 = vld [vmem:[%s19264_s1 + $0x2b4] ss:$8 sps:$4 sm:$0xff]  }
 0x25c   :  { %2362 = vmatmul.mubr.bf16.gmra.mrb[36].mxu1 %v14880_v50  ;;  %v14923_v50 = vld [vmem:[%s19264_s1 + $0x2b0] ss:$8 sps:$4 sm:$0xff]  }
 0x25d   :  { %2369 = vmatprep.mubr.bf16.mxu1 %v14881_v51 }
 0x264   :  { %2370 = vmatmul.mubr.bf16.gmra.mrb[40].mxu1 %v14883_v54  ;;  %v14924_v54 = vld [vmem:[%s19264_s1 + $0x2c4] ss:$8 sps:$4 sm:$0xff]  }
 0x265   :  { %2669 = vmatprep.mubr.bf16.mxu1 %v14886_v56 }
 0x26c   :  { %2670 = vmatmul.mubr.bf16.vlgmr.msra.gmra.mrb[44].mxu1 %v14884_v58  ;;  %v14926_v58 = vld [vmem:[%s19264_s1 + $0x2c0] ss:$8 sps:$4 sm:$0xff]  }
 0x26d   :  { %2677 = vmatprep.mubr.bf16.mxu1 %v14887_v59  ;;  %12711 = vmatpush3.bf16.msra.mxu1 %v16499_v44 }
 0x26e   :  { %12712 = vmatprep.subr.bf16.mxu1 %v16505_v52 }
 0x271   :  { %12713 = vmatpush3.bf16.msra.mxu1 %v16511_v55 }
 0x272   :  { %12714 = vmatprep.subr.bf16.mxu1 %v16546_v53 }
 0x274   :  { %2678 = vmatmul.mubr.bf16.gmra.mrb[48].mxu1 %v14889_v61 }
 0x275   :  { %2685 = vmatprep.mubr.bf16.mxu1 %v14890_v62  ;;  %12715 = vmatpush3.bf16.msra.mxu1 %v16553_v57 }
 0x276   :  { %12716 = vmatprep.subr.bf16.mxu1 %v16559_v60 }
 0x279   :  { %12717 = vmatpush3.bf16.msra.mxu1 %v16565_v63 }
 0x27a   :  { %12718 = vmatprep.subr.bf16.mxu1 %v16571_v37 }
 0x27c   :  { %2686 = vmatmul.mubr.bf16.gmra.mrb[52].mxu1 %v14892_v0  ;;  %v14930_v0 = vld [vmem:[%s19264_s1 + $0x2d4] ss:$8 sps:$4 sm:$0xff]  }
 0x27d   :  { %2693 = vmatprep.mubr.bf16.mxu1 %v14893_v1  ;;  %12719 = vmatpush3.bf16.msra.mxu1 %v16578_v38 }
 0x27e   :  { %12720 = vmatprep.subr.bf16.mxu1 %v16584_v40 }
 0x281   :  { %12721 = vmatpush3.bf16.msra.mxu1 %v16590_v5 }
 0x282   :  { %12722 = vmatprep.subr.bf16.mxu1 %v16596_v6 }
 0x284   :  { %2694 = vmatmul.mubr.bf16.gmra.mrb[56].mxu1 %v14895_v2  ;;  %v14932_v2 = vld [vmem:[%s19264_s1 + $0x2d0] ss:$8 sps:$4 sm:$0xff]  }
 0x285   :  { %2701 = vmatprep.mubr.bf16.mxu1 %v14896_v3  ;;  %12723 = vmatpush3.bf16.msra.mxu1 %v16603_v45 }
 0x286   :  { %12724 = vmatprep.subr.bf16.mxu1 %v16609_v9 }
 0x289   :  { %12725 = vmatpush3.bf16.msra.mxu1 %v16615_v12 }
 0x28a   :  { %12784 = vmatprep.subr.bf16.mxu1 %v16621_v13 }
 0x28c   :  { %2702 = vmatmul.mubr.bf16.gmra.mrb[60].mxu1 %v14898_v41 }
 0x28d   :  { %2709 = vmatprep.mubr.bf16.mxu1 %v14899_v4 }
 0x294   :  { %2710 = vmatmul.mubr.bf16.gmra.mrb[64].mxu1 %v14901_v43  ;;  %v14911_v43 = vld [vmem:[%s19269_s6 + $0x38] sm:$0xff]  }
 0x295   :  { %2717 = vmatprep.mubr.bf16.mxu1 %v14902_v7 }
 0x29c   :  { %2718 = vmatmul.mubr.bf16.gmra.mrb[68].mxu1 %v14904_v46  ;;  %v14936_v46 = vld [vmem:[%s19264_s1 + $0x2e4] ss:$8 sps:$4 sm:$0xff]  }
 0x29d   :  { %2725 = vmatprep.mubr.bf16.mxu1 %v14905_v8 }
 0x2a4   :  { %2726 = vmatmul.mubr.bf16.gmra.mrb[72].mxu1 %v14907_v10  ;;  %v14938_v10 = vld [vmem:[%s19264_s1 + $0x2e0] ss:$8 sps:$4 sm:$0xff]  }
 0x2a5   :  { %3381 = vmatprep.mubr.bf16.mxu1 %v14914_v25  ;;  %v14944_v25 = vld [vmem:[%s19264_s1 + $0x2f0] ss:$8 sps:$4 sm:$0xff]  }
 0x2ac   :  { %3382 = vmatmul.mubr.bf16.vlgmr.msra.gmra.mrb[76].mxu1 %v14912_v27 }
 0x2ad   :  { %12785 = vmatpush3.bf16.msra.mxu1 %v16499_v44  ;;  %3389 = vmatprep.mubr.bf16.mxu1 %v14915_v28 }
 0x2ae   :  { %12786 = vmatprep.subr.bf16.mxu1 %v16505_v52 }
 0x2b1   :  { %12787 = vmatpush3.bf16.msra.mxu1 %v16511_v55 }
 0x2b2   :  { %12788 = vmatprep.subr.bf16.mxu1 %v16546_v53 }
 0x2b4   :  { %3390 = vmatmul.mubr.bf16.gmra.mrb[80].mxu1 %v14917_v29 }
 0x2b5   :  { %12789 = vmatpush3.bf16.msra.mxu1 %v16553_v57  ;;  %3397 = vmatprep.mubr.bf16.mxu1 %v14918_v34 }
 0x2b6   :  { %12790 = vmatprep.subr.bf16.mxu1 %v16559_v60 }
 0x2b9   :  { %12791 = vmatpush3.bf16.msra.mxu1 %v16565_v63 }
 0x2ba   :  { %12792 = vmatprep.subr.bf16.mxu1 %v16571_v37 }
 0x2bc   :  { %3398 = vmatmul.mubr.bf16.gmra.mrb[84].mxu1 %v14920_v36 }
 0x2bd   :  { %12793 = vmatpush3.bf16.msra.mxu1 %v16578_v38  ;;  %3405 = vmatprep.mubr.bf16.mxu1 %v14921_v33  ;;  %v14950_v33 = vld [vmem:[%s19264_s1 + $0x304] ss:$8 sps:$4 sm:$0xff]  }
 0x2be   :  { %12794 = vmatprep.subr.bf16.mxu1 %v16584_v40 }
 0x2c1   :  { %12795 = vmatpush3.bf16.msra.mxu1 %v16590_v5 }
 0x2c2   :  { %12796 = vmatprep.subr.bf16.mxu1 %v16596_v6 }
 0x2c4   :  { %3406 = vmatmul.mubr.bf16.gmra.mrb[88].mxu1 %v14923_v50 }
 0x2c5   :  { %12797 = vmatpush3.bf16.msra.mxu1 %v16603_v45  ;;  %3413 = vmatprep.mubr.bf16.mxu1 %v14924_v54  ;;  %v14948_v54 = vld [vmem:[%s19264_s1 + $0x300] ss:$8 sps:$4 sm:$0xff]  }
 0x2c6   :  { %12798 = vmatprep.subr.bf16.mxu1 %v16609_v9 }
 0x2c7   :  { %v12504_v47 = vpop.f32.mrb[80].mxu0 }
 0x2c8   :  { %v12505_v48 = vpop.f32.mrb[81].mxu0 }
 0x2c9   :  { %v12506_v14 = vadd.f32 %v12505_v48, %v12504_v47  ;;  %v12507_v15 = vpop.f32.mrb[82].mxu0  ;;  %12799 = vmatpush3.bf16.msra.mxu1 %v16615_v12 }
 0x2ca   :  { %v12508_v49 = vpop.f32.mrb[83].mxu0  ;;  %12858 = vmatprep.subr.bf16.mxu1 %v16621_v13 }
 0x2cb   :  { %v12509_v16 = vadd.f32 %v12508_v49, %v12507_v15 }
 0x2cc   :  { %3414 = vmatmul.mubr.bf16.gmra.mrb[92].mxu1 %v14926_v58 }
 0x2cd   :  { %v2378_v17 = vpack.c.bf16 %v12509_v16, %v12506_v14  ;;  %3421 = vmatprep.mubr.bf16.mxu1 %v14930_v0 }
 0x2cf   :  { %v16761_v18 = vpop.f32.mrb[0].mxu1  ;;  %13437 = vmatprep.mubr.msk.bf16.mxu0 %vm1929_vm0, %v2378_v17 }
 0x2d0   :  { %19283 = vst [vmem:[#allocation6_spill] sm:$0xff] %v16761_v18  ;;  %v16764_v19 = vpop.f32.mrb[1].mxu1 }
 0x2d1   :  { %19284 = vst [vmem:[#allocation7_spill] sm:$0xff] %v16764_v19  ;;  %v16766_v20 = vpop.f32.mrb[2].mxu1 }
 0x2d2   :  { %19285 = vst [vmem:[#allocation8_spill] sm:$0xff] %v16766_v20  ;;  %v16768_v21 = vpop.f32.mrb[3].mxu1 }
 0x2d3   :  { %19286 = vst [vmem:[#allocation9_spill] sm:$0xff] %v16768_v21 }
 0x2d4   :  { %3422 = vmatmul.mubr.bf16.gmra.mrb[96].mxu1 %v14932_v2 }
 0x2d5   :  { %3429 = vmatprep.mubr.bf16.mxu1 %v14936_v46 }
 0x2dc   :  { %3430 = vmatmul.mubr.bf16.gmra.mrb[100].mxu1 %v14938_v10 }
 0x2df   :  { %v16770_v22 = vpop.f32.mrb[4].mxu1 }
 0x2e0   :  { %19287 = vst [vmem:[#allocation10_spill] sm:$0xff] %v16770_v22  ;;  %v16772_v23 = vpop.f32.mrb[5].mxu1 }
 0x2e1   :  { %19288 = vst [vmem:[#allocation11_spill] sm:$0xff] %v16772_v23  ;;  %v16774_v24 = vpop.f32.mrb[6].mxu1 }
 0x2e2   :  { %19289 = vst [vmem:[#allocation12_spill] sm:$0xff] %v16774_v24  ;;  %v16779_v26 = vpop.f32.mrb[7].mxu1 }
 0x2e3   :  { %19290 = vst [vmem:[#allocation13_spill] sm:$0xff] %v16779_v26 }
 0x2ef   :  { %v16796_v30 = vpop.f32.mrb[8].mxu1 }
 0x2f0   :  { %19291 = vst [vmem:[#allocation14_spill] sm:$0xff] %v16796_v30  ;;  %v16798_v31 = vpop.f32.mrb[9].mxu1 }
 0x2f1   :  { %19292 = vst [vmem:[#allocation15_spill] sm:$0xff] %v16798_v31  ;;  %v16800_v32 = vpop.f32.mrb[10].mxu1 }
 0x2f2   :  { %19293 = vst [vmem:[#allocation16_spill] sm:$0xff] %v16800_v32  ;;  %v16806_v35 = vpop.f32.mrb[11].mxu1 }
 0x2f3   :  { %19294 = vst [vmem:[#allocation17_spill] sm:$0xff] %v16806_v35 }
 0x2ff   :  { %v16824_v51 = vpop.f32.mrb[12].mxu1 }
 0x300   :  { %19295 = vst [vmem:[#allocation18_spill] sm:$0xff] %v16824_v51  ;;  %v16829_v56 = vpop.f32.mrb[13].mxu1 }
 0x301   :  { %19296 = vst [vmem:[#allocation19_spill] sm:$0xff] %v16829_v56  ;;  %v16834_v59 = vpop.f32.mrb[14].mxu1 }
 0x302   :  { %19297 = vst [vmem:[#allocation20_spill] sm:$0xff] %v16834_v59  ;;  %v16837_v61 = vpop.f32.mrb[15].mxu1 }
 0x303   :  { %19298 = vst [vmem:[#allocation21_spill] sm:$0xff] %v16837_v61 }
 0x307   :  { %v12510_v62 = vpop.f32.mrb[16].mxu1 }
 0x308   :  { %v12511_v1 = vpop.f32.mrb[17].mxu1 }
 0x309   :  { %v12512_v3 = vadd.f32 %v12511_v1, %v12510_v62  ;;  %v12513_v39 = vpop.f32.mrb[18].mxu1 }
 0x30a   :  { %v12514_v41 = vpop.f32.mrb[19].mxu1 }
 0x30b   :  { %v12515_v4 = vadd.f32 %v12514_v41, %v12513_v39  ;;  %v14954_v39 = vld [vmem:[%s19264_s1 + $0x314] ss:$8 sps:$4 sm:$0xff]  }
 0x30d   :  { %v2379_v42 = vpack.c.bf16 %v12515_v4, %v12512_v3  ;;  %v14956_v4 = vld [vmem:[%s19264_s1 + $0x310] ss:$8 sps:$4 sm:$0xff]  }
 0x30f   :  { %v12516_v7 = vpop.f32.mrb[20].mxu1  ;;  %13438 = vmatmul.mubr.msk.bf16.vlgmr.msra.gmra.mrb[64].mxu0 %vm1929_vm0, %v2379_v42 }
 0x310   :  { %v12517_v8 = vpop.f32.mrb[21].mxu1  ;;  %13454 = vmatpush3.bf16.msra.mxu0 %v16758_v11  ;;  %v14942_v11 = vld [vmem:[%s19264_s1 + $0x2f4] ss:$8 sps:$4 sm:$0xff]  }
 0x311   :  { %v12518_v47 = vadd.f32 %v12517_v8, %v12516_v7  ;;  %v12519_v48 = vpop.f32.mrb[22].mxu1  ;;  %13455 = vmatprep.subr.bf16.mxu0 %v14911_v43  ;;  %3437 = vmatprep.mubr.bf16.mxu1 %v14942_v11 }
 0x312   :  { %v12520_v14 = vpop.f32.mrb[23].mxu1  ;;  %3438 = vmatmul.mubr.bf16.gmra.mrb[104].mxu1 %v14944_v25 }
 0x313   :  { %v12521_v15 = vadd.f32 %v12520_v14, %v12519_v48  ;;  %3737 = vmatprep.mubr.bf16.mxu1 %v14950_v33  ;;  %v14962_v14 = vld [vmem:[%s19264_s1 + $0x320] ss:$8 sps:$4 sm:$0xff]  }
 0x314   :  { %13456 = vmatpush3.bf16.msra.mxu0 %v14911_v43 }
 0x315   :  { %v2380_v49 = vpack.c.bf16 %v12521_v15, %v12518_v47  ;;  %12636 = vmatprep.subr.bf16.mxu0 %v16621_v13  ;;  %v14960_v47 = vld [vmem:[%s19264_s1 + $0x324] ss:$8 sps:$4 sm:$0xff]  }
 0x317   :  { %v12522_v16 = vpop.f32.mrb[24].mxu1  ;;  %13441 = vmatprep.mubr.msk.bf16.mxu0 %vm1929_vm0, %v2380_v49 }
 0x318   :  { %v12523_v17 = vpop.f32.mrb[25].mxu1 }
 0x319   :  { %v12524_v27 = vadd.f32 %v12523_v17, %v12522_v16  ;;  %v12525_v28 = vpop.f32.mrb[26].mxu1 }
 0x31a   :  { %v12526_v29 = vpop.f32.mrb[27].mxu1  ;;  %3738 = vmatmul.mubr.bf16.vlgmr.msra.gmra.mrb[108].mxu1 %v14948_v54 }
 0x31b   :  { %v12527_v34 = vadd.f32 %v12526_v29, %v12525_v28  ;;  %12859 = vmatpush3.bf16.msra.mxu1 %v16499_v44  ;;  %3745 = vmatprep.mubr.bf16.mxu1 %v14954_v39  ;;  %v14968_v29 = vld [vmem:[%s19264_s1 + $0x330] ss:$8 sps:$4 sm:$0xff]  }
 0x31c   :  { %12860 = vmatprep.subr.bf16.mxu1 %v16505_v52 }
 0x31d   :  { %v2381_v36 = vpack.c.bf16 %v12527_v34, %v12524_v27  ;;  %v14966_v27 = vld [vmem:[%s19264_s1 + $0x334] ss:$8 sps:$4 sm:$0xff]  }
 0x31f   :  { %v12528_v13 = vpop.f32.mrb[28].mxu1  ;;  %13442 = vmatmul.mubr.msk.bf16.gmra.mrb[68].mxu0 %vm1929_vm0, %v2381_v36  ;;  %12861 = vmatpush3.bf16.msra.mxu1 %v16511_v55 }
 0x320   :  { %v12529_v50 = vpop.f32.mrb[29].mxu1  ;;  %12862 = vmatprep.subr.bf16.mxu1 %v16546_v53 }
 0x321   :  { %v12530_v58 = vadd.f32 %v12529_v50, %v12528_v13  ;;  %v12531_v62 = vpop.f32.mrb[30].mxu1 }
 0x322   :  { %v12532_v0 = vpop.f32.mrb[31].mxu1  ;;  %3746 = vmatmul.mubr.bf16.gmra.mrb[112].mxu1 %v14956_v4 }
 0x323   :  { %v12533_v1 = vadd.f32 %v12532_v0, %v12531_v62  ;;  %12863 = vmatpush3.bf16.msra.mxu1 %v16553_v57  ;;  %3753 = vmatprep.mubr.bf16.mxu1 %v14960_v47  ;;  %v14974_v0 = vld [vmem:[%s19264_s1 + $0x340] ss:$8 sps:$4 sm:$0xff]  }
 0x324   :  { %12864 = vmatprep.subr.bf16.mxu1 %v16559_v60 }
 0x325   :  { %v2382_v2 = vpack.c.bf16 %v12533_v1, %v12530_v58  ;;  %v14972_v58 = vld [vmem:[%s19264_s1 + $0x344] ss:$8 sps:$4 sm:$0xff]  }
 0x327   :  { %v12534_v3 = vpop.f32.mrb[32].mxu1  ;;  %13445 = vmatprep.mubr.msk.bf16.mxu0 %vm1929_vm0, %v2382_v2  ;;  %12865 = vmatpush3.bf16.msra.mxu1 %v16565_v63 }
 0x328   :  { %v12535_v41 = vpop.f32.mrb[33].mxu1  ;;  %12866 = vmatprep.subr.bf16.mxu1 %v16571_v37 }
 0x329   :  { %v12536_v42 = vadd.f32 %v12535_v41, %v12534_v3  ;;  %v12537_v43 = vpop.f32.mrb[34].mxu1  ;;  %v14975_v3 = vld [vmem:[%s19264_s1 + $0x354] ss:$8 sps:$4 sm:$0xff]  }
 0x32a   :  { %v12538_v7 = vpop.f32.mrb[35].mxu1  ;;  %3754 = vmatmul.mubr.bf16.gmra.mrb[116].mxu1 %v14962_v14 }
 0x32b   :  { %v12539_v46 = vadd.f32 %v12538_v7, %v12537_v43  ;;  %12867 = vmatpush3.bf16.msra.mxu1 %v16578_v38  ;;  %3761 = vmatprep.mubr.bf16.mxu1 %v14966_v27  ;;  %v14977_v7 = vld [vmem:[%s19264_s1 + $0x350] ss:$8 sps:$4 sm:$0xff]  }
 0x32c   :  { %12868 = vmatprep.subr.bf16.mxu1 %v16584_v40 }
 0x32d   :  { %v2383_v8 = vpack.c.bf16 %v12539_v46, %v12536_v42 }
 0x32f   :  { %v12540_v10 = vpop.f32.mrb[36].mxu1  ;;  %13446 = vmatmul.mubr.msk.bf16.gmra.mrb[72].mxu0 %vm1929_vm0, %v2383_v8  ;;  %12869 = vmatpush3.bf16.msra.mxu1 %v16590_v5 }
 0x330   :  { %v12541_v48 = vpop.f32.mrb[37].mxu1  ;;  %12870 = vmatprep.subr.bf16.mxu1 %v16596_v6 }
 0x331   :  { %v12542_v15 = vadd.f32 %v12541_v48, %v12540_v10  ;;  %v12543_v49 = vpop.f32.mrb[38].mxu1  ;;  %v14978_v10 = vld [vmem:[%s19264_s1 + $0x364] ss:$8 sps:$4 sm:$0xff]  }
 0x332   :  { %v12544_v16 = vpop.f32.mrb[39].mxu1  ;;  %3762 = vmatmul.mubr.bf16.gmra.mrb[120].mxu1 %v14968_v29 }
 0x333   :  { %v12545_v11 = vadd.f32 %v12544_v16, %v12543_v49  ;;  %12871 = vmatpush3.bf16.msra.mxu1 %v16603_v45  ;;  %3769 = vmatprep.mubr.bf16.mxu1 %v14972_v58  ;;  %v14980_v16 = vld [vmem:[%s19264_s1 + $0x360] ss:$8 sps:$4 sm:$0xff]  }
 0x334   :  { %12872 = vmatprep.subr.bf16.mxu1 %v16609_v9 }
 0x335   :  { %v2384_v17 = vpack.c.bf16 %v12545_v11, %v12542_v15 }
 0x337   :  { %v12546_v25 = vpop.f32.mrb[40].mxu1  ;;  %13449 = vmatprep.mubr.msk.bf16.mxu0 %vm1929_vm0, %v2384_v17  ;;  %12873 = vmatpush3.bf16.msra.mxu1 %v16615_v12 }
 0x338   :  { %v12547_v28 = vpop.f32.mrb[41].mxu1 }
 0x339   :  { %v12548_v34 = vadd.f32 %v12547_v28, %v12546_v25  ;;  %v12549_v36 = vpop.f32.mrb[42].mxu1  ;;  %v14981_v25 = vld [vmem:[%s19264_s1 + $0x374] ss:$8 sps:$4 sm:$0xff]  }
 0x33a   :  { %v12550_v13 = vpop.f32.mrb[43].mxu1  ;;  %3770 = vmatmul.mubr.bf16.gmra.mrb[124].mxu1 %v14974_v0 }
 0x33b   :  { %v12551_v33 = vadd.f32 %v12550_v13, %v12549_v36  ;;  %3777 = vmatprep.mubr.bf16.mxu1 %v14975_v3 }
 0x33d   :  { %v2385_v50 = vpack.c.bf16 %v12551_v33, %v12548_v34 }
 0x33f   :  { %13450 = vmatmul.mubr.msk.bf16.gmra.mrb[76].mxu0 %vm1929_vm0, %v2385_v50  ;;  %v12578_v54 = vpop.f32.mrb[44].mxu1 }
 0x340   :  { %v12579_v62 = vpop.f32.mrb[45].mxu1 }
 0x341   :  { %v12580_v1 = vadd.f32 %v12579_v62, %v12578_v54  ;;  %v12581_v2 = vpop.f32.mrb[46].mxu1 }
 0x342   :  { %v12582_v39 = vpop.f32.mrb[47].mxu1  ;;  %3778 = vmatmul.mubr.bf16.gmra.mrb[128].mxu1 %v14977_v7 }
 0x343   :  { %v12583_v41 = vadd.f32 %v12582_v39, %v12581_v2  ;;  %3785 = vmatprep.mubr.bf16.mxu1 %v14978_v10 }
 0x345   :  { %v2734_v4 = vpack.c.bf16 %v12583_v41, %v12580_v1 }
 0x347   :  { %v12584_v42 = vpop.f32.mrb[48].mxu1  ;;  %13457 = vmatprep.mubr.msk.bf16.mxu0 %vm1929_vm0, %v2734_v4 }
 0x348   :  { %v12585_v43 = vpop.f32.mrb[49].mxu1 }
 0x349   :  { %v12586_v46 = vadd.f32 %v12585_v43, %v12584_v42  ;;  %v12587_v8 = vpop.f32.mrb[50].mxu1  ;;  %v14992_v43 = vld [vmem:[%s19264_s1 + $0x3a0] ss:$8 sps:$4 sm:$0xff]  }
 0x34a   :  { %v12588_v47 = vpop.f32.mrb[51].mxu1  ;;  %3786 = vmatmul.mubr.bf16.gmra.mrb[132].mxu1 %v14980_v16 }
 0x34b   :  { %v12589_v48 = vadd.f32 %v12588_v47, %v12587_v8  ;;  %3793 = vmatprep.mubr.bf16.mxu1 %v14981_v25  ;;  %v14993_v8 = vld [vmem:[%s19264_s1 + $0x3b4] ss:$8 sps:$4 sm:$0xff]  }
 0x34d   :  { %v2735_v14 = vpack.c.bf16 %v12589_v48, %v12586_v46 }
 0x34f   :  { %v12590_v15 = vpop.f32.mrb[52].mxu1  ;;  %13458 = vmatmul.mubr.msk.bf16.vlgmr.msra.gmra.mrb[64].mxu0 %vm1929_vm0, %v2735_v14 }
 0x350   :  { %v12591_v49 = vpop.f32.mrb[53].mxu1  ;;  %12637 = vmatpush3.bf16.msra.mxu0 %v16499_v44 }
 0x351   :  { %v12592_v11 = vadd.f32 %v12591_v49, %v12590_v15  ;;  %v12593_v17 = vpop.f32.mrb[54].mxu1  ;;  %12638 = vmatprep.subr.bf16.mxu0 %v16505_v52  ;;  %v14983_v52 = vld [vmem:[%s19264_s1 + $0x370] ss:$8 sps:$4 sm:$0xff]  }
 0x352   :  { %v12594_v27 = vpop.f32.mrb[55].mxu1  ;;  %3794 = vmatmul.mubr.bf16.gmra.mrb[136].mxu1 %v14983_v52  ;;  %v14995_v15 = vld [vmem:[%s19264_s1 + $0x3b0] ss:$8 sps:$4 sm:$0xff]   ;;  %v14933_v52 = vld [vmem:[%s19264_s1 + $0x214] ss:$8 sps:$4 sm:$0xff]  }
 0x353   :  { %v12595_v28 = vadd.f32 %v12594_v27, %v12593_v17  ;;  %v14929_v27 = vld [vmem:[%s19264_s1 + $0x204] ss:$8 sps:$4 sm:$0xff]  }
 0x354   :  { %12639 = vmatpush3.bf16.msra.mxu0 %v16511_v55  ;;  %v14986_v55 = vld [vmem:[%s19264_s1 + $0x384] ss:$8 sps:$4 sm:$0xff]  }
 0x355   :  { %v2736_v29 = vpack.c.bf16 %v12595_v28, %v12592_v11  ;;  %12640 = vmatprep.subr.bf16.mxu0 %v16546_v53  ;;  %4093 = vmatprep.mubr.bf16.mxu1 %v14986_v55  ;;  %v14996_v11 = vld [vmem:[%s19264_s1 + $0x3c4] ss:$8 sps:$4 sm:$0xff]   ;;  %v14935_v55 = vld [vmem:[%s19264_s1 + $0x210] ss:$8 sps:$4 sm:$0xff]  }
 0x357   :  { %v12596_v44 = vpop.f32.mrb[56].mxu1  ;;  %13461 = vmatprep.mubr.msk.bf16.mxu0 %vm1929_vm0, %v2736_v29  ;;  %v14998_v29 = vld [vmem:[%s19264_s1 + $0x3c0] ss:$8 sps:$4 sm:$0xff]  }
 0x358   :  { %v12597_v34 = vpop.f32.mrb[57].mxu1  ;;  %12641 = vmatpush3.bf16.msra.mxu0 %v16553_v57 }
 0x359   :  { %v12598_v36 = vadd.f32 %v12597_v34, %v12596_v44  ;;  %v12599_v13 = vpop.f32.mrb[58].mxu1  ;;  %12642 = vmatprep.subr.bf16.mxu0 %v16559_v60  ;;  %v14984_v60 = vld [vmem:[%s19264_s1 + $0x380] ss:$8 sps:$4 sm:$0xff]   ;;  %v14999_v44 = vld [vmem:[%s19264_s1 + $0x3d4] ss:$8 sps:$4 sm:$0xff]  }
 0x35a   :  { %v12600_v53 = vpop.f32.mrb[59].mxu1  ;;  %4094 = vmatmul.mubr.bf16.vlgmr.msra.gmra.mrb[140].mxu1 %v14984_v60  ;;  %v14927_v34 = vld [vmem:[%s19264_s1 + $0x200] ss:$8 sps:$4 sm:$0xff]   ;;  %v15007_v60 = vld [vmem:[%s19264_s1 + $0x3f0] ss:$8 sps:$4 sm:$0xff]  }
 0x35b   :  { %v12601_v33 = vadd.f32 %v12600_v53, %v12599_v13  ;;  %v15002_v13 = vld [vmem:[%s19264_s1 + $0x3e4] ss:$8 sps:$4 sm:$0xff]  }
 0x35c   :  { %12643 = vmatpush3.bf16.msra.mxu0 %v16565_v63  ;;  %v14987_v63 = vld [vmem:[%s19264_s1 + $0x394] ss:$8 sps:$4 sm:$0xff]   ;;  %v14939_v53 = vld [vmem:[%s19264_s1 + $0x224] ss:$8 sps:$4 sm:$0xff]  }
 0x35d   :  { %v2737_v50 = vpack.c.bf16 %v12601_v33, %v12598_v36  ;;  %12644 = vmatprep.subr.bf16.mxu0 %v16571_v37  ;;  %4101 = vmatprep.mubr.bf16.mxu1 %v14987_v63  ;;  %v15001_v36 = vld [vmem:[%s19264_s1 + $0x3d0] ss:$8 sps:$4 sm:$0xff]   ;;  %v15004_v33 = vld [vmem:[%s19264_s1 + $0x3e0] ss:$8 sps:$4 sm:$0xff]  }
 0x35e   :  { %v14953_v63 = vld [vmem:[%s19264_s1 + $0x240] ss:$8 sps:$4 sm:$0xff]  }
 0x35f   :  { %v12602_v57 = vpop.f32.mrb[60].mxu1  ;;  %13462 = vmatmul.mubr.msk.bf16.gmra.mrb[68].mxu0 %vm1929_vm0, %v2737_v50  ;;  %v15005_v50 = vld [vmem:[%s19264_s1 + $0x3f4] ss:$8 sps:$4 sm:$0xff]  }
 0x360   :  { %v12603_v54 = vpop.f32.mrb[61].mxu1  ;;  %12645 = vmatpush3.bf16.msra.mxu0 %v16578_v38 }
 0x361   :  { %v12604_v58 = vadd.f32 %v12603_v54, %v12602_v57  ;;  %v12605_v62 = vpop.f32.mrb[62].mxu1  ;;  %12646 = vmatprep.subr.bf16.mxu0 %v16584_v40  ;;  %v14989_v40 = vld [vmem:[%s19264_s1 + $0x390] ss:$8 sps:$4 sm:$0xff]   ;;  %v14941_v57 = vld [vmem:[%s19264_s1 + $0x220] ss:$8 sps:$4 sm:$0xff]  }
 0x362   :  { %v12606_v37 = vpop.f32.mrb[63].mxu1  ;;  %4102 = vmatmul.mubr.bf16.gmra.mrb[144].mxu1 %v14989_v40  ;;  %v14945_v54 = vld [vmem:[%s19264_s1 + $0x234] ss:$8 sps:$4 sm:$0xff]  }
 0x363   :  { %v12607_v0 = vadd.f32 %v12606_v37, %v12605_v62  ;;  %v14951_v62 = vld [vmem:[%s19264_s1 + $0x244] ss:$8 sps:$4 sm:$0xff]   ;;  %v14957_v37 = vld [vmem:[%s19264_s1 + $0x254] ss:$8 sps:$4 sm:$0xff]  }
 0x364   :  { %12647 = vmatpush3.bf16.msra.mxu0 %v16590_v5  ;;  %v14990_v5 = vld [vmem:[%s19264_s1 + $0x3a4] ss:$8 sps:$4 sm:$0xff]  }
 0x365   :  { %v2738_v1 = vpack.c.bf16 %v12607_v0, %v12604_v58  ;;  %12648 = vmatprep.subr.bf16.mxu0 %v16596_v6  ;;  %v15008_v6 = vld [vmem:[%s19269_s6 + $0x40] sm:$0xff]   ;;  %4109 = vmatprep.mubr.bf16.mxu1 %v14990_v5  ;;  %v14947_v58 = vld [vmem:[%s19264_s1 + $0x230] ss:$8 sps:$4 sm:$0xff]  }
 0x366   :  { %v14959_v0 = vld [vmem:[%s19264_s1 + $0x250] ss:$8 sps:$4 sm:$0xff]  }
 0x367   :  { %v12608_v38 = vpop.f32.mrb[64].mxu1  ;;  %13465 = vmatprep.mubr.msk.bf16.mxu0 %vm1929_vm0, %v2738_v1  ;;  %v14963_v1 = vld [vmem:[%s19264_s1 + $0x264] ss:$8 sps:$4 sm:$0xff]  }
 0x368   :  { %v12609_v2 = vpop.f32.mrb[65].mxu1  ;;  %12649 = vmatpush3.bf16.msra.mxu0 %v16603_v45 }
 0x369   :  { %v12610_v3 = vadd.f32 %v12609_v2, %v12608_v38  ;;  %v12611_v39 = vpop.f32.mrb[66].mxu1  ;;  %12650 = vmatprep.subr.bf16.mxu0 %v16609_v9  ;;  %v14965_v38 = vld [vmem:[%s19264_s1 + $0x260] ss:$8 sps:$4 sm:$0xff]   ;;  %v14969_v2 = vld [vmem:[%s19264_s1 + $0x274] ss:$8 sps:$4 sm:$0xff]  }
 0x36a   :  { %v12612_v41 = vpop.f32.mrb[67].mxu1  ;;  %4110 = vmatmul.mubr.bf16.gmra.mrb[148].mxu1 %v14992_v43 }
 0x36b   :  { %v12613_v4 = vadd.f32 %v12612_v41, %v12611_v39  ;;  %4117 = vmatprep.mubr.bf16.mxu1 %v14993_v8  ;;  %v14971_v41 = vld [vmem:[%s19264_s1 + $0x270] ss:$8 sps:$4 sm:$0xff]  }
 0x36c   :  { %12651 = vmatpush3.bf16.msra.mxu0 %v16615_v12 }
 0x36d   :  { %v2739_v45 = vpack.c.bf16 %v12613_v4, %v12610_v3  ;;  %13473 = vmatprep.subr.bf16.mxu0 %v15008_v6 }
 0x36f   :  { %v12614_v42 = vpop.f32.mrb[68].mxu1  ;;  %13466 = vmatmul.mubr.msk.bf16.gmra.mrb[72].mxu0 %vm1929_vm0, %v2739_v45 }
 0x370   :  { %v12615_v9 = vpop.f32.mrb[69].mxu1 }
 0x371   :  { %v12616_v7 = vadd.f32 %v12615_v9, %v12614_v42  ;;  %v12617_v46 = vpop.f32.mrb[70].mxu1 }
 0x372   :  { %v12618_v10 = vpop.f32.mrb[71].mxu1  ;;  %4118 = vmatmul.mubr.bf16.gmra.mrb[152].mxu1 %v14995_v15 }
 0x373   :  { %v12619_v12 = vadd.f32 %v12618_v10, %v12617_v46  ;;  %4125 = vmatprep.mubr.bf16.mxu1 %v14996_v11 }
 0x375   :  { %v2740_v47 = vpack.c.bf16 %v12619_v12, %v12616_v7 }
 0x377   :  { %v12620_v48 = vpop.f32.mrb[72].mxu1  ;;  %13469 = vmatprep.mubr.msk.bf16.mxu0 %vm1929_vm0, %v2740_v47 }
 0x378   :  { %v12621_v14 = vpop.f32.mrb[73].mxu1 }
 0x379   :  { %v12622_v49 = vadd.f32 %v12621_v14, %v12620_v48  ;;  %v12623_v16 = vpop.f32.mrb[74].mxu1 }
 0x37a   :  { %v12624_v17 = vpop.f32.mrb[75].mxu1  ;;  %4126 = vmatmul.mubr.bf16.gmra.mrb[156].mxu1 %v14998_v29 }
 0x37b   :  { %v12625_v25 = vadd.f32 %v12624_v17, %v12623_v16  ;;  %4133 = vmatprep.mubr.bf16.mxu1 %v14999_v44 }
 0x37d   :  { %v2741_v28 = vpack.c.bf16 %v12625_v25, %v12622_v49 }
 0x37f   :  { %13470 = vmatmul.mubr.msk.bf16.gmra.mrb[76].mxu0 %vm1929_vm0, %v2741_v28  ;;  %v12726_v40 = vpop.f32.mrb[76].mxu1 }
 0x380   :  { %3025 = vmatprep.mubr.bf16.mxu0 %v14929_v27  ;;  %v12727_v3 = vpop.f32.mrb[77].mxu1 }
 0x381   :  { %v17052_v39 = vadd.f32 %v12727_v3, %v12726_v40  ;;  %v12729_v5 = vpop.f32.mrb[78].mxu1 }
 0x382   :  { %4134 = vmatmul.mubr.bf16.gmra.mrb[160].mxu1 %v15001_v36 }
 0x383   :  { %4141 = vmatprep.mubr.bf16.mxu1 %v15002_v13 }
 0x387   :  { %3026 = vmatmul.mubr.bf16.vlgmr.msra.gmra.mrb[84].mxu0 %v14927_v34 }
 0x388   :  { %3033 = vmatprep.mubr.bf16.mxu0 %v14933_v52  ;;  %13474 = vmatpush3.bf16.msra.mxu0 %v15008_v6  ;;  %v12730_v6 = vpop.f32.mrb[79].mxu1 }
 0x389   :  { %v17057_v4 = vadd.f32 %v12730_v6, %v12729_v5  ;;  %v12732_v42 = vpop.f32.mrb[80].mxu1 }
 0x38a   :  { %4142 = vmatmul.mubr.bf16.gmra.mrb[164].mxu1 %v15004_v33  ;;  %v12733_v9 = vpop.f32.mrb[81].mxu1 }
 0x38b   :  { %4149 = vmatprep.mubr.bf16.mxu1 %v15005_v50  ;;  %v17061_v43 = vadd.f32 %v12733_v9, %v12732_v42  ;;  %v12735_v7 = vpop.f32.mrb[82].mxu1 }
 0x38c   :  { %v12736_v46 = vpop.f32.mrb[83].mxu1 }
 0x38d   :  { %v17063_v8 = vadd.f32 %v12736_v46, %v12735_v7 }
 0x38f   :  { %3034 = vmatmul.mubr.bf16.gmra.mrb[88].mxu0 %v14935_v55  ;;  %v12738_v12 = vpop.f32.mrb[84].mxu1 }
 0x390   :  { %3041 = vmatprep.mubr.bf16.mxu0 %v14939_v53  ;;  %v12739_v47 = vpop.f32.mrb[85].mxu1 }
 0x391   :  { %v17067_v48 = vadd.f32 %v12739_v47, %v12738_v12  ;;  %v12741_v14 = vpop.f32.mrb[86].mxu1 }
 0x392   :  { %4150 = vmatmul.mubr.bf16.gmra.mrb[168].mxu1 %v15007_v60  ;;  %v12742_v15 = vpop.f32.mrb[87].mxu1 }
 0x393   :  { %v17069_v49 = vadd.f32 %v12742_v15, %v12741_v14 }
 0x397   :  { %3042 = vmatmul.mubr.bf16.gmra.mrb[92].mxu0 %v14941_v57  ;;  %v12744_v11 = vpop.f32.mrb[88].mxu1 }
 0x398   :  { %3049 = vmatprep.mubr.bf16.mxu0 %v14945_v54  ;;  %v12745_v17 = vpop.f32.mrb[89].mxu1 }
 0x399   :  { %v17073_v25 = vadd.f32 %v12745_v17, %v12744_v11  ;;  %v12747_v27 = vpop.f32.mrb[90].mxu1 }
 0x39a   :  { %v12748_v28 = vpop.f32.mrb[91].mxu1 }
 0x39b   :  { %v17075_v29 = vadd.f32 %v12748_v28, %v12747_v27 }
 0x39f   :  { %3050 = vmatmul.mubr.bf16.gmra.mrb[96].mxu0 %v14947_v58  ;;  %v12750_v34 = vpop.f32.mrb[92].mxu1 }
 0x3a0   :  { %3057 = vmatprep.mubr.bf16.mxu0 %v14951_v62  ;;  %v12751_v52 = vpop.f32.mrb[93].mxu1 }
 0x3a1   :  { %v17079_v36 = vadd.f32 %v12751_v52, %v12750_v34  ;;  %v12753_v13 = vpop.f32.mrb[94].mxu1 }
 0x3a2   :  { %v12754_v55 = vpop.f32.mrb[95].mxu1 }
 0x3a3   :  { %v17081_v53 = vadd.f32 %v12754_v55, %v12753_v13 }
 0x3a7   :  { %3058 = vmatmul.mubr.bf16.gmra.mrb[100].mxu0 %v14953_v63  ;;  %v12756_v50 = vpop.f32.mrb[96].mxu1  ;;  %v15009_v63 = vld [vmem:[%s19269_s6 + $0x48] sm:$0xff]  }
 0x3a8   :  { %3065 = vmatprep.mubr.bf16.mxu0 %v14957_v37  ;;  %v12757_v57 = vpop.f32.mrb[97].mxu1  ;;  %13475 = vmatprep.subr.bf16.mxu0 %v15009_v63 }
 0x3a9   :  { %v17085_v54 = vadd.f32 %v12757_v57, %v12756_v50  ;;  %v12759_v60 = vpop.f32.mrb[98].mxu1  ;;  %13476 = vmatpush3.bf16.msra.mxu0 %v15009_v63 }
 0x3aa   :  { %v12760_v58 = vpop.f32.mrb[99].mxu1 }
 0x3ab   :  { %v17087_v62 = vadd.f32 %v12760_v58, %v12759_v60 }
 0x3af   :  { %3066 = vmatmul.mubr.bf16.gmra.mrb[104].mxu0 %v14959_v0  ;;  %v12762_v0 = vpop.f32.mrb[100].mxu1 }
 0x3b0   :  { %3073 = vmatprep.mubr.bf16.mxu0 %v14963_v1  ;;  %v12763_v1 = vpop.f32.mrb[101].mxu1 }
 0x3b7   :  { %3074 = vmatmul.mubr.bf16.gmra.mrb[108].mxu0 %v14965_v38  ;;  %v17094_v38 = vadd.f32 %v12763_v1, %v12762_v0  ;;  %v17121_v0 = vld [vmem:[%s19269_s6 + $0x50] sm:$0xff]  }
 0x3b8   :  { %3081 = vmatprep.mubr.bf16.mxu0 %v14969_v2  ;;  %v12765_v2 = vpop.f32.mrb[102].mxu1  ;;  %13493 = vmatprep.subr.bf16.mxu0 %v17121_v0 }
 0x3b9   :  { %v12766_v40 = vpop.f32.mrb[103].mxu1 }
 0x3ba   :  { %v17096_v3 = vadd.f32 %v12766_v40, %v12765_v2 }
 0x3bf   :  { %3082 = vmatmul.mubr.bf16.gmra.mrb[112].mxu0 %v14971_v41 }
 0x3e5   :  { %v12768_v6 = vpop.f32.mrb[104].mxu1 }
 0x3e6   :  { %v12769_v41 = vpop.f32.mrb[105].mxu1 }
 0x3e7   :  { %v17100_v42 = vadd.f32 %v12769_v41, %v12768_v6  ;;  %v12771_v9 = vpop.f32.mrb[106].mxu1 }
 0x3e8   :  { %v12772_v7 = vpop.f32.mrb[107].mxu1 }
 0x3e9   :  { %v17102_v46 = vadd.f32 %v12772_v7, %v12771_v9 }
 0x3ed   :  { %v12800_v47 = vpop.f32.mrb[108].mxu1 }
 0x3ee   :  { %v12801_v14 = vpop.f32.mrb[109].mxu1 }
 0x3ef   :  { %v17106_v15 = vadd.f32 %v12801_v14, %v12800_v47  ;;  %v12803_v11 = vpop.f32.mrb[110].mxu1 }
 0x3f0   :  { %v12804_v17 = vpop.f32.mrb[111].mxu1 }
 0x3f1   :  { %v17108_v27 = vadd.f32 %v12804_v17, %v12803_v11 }
 0x3f5   :  { %v12806_v34 = vpop.f32.mrb[112].mxu1 }
 0x3f6   :  { %v12807_v52 = vpop.f32.mrb[113].mxu1 }
 0x3f7   :  { %v17112_v13 = vadd.f32 %v12807_v52, %v12806_v34  ;;  %v12809_v55 = vpop.f32.mrb[114].mxu1 }
 0x3f8   :  { %v12810_v50 = vpop.f32.mrb[115].mxu1 }
 0x3f9   :  { %v17114_v57 = vadd.f32 %v12810_v50, %v12809_v55 }
 0x3fd   :  { %v12812_v58 = vpop.f32.mrb[116].mxu1 }
 0x3fe   :  { %v12813_v63 = vpop.f32.mrb[117].mxu1 }
 0x3ff   :  { %v17123_v1 = vadd.f32 %v12813_v63, %v12812_v58  ;;  %v12815_v2 = vpop.f32.mrb[118].mxu1 }
 0x400   :  { %v12816_v40 = vpop.f32.mrb[119].mxu1 }
 0x401   :  { %v17126_v6 = vadd.f32 %v12816_v40, %v12815_v2 }
 0x405   :  { %v12818_v9 = vpop.f32.mrb[120].mxu1 }
 0x406   :  { %v12819_v7 = vpop.f32.mrb[121].mxu1 }
 0x407   :  { %v17130_v47 = vadd.f32 %v12819_v7, %v12818_v9  ;;  %v12821_v14 = vpop.f32.mrb[122].mxu1 }
 0x408   :  { %v12822_v11 = vpop.f32.mrb[123].mxu1 }
 0x409   :  { %v17132_v17 = vadd.f32 %v12822_v11, %v12821_v14 }
 0x40d   :  { %v12824_v52 = vpop.f32.mrb[124].mxu1 }
 0x40e   :  { %v12825_v55 = vpop.f32.mrb[125].mxu1 }
 0x40f   :  { %v17136_v50 = vadd.f32 %v12825_v55, %v12824_v52  ;;  %v12827_v58 = vpop.f32.mrb[126].mxu1 }
 0x410   :  { %v12828_v63 = vpop.f32.mrb[127].mxu1 }
 0x411   :  { %v17138_v2 = vadd.f32 %v12828_v63, %v12827_v58 }
 0x415   :  { %v12830_v9 = vpop.f32.mrb[128].mxu1 }
 0x416   :  { %v12831_v7 = vpop.f32.mrb[129].mxu1 }
 0x417   :  { %v17142_v41 = vadd.f32 %v12831_v7, %v12830_v9  ;;  %v12833_v14 = vpop.f32.mrb[130].mxu1 }
 0x418   :  { %v12834_v11 = vpop.f32.mrb[131].mxu1 }
 0x419   :  { %v17144_v60 = vadd.f32 %v12834_v11, %v12833_v14 }
 0x41d   :  { %v12836_v52 = vpop.f32.mrb[132].mxu1 }
 0x41e   :  { %v12837_v55 = vpop.f32.mrb[133].mxu1 }
 0x41f   :  { %v17148_v28 = vadd.f32 %v12837_v55, %v12836_v52  ;;  %v12839_v58 = vpop.f32.mrb[134].mxu1 }
 0x420   :  { %v12840_v63 = vpop.f32.mrb[135].mxu1 }
 0x421   :  { %v17150_v12 = vadd.f32 %v12840_v63, %v12839_v58 }
 0x425   :  { %v12842_v9 = vpop.f32.mrb[136].mxu1 }
 0x426   :  { %v12843_v7 = vpop.f32.mrb[137].mxu1 }
 0x427   :  { %v17154_v5 = vadd.f32 %v12843_v7, %v12842_v9  ;;  %v12845_v14 = vpop.f32.mrb[138].mxu1 }
 0x428   :  { %v12846_v11 = vpop.f32.mrb[139].mxu1 }
 0x429   :  { %v17156_v37 = vadd.f32 %v12846_v11, %v12845_v14 }
 0x42d   :  { %v12874_v52 = vpop.f32.mrb[140].mxu1 }
 0x42e   :  { %v12875_v55 = vpop.f32.mrb[141].mxu1 }
 0x42f   :  { %v17160_v33 = vadd.f32 %v12875_v55, %v12874_v52  ;;  %v12877_v58 = vpop.f32.mrb[142].mxu1 }
 0x430   :  { %v12878_v63 = vpop.f32.mrb[143].mxu1 }
 0x431   :  { %v17162_v44 = vadd.f32 %v12878_v63, %v12877_v58 }
 0x435   :  { %v12880_v9 = vpop.f32.mrb[144].mxu1 }
 0x436   :  { %v12881_v7 = vpop.f32.mrb[145].mxu1 }
 0x437   :  { %v17166_v16 = vadd.f32 %v12881_v7, %v12880_v9  ;;  %v12883_v14 = vpop.f32.mrb[146].mxu1 }
 0x438   :  { %v12884_v11 = vpop.f32.mrb[147].mxu1 }
 0x439   :  { %v17168_v10 = vadd.f32 %v12884_v11, %v12883_v14 }
 0x43d   :  { %v12886_v52 = vpop.f32.mrb[148].mxu1 }
 0x43e   :  { %v12887_v55 = vpop.f32.mrb[149].mxu1 }
 0x43f   :  { %v17172_v45 = vadd.f32 %v12887_v55, %v12886_v52  ;;  %v12889_v58 = vpop.f32.mrb[150].mxu1 }
 0x440   :  { %v12890_v63 = vpop.f32.mrb[151].mxu1 }
 0x441   :  { %v17174_v61 = vadd.f32 %v12890_v63, %v12889_v58 }
 0x445   :  { %v12892_v9 = vpop.f32.mrb[152].mxu1 }
 0x446   :  { %v12893_v7 = vpop.f32.mrb[153].mxu1 }
 0x447   :  { %v17178_v59 = vadd.f32 %v12893_v7, %v12892_v9  ;;  %v12895_v14 = vpop.f32.mrb[154].mxu1 }
 0x448   :  { %v12896_v11 = vpop.f32.mrb[155].mxu1 }
 0x449   :  { %v17180_v56 = vadd.f32 %v12896_v11, %v12895_v14 }
 0x44d   :  { %v12898_v52 = vpop.f32.mrb[156].mxu1 }
 0x44e   :  { %v12899_v55 = vpop.f32.mrb[157].mxu1 }
 0x44f   :  { %v17184_v51 = vadd.f32 %v12899_v55, %v12898_v52  ;;  %v12901_v58 = vpop.f32.mrb[158].mxu1 }
 0x450   :  { %v12902_v35 = vpop.f32.mrb[159].mxu1 }
 0x451   :  { %v17186_v40 = vadd.f32 %v12902_v35, %v12901_v58 }
 0x455   :  { %v12904_v30 = vpop.f32.mrb[160].mxu1 }
 0x456   :  { %v12905_v34 = vpop.f32.mrb[161].mxu1 }
 0x457   :  { %v17190_v24 = vadd.f32 %v12905_v34, %v12904_v30  ;;  %v12907_v52 = vpop.f32.mrb[162].mxu1  ;;  %v15011_v30 = vld [vmem:[%s19269_s6 + $0x58] sm:$0xff]  }
 0x458   :  { %v12908_v23 = vpop.f32.mrb[163].mxu1 }
 0x459   :  { %19299 = vst [vmem:[#allocation22_spill] sm:$0xff] %v17190_v24  ;;  %v17193_v35 = vadd.f32 %v12908_v23, %v12907_v52 }
 0x45a   :  { %v12652_v63 = vpop.f32.mrb[84].mxu0 }
 0x45b   :  { %v12653_v32 = vpop.f32.mrb[85].mxu0  ;;  %19300 = vst [vmem:[#allocation23_spill] sm:$0xff] %v17193_v35 }
 0x45c   :  { %v12654_v31 = vadd.f32 %v12653_v32, %v12652_v63  ;;  %v12655_v9 = vpop.f32.mrb[86].mxu0 }
 0x45d   :  { %v12656_v7 = vpop.f32.mrb[87].mxu0 }
 0x45e   :  { %v12657_v11 = vadd.f32 %v12656_v7, %v12655_v9  ;;  %v12910_v7 = vpop.f32.mrb[164].mxu1 }
 0x45f   :  { %v12911_v34 = vpop.f32.mrb[165].mxu1 }
 0x460   :  { %v3090_v26 = vpack.c.bf16 %v12657_v11, %v12654_v31  ;;  %v17200_v11 = vadd.f32 %v12911_v34, %v12910_v7 }
 0x462   :  { %v12658_v55 = vpop.f32.mrb[88].mxu0  ;;  %13477 = vmatprep.mubr.msk.bf16.mxu0 %vm1929_vm0, %v3090_v26  ;;  %19301 = vst [vmem:[#allocation24_spill] sm:$0xff] %v17200_v11  ;;  %v12913_v26 = vpop.f32.mrb[166].mxu1 }
 0x463   :  { %v12659_v22 = vpop.f32.mrb[89].mxu0 }
 0x464   :  { %v12660_v32 = vadd.f32 %v12659_v22, %v12658_v55  ;;  %v12661_v58 = vpop.f32.mrb[90].mxu0  ;;  %v12914_v22 = vpop.f32.mrb[167].mxu1 }
 0x465   :  { %v12662_v63 = vpop.f32.mrb[91].mxu0  ;;  %v17204_v52 = vadd.f32 %v12914_v22, %v12913_v26 }
 0x466   :  { %v12663_v9 = vadd.f32 %v12662_v63, %v12661_v58 }
 0x467   :  { %19302 = vst [vmem:[#allocation25_spill] sm:$0xff] %v17204_v52 }
 0x468   :  { %v3091_v31 = vpack.c.bf16 %v12663_v9, %v12660_v32  ;;  %v15012_v32 = vld [vmem:[%s19269_s6 + $0x60] sm:$0xff]  }
 0x46a   :  { %v12664_v21 = vpop.f32.mrb[92].mxu0  ;;  %13478 = vmatmul.mubr.msk.bf16.vlgmr.msra.gmra.mrb[64].mxu0 %vm1929_vm0, %v3091_v31  ;;  %v12916_v31 = vpop.f32.mrb[168].mxu1 }
 0x46b   :  { %v12665_v23 = vpop.f32.mrb[93].mxu0  ;;  %13494 = vmatpush3.bf16.msra.mxu0 %v17121_v0  ;;  %v12917_v14 = vpop.f32.mrb[169].mxu1 }
 0x46c   :  { %v12666_v55 = vadd.f32 %v12665_v23, %v12664_v21  ;;  %v12667_v58 = vpop.f32.mrb[94].mxu0  ;;  %13495 = vmatprep.subr.bf16.mxu0 %v15011_v30  ;;  %v17211_v0 = vadd.f32 %v12917_v14, %v12916_v31  ;;  %v12919_v26 = vpop.f32.mrb[170].mxu1 }
 0x46d   :  { %v12668_v63 = vpop.f32.mrb[95].mxu0  ;;  %v12920_v22 = vpop.f32.mrb[171].mxu1 }
 0x46e   :  { %v12669_v7 = vadd.f32 %v12668_v63, %v12667_v58  ;;  %v17214_v20 = vadd.f32 %v12920_v22, %v12919_v26 }
 0x46f   :  { %13496 = vmatpush3.bf16.msra.mxu0 %v15011_v30 }
 0x470   :  { %v3092_v34 = vpack.c.bf16 %v12669_v7, %v12666_v55  ;;  %13513 = vmatprep.subr.bf16.mxu0 %v15012_v32 }
 0x472   :  { %v12670_v21 = vpop.f32.mrb[96].mxu0  ;;  %13481 = vmatprep.mubr.msk.bf16.mxu0 %vm1929_vm0, %v3092_v34 }
 0x473   :  { %v12671_v23 = vpop.f32.mrb[97].mxu0 }
 0x474   :  { %v12672_v19 = vadd.f32 %v12671_v23, %v12670_v21  ;;  %v12673_v18 = vpop.f32.mrb[98].mxu0 }
 0x475   :  { %v12674_v24 = vpop.f32.mrb[99].mxu0 }
 0x476   :  { %v12675_v58 = vadd.f32 %v12674_v24, %v12673_v18 }
 0x478   :  { %v3093_v55 = vpack.c.bf16 %v12675_v58, %v12672_v19 }
 0x47a   :  { %v12676_v63 = vpop.f32.mrb[100].mxu0  ;;  %13482 = vmatmul.mubr.msk.bf16.gmra.mrb[68].mxu0 %vm1929_vm0, %v3093_v55 }
 0x47b   :  { %v12677_v14 = vpop.f32.mrb[101].mxu0 }
 0x47c   :  { %v12678_v7 = vadd.f32 %v12677_v14, %v12676_v63  ;;  %v12679_v31 = vpop.f32.mrb[102].mxu0 }
 0x47d   :  { %v12680_v9 = vpop.f32.mrb[103].mxu0 }
 0x47e   :  { %v12681_v34 = vadd.f32 %v12680_v9, %v12679_v31 }
 0x480   :  { %v3094_v11 = vpack.c.bf16 %v12681_v34, %v12678_v7 }
 0x482   :  { %v12682_v52 = vpop.f32.mrb[104].mxu0  ;;  %13485 = vmatprep.mubr.msk.bf16.mxu0 %vm1929_vm0, %v3094_v11 }
 0x483   :  { %v12683_v26 = vpop.f32.mrb[105].mxu0 }
 0x484   :  { %v12684_v21 = vadd.f32 %v12683_v26, %v12682_v52  ;;  %v12685_v22 = vpop.f32.mrb[106].mxu0 }
 0x485   :  { %v12686_v23 = vpop.f32.mrb[107].mxu0 }
 0x486   :  { %v12687_v35 = vadd.f32 %v12686_v23, %v12685_v22  ;;  %v19305_v22 = vpack.c.bf16 %v17069_v49, %v17067_v48  ;;  %v19309_v48 = vpack.c.bf16 %v17096_v3, %v17094_v38  ;;  %v19310_v49 = vpack.c.bf16 %v17102_v46, %v17100_v42  ;;  %v15040_v23 = vld [vmem:[%s19269_s6 + $0x80] sm:$0xff]  }
 0x487   :  { %v19315_v38 = vpack.c.bf16 %v17138_v2, %v17136_v50  ;;  %v19316_v3 = vpack.c.bf16 %v17144_v60, %v17142_v41  ;;  %v19317_v42 = vpack.c.bf16 %v17150_v12, %v17148_v28  ;;  %v19318_v46 = vpack.c.bf16 %v17156_v37, %v17154_v5  ;;  %v15264_v37 = vld [vmem:[%s19263_s0] sm:$0xff]   ;;  %v15269_v5 = vld [vmem:[%s19263_s0 + $0x58] sm:$0xff]   ;;  %v19328_v60 = vld [vmem:[#allocation24_spill] sm:$0xff] }
 0x488   :  { %v3095_v30 = vpack.c.bf16 %v12687_v35, %v12684_v21  ;;  %v19303_v35 = vpack.c.bf16 %v17057_v4, %v17052_v39  ;;  %v19304_v21 = vpack.c.bf16 %v17063_v8, %v17061_v43  ;;  %v15014_v39 = vld [vmem:[%s19269_s6 + $0x70] sm:$0xff]   ;;  %v19306_v4 = vpack.c.bf16 %v17075_v29, %v17073_v25  ;;  %v15015_v29 = vld [vmem:[%s19269_s6 + $0x78] sm:$0xff]   ;;  %v19325_v28 = vld [vmem:[#allocation22_spill] sm:$0xff] }
 0x489   :  { %v19307_v43 = vpack.c.bf16 %v17081_v53, %v17079_v36  ;;  %v19308_v8 = vpack.c.bf16 %v17087_v62, %v17085_v54  ;;  %v19311_v25 = vpack.c.bf16 %v17108_v27, %v17106_v15  ;;  %v19312_v36 = vpack.c.bf16 %v17114_v57, %v17112_v13  ;;  %v15263_v54 = vld [vmem:[%s19263_s0 + $0x40] sm:$0xff]   ;;  %v19327_v57 = vld [vmem:[#allocation25_spill] sm:$0xff]  ;;  %v15273_v41 = vld [vmem:[%s19263_s0 + $0x68] sm:$0xff]  }
 0x48a   :  { %v12688_v18 = vpop.f32.mrb[108].mxu0  ;;  %13486 = vmatmul.mubr.msk.bf16.gmra.mrb[72].mxu0 %vm1929_vm0, %v3095_v30  ;;  %v15013_v30 = vld [vmem:[%s19269_s6 + $0x68] sm:$0xff]   ;;  %v19313_v53 = vpack.c.bf16 %v17126_v6, %v17123_v1  ;;  %v19314_v62 = vpack.c.bf16 %v17132_v17, %v17130_v47  ;;  %v19319_v15 = vpack.c.bf16 %v17162_v44, %v17160_v33  ;;  %v19320_v27 = vpack.c.bf16 %v17168_v10, %v17166_v16  ;;  %v15268_v33 = vld [vmem:[%s19263_s0 + $0x10] sm:$0xff]   ;;  %v15272_v6 = vld [vmem:[%s19263_s0 + $0x20] sm:$0xff]  }
 0x48b   :  { %v12689_v19 = vpop.f32.mrb[109].mxu0  ;;  %v19321_v12 = vpack.c.bf16 %v17174_v61, %v17172_v45  ;;  %v15265_v44 = vld [vmem:[%s19263_s0 + $0x48] sm:$0xff]   ;;  %v15267_v61 = vld [vmem:[%s19263_s0 + $0x50] sm:$0xff]   ;;  %v19322_v45 = vpack.c.bf16 %v17180_v56, %v17178_v59  ;;  %v19323_v16 = vpack.c.bf16 %v17186_v40, %v17184_v51  ;;  %v15270_v56 = vld [vmem:[%s19263_s0 + $0x18] sm:$0xff]   ;;  %v19329_v1 = vpack.c.bf16 %v19327_v57, %v19328_v60 }
 0x48c   :  { %v12690_v24 = vadd.f32 %v12689_v19, %v12688_v18  ;;  %v12691_v58 = vpop.f32.mrb[110].mxu0  ;;  %v15266_v10 = vld [vmem:[%s19263_s0 + $0x8] sm:$0xff]   ;;  %v15271_v51 = vld [vmem:[%s19263_s0 + $0x60] sm:$0xff]   ;;  %v15275_v50 = vld [vmem:[%s19263_s0 + $0x70] sm:$0xff]   ;;  %v19330_v2 = vpack.c.bf16 %v17214_v20, %v17211_v0 }
 0x48d   :  { %v12692_v55 = vpop.f32.mrb[111].mxu0  ;;  %v19324_v59 = vld [vmem:[#allocation23_spill] sm:$0xff]  ;;  %v15276_v40 = vld [vmem:[%s19263_s0 + $0x30] sm:$0xff]   ;;  %v15278_v0 = vld [vmem:[%s19263_s0 + $0x38] sm:$0xff]  }
 0x48e   :  { %v12693_v63 = vadd.f32 %v12692_v55, %v12691_v58  ;;  %v19326_v13 = vpack.c.bf16 %v19324_v59, %v19325_v28  ;;  %v15274_v47 = vld [vmem:[%s19263_s0 + $0x28] sm:$0xff]   ;;  %v15019_v18 = vld [vmem:[%s19264_s1 + $0x414] ss:$8 sps:$4 sm:$0xff]  }
 0x48f   :  { %v15018_v17 = vld [vmem:[%s19264_s1 + $0x404] ss:$8 sps:$4 sm:$0xff]   ;;  %v15016_v20 = vld [vmem:[%s19264_s1 + $0x400] ss:$8 sps:$4 sm:$0xff]  }
 0x490   :  { %v3096_v14 = vpack.c.bf16 %v12693_v63, %v12690_v24  ;;  %v15041_v19 = vld [vmem:[%s19269_s6 + $0x88] sm:$0xff]   ;;  %v15021_v24 = vld [vmem:[%s19264_s1 + $0x410] ss:$8 sps:$4 sm:$0xff]   ;;  %v15025_v63 = vld [vmem:[%s19264_s1 + $0x434] ss:$8 sps:$4 sm:$0xff]  }
 0x491   :  { %v15022_v58 = vld [vmem:[%s19264_s1 + $0x424] ss:$8 sps:$4 sm:$0xff]   ;;  %v15024_v55 = vld [vmem:[%s19264_s1 + $0x420] ss:$8 sps:$4 sm:$0xff]  }
 0x492   :  { %v12694_v9 = vpop.f32.mrb[112].mxu0  ;;  %13489 = vmatprep.mubr.msk.bf16.mxu0 %vm1929_vm0, %v3096_v14  ;;  %v15027_v14 = vld [vmem:[%s19264_s1 + $0x430] ss:$8 sps:$4 sm:$0xff]  }
 0x493   :  { %v12695_v7 = vpop.f32.mrb[113].mxu0 }
 0x494   :  { %v12696_v11 = vadd.f32 %v12695_v7, %v12694_v9  ;;  %v12697_v31 = vpop.f32.mrb[114].mxu0  ;;  %v15028_v9 = vld [vmem:[%s19264_s1 + $0x444] ss:$8 sps:$4 sm:$0xff]   ;;  %v15030_v7 = vld [vmem:[%s19264_s1 + $0x440] ss:$8 sps:$4 sm:$0xff]  }
 0x495   :  { %v12698_v52 = vpop.f32.mrb[115].mxu0 }
 0x496   :  { %v12699_v34 = vadd.f32 %v12698_v52, %v12697_v31  ;;  %v15033_v31 = vld [vmem:[%s19264_s1 + $0x450] ss:$8 sps:$4 sm:$0xff]   ;;  %v15034_v52 = vld [vmem:[%s19264_s1 + $0x464] ss:$8 sps:$4 sm:$0xff]  }
 0x498   :  { %v3097_v26 = vpack.c.bf16 %v12699_v34, %v12696_v11  ;;  %v15031_v11 = vld [vmem:[%s19264_s1 + $0x454] ss:$8 sps:$4 sm:$0xff]   ;;  %v15036_v34 = vld [vmem:[%s19264_s1 + $0x460] ss:$8 sps:$4 sm:$0xff]  }
 0x49a   :  { %13490 = vmatmul.mubr.msk.bf16.gmra.mrb[76].mxu0 %vm1929_vm0, %v3097_v26  ;;  %v15037_v26 = vld [vmem:[%s19264_s1 + $0x474] ss:$8 sps:$4 sm:$0xff]  }
 0x49b   :  { %13497 = vmatprep.mubr.msk.bf16.mxu0 %vm1929_vm0, %v19303_v35  ;;  %v15039_v35 = vld [vmem:[%s19264_s1 + $0x470] ss:$8 sps:$4 sm:$0xff]  }
 0x4a2   :  { %13498 = vmatmul.mubr.msk.bf16.vlgmr.msra.gmra.mrb[64].mxu0 %vm1929_vm0, %v19304_v21 }
 0x4a3   :  { %13501 = vmatprep.mubr.msk.bf16.mxu0 %vm1929_vm0, %v19305_v22  ;;  %13514 = vmatpush3.bf16.msra.mxu0 %v15012_v32  ;;  %v15277_v32 = vld [vmem:[%s19263_s0 + $0x78] sm:$0xff]  }
 0x4a4   :  { %13515 = vmatprep.subr.bf16.mxu0 %v15013_v30 }
 0x4a7   :  { %13516 = vmatpush3.bf16.msra.mxu0 %v15013_v30 }
 0x4a8   :  { %13533 = vmatprep.subr.bf16.mxu0 %v15014_v39 }
 0x4aa   :  { %13502 = vmatmul.mubr.msk.bf16.gmra.mrb[68].mxu0 %vm1929_vm0, %v19306_v4 }
 0x4ab   :  { %13505 = vmatprep.mubr.msk.bf16.mxu0 %vm1929_vm0, %v19307_v43 }
 0x4b2   :  { %13506 = vmatmul.mubr.msk.bf16.gmra.mrb[72].mxu0 %vm1929_vm0, %v19308_v8 }
 0x4b3   :  { %13509 = vmatprep.mubr.msk.bf16.mxu0 %vm1929_vm0, %v19309_v48 }
 0x4ba   :  { %13510 = vmatmul.mubr.msk.bf16.gmra.mrb[76].mxu0 %vm1929_vm0, %v19310_v49 }
 0x4bb   :  { %13517 = vmatprep.mubr.msk.bf16.mxu0 %vm1929_vm0, %v19311_v25 }
 0x4c2   :  { %13518 = vmatmul.mubr.msk.bf16.vlgmr.msra.gmra.mrb[64].mxu0 %vm1929_vm0, %v19312_v36 }
 0x4c3   :  { %13521 = vmatprep.mubr.msk.bf16.mxu0 %vm1929_vm0, %v19313_v53  ;;  %13534 = vmatpush3.bf16.msra.mxu0 %v15014_v39 }
 0x4c4   :  { %13535 = vmatprep.subr.bf16.mxu0 %v15015_v29 }
 0x4c7   :  { %13536 = vmatpush3.bf16.msra.mxu0 %v15015_v29 }
 0x4c8   :  { %12932 = vmatprep.subr.bf16.mxu0 %v15263_v54 }
 0x4ca   :  { %13522 = vmatmul.mubr.msk.bf16.gmra.mrb[68].mxu0 %vm1929_vm0, %v19314_v62 }
 0x4cb   :  { %13525 = vmatprep.mubr.msk.bf16.mxu0 %vm1929_vm0, %v19315_v38 }
 0x4d2   :  { %13526 = vmatmul.mubr.msk.bf16.gmra.mrb[72].mxu0 %vm1929_vm0, %v19316_v3 }
 0x4d3   :  { %13529 = vmatprep.mubr.msk.bf16.mxu0 %vm1929_vm0, %v19317_v42 }
 0x4da   :  { %13530 = vmatmul.mubr.msk.bf16.gmra.mrb[76].mxu0 %vm1929_vm0, %v19318_v46 }
 0x4db   :  { %13537 = vmatprep.mubr.msk.bf16.mxu0 %vm1929_vm0, %v19319_v15 }
 0x4e2   :  { %13538 = vmatmul.mubr.msk.bf16.vlgmr.msra.gmra.mrb[64].mxu0 %vm1929_vm0, %v19320_v27 }
 0x4e3   :  { %13541 = vmatprep.mubr.msk.bf16.mxu0 %vm1929_vm0, %v19321_v12  ;;  %12933 = vmatpush3.bf16.msra.mxu0 %v15264_v37 }
 0x4e4   :  { %12934 = vmatprep.subr.bf16.mxu0 %v15265_v44 }
 0x4e7   :  { %12935 = vmatpush3.bf16.msra.mxu0 %v15266_v10 }
 0x4e8   :  { %12936 = vmatprep.subr.bf16.mxu0 %v15267_v61 }
 0x4ea   :  { %13542 = vmatmul.mubr.msk.bf16.gmra.mrb[68].mxu0 %vm1929_vm0, %v19322_v45 }
 0x4eb   :  { %13545 = vmatprep.mubr.msk.bf16.mxu0 %vm1929_vm0, %v19323_v16  ;;  %12937 = vmatpush3.bf16.msra.mxu0 %v15268_v33 }
 0x4ec   :  { %12938 = vmatprep.subr.bf16.mxu0 %v15269_v5 }
 0x4ef   :  { %12939 = vmatpush3.bf16.msra.mxu0 %v15270_v56 }
 0x4f0   :  { %12940 = vmatprep.subr.bf16.mxu0 %v15271_v51 }
 0x4f2   :  { %13546 = vmatmul.mubr.msk.bf16.gmra.mrb[72].mxu0 %vm1929_vm0, %v19326_v13 }
 0x4f3   :  { %13549 = vmatprep.mubr.msk.bf16.mxu0 %vm1929_vm0, %v19329_v1  ;;  %12941 = vmatpush3.bf16.msra.mxu0 %v15272_v6 }
 0x4f4   :  { %12942 = vmatprep.subr.bf16.mxu0 %v15273_v41 }
 0x4f7   :  { %12943 = vmatpush3.bf16.msra.mxu0 %v15274_v47 }
 0x4f8   :  { %12944 = vmatprep.subr.bf16.mxu0 %v15275_v50 }
 0x4fa   :  { %13550 = vmatmul.mubr.msk.bf16.gmra.mrb[76].mxu0 %vm1929_vm0, %v19330_v2 }
 0x4fb   :  { %12945 = vmatpush3.bf16.msra.mxu0 %v15276_v40  ;;  %4449 = vmatprep.mubr.bf16.mxu0 %v15018_v17 }
 0x4fc   :  { %12946 = vmatprep.subr.bf16.mxu0 %v15277_v32 }
 0x4ff   :  { %12947 = vmatpush3.bf16.msra.mxu0 %v15278_v0 }
 0x500   :  { %13553 = vmatprep.subr.bf16.mxu0 %v15040_v23 }
 0x502   :  { %4450 = vmatmul.mubr.bf16.vlgmr.msra.gmra.mrb[116].mxu0 %v15016_v20 }
 0x503   :  { %4457 = vmatprep.mubr.bf16.mxu0 %v15019_v18  ;;  %13554 = vmatpush3.bf16.msra.mxu0 %v15040_v23 }
 0x504   :  { %13555 = vmatprep.subr.bf16.mxu0 %v15041_v19 }
 0x507   :  { %13556 = vmatpush3.bf16.msra.mxu0 %v15041_v19 }
 0x50a   :  { %4458 = vmatmul.mubr.bf16.gmra.mrb[120].mxu0 %v15021_v24 }
 0x50b   :  { %4465 = vmatprep.mubr.bf16.mxu0 %v15022_v58 }
 0x512   :  { %4466 = vmatmul.mubr.bf16.gmra.mrb[124].mxu0 %v15024_v55 }
 0x513   :  { %4473 = vmatprep.mubr.bf16.mxu0 %v15025_v63 }
 0x51a   :  { %4474 = vmatmul.mubr.bf16.gmra.mrb[128].mxu0 %v15027_v14 }
 0x51b   :  { %4481 = vmatprep.mubr.bf16.mxu0 %v15028_v9 }
 0x522   :  { %4482 = vmatmul.mubr.bf16.gmra.mrb[132].mxu0 %v15030_v7  ;;  %v19331_v7 = vld [vmem:[#allocation6_spill] sm:$0xff] }
 0x523   :  { %4489 = vmatprep.mubr.bf16.mxu0 %v15031_v11 }
 0x52a   :  { %4490 = vmatmul.mubr.bf16.gmra.mrb[136].mxu0 %v15033_v31 }
 0x52b   :  { %4497 = vmatprep.mubr.bf16.mxu0 %v15034_v52  ;;  %v19332_v52 = vld [vmem:[#allocation7_spill] sm:$0xff] }
 0x532   :  { %4498 = vmatmul.mubr.bf16.gmra.mrb[140].mxu0 %v15036_v34 }
 0x533   :  { %4505 = vmatprep.mubr.bf16.mxu0 %v15037_v26 }
 0x53a   :  { %4506 = vmatmul.mubr.bf16.gmra.mrb[144].mxu0 %v15039_v35  ;;  %v19333_v35 = vld [vmem:[#allocation8_spill] sm:$0xff] }
 0x5d5   :  { %v12948_v30 = vpop.f32.mrb[116].mxu0 }
 0x5d6   :  { %v12949_v21 = vpop.f32.mrb[117].mxu0 }
 0x5d7   :  { %v12950_v22 = vadd.f32 %v12949_v21, %v12948_v30  ;;  %v12951_v39 = vpop.f32.mrb[118].mxu0 }
 0x5d8   :  { %v12952_v4 = vpop.f32.mrb[119].mxu0 }
 0x5d9   :  { %v12953_v43 = vadd.f32 %v12952_v4, %v12951_v39  ;;  %v19334_v39 = vld [vmem:[#allocation9_spill] sm:$0xff] }
 0x5db   :  { %v4514_v8 = vpack.c.bf16 %v12953_v43, %v12950_v22 }
 0x5dd   :  { %v12954_v48 = vpop.f32.mrb[120].mxu0  ;;  %13557 = vmatprep.mubr.msk.bf16.mxu0 %vm1929_vm0, %v4514_v8 }
 0x5de   :  { %v12955_v49 = vpop.f32.mrb[121].mxu0 }
 0x5df   :  { %v12956_v25 = vadd.f32 %v12955_v49, %v12954_v48  ;;  %v12957_v29 = vpop.f32.mrb[122].mxu0 }
 0x5e0   :  { %v12958_v36 = vpop.f32.mrb[123].mxu0 }
 0x5e1   :  { %v12959_v53 = vadd.f32 %v12958_v36, %v12957_v29 }
 0x5e3   :  { %v4515_v54 = vpack.c.bf16 %v12959_v53, %v12956_v25 }
 0x5e5   :  { %v12960_v62 = vpop.f32.mrb[124].mxu0  ;;  %13558 = vmatmul.mubr.msk.bf16.vlgmr.msra.gmra.mrb[64].mxu0 %vm1929_vm0, %v4515_v54 }
 0x5e6   :  { %v12961_v38 = vpop.f32.mrb[125].mxu0 }
 0x5e7   :  { %v12962_v3 = vadd.f32 %v12961_v38, %v12960_v62  ;;  %v12963_v42 = vpop.f32.mrb[126].mxu0 }
 0x5e8   :  { %v12964_v46 = vpop.f32.mrb[127].mxu0 }
 0x5e9   :  { %v12965_v15 = vadd.f32 %v12964_v46, %v12963_v42 }
 0x5eb   :  { %v4516_v27 = vpack.c.bf16 %v12965_v15, %v12962_v3  ;;  %v19335_v3 = vld [vmem:[#allocation10_spill] sm:$0xff] }
 0x5ed   :  { %v12966_v12 = vpop.f32.mrb[128].mxu0  ;;  %13561 = vmatprep.mubr.msk.bf16.mxu0 %vm1929_vm0, %v4516_v27  ;;  %v19336_v27 = vld [vmem:[#allocation11_spill] sm:$0xff] }
 0x5ee   :  { %v12967_v37 = vpop.f32.mrb[129].mxu0 }
 0x5ef   :  { %v12968_v44 = vadd.f32 %v12967_v37, %v12966_v12  ;;  %v12969_v10 = vpop.f32.mrb[130].mxu0 }
 0x5f0   :  { %v12970_v61 = vpop.f32.mrb[131].mxu0 }
 0x5f1   :  { %v12971_v45 = vadd.f32 %v12970_v61, %v12969_v10 }
 0x5f3   :  { %v4517_v16 = vpack.c.bf16 %v12971_v45, %v12968_v44  ;;  %v19337_v44 = vld [vmem:[#allocation12_spill] sm:$0xff] }
 0x5f5   :  { %v12972_v33 = vpop.f32.mrb[132].mxu0  ;;  %13562 = vmatmul.mubr.msk.bf16.gmra.mrb[68].mxu0 %vm1929_vm0, %v4517_v16  ;;  %v19338_v16 = vld [vmem:[#allocation13_spill] sm:$0xff] }
 0x5f6   :  { %v12973_v5 = vpop.f32.mrb[133].mxu0 }
 0x5f7   :  { %v12974_v56 = vadd.f32 %v12973_v5, %v12972_v33  ;;  %v12975_v51 = vpop.f32.mrb[134].mxu0 }
 0x5f8   :  { %v12976_v59 = vpop.f32.mrb[135].mxu0 }
 0x5f9   :  { %v12977_v28 = vadd.f32 %v12976_v59, %v12975_v51 }
 0x5fb   :  { %v4518_v13 = vpack.c.bf16 %v12977_v28, %v12974_v56 }
 0x5fd   :  { %v12978_v57 = vpop.f32.mrb[136].mxu0  ;;  %13565 = vmatprep.mubr.msk.bf16.mxu0 %vm1929_vm0, %v4518_v13 }
 0x5fe   :  { %v12979_v60 = vpop.f32.mrb[137].mxu0 }
 0x5ff   :  { %v12980_v1 = vadd.f32 %v12979_v60, %v12978_v57  ;;  %v12981_v6 = vpop.f32.mrb[138].mxu0 }
 0x600   :  { %v12982_v41 = vpop.f32.mrb[139].mxu0 }
 0x601   :  { %v12983_v47 = vadd.f32 %v12982_v41, %v12981_v6 }
 0x603   :  { %v4519_v17 = vpack.c.bf16 %v12983_v47, %v12980_v1  ;;  %v19339_v47 = vld [vmem:[#allocation14_spill] sm:$0xff] }
 0x605   :  { %13566 = vmatmul.mubr.msk.bf16.gmra.mrb[72].mxu0 %vm1929_vm0, %v4519_v17  ;;  %v12984_v50 = vpop.f32.mrb[140].mxu0 }
 0x606   :  { %v12985_v2 = vpop.f32.mrb[141].mxu0 }
 0x607   :  { %v12986_v40 = vadd.f32 %v12985_v2, %v12984_v50  ;;  %v12987_v32 = vpop.f32.mrb[142].mxu0 }
 0x608   :  { %v12988_v23 = vpop.f32.mrb[143].mxu0 }
 0x609   :  { %v12989_v20 = vadd.f32 %v12988_v23, %v12987_v32 }
 0x60b   :  { %v4520_v0 = vpack.c.bf16 %v12989_v20, %v12986_v40  ;;  %v19340_v40 = vld [vmem:[#allocation15_spill] sm:$0xff]  ;;  %v19341_v20 = vld [vmem:[#allocation16_spill] sm:$0xff] }
 0x60d   :  { %v12990_v18 = vpop.f32.mrb[144].mxu0  ;;  %13569 = vmatprep.mubr.msk.bf16.mxu0 %vm1929_vm0, %v4520_v0 }
 0x60e   :  { %v12991_v19 = vpop.f32.mrb[145].mxu0 }
 0x60f   :  { %v12992_v24 = vadd.f32 %v12991_v19, %v12990_v18  ;;  %v12993_v58 = vpop.f32.mrb[146].mxu0 }
 0x610   :  { %v12994_v55 = vpop.f32.mrb[147].mxu0 }
 0x611   :  { %v12995_v63 = vadd.f32 %v12994_v55, %v12993_v58 }
 0x613   :  { %v4521_v14 = vpack.c.bf16 %v12995_v63, %v12992_v24  ;;  %v19342_v24 = vld [vmem:[#allocation17_spill] sm:$0xff] }
 0x615   :  { %13570 = vmatmul.mubr.msk.bf16.gmra.mrb[76].mxu0 %vm1929_vm0, %v4521_v14 }
 0x6b8   :  { %v13559_v9 = vpop.f32.mrb[64].mxu0 }
 0x6b9   :  { %v17439_v11 = vadd.f32 %v13559_v9, %v19331_v7  ;;  %v4597_v31 = vpop.f32.mrb[65].mxu0 }
 0x6ba   :  { %v17442_v34 = vadd.f32 %v4597_v31, %v19332_v52  ;;  %v13560_v26 = vpop.f32.mrb[66].mxu0 }
 0x6bb   :  { %v17445_v30 = vadd.f32 %v13560_v26, %v19333_v35  ;;  %v4600_v21 = vpop.f32.mrb[67].mxu0  ;;  %v4698_v22 = vsel %vm1929_vm0, %v17439_v11, 0.0  ;;  %v4742_v49 = vmul.f32 %v17439_v11, %v17439_v11 }
 0x6bc   :  { %v17450_v4 = vadd.f32 %v4600_v21, %v19334_v39  ;;  %4699 = vadd.xlane.f32.xlu0 %v4698_v22  ;;  %v4740_v8 = vmul.f32 %v17442_v34, %v17442_v34  ;;  %v4692_v48 = vsel %vm1929_vm0, %v17442_v34, 0.0  ;;  %v19343_v39 = vld [vmem:[#allocation18_spill] sm:$0xff] }
 0x6bd   :  { %v4701_v43 = vsel %vm1929_vm0, %v17445_v30, 0.0  ;;  %v4743_v29 = vmul.f32 %v17445_v30, %v17445_v30  ;;  %v4762_v36 = vsel %vm1929_vm0, %v4742_v49, 0.0  ;;  %v19344_v49 = vld [vmem:[#allocation19_spill] sm:$0xff] }
 0x6be   :  { %4702 = vadd.xlane.f32.xlu1 %v4701_v43  ;;  %v4756_v25 = vsel %vm1929_vm0, %v4740_v8, 0.0  ;;  %v4741_v54 = vmul.f32 %v17450_v4, %v17450_v4  ;;  %v4695_v62 = vsel %vm1929_vm0, %v17450_v4, 0.0 }
 0x6bf   :  { %v4765_v53 = vsel %vm1929_vm0, %v4743_v29, 0.0 }
 0x6c0   :  { %4693 = vadd.xlane.f32.xlu0 %v4692_v48  ;;  %v4759_v15 = vsel %vm1929_vm0, %v4741_v54, 0.0 }
 0x6c2   :  { %4757 = vadd.xlane.f32.xlu1 %v4756_v25 }
 0x6c4   :  { %4763 = vadd.xlane.f32.xlu0 %v4762_v36  ;;  %v19345_v36 = vld [vmem:[#allocation20_spill] sm:$0xff] }
 0x6c6   :  { %4766 = vadd.xlane.f32.xlu1 %v4765_v53 }
 0x6c8   :  { %4696 = vadd.xlane.f32.xlu0 %v4695_v62  ;;  %v13563_v38 = vpop.f32.mrb[68].mxu0 }
 0x6c9   :  { %v17470_v42 = vadd.f32 %v13563_v38, %v19335_v3  ;;  %v4613_v46 = vpop.f32.mrb[69].mxu0  ;;  %v19346_v38 = vld [vmem:[#allocation21_spill] sm:$0xff] }
 0x6ca   :  { %v17474_v12 = vadd.f32 %v4613_v46, %v19336_v27  ;;  %4760 = vadd.xlane.f32.xlu1 %v4759_v15  ;;  %v13564_v37 = vpop.f32.mrb[70].mxu0 }
 0x6cb   :  { %v17477_v10 = vadd.f32 %v13564_v37, %v19337_v44  ;;  %v4616_v61 = vpop.f32.mrb[71].mxu0  ;;  %v4710_v45 = vsel %vm1929_vm0, %v17470_v42, 0.0  ;;  %v4746_v51 = vmul.f32 %v17470_v42, %v17470_v42 }
 0x6cc   :  { %v17482_v33 = vadd.f32 %v4616_v61, %v19338_v16  ;;  %4711 = vadd.xlane.f32.xlu0 %v4710_v45  ;;  %v4704_v56 = vsel %vm1929_vm0, %v17474_v12, 0.0  ;;  %v4744_v57 = vmul.f32 %v17474_v12, %v17474_v12 }
 0x6cd   :  { %v4713_v5 = vsel %vm1929_vm0, %v17477_v10, 0.0  ;;  %v4747_v28 = vmul.f32 %v17477_v10, %v17477_v10  ;;  %v4774_v13 = vsel %vm1929_vm0, %v4746_v51, 0.0 }
 0x6ce   :  { %4714 = vadd.xlane.f32.xlu1 %v4713_v5  ;;  %v4707_v59 = vsel %vm1929_vm0, %v17482_v33, 0.0  ;;  %v4745_v1 = vmul.f32 %v17482_v33, %v17482_v33  ;;  %v4768_v6 = vsel %vm1929_vm0, %v4744_v57, 0.0 }
 0x6cf   :  { %v4777_v60 = vsel %vm1929_vm0, %v4747_v28, 0.0 }
 0x6d0   :  { %4705 = vadd.xlane.f32.xlu0 %v4704_v56  ;;  %v4771_v2 = vsel %vm1929_vm0, %v4745_v1, 0.0 }
 0x6d2   :  { %4708 = vadd.xlane.f32.xlu1 %v4707_v59  ;;  %v15331_v59 = vmov 0  }
 0x6d3   :  { %14774 = vset.pattern.permute.xlu1 %v15331_v59  ;;  %14773 = vset.pattern.permute.xlu0 %v15331_v59 }
 0x6d4   :  { %4775 = vadd.xlane.f32.xlu0 %v4774_v13 }
 0x6d6   :  { %4778 = vadd.xlane.f32.xlu1 %v4777_v60 }
 0x6d8   :  { %4769 = vadd.xlane.f32.xlu0 %v4768_v6  ;;  %v13567_v41 = vpop.f32.mrb[72].mxu0 }
 0x6d9   :  { %v17502_v17 = vadd.f32 %v13567_v41, %v19339_v47  ;;  %v4629_v50 = vpop.f32.mrb[73].mxu0 }
 0x6da   :  { %v17506_v32 = vadd.f32 %v4629_v50, %v19340_v40  ;;  %4772 = vadd.xlane.f32.xlu1 %v4771_v2  ;;  %v13568_v23 = vpop.f32.mrb[74].mxu0 }
 0x6db   :  { %v17509_v0 = vadd.f32 %v13568_v23, %v19341_v20  ;;  %v4632_v18 = vpop.f32.mrb[75].mxu0  ;;  %v4722_v19 = vsel %vm1929_vm0, %v17502_v17, 0.0  ;;  %v4750_v14 = vmul.f32 %v17502_v17, %v17502_v17 }
 0x6dc   :  { %v17514_v58 = vadd.f32 %v4632_v18, %v19342_v24  ;;  %4723 = vadd.xlane.f32.xlu0 %v4722_v19  ;;  %v4716_v63 = vsel %vm1929_vm0, %v17506_v32, 0.0  ;;  %v4748_v52 = vmul.f32 %v17506_v32, %v17506_v32 }
 0x6dd   :  { %v4725_v55 = vsel %vm1929_vm0, %v17509_v0, 0.0  ;;  %v4751_v7 = vmul.f32 %v17509_v0, %v17509_v0  ;;  %v4786_v31 = vsel %vm1929_vm0, %v4750_v14, 0.0 }
 0x6de   :  { %4726 = vadd.xlane.f32.xlu1 %v4725_v55  ;;  %v4719_v9 = vsel %vm1929_vm0, %v17514_v58, 0.0  ;;  %v4749_v35 = vmul.f32 %v17514_v58, %v17514_v58  ;;  %v4780_v21 = vsel %vm1929_vm0, %v4748_v52, 0.0 }
 0x6df   :  { %v4789_v26 = vsel %vm1929_vm0, %v4751_v7, 0.0 }
 0x6e0   :  { %4717 = vadd.xlane.f32.xlu0 %v4716_v63  ;;  %v4783_v48 = vsel %vm1929_vm0, %v4749_v35, 0.0 }
 0x6e2   :  { %4720 = vadd.xlane.f32.xlu1 %v4719_v9 }
 0x6e4   :  { %4787 = vadd.xlane.f32.xlu0 %v4786_v31 }
 0x6e6   :  { %4790 = vadd.xlane.f32.xlu1 %v4789_v26 }
 0x6e8   :  { %4781 = vadd.xlane.f32.xlu0 %v4780_v21  ;;  %v13571_v22 = vpop.f32.mrb[76].mxu0 }
 0x6e9   :  { %v17534_v43 = vadd.f32 %v13571_v22, %v19343_v39  ;;  %v4645_v8 = vpop.f32.mrb[77].mxu0 }
 0x6ea   :  { %v17538_v25 = vadd.f32 %v4645_v8, %v19344_v49  ;;  %4784 = vadd.xlane.f32.xlu1 %v4783_v48  ;;  %v13572_v29 = vpop.f32.mrb[78].mxu0 }
 0x6eb   :  { %v17541_v53 = vadd.f32 %v13572_v29, %v19345_v36  ;;  %v4648_v54 = vpop.f32.mrb[79].mxu0  ;;  %v4734_v62 = vsel %vm1929_vm0, %v17534_v43, 0.0  ;;  %v4754_v45 = vmul.f32 %v17534_v43, %v17534_v43 }
 0x6ec   :  { %v17546_v3 = vadd.f32 %v4648_v54, %v19346_v38  ;;  %4735 = vadd.xlane.f32.xlu0 %v4734_v62  ;;  %v4728_v15 = vsel %vm1929_vm0, %v17538_v25, 0.0  ;;  %v4752_v27 = vmul.f32 %v17538_v25, %v17538_v25 }
 0x6ed   :  { %v4737_v46 = vsel %vm1929_vm0, %v17541_v53, 0.0  ;;  %v4755_v5 = vmul.f32 %v17541_v53, %v17541_v53  ;;  %v4798_v56 = vsel %vm1929_vm0, %v4754_v45, 0.0 }
 0x6ee   :  { %4738 = vadd.xlane.f32.xlu1 %v4737_v46  ;;  %v4731_v37 = vsel %vm1929_vm0, %v17546_v3, 0.0  ;;  %v4753_v44 = vmul.f32 %v17546_v3, %v17546_v3  ;;  %v4792_v61 = vsel %vm1929_vm0, %v4752_v27, 0.0  ;;  %v17587_v27 = vld [vmem:[%s19272_s9] sm:$0xff] }
 0x6ef   :  { %v4801_v51 = vsel %vm1929_vm0, %v4755_v5, 0.0  ;;  %v17596_v5 = vld [vmem:[%s19272_s9 + $0x10] sm:$0xff] }
 0x6f0   :  { %4729 = vadd.xlane.f32.xlu0 %v4728_v15  ;;  %v4795_v16 = vsel %vm1929_vm0, %v4753_v44, 0.0 }
 0x6f2   :  { %4732 = vadd.xlane.f32.xlu1 %v4731_v37 }
 0x6f4   :  { %4793 = vadd.xlane.f32.xlu0 %v4792_v61 }
 0x6f6   :  { %4796 = vadd.xlane.f32.xlu1 %v4795_v16 }
 0x6f8   :  { %4799 = vadd.xlane.f32.xlu0 %v4798_v56 }
 0x6fa   :  { %4802 = vadd.xlane.f32.xlu1 %v4801_v51 }
 0x749   :  { %v4700_v28 = vpop.xlane.xlu0 %4699 }
 0x74a   :  { %v17568_v60 = vmul.f32 0.03125, %v4700_v28 }
 0x74b   :  { %v4703_v13 = vpop.xlane.xlu1 %4702 }
 0x74c   :  { %v17570_v41 = vmul.f32 0.03125, %v4703_v13  ;;  %v4838_v40 = vmul.f32 %v17568_v60, %v17568_v60 }
 0x74d   :  { %v4694_v57 = vpop.xlane.xlu0 %4693 }
 0x74e   :  { %v4804_v1 = vmul.f32 0.03125, %v4694_v57  ;;  %v4839_v19 = vmul.f32 %v17570_v41, %v17570_v41 }
 0x74f   :  { %v4758_v6 = vpop.xlane.xlu1 %4757 }
 0x750   :  { %v4836_v47 = vmul.f32 %v4804_v1, %v4804_v1  ;;  %v4820_v50 = vmul.f32 0.03125, %v4758_v6 }
 0x751   :  { %v4764_v2 = vpop.xlane.xlu0 %4763 }
 0x752   :  { %v4852_v23 = vsub.f32 %v4820_v50, %v4836_v47  ;;  %v4822_v20 = vmul.f32 0.03125, %v4764_v2  ;;  %v17608_v50 = vld [vmem:[%s19272_s9 + $0x18] sm:$0xff] }
 0x753   :  { %v4767_v18 = vpop.xlane.xlu1 %4766 }
 0x754   :  { %v4868_v24 = vmax.f32 %v4852_v23, 0.0  ;;  %v4854_v55 = vsub.f32 %v4822_v20, %v4838_v40  ;;  %v4823_v63 = vmul.f32 0.03125, %v4767_v18 }
 0x755   :  { %v4697_v14 = vpop.xlane.xlu0 %4696 }
 0x756   :  { %v4884_v9 = vadd.f32 1e-05, %v4868_v24  ;;  %v4870_v7 = vmax.f32 %v4854_v55, 0.0  ;;  %v4855_v31 = vsub.f32 %v4823_v63, %v4839_v19  ;;  %v17576_v52 = vmul.f32 0.03125, %v4697_v14 }
 0x757   :  { %v4761_v26 = vpop.xlane.xlu1 %4760 }
 0x758   :  { %15123 = vrsqrt.f32 %v4884_v9  ;;  %v4886_v35 = vadd.f32 1e-05, %v4870_v7  ;;  %v4871_v21 = vmax.f32 %v4855_v31, 0.0  ;;  %v4837_v22 = vmul.f32 %v17576_v52, %v17576_v52 }
 0x759   :  { %v4821_v39 = vmul.f32 0.03125, %v4761_v26  ;;  %v4712_v8 = vpop.xlane.xlu0 %4711 }
 0x75a   :  { %15125 = vrsqrt.f32 %v4886_v35  ;;  %v4887_v48 = vadd.f32 1e-05, %v4871_v21  ;;  %v17580_v62 = vmul.f32 0.03125, %v4712_v8 }
 0x75b   :  { %v4853_v49 = vsub.f32 %v4821_v39, %v4837_v22  ;;  %v4715_v29 = vpop.xlane.xlu1 %4714 }
 0x75c   :  { %15127 = vrsqrt.f32 %v4887_v48  ;;  %v17582_v15 = vmul.f32 0.03125, %v4715_v29  ;;  %v4842_v61 = vmul.f32 %v17580_v62, %v17580_v62 }
 0x75d   :  { %v4869_v36 = vmax.f32 %v4853_v49, 0.0  ;;  %v4706_v54 = vpop.xlane.xlu0 %4705 }
 0x75e   :  { %v17591_v45 = vmul.f32 0.03125, %v4706_v54  ;;  %v4843_v13 = vmul.f32 %v17582_v15, %v17582_v15 }
 0x75f   :  { %v4885_v38 = vadd.f32 1e-05, %v4869_v36  ;;  %v4709_v46 = vpop.xlane.xlu1 %4708 }
 0x760   :  { %v17603_v57 = vmul.f32 0.03125, %v4709_v46  ;;  %v4840_v18 = vmul.f32 %v17591_v45, %v17591_v45 }
 0x761   :  { %15129 = vrsqrt.f32 %v4885_v38  ;;  %v4776_v37 = vpop.xlane.xlu0 %4775 }
 0x762   :  { %v15124_v44 = vpop.eup %15123  ;;  %v4826_v16 = vmul.f32 0.03125, %v4776_v37 }
 0x763   :  { %v4779_v56 = vpop.xlane.xlu1 %4778  ;;  %v17599_v51 = vmul.f32 %v15124_v44, %v17587_v27 }
 0x764   :  { %v15126_v28 = vpop.eup %15125  ;;  %v4858_v6 = vsub.f32 %v4826_v16, %v4842_v61  ;;  %v4827_v47 = vmul.f32 0.03125, %v4779_v56 }
 0x765   :  { %v4770_v2 = vpop.xlane.xlu0 %4769  ;;  %v4932_v40 = vmul.f32 %v17599_v51, %v4804_v1  ;;  %v17612_v23 = vmul.f32 %v15126_v28, %v17596_v5  ;;  %v4841_v1 = vmul.f32 %v17603_v57, %v17603_v57 }
 0x766   :  { %v15128_v20 = vpop.eup %15127  ;;  %v4874_v19 = vmax.f32 %v4858_v6, 0.0  ;;  %v4859_v24 = vsub.f32 %v4827_v47, %v4843_v13  ;;  %v4824_v55 = vmul.f32 0.03125, %v4770_v2 }
 0x767   :  { %v4773_v63 = vpop.xlane.xlu1 %4772  ;;  %4964 = vrot.lane.b32.xlu0 %v4932_v40, %s15332_s8  ;;  %v4934_v14 = vmul.f32 %v17612_v23, %v17568_v60  ;;  %v17620_v9 = vmul.f32 %v15128_v20, %v17608_v50  ;;  %v17628_v60 = vld [vmem:[%s19272_s9 + $0x8] sm:$0xff] }
 0x768   :  { %v4875_v7 = vmax.f32 %v4859_v24, 0.0  ;;  %v4856_v31 = vsub.f32 %v4824_v55, %v4840_v18  ;;  %v4825_v26 = vmul.f32 0.03125, %v4773_v63  ;;  %v4890_v35 = vadd.f32 1e-05, %v4874_v19  ;;  %v17654_v18 = vld [vmem:[%s19272_s9 + $0x38] sm:$0xff] }
 0x769   :  { %v4724_v21 = vpop.xlane.xlu0 %4723  ;;  %4968 = vrot.lane.b32.xlu1 %v4934_v14, %s15332_s8  ;;  %v4935_v29 = vmul.f32 %v17620_v9, %v17570_v41 }
 0x76a   :  { %v4891_v22 = vadd.f32 1e-05, %v4875_v7  ;;  %v4872_v39 = vmax.f32 %v4856_v31, 0.0  ;;  %v4857_v8 = vsub.f32 %v4825_v26, %v4841_v1  ;;  %v17636_v44 = vmul.f32 0.03125, %v4724_v21  ;;  %v17661_v7 = vld [vmem:[%s19272_s9 + $0x20] sm:$0xff] }
 0x76b   :  { %v15130_v48 = vpop.eup %15129  ;;  %v4727_v49 = vpop.xlane.xlu1 %4726 }
 0x76c   :  { %15131 = vrsqrt.f32 %v4891_v22  ;;  %v4888_v36 = vadd.f32 1e-05, %v4872_v39  ;;  %v4873_v54 = vmax.f32 %v4857_v8, 0.0  ;;  %v17634_v46 = vmul.f32 %v15130_v48, %v17628_v60 }
 0x76d   :  { %15133 = vrsqrt.f32 %v4890_v35  ;;  %v4718_v38 = vpop.xlane.xlu0 %4717  ;;  %4970 = vrot.lane.b32.xlu1 %v4935_v29, %s15332_s8  ;;  %v17640_v41 = vmul.f32 0.03125, %v4727_v49  ;;  %v4846_v28 = vmul.f32 %v17636_v44, %v17636_v44  ;;  %v17671_v49 = vld [vmem:[%s19272_s9 + $0x28] sm:$0xff]  ;;  %v17676_v29 = vld [vmem:[%s19272_s9 + $0x30] sm:$0xff] }
 0x76e   :  { %15135 = vrsqrt.f32 %v4888_v36  ;;  %v4889_v37 = vadd.f32 1e-05, %v4873_v54  ;;  %v4933_v16 = vmul.f32 %v17634_v46, %v17576_v52  ;;  %v17645_v13 = vmul.f32 0.03125, %v4718_v38 }
 0x76f   :  { %v4721_v61 = vpop.xlane.xlu1 %4720  ;;  %v4847_v2 = vmul.f32 %v17640_v41, %v17640_v41 }
 0x770   :  { %15137 = vrsqrt.f32 %v4889_v37  ;;  %v17649_v40 = vmul.f32 0.03125, %v4721_v61  ;;  %v4844_v55 = vmul.f32 %v17645_v13, %v17645_v13 }
 0x771   :  { %v4788_v56 = vpop.xlane.xlu0 %4787  ;;  %4966 = vrot.lane.b32.xlu1 %v4933_v16, %s15332_s8 }
 0x772   :  { %v4830_v6 = vmul.f32 0.03125, %v4788_v56  ;;  %v4845_v22 = vmul.f32 %v17649_v40, %v17649_v40 }
 0x773   :  { %v4791_v47 = vpop.xlane.xlu1 %4790 }
 0x774   :  { %v4862_v20 = vsub.f32 %v4830_v6, %v4846_v28  ;;  %v4831_v52 = vmul.f32 0.03125, %v4791_v47 }
 0x775   :  { %v4782_v19 = vpop.xlane.xlu0 %4781 }
 0x776   :  { %v15132_v24 = vpop.eup %15131  ;;  %v4878_v63 = vmax.f32 %v4862_v20, 0.0  ;;  %v4863_v14 = vsub.f32 %v4831_v52, %v4847_v2  ;;  %v4828_v1 = vmul.f32 0.03125, %v4782_v19 }
 0x777   :  { %v15134_v31 = vpop.eup %15133  ;;  %v4785_v26 = vpop.xlane.xlu1 %4784  ;;  %v17664_v35 = vmul.f32 %v15132_v24, %v17654_v18 }
 0x778   :  { %v15136_v21 = vpop.eup %15135  ;;  %v4879_v39 = vmax.f32 %v4863_v14, 0.0  ;;  %v4860_v8 = vsub.f32 %v4828_v1, %v4844_v55  ;;  %v4829_v48 = vmul.f32 0.03125, %v4785_v26  ;;  %v4894_v36 = vadd.f32 1e-05, %v4878_v63 }
 0x779   :  { %v4736_v54 = vpop.xlane.xlu0 %4735  ;;  %v4939_v38 = vmul.f32 %v17664_v35, %v17582_v15  ;;  %v17681_v37 = vmul.f32 %v15136_v21, %v17661_v7  ;;  %v17690_v20 = vmul.f32 %v15134_v31, %v17676_v29 }
 0x77a   :  { %v15138_v61 = vpop.eup %15137  ;;  %v4895_v16 = vadd.f32 1e-05, %v4879_v39  ;;  %v4876_v56 = vmax.f32 %v4860_v8, 0.0  ;;  %v4861_v28 = vsub.f32 %v4829_v48, %v4845_v22  ;;  %v17701_v31 = vmul.f32 0.03125, %v4736_v54 }
 0x77b   :  { %v4739_v6 = vpop.xlane.xlu1 %4738  ;;  %4978 = vrot.lane.b32.xlu1 %v4939_v38, %s15332_s8  ;;  %v4936_v47 = vmul.f32 %v17681_v37, %v17591_v45  ;;  %v17687_v2 = vmul.f32 %v15138_v61, %v17671_v49  ;;  %v4938_v14 = vmul.f32 %v17690_v20, %v17580_v62  ;;  %v17712_v62 = vld [vmem:[%s19272_s9 + $0x58] sm:$0xff] }
 0x77c   :  { %15139 = vrsqrt.f32 %v4895_v16  ;;  %v4892_v15 = vadd.f32 1e-05, %v4876_v56  ;;  %v4877_v52 = vmax.f32 %v4861_v28, 0.0  ;;  %v17707_v22 = vmul.f32 0.03125, %v4739_v6  ;;  %v17721_v28 = vld [vmem:[%s19272_s9 + $0x40] sm:$0xff] }
 0x77d   :  { %15141 = vrsqrt.f32 %v4894_v36  ;;  %4972 = vrot.lane.b32.xlu0 %v4936_v47, %s15332_s8  ;;  %v4730_v19 = vpop.xlane.xlu0 %4729  ;;  %v4937_v24 = vmul.f32 %v17687_v2, %v17603_v57  ;;  %v4850_v54 = vmul.f32 %v17701_v31, %v17701_v31 }
 0x77e   :  { %15143 = vrsqrt.f32 %v4892_v15  ;;  %v4893_v55 = vadd.f32 1e-05, %v4877_v52  ;;  %v17695_v63 = vmul.f32 0.03125, %v4730_v19  ;;  %v4851_v47 = vmul.f32 %v17707_v22, %v17707_v22 }
 0x77f   :  { %4974 = vrot.lane.b32.xlu1 %v4937_v24, %s15332_s8  ;;  %v4733_v45 = vpop.xlane.xlu1 %4732 }
 0x780   :  { %15145 = vrsqrt.f32 %v4893_v55  ;;  %v4848_v26 = vmul.f32 %v17695_v63, %v17695_v63  ;;  %v17705_v57 = vmul.f32 0.03125, %v4733_v45 }
 0x781   :  { %4976 = vrot.lane.b32.xlu0 %v4938_v14, %s15332_s8  ;;  %v4794_v1 = vpop.xlane.xlu0 %4793 }
 0x782   :  { %v4832_v21 = vmul.f32 0.03125, %v4794_v1  ;;  %v4849_v61 = vmul.f32 %v17705_v57, %v17705_v57  ;;  %v17731_v1 = vld [vmem:[%s19272_s9 + $0x48] sm:$0xff] }
 0x783   :  { %v4797_v39 = vpop.xlane.xlu1 %4796 }
 0x784   :  { %v4864_v8 = vsub.f32 %v4832_v21, %v4848_v26  ;;  %v4833_v48 = vmul.f32 0.03125, %v4797_v39  ;;  %v17736_v26 = vld [vmem:[%s19272_s9 + $0x50] sm:$0xff] }
 0x785   :  { %v4800_v36 = vpop.xlane.xlu0 %4799 }
 0x786   :  { %v15140_v38 = vpop.eup %15139  ;;  %v4880_v16 = vmax.f32 %v4864_v8, 0.0  ;;  %v4834_v56 = vmul.f32 0.03125, %v4800_v36  ;;  %v4865_v55 = vsub.f32 %v4833_v48, %v4849_v61 }
 0x787   :  { %v15142_v6 = vpop.eup %15141  ;;  %v4803_v15 = vpop.xlane.xlu1 %4802  ;;  %v17726_v52 = vmul.f32 %v15140_v38, %v17712_v62 }
 0x788   :  { %v15144_v19 = vpop.eup %15143  ;;  %v4896_v24 = vadd.f32 1e-05, %v4880_v16  ;;  %v4866_v45 = vsub.f32 %v4834_v56, %v4850_v54  ;;  %v4835_v14 = vmul.f32 0.03125, %v4803_v15  ;;  %v4926_v61 = vmul.f32 %v15142_v6, %v17736_v26 }
 0x789   :  { %v4943_v21 = vmul.f32 %v17726_v52, %v17640_v41  ;;  %v4924_v39 = vmul.f32 %v15144_v19, %v17721_v28  ;;  %v4881_v16 = vmax.f32 %v4865_v55, 0.0  ;;  %v17760_v55 = vld [vmem:[%s19272_s9 + $0x70] sm:$0xff] }
 0x78a   :  { %v15146_v8 = vpop.eup %15145  ;;  %15147 = vrsqrt.f32 %v4896_v24  ;;  %v4882_v48 = vmax.f32 %v4866_v45, 0.0  ;;  %v4867_v36 = vsub.f32 %v4835_v14, %v4851_v47  ;;  %v4942_v47 = vmul.f32 %v4926_v61, %v17636_v44 }
 0x78b   :  { %4986 = vrot.lane.b32.xlu1 %v4943_v21, %s15332_s8  ;;  %v4940_v38 = vmul.f32 %v4924_v39, %v17645_v13  ;;  %v4925_v54 = vmul.f32 %v15146_v8, %v17731_v1  ;;  %v4897_v24 = vadd.f32 1e-05, %v4881_v16  ;;  %v17753_v13 = vld [vmem:[%s19272_s9 + $0x60] sm:$0xff]  ;;  %v17771_v21 = vld [vmem:[%s19272_s9 + $0x78] sm:$0xff] }
 0x78c   :  { %v4898_v56 = vadd.f32 1e-05, %v4882_v48  ;;  %v4883_v15 = vmax.f32 %v4867_v36, 0.0  ;;  %v17781_v48 = vld [vmem:[%s19272_s9 + $0x68] sm:$0xff] }
 0x78d   :  { %4980 = vrot.lane.b32.xlu0 %v4940_v38, %s15332_s8  ;;  %v4941_v41 = vmul.f32 %v4925_v54, %v17649_v40 }
 0x78e   :  { %15149 = vrsqrt.f32 %v4898_v56  ;;  %v4899_v19 = vadd.f32 1e-05, %v4883_v15 }
 0x78f   :  { %4982 = vrot.lane.b32.xlu1 %v4941_v41, %s15332_s8 }
 0x790   :  { %15151 = vrsqrt.f32 %v4899_v19 }
 0x791   :  { %4984 = vrot.lane.b32.xlu0 %v4942_v47, %s15332_s8  ;;  %15153 = vrsqrt.f32 %v4897_v24 }
 0x793   :  { %5035 = vperm.xlu1 %14774, %v17634_v46  }
 0x794   :  { %v15148_v6 = vpop.eup %15147 }
 0x795   :  { %v4928_v40 = vmul.f32 %v15148_v6, %v17753_v13 }
 0x797   :  { %5040 = vperm.xlu1 %14774, %v17612_v23   ;;  %v4944_v44 = vmul.f32 %v4928_v40, %v17695_v63 }
 0x798   :  { %v15150_v45 = vpop.eup %15149 }
 0x799   :  { %4988 = vrot.lane.b32.xlu0 %v4944_v44, %s15332_s8  ;;  %v17766_v14 = vmul.f32 %v15150_v45, %v17760_v55 }
 0x79a   :  { %v15152_v46 = vpop.eup %15151 }
 0x79b   :  { %5045 = vperm.xlu1 %14774, %v17620_v9   ;;  %v4946_v8 = vmul.f32 %v17766_v14, %v17701_v31  ;;  %v4931_v23 = vmul.f32 %v15152_v46, %v17771_v21  ;;  %v15154_v63 = vpop.eup %15153 }
 0x79c   :  { %v4929_v9 = vmul.f32 %v15154_v63, %v17781_v48  ;;  %v15043_v63 = vld [vmem:[%s19265_s2 + $0x40] sm:$0xff]  }
 0x79d   :  { %4992 = vrot.lane.b32.xlu0 %v4946_v8, %s15332_s8  ;;  %v4947_v36 = vmul.f32 %v4931_v23, %v17707_v22  ;;  %13661 = vmatprep.mubr.bf16.mxu0 %v15043_v63 }
 0x79e   :  { %v4945_v31 = vmul.f32 %v4929_v9, %v17705_v57 }
 0x79f   :  { %5055 = vperm.xlu1 %14774, %v17687_v2   ;;  %v15333_v2 = vmov 1  }
 0x7a1   :  { %5030 = vperm.xlu0 %14773, %v17599_v51  }
 0x7a3   :  { %4994 = vrot.lane.b32.xlu1 %v4947_v36, %s15332_s8 }
 0x7a5   :  { %5050 = vperm.xlu0 %14773, %v17681_v37  }
 0x7a7   :  { %4990 = vrot.lane.b32.xlu1 %v4945_v31, %s15332_s8 }
 0x7a9   :  { %5070 = vperm.xlu0 %14773, %v4924_v39  }
 0x7ab   :  { %5060 = vperm.xlu1 %14774, %v17690_v20  }
 0x7ad   :  { %5090 = vperm.xlu0 %14773, %v4928_v40  }
 0x7af   :  { %5065 = vperm.xlu1 %14774, %v17664_v35  }
 0x7b1   :  { %14776 = vset.pattern.permute.xlu0 %v15333_v2 }
 0x7b3   :  { %5075 = vperm.xlu1 %14774, %v4925_v54  }
 0x7b7   :  { %5080 = vperm.xlu1 %14774, %v4926_v61  }
 0x7bb   :  { %5085 = vperm.xlu1 %14774, %v17726_v52  }
 0x7bf   :  { %14775 = vset.pattern.permute.xlu1 %v15333_v2 }
 0x7d9   :  { %v4965_v51 = vpop.permute.xlu0 %4964 }
 0x7da   :  { %v5012_v37 = vsub.f32 %v17587_v27, %v4965_v51 }
 0x7db   :  { %v4969_v57 = vpop.permute.xlu1 %4968 }
 0x7dc   :  { %5126 = vperm.xlu1 %14775, %v5012_v37   ;;  %v5014_v38 = vsub.f32 %v17596_v5, %v4969_v57 }
 0x7df   :  { %v4971_v22 = vpop.permute.xlu1 %4970 }
 0x7e0   :  { %v5015_v20 = vsub.f32 %v17608_v50, %v4971_v22 }
 0x7e2   :  { %5141 = vperm.xlu1 %14775, %v5015_v20  }
 0x7e3   :  { %v4967_v39 = vpop.permute.xlu1 %4966 }
 0x7e4   :  { %v5013_v35 = vsub.f32 %v17628_v60, %v4967_v39 }
 0x7e6   :  { %5131 = vperm.xlu0 %14776, %v5013_v35  }
 0x7ea   :  { %5136 = vperm.xlu0 %14776, %v5014_v38  }
 0x7ed   :  { %v4979_v54 = vpop.permute.xlu1 %4978 }
 0x7ee   :  { %v5019_v15 = vsub.f32 %v17654_v18, %v4979_v54 }
 0x7ef   :  { %v4973_v52 = vpop.permute.xlu0 %4972 }
 0x7f0   :  { %v5016_v61 = vsub.f32 %v17661_v7, %v4973_v52 }
 0x7f1   :  { %v4975_v16 = vpop.permute.xlu1 %4974 }
 0x7f2   :  { %v5017_v27 = vsub.f32 %v17671_v49, %v4975_v16  ;;  %5146 = vperm.xlu1 %14775, %v5016_v61  }
 0x7f3   :  { %v4977_v56 = vpop.permute.xlu0 %4976 }
 0x7f4   :  { %5151 = vperm.xlu0 %14776, %v5017_v27   ;;  %v5018_v50 = vsub.f32 %v17676_v29, %v4977_v56 }
 0x7f6   :  { %5161 = vperm.xlu1 %14775, %v5019_v15  }
 0x7f8   :  { %5156 = vperm.xlu0 %14776, %v5018_v50  }
 0x7fd   :  { %v4987_v60 = vpop.permute.xlu1 %4986 }
 0x7fe   :  { %v5023_v49 = vsub.f32 %v17712_v62, %v4987_v60 }
 0x7ff   :  { %v4981_v41 = vpop.permute.xlu0 %4980 }
 0x800   :  { %v5020_v5 = vsub.f32 %v17721_v28, %v4981_v41 }
 0x801   :  { %v4983_v19 = vpop.permute.xlu1 %4982 }
 0x802   :  { %v5021_v47 = vsub.f32 %v17731_v1, %v4983_v19  ;;  %5166 = vperm.xlu1 %14775, %v5020_v5  }
 0x803   :  { %v4985_v7 = vpop.permute.xlu0 %4984 }
 0x804   :  { %5171 = vperm.xlu0 %14776, %v5021_v47   ;;  %v5022_v24 = vsub.f32 %v17736_v26, %v4985_v7 }
 0x806   :  { %5181 = vperm.xlu1 %14775, %v5023_v49  }
 0x808   :  { %5176 = vperm.xlu0 %14776, %v5022_v24  }
 0x80a   :  { %14777 = vset.pattern.permute.xlu1 %v15331_v59 }
 0x80b   :  { %5095 = vperm.xlu1 %14777, %v4929_v9   ;;  %v4989_v29 = vpop.permute.xlu0 %4988 }
 0x80c   :  { %v5024_v28 = vsub.f32 %v17753_v13, %v4989_v29 }
 0x80f   :  { %5100 = vperm.xlu1 %14777, %v17766_v14   ;;  %v4993_v46 = vpop.permute.xlu0 %4992 }
 0x810   :  { %v5026_v14 = vsub.f32 %v17760_v55, %v4993_v46 }
 0x812   :  { %v5036_v18 = vpop.permute.xlu1 %5035 }
 0x813   :  { %5105 = vperm.xlu1 %14777, %v4931_v23  }
 0x816   :  { %v5041_v1 = vpop.permute.xlu1 %5040 }
 0x817   :  { %14778 = vset.pattern.permute.xlu1 %v15333_v2 }
 0x818   :  { %5186 = vperm.xlu1 %14778, %v5024_v28  }
 0x81a   :  { %v5046_v62 = vpop.permute.xlu1 %5045 }
 0x81b   :  { %v5111_v20 = vmul.f32 %v17445_v30, %v5046_v62  ;;  %v5110_v30 = vmul.f32 %v17439_v11, %v5041_v1 }
 0x81e   :  { %v5056_v6 = vpop.permute.xlu1 %5055 }
 0x81f   :  { %v5113_v1 = vmul.f32 %v17482_v33, %v5056_v6 }
 0x822   :  { %v4995_v40 = vpop.permute.xlu1 %4994 }
 0x823   :  { %v5027_v26 = vsub.f32 %v17771_v21, %v4995_v40  ;;  %v15042_v21 = vld [vmem:[%s19265_s2] sm:$0xff]  }
 0x824   :  { %13589 = vmatprep.mubr.bf16.mxu1 %v15042_v21 }
 0x825   :  { %5201 = vperm.xlu1 %14778, %v5027_v26  }
 0x826   :  { %v4991_v44 = vpop.permute.xlu1 %4990 }
 0x827   :  { %v5025_v45 = vsub.f32 %v17781_v48, %v4991_v44  ;;  %v5031_v48 = vpop.permute.xlu0 %5030 }
 0x828   :  { %v5108_v31 = vmul.f32 %v17442_v34, %v5031_v48  ;;  %v5109_v34 = vmul.f32 %v17450_v4, %v5036_v18 }
 0x829   :  { %5191 = vperm.xlu0 %14776, %v5025_v45   ;;  %14780 = vset.pattern.permute.xlu1 %v15331_v59 }
 0x82a   :  { %v5061_v13 = vpop.permute.xlu1 %5060 }
 0x82b   :  { %v5051_v55 = vpop.permute.xlu0 %5050 }
 0x82c   :  { %v5112_v28 = vmul.f32 %v17474_v12, %v5051_v55  ;;  %v5114_v12 = vmul.f32 %v17470_v42, %v5061_v13 }
 0x82d   :  { %5196 = vperm.xlu0 %14776, %v5026_v14  }
 0x82e   :  { %v5066_v8 = vpop.permute.xlu1 %5065 }
 0x82f   :  { %v17830_v51 = vpop.permute.xlu0 %5070  ;;  %v5115_v63 = vmul.f32 %v17477_v10, %v5066_v8 }
 0x831   :  { %14779 = vset.pattern.permute.xlu0 %v15331_v59 }
 0x832   :  { %v17817_v23 = vpop.permute.xlu1 %5075 }
 0x833   :  { %v17837_v35 = vpop.permute.xlu0 %5090 }
 0x836   :  { %v17825_v36 = vpop.permute.xlu1 %5080 }
 0x83a   :  { %v17827_v9 = vpop.permute.xlu1 %5085 }
 0x85b   :  { %v5127_v37 = vpop.permute.xlu1 %5126 }
 0x85c   :  { %v17832_v57 = vadd.f32 %v5127_v37, %v5108_v31 }
 0x85e   :  { %v5236_v22 = vmul.f32 0.044715, %v17832_v57 }
 0x860   :  { %v5252_v39 = vmul.f32 %v5236_v22, %v17832_v57 }
 0x861   :  { %v5142_v38 = vpop.permute.xlu1 %5141 }
 0x862   :  { %v5268_v54 = vmul.f32 %v5252_v39, %v17832_v57  ;;  %v17840_v52 = vadd.f32 %v5142_v38, %v5111_v20 }
 0x864   :  { %v5239_v61 = vmul.f32 0.044715, %v17840_v52  ;;  %v5284_v27 = vadd.f32 %v5268_v54, %v17832_v57 }
 0x865   :  { %v5132_v16 = vpop.permute.xlu0 %5131 }
 0x866   :  { %v5255_v56 = vmul.f32 %v5239_v61, %v17840_v52  ;;  %v5205_v15 = vadd.f32 %v5132_v16, %v5109_v34  ;;  %v5300_v5 = vmul.f32 0.7978846, %v5284_v27 }
 0x868   :  { %v5271_v50 = vmul.f32 %v5255_v56, %v17840_v52  ;;  %v5237_v60 = vmul.f32 0.044715, %v5205_v15  ;;  %15155 = vtanh.f32 %v5300_v5 }
 0x869   :  { %v5137_v41 = vpop.permute.xlu0 %5136 }
 0x86a   :  { %v5287_v19 = vadd.f32 %v5271_v50, %v17840_v52  ;;  %v5253_v47 = vmul.f32 %v5237_v60, %v5205_v15  ;;  %v5206_v7 = vadd.f32 %v5137_v41, %v5110_v30  ;;  %v5220_v30 = vmul.f32 0.5, %v17832_v57 }
 0x86b   :  { %v5221_v50 = vmul.f32 0.5, %v5205_v15 }
 0x86c   :  { %v5269_v4 = vmul.f32 %v5253_v47, %v5205_v15  ;;  %v5238_v49 = vmul.f32 0.044715, %v5206_v7  ;;  %v5303_v24 = vmul.f32 0.7978846, %v5287_v19 }
 0x86e   :  { %v5285_v18 = vadd.f32 %v5269_v4, %v5205_v15  ;;  %v5254_v29 = vmul.f32 %v5238_v49, %v5206_v7  ;;  %15157 = vtanh.f32 %v5303_v24 }
 0x870   :  { %v5301_v62 = vmul.f32 0.7978846, %v5285_v18  ;;  %v5270_v40 = vmul.f32 %v5254_v29, %v5206_v7  ;;  %v5116_v29 = vmul.f32 %v17506_v32, %v17830_v51  ;;  %v5119_v51 = vmul.f32 %v17509_v0, %v17827_v9 }
 0x871   :  { %v5147_v11 = vpop.permute.xlu1 %5146  ;;  %v5118_v0 = vmul.f32 %v17502_v17, %v17825_v36 }
 0x872   :  { %15159 = vtanh.f32 %v5301_v62  ;;  %v5286_v26 = vadd.f32 %v5270_v40, %v5206_v7  ;;  %v17851_v44 = vadd.f32 %v5147_v11, %v5112_v28  ;;  %v15156_v37 = vpop.eup %15155  ;;  %v5223_v28 = vmul.f32 0.5, %v17840_v52 }
 0x873   :  { %v5152_v45 = vpop.permute.xlu0 %5151  ;;  %v5332_v54 = vadd.f32 1.0, %v15156_v37  ;;  %v5222_v62 = vmul.f32 0.5, %v5206_v7 }
 0x874   :  { %v5302_v46 = vmul.f32 0.7978846, %v5286_v26  ;;  %v5240_v14 = vmul.f32 0.044715, %v17851_v44  ;;  %v17854_v21 = vadd.f32 %v5152_v45, %v5113_v1  ;;  %v5117_v26 = vmul.f32 %v17514_v58, %v17817_v23 }
 0x875   :  { %v5162_v48 = vpop.permute.xlu1 %5161  ;;  %v5348_v47 = vmul.f32 %v5332_v54, %v5220_v30 }
 0x876   :  { %15161 = vtanh.f32 %v5302_v46  ;;  %v5256_v55 = vmul.f32 %v5240_v14, %v17851_v44  ;;  %v5241_v33 = vmul.f32 0.044715, %v17854_v21  ;;  %v17860_v6 = vadd.f32 %v5162_v48, %v5115_v63 }
 0x877   :  { %v5157_v31 = vpop.permute.xlu0 %5156  ;;  %v5225_v54 = vmul.f32 0.5, %v17854_v21 }
 0x878   :  { %v5272_v22 = vmul.f32 %v5256_v55, %v17851_v44  ;;  %v5257_v20 = vmul.f32 %v5241_v33, %v17854_v21  ;;  %v17864_v39 = vadd.f32 %v5157_v31, %v5114_v12  ;;  %v5243_v10 = vmul.f32 0.044715, %v17860_v6  ;;  %v15158_v38 = vpop.eup %15157 }
 0x879   :  { %v5335_v4 = vadd.f32 1.0, %v15158_v38  ;;  %v5224_v38 = vmul.f32 0.5, %v17851_v44 }
 0x87a   :  { %v5288_v8 = vadd.f32 %v5272_v22, %v17851_v44  ;;  %v5273_v42 = vmul.f32 %v5257_v20, %v17854_v21  ;;  %v5242_v13 = vmul.f32 0.044715, %v17864_v39  ;;  %v5259_v34 = vmul.f32 %v5243_v10, %v17860_v6 }
 0x87b   :  { %v5351_v14 = vmul.f32 %v5335_v4, %v5223_v28 }
 0x87c   :  { %v15160_v61 = vpop.eup %15159  ;;  %v5304_v16 = vmul.f32 0.7978846, %v5288_v8  ;;  %v5289_v27 = vadd.f32 %v5273_v42, %v17854_v21  ;;  %v5258_v56 = vmul.f32 %v5242_v13, %v17864_v39  ;;  %v5275_v41 = vmul.f32 %v5259_v34, %v17860_v6 }
 0x87d   :  { %v5333_v60 = vadd.f32 1.0, %v15160_v61 }
 0x87e   :  { %15163 = vtanh.f32 %v5304_v16  ;;  %v5305_v5 = vmul.f32 0.7978846, %v5289_v27  ;;  %v5274_v19 = vmul.f32 %v5258_v56, %v17864_v39  ;;  %v5291_v24 = vadd.f32 %v5275_v41, %v17860_v6 }
 0x87f   :  { %v5349_v49 = vmul.f32 %v5333_v60, %v5221_v50  ;;  %v5227_v41 = vmul.f32 0.5, %v17860_v6 }
 0x880   :  { %v15162_v18 = vpop.eup %15161  ;;  %15165 = vtanh.f32 %v5305_v5  ;;  %v5290_v57 = vadd.f32 %v5274_v19, %v17864_v39  ;;  %v5307_v11 = vmul.f32 0.7978846, %v5291_v24  ;;  %v5226_v24 = vmul.f32 0.5, %v17864_v39 }
 0x881   :  { %v17881_v15 = vpack.c.bf16 %v5349_v49, %v5348_v47  ;;  %v5334_v40 = vadd.f32 1.0, %v15162_v18  ;;  %v5167_v1 = vpop.permute.xlu1 %5166 }
 0x882   :  { %v5306_v45 = vmul.f32 0.7978846, %v5290_v57  ;;  %v17885_v46 = vadd.f32 %v5167_v1, %v5116_v29  ;;  %15167 = vtanh.f32 %v5307_v11  ;;  %v5120_v1 = vmul.f32 %v17538_v25, %v17837_v35 }
 0x883   :  { %v5350_v63 = vmul.f32 %v5334_v40, %v5222_v62  ;;  %v5172_v32 = vpop.permute.xlu0 %5171  ;;  %13573 = vmatprep.subr.bf16.mxu1 %v17881_v15  ;;  %13645 = vmatprep.subr.bf16.mxu0 %v17881_v15 }
 0x884   :  { %15169 = vtanh.f32 %v5306_v45  ;;  %v5244_v52 = vmul.f32 0.044715, %v17885_v46  ;;  %v17892_v7 = vadd.f32 %v5172_v32, %v5117_v26  ;;  %13574 = vmatpush3.bf16.msra.mxu1 %v17881_v15  ;;  %13646 = vmatpush3.bf16.msra.mxu0 %v17881_v15 }
 0x885   :  { %v17896_v58 = vpack.c.bf16 %v5351_v14, %v5350_v63  ;;  %v5182_v23 = vpop.permute.xlu1 %5181 }
 0x886   :  { %v5260_v48 = vmul.f32 %v5244_v52, %v17885_v46  ;;  %v5245_v12 = vmul.f32 0.044715, %v17892_v7  ;;  %v17900_v55 = vadd.f32 %v5182_v23, %v5119_v51  ;;  %v5228_v51 = vmul.f32 0.5, %v17885_v46 }
 0x887   :  { %v5177_v9 = vpop.permute.xlu0 %5176  ;;  %13575 = vmatprep.subr.bf16.mxu1 %v17896_v58  ;;  %13647 = vmatprep.subr.bf16.mxu0 %v17896_v58  ;;  %v5229_v52 = vmul.f32 0.5, %v17892_v7 }
 0x888   :  { %v15164_v33 = vpop.eup %15163  ;;  %v5276_v31 = vmul.f32 %v5260_v48, %v17885_v46  ;;  %v5261_v37 = vmul.f32 %v5245_v12, %v17892_v7  ;;  %v5247_v22 = vmul.f32 0.044715, %v17900_v55  ;;  %13576 = vmatpush3.bf16.msra.mxu1 %v17896_v58  ;;  %13648 = vmatpush3.bf16.msra.mxu0 %v17896_v58  ;;  %v5214_v10 = vadd.f32 %v5177_v9, %v5118_v0 }
 0x889   :  { %v5336_v20 = vadd.f32 1.0, %v15164_v33  ;;  %v5231_v25 = vmul.f32 0.5, %v17900_v55 }
 0x88a   :  { %v15166_v8 = vpop.eup %15165  ;;  %v5292_v17 = vadd.f32 %v5276_v31, %v17885_v46  ;;  %v5277_v36 = vmul.f32 %v5261_v37, %v17892_v7  ;;  %v5263_v42 = vmul.f32 %v5247_v22, %v17900_v55  ;;  %v17914_v13 = vpop.permute.xlu1 %5095  ;;  %v5246_v61 = vmul.f32 0.044715, %v5214_v10 }
 0x88b   :  { %v5337_v34 = vadd.f32 1.0, %v15166_v8  ;;  %v5352_v50 = vmul.f32 %v5336_v20, %v5224_v38  ;;  %v5230_v35 = vmul.f32 0.5, %v5214_v10 }
 0x88c   :  { %v5308_v16 = vmul.f32 0.7978846, %v5292_v17  ;;  %v5293_v27 = vadd.f32 %v5277_v36, %v17892_v7  ;;  %v5279_v56 = vmul.f32 %v5263_v42, %v17900_v55  ;;  %v15168_v30 = vpop.eup %15167  ;;  %v5262_v5 = vmul.f32 %v5246_v61, %v5214_v10 }
 0x88d   :  { %v5353_v60 = vmul.f32 %v5337_v34, %v5225_v54  ;;  %v5339_v47 = vadd.f32 1.0, %v15168_v30 }
 0x88e   :  { %v15170_v19 = vpop.eup %15169  ;;  %15171 = vtanh.f32 %v5308_v16  ;;  %v5309_v4 = vmul.f32 0.7978846, %v5293_v27  ;;  %v5295_v44 = vadd.f32 %v5279_v56, %v17900_v55  ;;  %v17922_v21 = vpop.permute.xlu1 %5100  ;;  %v5278_v29 = vmul.f32 %v5262_v5, %v5214_v10 }
 0x88f   :  { %v17924_v49 = vpack.c.bf16 %v5353_v60, %v5352_v50  ;;  %v5338_v18 = vadd.f32 1.0, %v15170_v19  ;;  %v5355_v57 = vmul.f32 %v5339_v47, %v5227_v41  ;;  %v5122_v16 = vmul.f32 %v17534_v43, %v17922_v21 }
 0x890   :  { %15173 = vtanh.f32 %v5309_v4  ;;  %v5311_v28 = vmul.f32 0.7978846, %v5295_v44  ;;  %v5294_v6 = vadd.f32 %v5278_v29, %v5214_v10  ;;  %v5121_v10 = vmul.f32 %v17546_v3, %v17914_v13 }
 0x891   :  { %v5354_v62 = vmul.f32 %v5338_v18, %v5226_v24  ;;  %13577 = vmatprep.subr.bf16.mxu1 %v17924_v49  ;;  %13649 = vmatprep.subr.bf16.mxu0 %v17924_v49 }
 0x892   :  { %15175 = vtanh.f32 %v5311_v28  ;;  %13578 = vmatpush3.bf16.msra.mxu1 %v17924_v49  ;;  %13650 = vmatpush3.bf16.msra.mxu0 %v17924_v49  ;;  %v5106_v40 = vpop.permute.xlu1 %5105  ;;  %v5310_v39 = vmul.f32 0.7978846, %v5294_v6 }
 0x893   :  { %v17931_v11 = vpack.c.bf16 %v5355_v57, %v5354_v62  ;;  %v5123_v8 = vmul.f32 %v17541_v53, %v5106_v40 }
 0x894   :  { %15177 = vtanh.f32 %v5310_v39 }
 0x895   :  { %13579 = vmatprep.subr.bf16.mxu1 %v17931_v11  ;;  %13651 = vmatprep.subr.bf16.mxu0 %v17931_v11 }
 0x896   :  { %13580 = vmatpush3.bf16.msra.mxu1 %v17931_v11  ;;  %13652 = vmatpush3.bf16.msra.mxu0 %v17931_v11 }
 0x897   :  { %v5187_v26 = vpop.permute.xlu1 %5186 }
 0x898   :  { %v15172_v45 = vpop.eup %15171  ;;  %v5216_v63 = vadd.f32 %v5187_v26, %v5120_v1 }
 0x899   :  { %v5340_v14 = vadd.f32 1.0, %v15172_v45 }
 0x89a   :  { %v15174_v32 = vpop.eup %15173  ;;  %v5248_v9 = vmul.f32 0.044715, %v5216_v63  ;;  %v5232_v62 = vmul.f32 0.5, %v5216_v63 }
 0x89b   :  { %v5341_v23 = vadd.f32 1.0, %v15174_v32  ;;  %v5356_v12 = vmul.f32 %v5340_v14, %v5228_v51 }
 0x89c   :  { %v15176_v48 = vpop.eup %15175  ;;  %v5264_v20 = vmul.f32 %v5248_v9, %v5216_v63  ;;  %v15046_v9 = vld [vmem:[%s19265_s2 + $0x10] sm:$0xff]  }
 0x89d   :  { %v5357_v0 = vmul.f32 %v5341_v23, %v5229_v52  ;;  %v5343_v33 = vadd.f32 1.0, %v15176_v48 }
 0x89e   :  { %v15178_v31 = vpop.eup %15177  ;;  %v5280_v42 = vmul.f32 %v5264_v20, %v5216_v63  ;;  %v15051_v20 = vld [vmem:[%s19265_s2 + $0x28] sm:$0xff]  }
 0x89f   :  { %v17941_v37 = vpack.c.bf16 %v5357_v0, %v5356_v12  ;;  %v5342_v22 = vadd.f32 1.0, %v15178_v31  ;;  %v5359_v46 = vmul.f32 %v5343_v33, %v5231_v25  ;;  %v15044_v12 = vld [vmem:[%s19265_s2 + $0x8] sm:$0xff]   ;;  %v15048_v33 = vld [vmem:[%s19265_s2 + $0x50] sm:$0xff]   ;;  %v15047_v31 = vld [vmem:[%s19265_s2 + $0x18] sm:$0xff]  }
 0x8a0   :  { %v5296_v34 = vadd.f32 %v5280_v42, %v5216_v63  ;;  %v15045_v0 = vld [vmem:[%s19265_s2 + $0x48] sm:$0xff]   ;;  %v15049_v25 = vld [vmem:[%s19265_s2 + $0x58] sm:$0xff]  }
 0x8a1   :  { %13581 = vmatprep.subr.bf16.mxu1 %v17941_v37  ;;  %13653 = vmatprep.subr.bf16.mxu0 %v17941_v37  ;;  %v5358_v7 = vmul.f32 %v5342_v22, %v5230_v35  ;;  %v15050_v35 = vld [vmem:[%s19265_s2 + $0x20] sm:$0xff]   ;;  %v15055_v42 = vld [vmem:[%s19265_s2 + $0x38] sm:$0xff]  }
 0x8a2   :  { %13582 = vmatpush3.bf16.msra.mxu1 %v17941_v37  ;;  %13654 = vmatpush3.bf16.msra.mxu0 %v17941_v37  ;;  %v5312_v50 = vmul.f32 0.7978846, %v5296_v34  ;;  %v15052_v22 = vld [vmem:[%s19265_s2 + $0x80] sm:$0xff]   ;;  %v15059_v34 = vld [vmem:[%s19265_s2 + $0xa8] sm:$0xff]  }
 0x8a3   :  { %v17949_v17 = vpack.c.bf16 %v5359_v46, %v5358_v7  ;;  %v15053_v46 = vld [vmem:[%s19265_s2 + $0x88] sm:$0xff]   ;;  %v15054_v7 = vld [vmem:[%s19265_s2 + $0x30] sm:$0xff]  }
 0x8a4   :  { %v5202_v36 = vpop.permute.xlu1 %5201  ;;  %15179 = vtanh.f32 %v5312_v50 }
 0x8a5   :  { %v5219_v55 = vadd.f32 %v5202_v36, %v5123_v8  ;;  %13583 = vmatprep.subr.bf16.mxu1 %v17949_v17  ;;  %13655 = vmatprep.subr.bf16.mxu0 %v17949_v17  ;;  %v15056_v8 = vld [vmem:[%s19265_s2 + $0x90] sm:$0xff]  }
 0x8a6   :  { %13584 = vmatpush3.bf16.msra.mxu1 %v17949_v17  ;;  %13656 = vmatpush3.bf16.msra.mxu0 %v17949_v17  ;;  %v18043_v36 = vld [vmem:[%s19269_s6 + $0x10] sm:$0xff]  }
 0x8a7   :  { %v5251_v38 = vmul.f32 0.044715, %v5219_v55  ;;  %v5235_v32 = vmul.f32 0.5, %v5219_v55 }
 0x8a8   :  { %v5192_v54 = vpop.permute.xlu0 %5191 }
 0x8a9   :  { %v5267_v53 = vmul.f32 %v5251_v38, %v5219_v55  ;;  %v5217_v61 = vadd.f32 %v5192_v54, %v5121_v10  ;;  %v18058_v10 = vld [vmem:[%s19269_s6 + $0x18] sm:$0xff]   ;;  %v15058_v38 = vld [vmem:[%s19265_s2 + $0xa0] sm:$0xff]  }
 0x8aa   :  { %v18072_v54 = vld [vmem:[%s19269_s6] sm:$0xff]  }
 0x8ab   :  { %v5283_v27 = vmul.f32 %v5267_v53, %v5219_v55  ;;  %v5249_v56 = vmul.f32 0.044715, %v5217_v61  ;;  %v5233_v6 = vmul.f32 0.5, %v5217_v61  ;;  %v15060_v53 = vld [vmem:[%s19265_s2 + $0xb0] sm:$0xff]  }
 0x8ac   :  { %v5197_v30 = vpop.permute.xlu0 %5196 }
 0x8ad   :  { %v5265_v60 = vmul.f32 %v5249_v56, %v5217_v61  ;;  %v5218_v41 = vadd.f32 %v5197_v30, %v5122_v16  ;;  %v5299_v5 = vadd.f32 %v5283_v27, %v5219_v55  ;;  %v15057_v55 = vld [vmem:[%s19265_s2 + $0x98] sm:$0xff]   ;;  %v15062_v16 = vld [vmem:[%s19265_s2 + $0xc0] sm:$0xff]   ;;  %v15063_v27 = vld [vmem:[%s19265_s2 + $0xc8] sm:$0xff]  }
 0x8ae   :  { %v15180_v43 = vpop.eup %15179  ;;  %v15068_v56 = vld [vmem:[%s19265_s2 + $0xd0] sm:$0xff]   ;;  %v15069_v30 = vld [vmem:[%s19265_s2 + $0xd8] sm:$0xff]  }
 0x8af   :  { %v5281_v3 = vmul.f32 %v5265_v60, %v5217_v61  ;;  %v5250_v13 = vmul.f32 0.044715, %v5218_v41  ;;  %v5315_v47 = vmul.f32 0.7978846, %v5299_v5  ;;  %v5344_v21 = vadd.f32 1.0, %v15180_v43 }
 0x8b0   :  { %v5234_v51 = vmul.f32 0.5, %v5218_v41 }
 0x8b1   :  { %v5297_v19 = vadd.f32 %v5281_v3, %v5217_v61  ;;  %v5266_v4 = vmul.f32 %v5250_v13, %v5218_v41  ;;  %v5360_v39 = vmul.f32 %v5344_v21, %v5232_v62  ;;  %v15061_v61 = vld [vmem:[%s19265_s2 + $0xb8] sm:$0xff]  }
 0x8b3   :  { %v5313_v44 = vmul.f32 0.7978846, %v5297_v19  ;;  %v5282_v24 = vmul.f32 %v5266_v4, %v5218_v41 }
 0x8b5   :  { %15181 = vtanh.f32 %v5313_v44  ;;  %v5298_v18 = vadd.f32 %v5282_v24, %v5218_v41 }
 0x8b6   :  { %15183 = vtanh.f32 %v5315_v47 }
 0x8b7   :  { %v5314_v29 = vmul.f32 0.7978846, %v5298_v18 }
 0x8b9   :  { %15185 = vtanh.f32 %v5314_v29 }
 0x8bf   :  { %v15182_v28 = vpop.eup %15181 }
 0x8c0   :  { %v15184_v57 = vpop.eup %15183  ;;  %v5345_v40 = vadd.f32 1.0, %v15182_v28 }
 0x8c1   :  { %v5347_v26 = vadd.f32 1.0, %v15184_v57 }
 0x8c2   :  { %v5361_v1 = vmul.f32 %v5345_v40, %v5233_v6 }
 0x8c3   :  { %v15186_v45 = vpop.eup %15185  ;;  %v5363_v23 = vmul.f32 %v5347_v26, %v5235_v32 }
 0x8c4   :  { %v17959_v14 = vpack.c.bf16 %v5361_v1, %v5360_v39  ;;  %v5346_v52 = vadd.f32 1.0, %v15186_v45 }
 0x8c6   :  { %13585 = vmatprep.subr.bf16.mxu1 %v17959_v14  ;;  %13657 = vmatprep.subr.bf16.mxu0 %v17959_v14  ;;  %v5362_v48 = vmul.f32 %v5346_v52, %v5234_v51 }
 0x8c7   :  { %13586 = vmatpush3.bf16.msra.mxu1 %v17959_v14  ;;  %13658 = vmatpush3.bf16.msra.mxu0 %v17959_v14 }
 0x8c8   :  { %v17965_v63 = vpack.c.bf16 %v5363_v23, %v5362_v48 }
 0x8ca   :  { %13587 = vmatprep.subr.bf16.mxu1 %v17965_v63  ;;  %13659 = vmatprep.subr.bf16.mxu0 %v17965_v63 }
 0x8cb   :  { %13588 = vmatpush3.bf16.msra.mxu1 %v17965_v63  ;;  %13660 = vmatpush3.bf16.msra.mxu0 %v17965_v63 }
 0x8cc   :  { %13597 = vmatprep.subr.bf16.mxu1 %v17881_v15  ;;  %13717 = vmatprep.subr.bf16.mxu0 %v17881_v15 }
 0x8ce   :  { %13590 = vmatmul.mubr.bf16.vlgmr.msra.gmra.mrb[172].mxu1 %v15044_v12  ;;  %13662 = vmatmul.mubr.bf16.vlgmr.msra.gmra.mrb[148].mxu0 %v15045_v0 }
 0x8cf   :  { %13598 = vmatpush3.bf16.msra.mxu1 %v17881_v15  ;;  %13718 = vmatpush3.bf16.msra.mxu0 %v17881_v15 }
 0x8d0   :  { %13599 = vmatprep.subr.bf16.mxu1 %v17896_v58  ;;  %13719 = vmatprep.subr.bf16.mxu0 %v17896_v58 }
 0x8d1   :  { %13593 = vmatprep.mubr.bf16.mxu1 %v15046_v9  ;;  %13665 = vmatprep.mubr.bf16.mxu0 %v15048_v33 }
 0x8d3   :  { %13600 = vmatpush3.bf16.msra.mxu1 %v17896_v58  ;;  %13720 = vmatpush3.bf16.msra.mxu0 %v17896_v58 }
 0x8d4   :  { %13601 = vmatprep.subr.bf16.mxu1 %v17924_v49  ;;  %13721 = vmatprep.subr.bf16.mxu0 %v17924_v49 }
 0x8d6   :  { %13594 = vmatmul.mubr.bf16.gmra.mrb[176].mxu1 %v15047_v31  ;;  %13666 = vmatmul.mubr.bf16.gmra.mrb[152].mxu0 %v15049_v25 }
 0x8d7   :  { %13602 = vmatpush3.bf16.msra.mxu1 %v17924_v49  ;;  %13722 = vmatpush3.bf16.msra.mxu0 %v17924_v49 }
 0x8d8   :  { %13603 = vmatprep.subr.bf16.mxu1 %v17931_v11  ;;  %13723 = vmatprep.subr.bf16.mxu0 %v17931_v11 }
 0x8d9   :  { %13613 = vmatprep.mubr.bf16.mxu1 %v15050_v35  ;;  %13733 = vmatprep.mubr.bf16.mxu0 %v15052_v22 }
 0x8db   :  { %13604 = vmatpush3.bf16.msra.mxu1 %v17931_v11  ;;  %13724 = vmatpush3.bf16.msra.mxu0 %v17931_v11 }
 0x8dc   :  { %13605 = vmatprep.subr.bf16.mxu1 %v17941_v37  ;;  %13725 = vmatprep.subr.bf16.mxu0 %v17941_v37 }
 0x8df   :  { %13606 = vmatpush3.bf16.msra.mxu1 %v17941_v37  ;;  %13726 = vmatpush3.bf16.msra.mxu0 %v17941_v37 }
 0x8e0   :  { %13607 = vmatprep.subr.bf16.mxu1 %v17949_v17  ;;  %13727 = vmatprep.subr.bf16.mxu0 %v17949_v17 }
 0x8e3   :  { %13608 = vmatpush3.bf16.msra.mxu1 %v17949_v17  ;;  %13728 = vmatpush3.bf16.msra.mxu0 %v17949_v17 }
 0x8e4   :  { %13609 = vmatprep.subr.bf16.mxu1 %v17959_v14  ;;  %13729 = vmatprep.subr.bf16.mxu0 %v17959_v14 }
 0x8e7   :  { %13610 = vmatpush3.bf16.msra.mxu1 %v17959_v14  ;;  %13730 = vmatpush3.bf16.msra.mxu0 %v17959_v14 }
 0x8e8   :  { %13611 = vmatprep.subr.bf16.mxu1 %v17965_v63  ;;  %13731 = vmatprep.subr.bf16.mxu0 %v17965_v63 }
 0x8eb   :  { %13612 = vmatpush3.bf16.msra.mxu1 %v17965_v63  ;;  %13732 = vmatpush3.bf16.msra.mxu0 %v17965_v63 }
 0x8ec   :  { %13753 = vmatprep.subr.bf16.mxu0 %v17881_v15  ;;  %13621 = vmatprep.subr.bf16.mxu1 %v18043_v36 }
 0x8ee   :  { %13614 = vmatmul.mubr.bf16.vlgmr.msra.gmra.mrb[180].mxu1 %v15051_v20  ;;  %13734 = vmatmul.mubr.bf16.vlgmr.msra.gmra.mrb[156].mxu0 %v15053_v46  ;;  %v15282_v46 = vld [vmem:[%s19269_s6 + $0x8] sm:$0xff]  }
 0x8ef   :  { %13754 = vmatpush3.bf16.msra.mxu0 %v17881_v15  ;;  %13617 = vmatprep.mubr.bf16.mxu1 %v15054_v7 }
 0x8f0   :  { %13755 = vmatprep.subr.bf16.mxu0 %v17896_v58  ;;  %13737 = vmatprep.mubr.bf16.mxu0 %v15056_v8 }
 0x8f1   :  { %13622 = vmatpush3.bf16.msra.mxu1 %v18043_v36 }
 0x8f2   :  { %13623 = vmatprep.subr.bf16.mxu1 %v18058_v10 }
 0x8f3   :  { %13756 = vmatpush3.bf16.msra.mxu0 %v17896_v58 }
 0x8f4   :  { %13757 = vmatprep.subr.bf16.mxu0 %v17924_v49 }
 0x8f5   :  { %13624 = vmatpush3.bf16.msra.mxu1 %v18058_v10 }
 0x8f6   :  { %13618 = vmatmul.mubr.bf16.gmra.mrb[184].mxu1 %v15055_v42  ;;  %13738 = vmatmul.mubr.bf16.gmra.mrb[160].mxu0 %v15057_v55 }
 0x8f7   :  { %13758 = vmatpush3.bf16.msra.mxu0 %v17924_v49  ;;  %13769 = vmatprep.mubr.bf16.mxu0 %v15058_v38  ;;  %v15283_v38 = vld [vmem:[%s19269_s6 + $0x20] sm:$0xff]  }
 0x8f8   :  { %13759 = vmatprep.subr.bf16.mxu0 %v17931_v11  ;;  %13633 = vmatprep.subr.bf16.mxu1 %v18072_v54 }
 0x8fb   :  { %13760 = vmatpush3.bf16.msra.mxu0 %v17931_v11 }
 0x8fc   :  { %13761 = vmatprep.subr.bf16.mxu0 %v17941_v37 }
 0x8ff   :  { %13762 = vmatpush3.bf16.msra.mxu0 %v17941_v37 }
 0x900   :  { %13763 = vmatprep.subr.bf16.mxu0 %v17949_v17 }
 0x903   :  { %13764 = vmatpush3.bf16.msra.mxu0 %v17949_v17 }
 0x904   :  { %13765 = vmatprep.subr.bf16.mxu0 %v17959_v14 }
 0x907   :  { %13766 = vmatpush3.bf16.msra.mxu0 %v17959_v14 }
 0x908   :  { %13767 = vmatprep.subr.bf16.mxu0 %v17965_v63 }
 0x90b   :  { %13768 = vmatpush3.bf16.msra.mxu0 %v17965_v63 }
 0x90c   :  { %13789 = vmatprep.subr.bf16.mxu0 %v17881_v15 }
 0x90e   :  { %13770 = vmatmul.mubr.bf16.vlgmr.msra.gmra.mrb[164].mxu0 %v15059_v34  ;;  %v15284_v34 = vld [vmem:[%s19269_s6 + $0x28] sm:$0xff]  }
 0x90f   :  { %13790 = vmatpush3.bf16.msra.mxu0 %v17881_v15  ;;  %13773 = vmatprep.mubr.bf16.mxu0 %v15060_v53  ;;  %v15064_v53 = vld [vmem:[%s19265_s2 + $0x60] sm:$0xff]  }
 0x910   :  { %13791 = vmatprep.subr.bf16.mxu0 %v17896_v58 }
 0x913   :  { %13792 = vmatpush3.bf16.msra.mxu0 %v17896_v58 }
 0x914   :  { %13793 = vmatprep.subr.bf16.mxu0 %v17924_v49 }
 0x916   :  { %13774 = vmatmul.mubr.bf16.gmra.mrb[168].mxu0 %v15061_v61  ;;  %v15065_v61 = vld [vmem:[%s19265_s2 + $0x68] sm:$0xff]  }
 0x917   :  { %13794 = vmatpush3.bf16.msra.mxu0 %v17924_v49  ;;  %13805 = vmatprep.mubr.bf16.mxu0 %v15062_v16  ;;  %v15066_v16 = vld [vmem:[%s19265_s2 + $0x70] sm:$0xff]  }
 0x918   :  { %13795 = vmatprep.subr.bf16.mxu0 %v17931_v11 }
 0x91b   :  { %13796 = vmatpush3.bf16.msra.mxu0 %v17931_v11 }
 0x91c   :  { %13797 = vmatprep.subr.bf16.mxu0 %v17941_v37 }
 0x91f   :  { %13798 = vmatpush3.bf16.msra.mxu0 %v17941_v37 }
 0x920   :  { %13799 = vmatprep.subr.bf16.mxu0 %v17949_v17 }
 0x923   :  { %13800 = vmatpush3.bf16.msra.mxu0 %v17949_v17 }
 0x924   :  { %13801 = vmatprep.subr.bf16.mxu0 %v17959_v14 }
 0x927   :  { %13802 = vmatpush3.bf16.msra.mxu0 %v17959_v14 }
 0x928   :  { %13803 = vmatprep.subr.bf16.mxu0 %v17965_v63 }
 0x92b   :  { %13804 = vmatpush3.bf16.msra.mxu0 %v17965_v63 }
 0x92c   :  { %13861 = vmatprep.subr.bf16.mxu0 %v17881_v15 }
 0x92e   :  { %13806 = vmatmul.mubr.bf16.vlgmr.msra.gmra.mrb[172].mxu0 %v15063_v27  ;;  %v15285_v27 = vld [vmem:[%s19269_s6 + $0x30] sm:$0xff]  }
 0x92f   :  { %13862 = vmatpush3.bf16.msra.mxu0 %v17881_v15  ;;  %13809 = vmatprep.mubr.bf16.mxu0 %v15068_v56  ;;  %v15286_v56 = vld [vmem:[%s19269_s6 + $0x38] sm:$0xff]  }
 0x930   :  { %13863 = vmatprep.subr.bf16.mxu0 %v17896_v58 }
 0x933   :  { %13864 = vmatpush3.bf16.msra.mxu0 %v17896_v58 }
 0x934   :  { %13865 = vmatprep.subr.bf16.mxu0 %v17924_v49 }
 0x936   :  { %13810 = vmatmul.mubr.bf16.gmra.mrb[176].mxu0 %v15069_v30  ;;  %v15067_v30 = vld [vmem:[%s19265_s2 + $0x78] sm:$0xff]  }
 0x937   :  { %13866 = vmatpush3.bf16.msra.mxu0 %v17924_v49 }
 0x938   :  { %13867 = vmatprep.subr.bf16.mxu0 %v17931_v11 }
 0x93b   :  { %13868 = vmatpush3.bf16.msra.mxu0 %v17931_v11 }
 0x93c   :  { %13869 = vmatprep.subr.bf16.mxu0 %v17941_v37 }
 0x93f   :  { %13870 = vmatpush3.bf16.msra.mxu0 %v17941_v37 }
 0x940   :  { %13871 = vmatprep.subr.bf16.mxu0 %v17949_v17 }
 0x943   :  { %13872 = vmatpush3.bf16.msra.mxu0 %v17949_v17 }
 0x944   :  { %13873 = vmatprep.subr.bf16.mxu0 %v17959_v14 }
 0x947   :  { %13874 = vmatpush3.bf16.msra.mxu0 %v17959_v14 }
 0x948   :  { %13875 = vmatprep.subr.bf16.mxu0 %v17965_v63 }
 0x94b   :  { %13876 = vmatpush3.bf16.msra.mxu0 %v17965_v63 }
 0x9a1   :  { %v13591_v50 = vpop.f32.mrb[172].mxu1  ;;  %v13663_v60 = vpop.f32.mrb[148].mxu0 }
 0x9a2   :  { %v5438_v41 = vpop.f32.mrb[173].mxu1  ;;  %v5796_v5 = vpop.f32.mrb[149].mxu0 }
 0x9a3   :  { %v13592_v3 = vpop.f32.mrb[174].mxu1  ;;  %v13664_v13 = vpop.f32.mrb[150].mxu0 }
 0x9a4   :  { %v5470_v19 = vpack.c.bf16 %v13592_v3, %v13591_v50  ;;  %v5441_v47 = vpop.f32.mrb[175].mxu1  ;;  %v5828_v4 = vpack.c.bf16 %v13664_v13, %v13663_v60  ;;  %v5799_v44 = vpop.f32.mrb[151].mxu0  ;;  %v15287_v50 = vld [vmem:[%s19269_s6 + $0x40] sm:$0xff]  }
 0x9a5   :  { %v5469_v24 = vpack.c.bf16 %v5441_v47, %v5438_v41  ;;  %v5827_v18 = vpack.c.bf16 %v5799_v44, %v5796_v5 }
 0x9a9   :  { %v13595_v29 = vpop.f32.mrb[176].mxu1  ;;  %v13667_v43 = vpop.f32.mrb[152].mxu0 }
 0x9aa   :  { %v5454_v21 = vpop.f32.mrb[177].mxu1  ;;  %v5812_v28 = vpop.f32.mrb[153].mxu0 }
 0x9ab   :  { %v13596_v57 = vpop.f32.mrb[178].mxu1  ;;  %v13668_v62 = vpop.f32.mrb[154].mxu0 }
 0x9ac   :  { %v5472_v6 = vpack.c.bf16 %v13596_v57, %v13595_v29  ;;  %v5457_v40 = vpop.f32.mrb[179].mxu1  ;;  %v5830_v39 = vpack.c.bf16 %v13668_v62, %v13667_v43  ;;  %v5815_v1 = vpop.f32.mrb[155].mxu0 }
 0x9ad   :  { %v5471_v26 = vpack.c.bf16 %v5457_v40, %v5454_v21  ;;  %v5829_v45 = vpack.c.bf16 %v5815_v1, %v5812_v28 }
 0x9c1   :  { %v13615_v32 = vpop.f32.mrb[180].mxu1  ;;  %v18137_v51 = vpop.f32.mrb[156].mxu0 }
 0x9c2   :  { %v5540_v52 = vpop.f32.mrb[181].mxu1  ;;  %v18139_v23 = vpop.f32.mrb[157].mxu0 }
 0x9c3   :  { %v13616_v48 = vpop.f32.mrb[182].mxu1  ;;  %v18141_v12 = vpop.f32.mrb[158].mxu0 }
 0x9c4   :  { %v5572_v0 = vpack.c.bf16 %v13616_v48, %v13615_v32  ;;  %v5543_v9 = vpop.f32.mrb[183].mxu1  ;;  %v6202_v33 = vpack.c.bf16 %v18141_v12, %v18137_v51  ;;  %v18145_v31 = vpop.f32.mrb[159].mxu0  ;;  %v15292_v51 = vld [vmem:[%s19269_s6 + $0x68] sm:$0xff]   ;;  %v15070_v12 = vld [vmem:[%s19265_s2 + $0xe0] sm:$0xff]  }
 0x9c5   :  { %v5571_v25 = vpack.c.bf16 %v5543_v9, %v5540_v52  ;;  %v6201_v35 = vpack.c.bf16 %v18145_v31, %v18139_v23  ;;  %v15291_v23 = vld [vmem:[%s19269_s6 + $0x60] sm:$0xff]  }
 0x9c7   :  { %13625 = vmatprep.mubr.msk.bf16.mxu1 %vm1929_vm0, %v5571_v25 }
 0x9c8   :  { %13626 = vmatmul.mubr.msk.bf16.vlgmr.msra.gmra.mrb[188].mxu1 %vm1929_vm0, %v5572_v0 }
 0x9c9   :  { %v13619_v22 = vpop.f32.mrb[184].mxu1  ;;  %13634 = vmatpush3.bf16.msra.mxu1 %v18072_v54  ;;  %v18208_v60 = vpop.f32.mrb[160].mxu0 }
 0x9ca   :  { %v5556_v20 = vpop.f32.mrb[185].mxu1  ;;  %13635 = vmatprep.subr.bf16.mxu1 %v15282_v46  ;;  %v6186_v41 = vpop.f32.mrb[161].mxu0 }
 0x9cb   :  { %v13620_v7 = vpop.f32.mrb[186].mxu1  ;;  %v18210_v5 = vpop.f32.mrb[162].mxu0 }
 0x9cc   :  { %v5574_v8 = vpack.c.bf16 %v13620_v7, %v13619_v22  ;;  %v5559_v42 = vpop.f32.mrb[187].mxu1  ;;  %v6189_v3 = vpop.f32.mrb[163].mxu0  ;;  %v6204_v13 = vpack.c.bf16 %v18210_v5, %v18208_v60  ;;  %v15076_v7 = vld [vmem:[%s19265_s2 + $0x110] sm:$0xff]  }
 0x9cd   :  { %v5573_v55 = vpack.c.bf16 %v5559_v42, %v5556_v20  ;;  %13636 = vmatpush3.bf16.msra.mxu1 %v15282_v46  ;;  %v15074_v20 = vld [vmem:[%s19265_s2 + $0x100] sm:$0xff]   ;;  %v15075_v46 = vld [vmem:[%s19265_s2 + $0x108] sm:$0xff]  }
 0x9ce   :  { %13669 = vmatprep.subr.bf16.mxu1 %v15283_v38  ;;  %13877 = vmatprep.mubr.bf16.mxu0 %v15074_v20 }
 0x9cf   :  { %13629 = vmatprep.mubr.msk.bf16.mxu1 %vm1929_vm0, %v5573_v55  ;;  %13878 = vmatmul.mubr.bf16.vlgmr.msra.gmra.mrb[180].mxu0 %v15075_v46 }
 0x9d0   :  { %13630 = vmatmul.mubr.msk.bf16.gmra.mrb[192].mxu1 %vm1929_vm0, %v5574_v8  ;;  %13881 = vmatprep.mubr.bf16.mxu0 %v15076_v7  ;;  %v15077_v8 = vld [vmem:[%s19265_s2 + $0x118] sm:$0xff]  }
 0x9d1   :  { %13637 = vmatprep.mubr.msk.bf16.mxu1 %vm1929_vm0, %v5469_v24 }
 0x9d7   :  { %13882 = vmatmul.mubr.bf16.gmra.mrb[184].mxu0 %v15077_v8 }
 0x9d8   :  { %13638 = vmatmul.mubr.msk.bf16.vlgmr.msra.gmra.mrb[188].mxu1 %vm1929_vm0, %v5470_v19  ;;  %v6203_v19 = vpack.c.bf16 %v6189_v3, %v6186_v41 }
 0x9d9   :  { %13670 = vmatpush3.bf16.msra.mxu1 %v15283_v38  ;;  %13641 = vmatprep.mubr.msk.bf16.mxu1 %vm1929_vm0, %v5471_v26 }
 0x9da   :  { %13671 = vmatprep.subr.bf16.mxu1 %v15284_v34 }
 0x9dd   :  { %13672 = vmatpush3.bf16.msra.mxu1 %v15284_v34 }
 0x9de   :  { %13681 = vmatprep.subr.bf16.mxu1 %v17881_v15 }
 0x9e0   :  { %13642 = vmatmul.mubr.msk.bf16.gmra.mrb[192].mxu1 %vm1929_vm0, %v5472_v6 }
 0x9e1   :  { %13673 = vmatprep.mubr.msk.bf16.mxu1 %vm1929_vm0, %v5827_v18  ;;  %v18214_v47 = vpop.f32.mrb[164].mxu0 }
 0x9e8   :  { %13674 = vmatmul.mubr.msk.bf16.vlgmr.msra.gmra.mrb[188].mxu1 %vm1929_vm0, %v5828_v4  ;;  %v18216_v4 = vpop.f32.mrb[165].mxu0 }
 0x9e9   :  { %13682 = vmatpush3.bf16.msra.mxu1 %v17881_v15  ;;  %13677 = vmatprep.mubr.msk.bf16.mxu1 %vm1929_vm0, %v5829_v45  ;;  %v18218_v44 = vpop.f32.mrb[166].mxu0 }
 0x9ea   :  { %13683 = vmatprep.subr.bf16.mxu1 %v17896_v58  ;;  %v6389_v24 = vpack.c.bf16 %v18218_v44, %v18214_v47  ;;  %v6360_v18 = vpop.f32.mrb[167].mxu0 }
 0x9eb   :  { %v6388_v29 = vpack.c.bf16 %v6360_v18, %v18216_v4  ;;  %v18223_v43 = vpop.f32.mrb[168].mxu0  ;;  %v15289_v4 = vld [vmem:[%s19269_s6 + $0x50] sm:$0xff]  }
 0x9ec   :  { %v6373_v21 = vpop.f32.mrb[169].mxu0 }
 0x9ed   :  { %13684 = vmatpush3.bf16.msra.mxu1 %v17896_v58  ;;  %v18225_v28 = vpop.f32.mrb[170].mxu0 }
 0x9ee   :  { %13685 = vmatprep.subr.bf16.mxu1 %v17924_v49  ;;  %v6391_v57 = vpack.c.bf16 %v18225_v28, %v18223_v43  ;;  %v6376_v62 = vpop.f32.mrb[171].mxu0 }
 0x9ef   :  { %v6390_v6 = vpack.c.bf16 %v6376_v62, %v6373_v21 }
 0x9f0   :  { %13678 = vmatmul.mubr.msk.bf16.gmra.mrb[192].mxu1 %vm1929_vm0, %v5830_v39 }
 0x9f1   :  { %13686 = vmatpush3.bf16.msra.mxu1 %v17924_v49  ;;  %13697 = vmatprep.mubr.bf16.mxu1 %v15064_v53 }
 0x9f2   :  { %13687 = vmatprep.subr.bf16.mxu1 %v17931_v11 }
 0x9f5   :  { %13688 = vmatpush3.bf16.msra.mxu1 %v17931_v11 }
 0x9f6   :  { %13689 = vmatprep.subr.bf16.mxu1 %v17941_v37 }
 0x9f9   :  { %13690 = vmatpush3.bf16.msra.mxu1 %v17941_v37 }
 0x9fa   :  { %13691 = vmatprep.subr.bf16.mxu1 %v17949_v17 }
 0x9fd   :  { %13692 = vmatpush3.bf16.msra.mxu1 %v17949_v17 }
 0x9fe   :  { %13693 = vmatprep.subr.bf16.mxu1 %v17959_v14 }
 0xa01   :  { %13694 = vmatpush3.bf16.msra.mxu1 %v17959_v14  ;;  %v18229_v40 = vpop.f32.mrb[172].mxu0 }
 0xa02   :  { %13695 = vmatprep.subr.bf16.mxu1 %v17965_v63  ;;  %v6544_v39 = vpop.f32.mrb[173].mxu0 }
 0xa03   :  { %v13808_v1 = vpop.f32.mrb[174].mxu0 }
 0xa04   :  { %v6576_v26 = vpack.c.bf16 %v13808_v1, %v18229_v40  ;;  %v6547_v45 = vpop.f32.mrb[175].mxu0 }
 0xa05   :  { %13696 = vmatpush3.bf16.msra.mxu1 %v17965_v63  ;;  %v6575_v32 = vpack.c.bf16 %v6547_v45, %v6544_v39  ;;  %v15296_v39 = vld [vmem:[%s19269_s6 + $0x88] sm:$0xff]  }
 0xa06   :  { %13705 = vmatprep.subr.bf16.mxu1 %v15285_v27 }
 0xa08   :  { %13698 = vmatmul.mubr.bf16.vlgmr.msra.gmra.mrb[196].mxu1 %v15065_v61 }
 0xa09   :  { %13701 = vmatprep.mubr.bf16.mxu1 %v15066_v16  ;;  %13706 = vmatpush3.bf16.msra.mxu1 %v15285_v27  ;;  %v18232_v52 = vpop.f32.mrb[176].mxu0 }
 0xa0a   :  { %13707 = vmatprep.subr.bf16.mxu1 %v15286_v56  ;;  %v6560_v48 = vpop.f32.mrb[177].mxu0 }
 0xa0b   :  { %v13812_v0 = vpop.f32.mrb[178].mxu0 }
 0xa0c   :  { %v6563_v9 = vpop.f32.mrb[179].mxu0  ;;  %v6578_v25 = vpack.c.bf16 %v13812_v0, %v18232_v52 }
 0xa0d   :  { %13708 = vmatpush3.bf16.msra.mxu1 %v15286_v56  ;;  %v6577_v22 = vpack.c.bf16 %v6563_v9, %v6560_v48  ;;  %v15288_v56 = vld [vmem:[%s19269_s6 + $0x48] sm:$0xff]  }
 0xa0e   :  { %13741 = vmatprep.subr.bf16.mxu1 %v15287_v50 }
 0xa10   :  { %13702 = vmatmul.mubr.bf16.gmra.mrb[200].mxu1 %v15067_v30 }
 0xadb   :  { %v13699_v42 = vpop.f32.mrb[196].mxu1 }
 0xadc   :  { %v5983_v55 = vpop.f32.mrb[197].mxu1 }
 0xadd   :  { %v13700_v38 = vpop.f32.mrb[198].mxu1 }
 0xade   :  { %v6015_v34 = vpack.c.bf16 %v13700_v38, %v13699_v42  ;;  %v5986_v53 = vpop.f32.mrb[199].mxu1 }
 0xadf   :  { %v6014_v61 = vpack.c.bf16 %v5986_v53, %v5983_v55 }
 0xae1   :  { %13709 = vmatprep.mubr.msk.bf16.mxu1 %vm1929_vm0, %v6014_v61 }
 0xae2   :  { %13710 = vmatmul.mubr.msk.bf16.vlgmr.msra.gmra.mrb[188].mxu1 %vm1929_vm0, %v6015_v34 }
 0xae3   :  { %v13703_v16 = vpop.f32.mrb[200].mxu1  ;;  %13742 = vmatpush3.bf16.msra.mxu1 %v15287_v50  ;;  %v15290_v50 = vld [vmem:[%s19269_s6 + $0x58] sm:$0xff]  }
 0xae4   :  { %v5999_v27 = vpop.f32.mrb[201].mxu1  ;;  %13743 = vmatprep.subr.bf16.mxu1 %v15288_v56 }
 0xae5   :  { %v13704_v30 = vpop.f32.mrb[202].mxu1 }
 0xae6   :  { %v6017_v41 = vpack.c.bf16 %v13704_v30, %v13703_v16  ;;  %v6002_v3 = vpop.f32.mrb[203].mxu1 }
 0xae7   :  { %v6016_v47 = vpack.c.bf16 %v6002_v3, %v5999_v27  ;;  %13744 = vmatpush3.bf16.msra.mxu1 %v15288_v56 }
 0xae8   :  { %13777 = vmatprep.subr.bf16.mxu1 %v15289_v4 }
 0xae9   :  { %13713 = vmatprep.mubr.msk.bf16.mxu1 %vm1929_vm0, %v6016_v47 }
 0xaea   :  { %13714 = vmatmul.mubr.msk.bf16.gmra.mrb[192].mxu1 %vm1929_vm0, %v6017_v41 }
 0xaeb   :  { %13745 = vmatprep.mubr.msk.bf16.mxu1 %vm1929_vm0, %v6201_v35 }
 0xaf2   :  { %13746 = vmatmul.mubr.msk.bf16.vlgmr.msra.gmra.mrb[188].mxu1 %vm1929_vm0, %v6202_v33 }
 0xaf3   :  { %13749 = vmatprep.mubr.msk.bf16.mxu1 %vm1929_vm0, %v6203_v19  ;;  %13778 = vmatpush3.bf16.msra.mxu1 %v15289_v4 }
 0xaf4   :  { %13779 = vmatprep.subr.bf16.mxu1 %v15290_v50 }
 0xaf7   :  { %13780 = vmatpush3.bf16.msra.mxu1 %v15290_v50 }
 0xaf8   :  { %13813 = vmatprep.subr.bf16.mxu1 %v15291_v23 }
 0xafa   :  { %13750 = vmatmul.mubr.msk.bf16.gmra.mrb[192].mxu1 %vm1929_vm0, %v6204_v13 }
 0xafb   :  { %13781 = vmatprep.mubr.msk.bf16.mxu1 %vm1929_vm0, %v6388_v29 }
 0xb02   :  { %13782 = vmatmul.mubr.msk.bf16.vlgmr.msra.gmra.mrb[188].mxu1 %vm1929_vm0, %v6389_v24 }
 0xb03   :  { %13814 = vmatpush3.bf16.msra.mxu1 %v15291_v23  ;;  %13785 = vmatprep.mubr.msk.bf16.mxu1 %vm1929_vm0, %v6390_v6 }
 0xb04   :  { %13815 = vmatprep.subr.bf16.mxu1 %v15292_v51 }
 0xb07   :  { %13816 = vmatpush3.bf16.msra.mxu1 %v15292_v51 }
 0xb08   :  { %13825 = vmatprep.subr.bf16.mxu1 %v17881_v15 }
 0xb0a   :  { %13786 = vmatmul.mubr.msk.bf16.gmra.mrb[192].mxu1 %vm1929_vm0, %v6391_v57 }
 0xb0b   :  { %13817 = vmatprep.mubr.msk.bf16.mxu1 %vm1929_vm0, %v6575_v32 }
 0xb12   :  { %13818 = vmatmul.mubr.msk.bf16.vlgmr.msra.gmra.mrb[188].mxu1 %vm1929_vm0, %v6576_v26 }
 0xb13   :  { %13826 = vmatpush3.bf16.msra.mxu1 %v17881_v15  ;;  %13821 = vmatprep.mubr.msk.bf16.mxu1 %vm1929_vm0, %v6577_v22  ;;  %v15071_v15 = vld [vmem:[%s19265_s2 + $0xe8] sm:$0xff]  }
 0xb14   :  { %13827 = vmatprep.subr.bf16.mxu1 %v17896_v58 }
 0xb17   :  { %13828 = vmatpush3.bf16.msra.mxu1 %v17896_v58  ;;  %v15072_v58 = vld [vmem:[%s19265_s2 + $0xf0] sm:$0xff]  }
 0xb18   :  { %13829 = vmatprep.subr.bf16.mxu1 %v17924_v49 }
 0xb1a   :  { %13822 = vmatmul.mubr.msk.bf16.gmra.mrb[192].mxu1 %vm1929_vm0, %v6578_v25 }
 0xb1b   :  { %13830 = vmatpush3.bf16.msra.mxu1 %v17924_v49  ;;  %13841 = vmatprep.mubr.bf16.mxu1 %v15070_v12  ;;  %v15293_v49 = vld [vmem:[%s19269_s6 + $0x70] sm:$0xff]  }
 0xb1c   :  { %13831 = vmatprep.subr.bf16.mxu1 %v17931_v11 }
 0xb1f   :  { %13832 = vmatpush3.bf16.msra.mxu1 %v17931_v11  ;;  %v15294_v11 = vld [vmem:[%s19269_s6 + $0x78] sm:$0xff]  }
 0xb20   :  { %13833 = vmatprep.subr.bf16.mxu1 %v17941_v37 }
 0xb23   :  { %13834 = vmatpush3.bf16.msra.mxu1 %v17941_v37  ;;  %v15073_v37 = vld [vmem:[%s19265_s2 + $0xf8] sm:$0xff]  }
 0xb24   :  { %13835 = vmatprep.subr.bf16.mxu1 %v17949_v17 }
 0xb27   :  { %13836 = vmatpush3.bf16.msra.mxu1 %v17949_v17  ;;  %v15295_v17 = vld [vmem:[%s19269_s6 + $0x80] sm:$0xff]  }
 0xb28   :  { %13837 = vmatprep.subr.bf16.mxu1 %v17959_v14 }
 0xb2b   :  { %13838 = vmatpush3.bf16.msra.mxu1 %v17959_v14  ;;  %v13879_v14 = vpop.f32.mrb[180].mxu0 }
 0xb2c   :  { %13839 = vmatprep.subr.bf16.mxu1 %v17965_v63 }
 0xb2f   :  { %13840 = vmatpush3.bf16.msra.mxu1 %v17965_v63  ;;  %v6918_v63 = vpop.f32.mrb[181].mxu0 }
 0xb30   :  { %13849 = vmatprep.subr.bf16.mxu1 %v15293_v49  ;;  %v13880_v33 = vpop.f32.mrb[182].mxu0 }
 0xb31   :  { %v6950_v31 = vpack.c.bf16 %v13880_v33, %v13879_v14  ;;  %v6921_v35 = vpop.f32.mrb[183].mxu0 }
 0xb32   :  { %13842 = vmatmul.mubr.bf16.vlgmr.msra.gmra.mrb[204].mxu1 %v15071_v15  ;;  %v6949_v60 = vpack.c.bf16 %v6921_v35, %v6918_v63  ;;  %v13883_v5 = vpop.f32.mrb[184].mxu0 }
 0xb33   :  { %13845 = vmatprep.mubr.bf16.mxu1 %v15072_v58  ;;  %13850 = vmatpush3.bf16.msra.mxu1 %v15293_v49  ;;  %v6934_v13 = vpop.f32.mrb[185].mxu0 }
 0xb34   :  { %13851 = vmatprep.subr.bf16.mxu1 %v15294_v11  ;;  %v13884_v19 = vpop.f32.mrb[186].mxu0 }
 0xb35   :  { %v6952_v44 = vpack.c.bf16 %v13884_v19, %v13883_v5  ;;  %v6937_v24 = vpop.f32.mrb[187].mxu0 }
 0xb36   :  { %v6951_v18 = vpack.c.bf16 %v6937_v24, %v6934_v13 }
 0xb37   :  { %13852 = vmatpush3.bf16.msra.mxu1 %v15294_v11 }
 0xb38   :  { %13885 = vmatprep.subr.bf16.mxu1 %v15295_v17 }
 0xb3a   :  { %13846 = vmatmul.mubr.bf16.gmra.mrb[208].mxu1 %v15073_v37 }
 0xc05   :  { %v13843_v29 = vpop.f32.mrb[204].mxu1 }
 0xc06   :  { %v6731_v43 = vpop.f32.mrb[205].mxu1 }
 0xc07   :  { %v13844_v21 = vpop.f32.mrb[206].mxu1 }
 0xc08   :  { %v6763_v28 = vpack.c.bf16 %v13844_v21, %v13843_v29  ;;  %v6734_v57 = vpop.f32.mrb[207].mxu1 }
 0xc09   :  { %v6762_v62 = vpack.c.bf16 %v6734_v57, %v6731_v43 }
 0xc0b   :  { %13853 = vmatprep.mubr.msk.bf16.mxu1 %vm1929_vm0, %v6762_v62 }
 0xc0c   :  { %13854 = vmatmul.mubr.msk.bf16.vlgmr.msra.gmra.mrb[188].mxu1 %vm1929_vm0, %v6763_v28 }
 0xc0d   :  { %v13847_v6 = vpop.f32.mrb[208].mxu1  ;;  %13886 = vmatpush3.bf16.msra.mxu1 %v15295_v17 }
 0xc0e   :  { %v6747_v40 = vpop.f32.mrb[209].mxu1  ;;  %13887 = vmatprep.subr.bf16.mxu1 %v15296_v39 }
 0xc0f   :  { %v13848_v1 = vpop.f32.mrb[210].mxu1 }
 0xc10   :  { %v6765_v26 = vpack.c.bf16 %v13848_v1, %v13847_v6  ;;  %v6750_v45 = vpop.f32.mrb[211].mxu1 }
 0xc11   :  { %v6764_v32 = vpack.c.bf16 %v6750_v45, %v6747_v40  ;;  %13888 = vmatpush3.bf16.msra.mxu1 %v15296_v39 }
 0xc12   :  { %13921 = vmatprep.subr.bf16.mxu1 %v18043_v36 }
 0xc13   :  { %13857 = vmatprep.mubr.msk.bf16.mxu1 %vm1929_vm0, %v6764_v32 }
 0xc14   :  { %13858 = vmatmul.mubr.msk.bf16.gmra.mrb[192].mxu1 %vm1929_vm0, %v6765_v26 }
 0xc15   :  { %13889 = vmatprep.mubr.msk.bf16.mxu1 %vm1929_vm0, %v6949_v60 }
 0xc1c   :  { %13890 = vmatmul.mubr.msk.bf16.vlgmr.msra.gmra.mrb[188].mxu1 %vm1929_vm0, %v6950_v31 }
 0xc1d   :  { %13893 = vmatprep.mubr.msk.bf16.mxu1 %vm1929_vm0, %v6951_v18  ;;  %13922 = vmatpush3.bf16.msra.mxu1 %v18043_v36 }
 0xc1e   :  { %13923 = vmatprep.subr.bf16.mxu1 %v18058_v10 }
 0xc21   :  { %13924 = vmatpush3.bf16.msra.mxu1 %v18058_v10 }
 0xc22   :  { %13929 = vmatprep.subr.bf16.mxu1 %v18072_v54 }
 0xc24   :  { %13894 = vmatmul.mubr.msk.bf16.gmra.mrb[192].mxu1 %vm1929_vm0, %v6952_v44 }
 0xcef   :  { %v18343_v52 = vpop.f32.mrb[188].mxu1 }
 0xcf0   :  { %v18345_v48 = vpop.f32.mrb[189].mxu1  ;;  %v7052_v0 = vsel %vm1929_vm0, %v18343_v52, 0.0  ;;  %v7072_v54 = vmul.f32 %v18343_v52, %v18343_v52 }
 0xcf1   :  { %7053 = vadd.xlane.f32.xlu0 %v7052_v0  ;;  %v18349_v9 = vpop.f32.mrb[190].mxu1  ;;  %v7046_v10 = vsel %vm1929_vm0, %v18345_v48, 0.0  ;;  %v7070_v42 = vmul.f32 %v18345_v48, %v18345_v48 }
 0xcf2   :  { %v18351_v25 = vpop.f32.mrb[191].mxu1  ;;  %v7055_v36 = vsel %vm1929_vm0, %v18349_v9, 0.0  ;;  %v7073_v20 = vmul.f32 %v18349_v9, %v18349_v9  ;;  %v7084_v8 = vsel %vm1929_vm0, %v7072_v54, 0.0 }
 0xcf3   :  { %7056 = vadd.xlane.f32.xlu1 %v7055_v36  ;;  %v7049_v22 = vsel %vm1929_vm0, %v18351_v25, 0.0  ;;  %v7078_v53 = vsel %vm1929_vm0, %v7070_v42, 0.0  ;;  %v7071_v61 = vmul.f32 %v18351_v25, %v18351_v25 }
 0xcf4   :  { %v7087_v34 = vsel %vm1929_vm0, %v7073_v20, 0.0 }
 0xcf5   :  { %7047 = vadd.xlane.f32.xlu0 %v7046_v10  ;;  %v7081_v27 = vsel %vm1929_vm0, %v7071_v61, 0.0 }
 0xcf7   :  { %7050 = vadd.xlane.f32.xlu1 %v7049_v22  ;;  %v18363_v46 = vpop.f32.mrb[192].mxu1 }
 0xcf8   :  { %v18365_v7 = vpop.f32.mrb[193].mxu1  ;;  %v7064_v41 = vsel %vm1929_vm0, %v18363_v46, 0.0  ;;  %v7076_v12 = vmul.f32 %v18363_v46, %v18363_v46 }
 0xcf9   :  { %7085 = vadd.xlane.f32.xlu0 %v7084_v8  ;;  %v18370_v55 = vpop.f32.mrb[194].mxu1  ;;  %v7058_v4 = vsel %vm1929_vm0, %v18365_v7, 0.0  ;;  %v7074_v50 = vmul.f32 %v18365_v7, %v18365_v7 }
 0xcfa   :  { %v18372_v38 = vpop.f32.mrb[195].mxu1  ;;  %v7067_v16 = vsel %vm1929_vm0, %v18370_v55, 0.0  ;;  %v7077_v3 = vmul.f32 %v18370_v55, %v18370_v55  ;;  %v7096_v15 = vsel %vm1929_vm0, %v7076_v12, 0.0 }
 0xcfb   :  { %7088 = vadd.xlane.f32.xlu1 %v7087_v34  ;;  %v7075_v56 = vmul.f32 %v18372_v38, %v18372_v38  ;;  %v7061_v30 = vsel %vm1929_vm0, %v18372_v38, 0.0  ;;  %v7090_v51 = vsel %vm1929_vm0, %v7074_v50, 0.0 }
 0xcfc   :  { %v7099_v23 = vsel %vm1929_vm0, %v7077_v3, 0.0 }
 0xcfd   :  { %7079 = vadd.xlane.f32.xlu0 %v7078_v53  ;;  %v7093_v47 = vsel %vm1929_vm0, %v7075_v56, 0.0  ;;  %v18420_v56 = vld [vmem:[%s19273_s10 + $0x10] sm:$0xff] }
 0xcff   :  { %7068 = vadd.xlane.f32.xlu1 %v7067_v16 }
 0xd01   :  { %7082 = vadd.xlane.f32.xlu0 %v7081_v27 }
 0xd03   :  { %7062 = vadd.xlane.f32.xlu1 %v7061_v30 }
 0xd05   :  { %7065 = vadd.xlane.f32.xlu0 %v7064_v41 }
 0xd07   :  { %7094 = vadd.xlane.f32.xlu1 %v7093_v47 }
 0xd09   :  { %7059 = vadd.xlane.f32.xlu0 %v7058_v4 }
 0xd0b   :  { %7100 = vadd.xlane.f32.xlu1 %v7099_v23 }
 0xd0d   :  { %7091 = vadd.xlane.f32.xlu0 %v7090_v51 }
 0xd11   :  { %7097 = vadd.xlane.f32.xlu0 %v7096_v15 }
 0xd7e   :  { %v7054_v58 = vpop.xlane.xlu0 %7053 }
 0xd7f   :  { %v7104_v37 = vmul.f32 0.03125, %v7054_v58 }
 0xd80   :  { %v7057_v49 = vpop.xlane.xlu1 %7056 }
 0xd81   :  { %v18399_v14 = vmul.f32 0.03125, %v7057_v49  ;;  %v7120_v33 = vmul.f32 %v7104_v37, %v7104_v37 }
 0xd82   :  { %v7048_v11 = vpop.xlane.xlu0 %7047 }
 0xd83   :  { %v18401_v31 = vmul.f32 0.03125, %v7048_v11  ;;  %v7121_v5 = vmul.f32 %v18399_v14, %v18399_v14  ;;  %v7038_v11 = vld [vmem:[%s19273_s10] sm:$0xff] }
 0xd84   :  { %v7051_v17 = vpop.xlane.xlu1 %7050 }
 0xd85   :  { %v7118_v24 = vmul.f32 %v18401_v31, %v18401_v31  ;;  %v18407_v21 = vmul.f32 0.03125, %v7051_v17 }
 0xd86   :  { %v7086_v63 = vpop.xlane.xlu0 %7085 }
 0xd87   :  { %v7112_v35 = vmul.f32 0.03125, %v7086_v63  ;;  %v7119_v1 = vmul.f32 %v18407_v21, %v18407_v21 }
 0xd88   :  { %v7089_v60 = vpop.xlane.xlu1 %7088 }
 0xd89   :  { %v7128_v13 = vsub.f32 %v7112_v35, %v7120_v33  ;;  %v7113_v19 = vmul.f32 0.03125, %v7089_v60 }
 0xd8a   :  { %v7080_v44 = vpop.xlane.xlu0 %7079 }
 0xd8b   :  { %v7136_v18 = vmax.f32 %v7128_v13, 0.0  ;;  %v7129_v29 = vsub.f32 %v7113_v19, %v7121_v5  ;;  %v7110_v43 = vmul.f32 0.03125, %v7080_v44 }
 0xd8c   :  { %v7069_v28 = vpop.xlane.xlu1 %7068 }
 0xd8d   :  { %v7144_v57 = vadd.f32 1e-05, %v7136_v18  ;;  %v7126_v62 = vsub.f32 %v7110_v43, %v7118_v24  ;;  %v7137_v40 = vmax.f32 %v7129_v29, 0.0  ;;  %v18413_v8 = vmul.f32 0.03125, %v7069_v28  ;;  %v7039_v29 = vld [vmem:[%s19273_s10 + $0x8] sm:$0xff] }
 0xd8e   :  { %v7083_v6 = vpop.xlane.xlu0 %7082 }
 0xd8f   :  { %15187 = vrsqrt.f32 %v7144_v57  ;;  %v7134_v39 = vmax.f32 %v7126_v62, 0.0  ;;  %v7111_v26 = vmul.f32 0.03125, %v7083_v6  ;;  %v7145_v54 = vadd.f32 1e-05, %v7137_v40  ;;  %v7041_v62 = vld [vmem:[%s19273_s10 + $0x18] sm:$0xff] }
 0xd90   :  { %v7063_v45 = vpop.xlane.xlu1 %7062  ;;  %v7125_v3 = vmul.f32 %v18413_v8, %v18413_v8 }
 0xd91   :  { %v7142_v32 = vadd.f32 1e-05, %v7134_v39  ;;  %v18411_v0 = vmul.f32 0.03125, %v7063_v45  ;;  %v7127_v36 = vsub.f32 %v7111_v26, %v7119_v1  ;;  %v7043_v26 = vld [vmem:[%s19273_s10 + $0x28] sm:$0xff] }
 0xd92   :  { %v7066_v10 = vpop.xlane.xlu0 %7065 }
 0xd93   :  { %15189 = vrsqrt.f32 %v7142_v32  ;;  %v7135_v22 = vmax.f32 %v7127_v36, 0.0  ;;  %v7123_v42 = vmul.f32 %v18411_v0, %v18411_v0  ;;  %v7108_v50 = vmul.f32 0.03125, %v7066_v10  ;;  %v7045_v10 = vld [vmem:[%s19273_s10 + $0x38] sm:$0xff] }
 0xd94   :  { %v7095_v20 = vpop.xlane.xlu1 %7094  ;;  %15191 = vrsqrt.f32 %v7145_v54 }
 0xd95   :  { %v7115_v34 = vmul.f32 0.03125, %v7095_v20  ;;  %v7143_v53 = vadd.f32 1e-05, %v7135_v22  ;;  %v7124_v13 = vmul.f32 %v7108_v50, %v7108_v50 }
 0xd96   :  { %v7060_v61 = vpop.xlane.xlu0 %7059 }
 0xd97   :  { %v7131_v16 = vsub.f32 %v7115_v34, %v7123_v42  ;;  %v7106_v27 = vmul.f32 0.03125, %v7060_v61  ;;  %15193 = vrsqrt.f32 %v7143_v53 }
 0xd98   :  { %v7101_v30 = vpop.xlane.xlu1 %7100 }
 0xd99   :  { %v15188_v41 = vpop.eup %15187  ;;  %v7139_v47 = vmax.f32 %v7131_v16, 0.0  ;;  %v7117_v4 = vmul.f32 0.03125, %v7101_v30  ;;  %v7122_v15 = vmul.f32 %v7106_v27, %v7106_v27 }
 0xd9a   :  { %v7092_v23 = vpop.xlane.xlu0 %7091  ;;  %v7160_v51 = vmul.f32 %v15188_v41, %v18420_v56 }
 0xd9b   :  { %v7147_v12 = vadd.f32 1e-05, %v7139_v47  ;;  %v7133_v58 = vsub.f32 %v7117_v4, %v7125_v3  ;;  %v7114_v49 = vmul.f32 0.03125, %v7092_v23 }
 0xd9c   :  { %v7168_v17 = vmul.f32 %v7160_v51, %v7104_v37 }
 0xd9d   :  { %v15190_v63 = vpop.eup %15189  ;;  %15195 = vrsqrt.f32 %v7147_v12  ;;  %v7141_v33 = vmax.f32 %v7133_v58, 0.0  ;;  %v7130_v35 = vsub.f32 %v7114_v49, %v7122_v15 }
 0xd9e   :  { %v7098_v60 = vpop.xlane.xlu0 %7097  ;;  %7186 = vrot.lane.b32.xlu1 %v7168_v17, %s15332_s8  ;;  %v7158_v5 = vmul.f32 %v15190_v63, %v7038_v11  ;;  %v15192_v43 = vpop.eup %15191  ;;  %v15078_v63 = vld [vmem:[%s19266_s3] sm:$0xff]  }
 0xd9f   :  { %v7149_v19 = vadd.f32 1e-05, %v7141_v33  ;;  %v7138_v44 = vmax.f32 %v7130_v35, 0.0  ;;  %v7116_v24 = vmul.f32 0.03125, %v7098_v60  ;;  %v7161_v1 = vmul.f32 %v15192_v43, %v7041_v62  ;;  %13905 = vmatprep.mubr.msk.bf16.mxu0 %vm7400_vm1, %v15078_v63 }
 0xda0   :  { %v7166_v18 = vmul.f32 %v7158_v5, %v18401_v31 }
 0xda1   :  { %15197 = vrsqrt.f32 %v7149_v19  ;;  %v7146_v37 = vadd.f32 1e-05, %v7138_v44  ;;  %v7132_v28 = vsub.f32 %v7116_v24, %v7124_v13  ;;  %v15194_v57 = vpop.eup %15193  ;;  %v7169_v32 = vmul.f32 %v7161_v1, %v18399_v14  ;;  %v7044_v14 = vld [vmem:[%s19273_s10 + $0x30] sm:$0xff] }
 0xda2   :  { %7182 = vrot.lane.b32.xlu0 %v7166_v18, %s15332_s8  ;;  %v7159_v40 = vmul.f32 %v15194_v57, %v7039_v29 }
 0xda3   :  { %15199 = vrsqrt.f32 %v7146_v37  ;;  %v7140_v6 = vmax.f32 %v7132_v28, 0.0 }
 0xda4   :  { %v7167_v31 = vmul.f32 %v7159_v40, %v18407_v21  ;;  %v7042_v21 = vld [vmem:[%s19273_s10 + $0x20] sm:$0xff] }
 0xda5   :  { %v7148_v39 = vadd.f32 1e-05, %v7140_v6 }
 0xda6   :  { %7184 = vrot.lane.b32.xlu1 %v7167_v31, %s15332_s8 }
 0xda7   :  { %v15196_v45 = vpop.eup %15195  ;;  %15201 = vrsqrt.f32 %v7148_v39 }
 0xda8   :  { %v7163_v36 = vmul.f32 %v15196_v45, %v7043_v26 }
 0xdaa   :  { %7188 = vrot.lane.b32.xlu1 %v7169_v32, %s15332_s8  ;;  %v7171_v20 = vmul.f32 %v7163_v36, %v18411_v0 }
 0xdab   :  { %v15198_v54 = vpop.eup %15197 }
 0xdac   :  { %v7165_v42 = vmul.f32 %v15198_v54, %v7045_v10 }
 0xdad   :  { %v15200_v22 = vpop.eup %15199 }
 0xdae   :  { %v7162_v34 = vmul.f32 %v15200_v22, %v7042_v21  ;;  %7192 = vrot.lane.b32.xlu1 %v7171_v20, %s15332_s8  ;;  %v7173_v16 = vmul.f32 %v7165_v42, %v18413_v8 }
 0xdb0   :  { %v7170_v53 = vmul.f32 %v7162_v34, %v7106_v27 }
 0xdb1   :  { %v15202_v61 = vpop.eup %15201 }
 0xdb2   :  { %7190 = vrot.lane.b32.xlu0 %v7170_v53, %s15332_s8  ;;  %v7164_v30 = vmul.f32 %v15202_v61, %v7044_v14  ;;  %7196 = vrot.lane.b32.xlu1 %v7173_v16, %s15332_s8 }
 0xdb4   :  { %v7172_v41 = vmul.f32 %v7164_v30, %v7108_v50 }
 0xdb6   :  { %7194 = vrot.lane.b32.xlu0 %v7172_v41, %s15332_s8  ;;  %7221 = vperm.xlu1 %14780, %v7159_v40  }
 0xdba   :  { %7216 = vperm.xlu0 %14779, %v7158_v5   ;;  %7226 = vperm.xlu1 %14780, %v7160_v51  }
 0xdbe   :  { %7236 = vperm.xlu0 %14779, %v7162_v34   ;;  %7231 = vperm.xlu1 %14780, %v7161_v1  }
 0xdc2   :  { %14782 = vset.pattern.permute.xlu0 %v15333_v2  ;;  %14781 = vset.pattern.permute.xlu1 %v15333_v2 }
 0xe10   :  { %v7187_v27 = vpop.permute.xlu1 %7186 }
 0xe11   :  { %v7208_v50 = vsub.f32 %v18420_v56, %v7187_v27 }
 0xe14   :  { %v7183_v0 = vpop.permute.xlu0 %7182 }
 0xe15   :  { %v7206_v8 = vsub.f32 %v7038_v11, %v7183_v0 }
 0xe17   :  { %7264 = vperm.xlu1 %14781, %v7206_v8  }
 0xe18   :  { %v7185_v3 = vpop.permute.xlu1 %7184 }
 0xe19   :  { %v7207_v47 = vsub.f32 %v7039_v29, %v7185_v3 }
 0xe1b   :  { %7269 = vperm.xlu0 %14782, %v7207_v47  }
 0xe1c   :  { %v7189_v4 = vpop.permute.xlu1 %7188 }
 0xe1d   :  { %v7209_v23 = vsub.f32 %v7041_v62, %v7189_v4 }
 0xe1f   :  { %7274 = vperm.xlu0 %14782, %v7208_v50   ;;  %7279 = vperm.xlu1 %14781, %v7209_v23  }
 0xe20   :  { %v7193_v51 = vpop.permute.xlu1 %7192 }
 0xe21   :  { %v7211_v12 = vsub.f32 %v7043_v26, %v7193_v51 }
 0xe23   :  { %14783 = vset.pattern.permute.xlu1 %v15331_v59  ;;  %7289 = vperm.xlu0 %14782, %v7211_v12  }
 0xe24   :  { %v7191_v15 = vpop.permute.xlu0 %7190  ;;  %7241 = vperm.xlu1 %14783, %v7163_v36   ;;  %v7197_v17 = vpop.permute.xlu1 %7196 }
 0xe25   :  { %v7210_v11 = vsub.f32 %v7042_v21, %v7191_v15  ;;  %v7213_v56 = vsub.f32 %v7045_v10, %v7197_v17 }
 0xe28   :  { %v7195_v58 = vpop.permute.xlu0 %7194  ;;  %7246 = vperm.xlu1 %14783, %v7164_v30  }
 0xe29   :  { %v7212_v49 = vsub.f32 %v7044_v14, %v7195_v58 }
 0xe2b   :  { %7294 = vperm.xlu0 %14782, %v7212_v49  }
 0xe2c   :  { %7251 = vperm.xlu1 %14783, %v7165_v42  }
 0xe2f   :  { %14785 = vset.pattern.permute.xlu0 %v15331_v59 }
 0xe30   :  { %14784 = vset.pattern.permute.xlu1 %v15333_v2 }
 0xe31   :  { %7284 = vperm.xlu1 %14784, %v7210_v11  }
 0xe35   :  { %7299 = vperm.xlu1 %14784, %v7213_v56   ;;  %v7222_v33 = vpop.permute.xlu1 %7221 }
 0xe36   :  { %v7255_v29 = vmul.f32 %v7222_v33, %v18351_v25 }
 0xe39   :  { %14786 = vset.pattern.permute.xlu1 %v15331_v59  ;;  %v7227_v35 = vpop.permute.xlu1 %7226  ;;  %v7217_v60 = vpop.permute.xlu0 %7216 }
 0xe3a   :  { %v7254_v13 = vmul.f32 %v7217_v60, %v18345_v48  ;;  %v7256_v62 = vmul.f32 %v18343_v52, %v7227_v35 }
 0xe3d   :  { %v7232_v5 = vpop.permute.xlu1 %7231  ;;  %v7237_v44 = vpop.permute.xlu0 %7236 }
 0xe3e   :  { %v7257_v6 = vmul.f32 %v18349_v9, %v7232_v5  ;;  %v7258_v15 = vmul.f32 %v7237_v44, %v18365_v7 }
 0xe96   :  { %v7265_v19 = vpop.permute.xlu1 %7264 }
 0xe97   :  { %v7302_v24 = vadd.f32 %v7265_v19, %v7254_v13 }
 0xe99   :  { %v7318_v18 = vmul.f32 0.044715, %v7302_v24  ;;  %v7310_v63 = vmul.f32 0.5, %v7302_v24 }
 0xe9a   :  { %v7270_v37 = vpop.permute.xlu0 %7269 }
 0xe9b   :  { %v7326_v43 = vmul.f32 %v7318_v18, %v7302_v24  ;;  %v7303_v28 = vadd.f32 %v7270_v37, %v7255_v29 }
 0xe9d   :  { %v7334_v57 = vmul.f32 %v7326_v43, %v7302_v24  ;;  %v7319_v40 = vmul.f32 0.044715, %v7303_v28  ;;  %v7311_v33 = vmul.f32 0.5, %v7303_v28 }
 0xe9e   :  { %v7275_v31 = vpop.permute.xlu0 %7274  ;;  %v7280_v1 = vpop.permute.xlu1 %7279 }
 0xe9f   :  { %v7342_v39 = vadd.f32 %v7334_v57, %v7302_v24  ;;  %v7327_v26 = vmul.f32 %v7319_v40, %v7303_v28  ;;  %v7304_v48 = vadd.f32 %v7275_v31, %v7256_v62  ;;  %v7305_v45 = vadd.f32 %v7280_v1, %v7257_v6 }
 0xea1   :  { %v7350_v32 = vmul.f32 0.7978846, %v7342_v39  ;;  %v7335_v36 = vmul.f32 %v7327_v26, %v7303_v28  ;;  %v7320_v10 = vmul.f32 0.044715, %v7304_v48  ;;  %v7321_v54 = vmul.f32 0.044715, %v7305_v45 }
 0xea2   :  { %v7290_v34 = vpop.permute.xlu0 %7289  ;;  %v7312_v6 = vmul.f32 0.5, %v7304_v48  ;;  %v7313_v24 = vmul.f32 0.5, %v7305_v45 }
 0xea3   :  { %15203 = vtanh.f32 %v7350_v32  ;;  %v7343_v25 = vadd.f32 %v7335_v36, %v7303_v28  ;;  %v7328_v21 = vmul.f32 %v7320_v10, %v7304_v48  ;;  %v7242_v22 = vpop.permute.xlu1 %7241  ;;  %v7329_v20 = vmul.f32 %v7321_v54, %v7305_v45 }
 0xea4   :  { %v7259_v52 = vmul.f32 %v7242_v22, %v18372_v38 }
 0xea5   :  { %v7351_v42 = vmul.f32 0.7978846, %v7343_v25  ;;  %v7336_v9 = vmul.f32 %v7328_v21, %v7304_v48  ;;  %v7337_v14 = vmul.f32 %v7329_v20, %v7305_v45 }
 0xea6   :  { %v18475_v53 = vadd.f32 %v7290_v34, %v7259_v52 }
 0xea7   :  { %15205 = vtanh.f32 %v7351_v42  ;;  %v7344_v61 = vadd.f32 %v7336_v9, %v7304_v48  ;;  %v7247_v16 = vpop.permute.xlu1 %7246  ;;  %v7345_v30 = vadd.f32 %v7337_v14, %v7305_v45 }
 0xea8   :  { %v7323_v41 = vmul.f32 0.044715, %v18475_v53  ;;  %v7260_v0 = vmul.f32 %v18363_v46, %v7247_v16  ;;  %v7315_v42 = vmul.f32 0.5, %v18475_v53 }
 0xea9   :  { %v7352_v27 = vmul.f32 0.7978846, %v7344_v61  ;;  %v7353_v3 = vmul.f32 0.7978846, %v7345_v30 }
 0xeaa   :  { %v7295_v8 = vpop.permute.xlu0 %7294  ;;  %v7331_v47 = vmul.f32 %v7323_v41, %v18475_v53 }
 0xeab   :  { %v18480_v38 = vadd.f32 %v7295_v8, %v7260_v0  ;;  %15207 = vtanh.f32 %v7352_v27  ;;  %v7252_v4 = vpop.permute.xlu1 %7251 }
 0xeac   :  { %15209 = vtanh.f32 %v7353_v3  ;;  %v7339_v51 = vmul.f32 %v7331_v47, %v18475_v53  ;;  %v7261_v60 = vmul.f32 %v18370_v55, %v7252_v4 }
 0xead   :  { %v7324_v50 = vmul.f32 0.044715, %v18480_v38  ;;  %v15204_v23 = vpop.eup %15203  ;;  %v7316_v41 = vmul.f32 0.5, %v18480_v38 }
 0xeae   :  { %v7366_v46 = vadd.f32 1.0, %v15204_v23  ;;  %v7347_v17 = vadd.f32 %v7339_v51, %v18475_v53  ;;  %v15079_v53 = vld [vmem:[%s19266_s3 + $0x8] sm:$0xff]   ;;  %v15082_v23 = vld [vmem:[%s19266_s3 + $0x20] sm:$0xff]  }
 0xeaf   :  { %v7332_v12 = vmul.f32 %v7324_v50, %v18480_v38  ;;  %v15081_v50 = vld [vmem:[%s19266_s3 + $0x18] sm:$0xff]   ;;  %v15083_v51 = vld [vmem:[%s19266_s3 + $0x28] sm:$0xff]  }
 0xeb0   :  { %v7285_v49 = vpop.permute.xlu1 %7284  ;;  %v7374_v13 = vmul.f32 %v7366_v46, %v7310_v63  ;;  %v7355_v44 = vmul.f32 0.7978846, %v7347_v17  ;;  %v15086_v46 = vld [vmem:[%s19266_s3 + $0x50] sm:$0xff]  }
 0xeb1   :  { %v7340_v58 = vmul.f32 %v7332_v12, %v18480_v38  ;;  %v15206_v11 = vpop.eup %15205  ;;  %v7306_v56 = vadd.f32 %v7285_v49, %v7258_v15  ;;  %v15084_v12 = vld [vmem:[%s19266_s3 + $0x30] sm:$0xff]   ;;  %v15085_v15 = vld [vmem:[%s19266_s3 + $0x38] sm:$0xff]   ;;  %v15088_v49 = vld [vmem:[%s19266_s3 + $0x60] sm:$0xff]  }
 0xeb2   :  { %v7367_v35 = vadd.f32 1.0, %v15206_v11  ;;  %15211 = vtanh.f32 %v7355_v44  ;;  %v15089_v11 = vld [vmem:[%s19266_s3 + $0x68] sm:$0xff]   ;;  %v15092_v17 = vld [vmem:[%s19266_s3 + $0x70] sm:$0xff]  }
 0xeb3   :  { %v7322_v5 = vmul.f32 0.044715, %v7306_v56  ;;  %v7348_v18 = vadd.f32 %v7340_v58, %v18480_v38  ;;  %v7314_v9 = vmul.f32 0.5, %v7306_v56  ;;  %v15080_v38 = vld [vmem:[%s19266_s3 + $0x10] sm:$0xff]   ;;  %v15087_v58 = vld [vmem:[%s19266_s3 + $0x58] sm:$0xff]  }
 0xeb4   :  { %v7375_v19 = vmul.f32 %v7367_v35, %v7311_v33  ;;  %v7300_v29 = vpop.permute.xlu1 %7299 }
 0xeb5   :  { %v15208_v7 = vpop.eup %15207  ;;  %v7330_v43 = vmul.f32 %v7322_v5, %v7306_v56  ;;  %v7309_v37 = vadd.f32 %v7300_v29, %v7261_v60  ;;  %v7356_v1 = vmul.f32 0.7978846, %v7348_v18 }
 0xeb6   :  { %v15210_v57 = vpop.eup %15209  ;;  %v18490_v62 = vpack.c.bf16 %v7375_v19, %v7374_v13  ;;  %v7368_v40 = vadd.f32 1.0, %v15208_v7 }
 0xeb7   :  { %v7369_v28 = vadd.f32 1.0, %v15210_v57  ;;  %v7338_v39 = vmul.f32 %v7330_v43, %v7306_v56  ;;  %v7325_v31 = vmul.f32 0.044715, %v7309_v37  ;;  %15213 = vtanh.f32 %v7356_v1  ;;  %v18620_v57 = vld [vmem:[%s19269_s6 + $0x8] sm:$0xff]  }
 0xeb8   :  { %v7376_v55 = vmul.f32 %v7368_v40, %v7312_v6  ;;  %13897 = vmatprep.subr.bf16.mxu0 %v18490_v62  ;;  %v7317_v27 = vmul.f32 0.5, %v7309_v37  ;;  %v18627_v6 = vld [vmem:[%s19269_s6 + $0x20] sm:$0xff]   ;;  %v18635_v1 = vld [vmem:[%s19269_s6 + $0x28] sm:$0xff]  }
 0xeb9   :  { %v7377_v26 = vmul.f32 %v7369_v28, %v7313_v24  ;;  %v7346_v32 = vadd.f32 %v7338_v39, %v7306_v56  ;;  %v7333_v36 = vmul.f32 %v7325_v31, %v7309_v37  ;;  %13898 = vmatpush3.bf16.msra.mxu0 %v18490_v62  ;;  %v15093_v56 = vld [vmem:[%s19266_s3 + $0x78] sm:$0xff]  }
 0xebb   :  { %v18494_v10 = vpack.c.bf16 %v7377_v26, %v7376_v55  ;;  %v7354_v54 = vmul.f32 0.7978846, %v7346_v32  ;;  %v7341_v25 = vmul.f32 %v7333_v36, %v7309_v37  ;;  %v18643_v26 = vld [vmem:[%s19269_s6 + $0x30] sm:$0xff]   ;;  %v18651_v36 = vld [vmem:[%s19269_s6 + $0x38] sm:$0xff]  }
 0xebc   :  { %v15212_v21 = vpop.eup %15211 }
 0xebd   :  { %15215 = vtanh.f32 %v7354_v54  ;;  %v7349_v48 = vadd.f32 %v7341_v25, %v7309_v37  ;;  %13899 = vmatprep.subr.bf16.mxu0 %v18494_v10  ;;  %v7371_v20 = vadd.f32 1.0, %v15212_v21  ;;  %v18614_v37 = vld [vmem:[%s19269_s6] sm:$0xff]  }
 0xebe   :  { %13900 = vmatpush3.bf16.msra.mxu0 %v18494_v10 }
 0xebf   :  { %v7357_v45 = vmul.f32 0.7978846, %v7349_v48  ;;  %v7379_v14 = vmul.f32 %v7371_v20, %v7315_v42  ;;  %v15091_v20 = vld [vmem:[%s19266_s3 + $0x48] sm:$0xff]  }
 0xec0   :  { %v18683_v42 = vld [vmem:[%s19269_s6 + $0x48] sm:$0xff]  }
 0xec1   :  { %15217 = vtanh.f32 %v7357_v45  ;;  %v15214_v22 = vpop.eup %15213 }
 0xec2   :  { %v7372_v61 = vadd.f32 1.0, %v15214_v22  ;;  %v15090_v22 = vld [vmem:[%s19266_s3 + $0x40] sm:$0xff]  }
 0xec4   :  { %v7380_v3 = vmul.f32 %v7372_v61, %v7316_v41 }
 0xec7   :  { %v15216_v52 = vpop.eup %15215 }
 0xec8   :  { %v7370_v34 = vadd.f32 1.0, %v15216_v52  ;;  %v18675_v52 = vld [vmem:[%s19269_s6 + $0x40] sm:$0xff]  }
 0xeca   :  { %v7378_v16 = vmul.f32 %v7370_v34, %v7314_v9  ;;  %v18690_v9 = vld [vmem:[%s19269_s6 + $0x50] sm:$0xff]  }
 0xecb   :  { %v15218_v30 = vpop.eup %15217 }
 0xecc   :  { %v18500_v0 = vpack.c.bf16 %v7379_v14, %v7378_v16  ;;  %v7373_v8 = vadd.f32 1.0, %v15218_v30 }
 0xece   :  { %v7381_v47 = vmul.f32 %v7373_v8, %v7317_v27  ;;  %13901 = vmatprep.subr.bf16.mxu0 %v18500_v0 }
 0xecf   :  { %13902 = vmatpush3.bf16.msra.mxu0 %v18500_v0 }
 0xed0   :  { %v18504_v4 = vpack.c.bf16 %v7381_v47, %v7380_v3 }
 0xed2   :  { %13903 = vmatprep.subr.bf16.mxu0 %v18504_v4 }
 0xed3   :  { %13904 = vmatpush3.bf16.msra.mxu0 %v18504_v4 }
 0xed4   :  { %13909 = vmatprep.subr.bf16.mxu0 %v18490_v62 }
 0xed6   :  { %13906 = vmatmul.mubr.msk.bf16.vlgmr.msra.gmra.mrb[188].mxu0 %vm7400_vm1, %v15079_v53 }
 0xed7   :  { %13910 = vmatpush3.bf16.msra.mxu0 %v18490_v62  ;;  %13917 = vmatprep.mubr.msk.bf16.mxu0 %vm7400_vm1, %v15080_v38 }
 0xed8   :  { %13911 = vmatprep.subr.bf16.mxu0 %v18494_v10 }
 0xedb   :  { %13912 = vmatpush3.bf16.msra.mxu0 %v18494_v10 }
 0xedc   :  { %13913 = vmatprep.subr.bf16.mxu0 %v18500_v0 }
 0xedf   :  { %13914 = vmatpush3.bf16.msra.mxu0 %v18500_v0 }
 0xee0   :  { %13915 = vmatprep.subr.bf16.mxu0 %v18504_v4 }
 0xee3   :  { %13916 = vmatpush3.bf16.msra.mxu0 %v18504_v4 }
 0xee4   :  { %13937 = vmatprep.subr.bf16.mxu0 %v18490_v62 }
 0xee6   :  { %13918 = vmatmul.mubr.msk.bf16.vlgmr.msra.gmra.mrb[192].mxu0 %vm7400_vm1, %v15081_v50 }
 0xee7   :  { %13938 = vmatpush3.bf16.msra.mxu0 %v18490_v62  ;;  %13945 = vmatprep.mubr.msk.bf16.mxu0 %vm7400_vm1, %v15082_v23 }
 0xee8   :  { %13939 = vmatprep.subr.bf16.mxu0 %v18494_v10 }
 0xeeb   :  { %13940 = vmatpush3.bf16.msra.mxu0 %v18494_v10 }
 0xeec   :  { %13941 = vmatprep.subr.bf16.mxu0 %v18500_v0 }
 0xeef   :  { %13942 = vmatpush3.bf16.msra.mxu0 %v18500_v0 }
 0xef0   :  { %13943 = vmatprep.subr.bf16.mxu0 %v18504_v4 }
 0xef3   :  { %13944 = vmatpush3.bf16.msra.mxu0 %v18504_v4 }
 0xef4   :  { %13957 = vmatprep.subr.bf16.mxu0 %v18490_v62 }
 0xef6   :  { %13946 = vmatmul.mubr.msk.bf16.vlgmr.msra.gmra.mrb[196].mxu0 %vm7400_vm1, %v15083_v51 }
 0xef7   :  { %13958 = vmatpush3.bf16.msra.mxu0 %v18490_v62  ;;  %13965 = vmatprep.mubr.msk.bf16.mxu0 %vm7400_vm1, %v15084_v12 }
 0xef8   :  { %13959 = vmatprep.subr.bf16.mxu0 %v18494_v10 }
 0xefb   :  { %13960 = vmatpush3.bf16.msra.mxu0 %v18494_v10 }
 0xefc   :  { %13961 = vmatprep.subr.bf16.mxu0 %v18500_v0 }
 0xeff   :  { %13962 = vmatpush3.bf16.msra.mxu0 %v18500_v0 }
 0xf00   :  { %13963 = vmatprep.subr.bf16.mxu0 %v18504_v4 }
 0xf03   :  { %13964 = vmatpush3.bf16.msra.mxu0 %v18504_v4 }
 0xf04   :  { %13997 = vmatprep.subr.bf16.mxu0 %v18490_v62 }
 0xf06   :  { %13966 = vmatmul.mubr.msk.bf16.vlgmr.msra.gmra.mrb[200].mxu0 %vm7400_vm1, %v15085_v15 }
 0xf07   :  { %13998 = vmatpush3.bf16.msra.mxu0 %v18490_v62  ;;  %14005 = vmatprep.mubr.msk.bf16.mxu0 %vm7400_vm1, %v15086_v46 }
 0xf08   :  { %13999 = vmatprep.subr.bf16.mxu0 %v18494_v10 }
 0xf0b   :  { %14000 = vmatpush3.bf16.msra.mxu0 %v18494_v10 }
 0xf0c   :  { %14001 = vmatprep.subr.bf16.mxu0 %v18500_v0 }
 0xf0f   :  { %14002 = vmatpush3.bf16.msra.mxu0 %v18500_v0 }
 0xf10   :  { %14003 = vmatprep.subr.bf16.mxu0 %v18504_v4 }
 0xf13   :  { %14004 = vmatpush3.bf16.msra.mxu0 %v18504_v4 }
 0xf14   :  { %14017 = vmatprep.subr.bf16.mxu0 %v18490_v62 }
 0xf16   :  { %14006 = vmatmul.mubr.msk.bf16.vlgmr.msra.gmra.mrb[204].mxu0 %vm7400_vm1, %v15087_v58 }
 0xf17   :  { %14018 = vmatpush3.bf16.msra.mxu0 %v18490_v62  ;;  %14025 = vmatprep.mubr.msk.bf16.mxu0 %vm7400_vm1, %v15088_v49 }
 0xf18   :  { %14019 = vmatprep.subr.bf16.mxu0 %v18494_v10 }
 0xf1b   :  { %14020 = vmatpush3.bf16.msra.mxu0 %v18494_v10 }
 0xf1c   :  { %14021 = vmatprep.subr.bf16.mxu0 %v18500_v0 }
 0xf1f   :  { %14022 = vmatpush3.bf16.msra.mxu0 %v18500_v0 }
 0xf20   :  { %14023 = vmatprep.subr.bf16.mxu0 %v18504_v4 }
 0xf23   :  { %14024 = vmatpush3.bf16.msra.mxu0 %v18504_v4 }
 0xf24   :  { %14037 = vmatprep.subr.bf16.mxu0 %v18490_v62 }
 0xf26   :  { %14026 = vmatmul.mubr.msk.bf16.vlgmr.msra.gmra.mrb[208].mxu0 %vm7400_vm1, %v15089_v11 }
 0xf27   :  { %14038 = vmatpush3.bf16.msra.mxu0 %v18490_v62  ;;  %14045 = vmatprep.mubr.msk.bf16.mxu0 %vm7400_vm1, %v15092_v17 }
 0xf28   :  { %14039 = vmatprep.subr.bf16.mxu0 %v18494_v10 }
 0xf2b   :  { %14040 = vmatpush3.bf16.msra.mxu0 %v18494_v10 }
 0xf2c   :  { %14041 = vmatprep.subr.bf16.mxu0 %v18500_v0 }
 0xf2f   :  { %14042 = vmatpush3.bf16.msra.mxu0 %v18500_v0 }
 0xf30   :  { %14043 = vmatprep.subr.bf16.mxu0 %v18504_v4 }
 0xf33   :  { %14044 = vmatpush3.bf16.msra.mxu0 %v18504_v4 }
 0xf36   :  { %14046 = vmatmul.mubr.msk.bf16.vlgmr.msra.gmra.mrb[212].mxu0 %vm7400_vm1, %v15093_v56 }
 0xfa9   :  { %v13907_v63 = vpop.f32.mrb[188].mxu0 }
 0xfaa   :  { %v7441_v33 = vpop.f32.mrb[189].mxu0 }
 0xfab   :  { %v13908_v35 = vpop.f32.mrb[190].mxu0 }
 0xfac   :  { %v7457_v60 = vpack.c.bf16 %v13908_v35, %v13907_v63  ;;  %v7444_v5 = vpop.f32.mrb[191].mxu0  ;;  %v18707_v35 = vld [vmem:[%s19269_s6 + $0x60] sm:$0xff]  }
 0xfad   :  { %v7456_v13 = vpack.c.bf16 %v7444_v5, %v7441_v33  ;;  %v18700_v33 = vld [vmem:[%s19269_s6 + $0x58] sm:$0xff]   ;;  %v18723_v5 = vld [vmem:[%s19269_s6 + $0x70] sm:$0xff]  }
 0xfb9   :  { %v13919_v19 = vpop.f32.mrb[192].mxu0 }
 0xfba   :  { %v7513_v18 = vpop.f32.mrb[193].mxu0 }
 0xfbb   :  { %v13920_v29 = vpop.f32.mrb[194].mxu0 }
 0xfbc   :  { %v7529_v7 = vpack.c.bf16 %v13920_v29, %v13919_v19  ;;  %v7516_v44 = vpop.f32.mrb[195].mxu0  ;;  %v15094_v19 = vld [vmem:[%s19266_s3 + $0x80] sm:$0xff]  }
 0xfbd   :  { %v7528_v43 = vpack.c.bf16 %v7516_v44, %v7513_v18  ;;  %v15095_v18 = vld [vmem:[%s19266_s3 + $0x88] sm:$0xff]  }
 0xfbf   :  { %13925 = vmatprep.mubr.msk.bf16.mxu1 %vm1929_vm0, %v7528_v43 }
 0xfc0   :  { %13926 = vmatmul.mubr.msk.bf16.vlgmr.msra.gmra.mrb[212].mxu1 %vm1929_vm0, %v7529_v7 }
 0xfc1   :  { %13933 = vmatprep.mubr.msk.bf16.mxu1 %vm1929_vm0, %v7456_v13  ;;  %13930 = vmatpush3.bf16.msra.mxu1 %v18614_v37  ;;  %v18732_v13 = vld [vmem:[%s19269_s6 + $0x78] sm:$0xff]  }
 0xfc2   :  { %13931 = vmatprep.subr.bf16.mxu1 %v18620_v57 }
 0xfc5   :  { %13932 = vmatpush3.bf16.msra.mxu1 %v18620_v57 }
 0xfc6   :  { %13949 = vmatprep.subr.bf16.mxu1 %v18627_v6 }
 0xfc9   :  { %v13947_v40 = vpop.f32.mrb[196].mxu0 }
 0xfca   :  { %v7695_v24 = vpop.f32.mrb[197].mxu0 }
 0xfcb   :  { %v13948_v28 = vpop.f32.mrb[198].mxu0 }
 0xfcc   :  { %13934 = vmatmul.mubr.msk.bf16.vlgmr.msra.gmra.mrb[212].mxu1 %vm1929_vm0, %v7457_v60  ;;  %v7711_v39 = vpack.c.bf16 %v13948_v28, %v13947_v40  ;;  %v7698_v31 = vpop.f32.mrb[199].mxu0  ;;  %v18716_v60 = vld [vmem:[%s19269_s6 + $0x68] sm:$0xff]  }
 0xfcd   :  { %13950 = vmatpush3.bf16.msra.mxu1 %v18627_v6  ;;  %v7710_v55 = vpack.c.bf16 %v7698_v31, %v7695_v24 }
 0xfce   :  { %13951 = vmatprep.subr.bf16.mxu1 %v18635_v1 }
 0xfcf   :  { %13953 = vmatprep.mubr.msk.bf16.mxu1 %vm1929_vm0, %v7710_v55 }
 0xfd1   :  { %13952 = vmatpush3.bf16.msra.mxu1 %v18635_v1 }
 0xfd2   :  { %13969 = vmatprep.subr.bf16.mxu1 %v18643_v26 }
 0xfd8   :  { %13954 = vmatmul.mubr.msk.bf16.vlgmr.msra.gmra.mrb[212].mxu1 %vm1929_vm0, %v7711_v39 }
 0xfd9   :  { %13970 = vmatpush3.bf16.msra.mxu1 %v18643_v26  ;;  %v13967_v32 = vpop.f32.mrb[200].mxu0 }
 0xfda   :  { %13971 = vmatprep.subr.bf16.mxu1 %v18651_v36  ;;  %v7826_v54 = vpop.f32.mrb[201].mxu0 }
 0xfdb   :  { %v13968_v25 = vpop.f32.mrb[202].mxu0 }
 0xfdc   :  { %v7842_v48 = vpack.c.bf16 %v13968_v25, %v13967_v32  ;;  %v7829_v45 = vpop.f32.mrb[203].mxu0 }
 0xfdd   :  { %13972 = vmatpush3.bf16.msra.mxu1 %v18651_v36  ;;  %v7841_v21 = vpack.c.bf16 %v7829_v45, %v7826_v54 }
 0xfde   :  { %13977 = vmatprep.subr.bf16.mxu1 %v18490_v62 }
 0xfdf   :  { %13973 = vmatprep.mubr.msk.bf16.mxu1 %vm1929_vm0, %v7841_v21 }
 0xfe4   :  { %13974 = vmatmul.mubr.msk.bf16.vlgmr.msra.gmra.mrb[212].mxu1 %vm1929_vm0, %v7842_v48 }
 0xfe5   :  { %13978 = vmatpush3.bf16.msra.mxu1 %v18490_v62  ;;  %13985 = vmatprep.mubr.msk.bf16.mxu1 %vm7400_vm1, %v15090_v22 }
 0xfe6   :  { %13979 = vmatprep.subr.bf16.mxu1 %v18494_v10 }
 0xfe9   :  { %13980 = vmatpush3.bf16.msra.mxu1 %v18494_v10  ;;  %v14007_v34 = vpop.f32.mrb[204].mxu0 }
 0xfea   :  { %13981 = vmatprep.subr.bf16.mxu1 %v18500_v0  ;;  %v8088_v14 = vpop.f32.mrb[205].mxu0 }
 0xfeb   :  { %v14008_v61 = vpop.f32.mrb[206].mxu0 }
 0xfec   :  { %v8091_v16 = vpop.f32.mrb[207].mxu0  ;;  %v8104_v30 = vpack.c.bf16 %v14008_v61, %v14007_v34 }
 0xfed   :  { %13982 = vmatpush3.bf16.msra.mxu1 %v18500_v0  ;;  %v8103_v41 = vpack.c.bf16 %v8091_v16, %v8088_v14 }
 0xfee   :  { %13983 = vmatprep.subr.bf16.mxu1 %v18504_v4 }
 0xff1   :  { %13984 = vmatpush3.bf16.msra.mxu1 %v18504_v4 }
 0xff2   :  { %13989 = vmatprep.subr.bf16.mxu1 %v18675_v52 }
 0xff4   :  { %13986 = vmatmul.mubr.msk.bf16.vlgmr.msra.gmra.mrb[216].mxu1 %vm7400_vm1, %v15091_v20 }
 0xff5   :  { %13990 = vmatpush3.bf16.msra.mxu1 %v18675_v52 }
 0xff6   :  { %13991 = vmatprep.subr.bf16.mxu1 %v18683_v42 }
 0xff9   :  { %13992 = vmatpush3.bf16.msra.mxu1 %v18683_v42  ;;  %v14027_v27 = vpop.f32.mrb[208].mxu0 }
 0xffa   :  { %14009 = vmatprep.subr.bf16.mxu1 %v18690_v9  ;;  %v8219_v8 = vpop.f32.mrb[209].mxu0 }
 0xffb   :  { %v14028_v3 = vpop.f32.mrb[210].mxu0 }
 0xffc   :  { %v8235_v47 = vpack.c.bf16 %v14028_v3, %v14027_v27  ;;  %v8222_v53 = vpop.f32.mrb[211].mxu0 }
 0xffd   :  { %v8234_v38 = vpack.c.bf16 %v8222_v53, %v8219_v8 }
0x1009   :  { %v14047_v50 = vpop.f32.mrb[212].mxu0 }
0x100a   :  { %v8350_v23 = vpop.f32.mrb[213].mxu0 }
0x100b   :  { %v14048_v51 = vpop.f32.mrb[214].mxu0 }
0x100c   :  { %v8366_v12 = vpack.c.bf16 %v14048_v51, %v14047_v50  ;;  %v8353_v15 = vpop.f32.mrb[215].mxu0 }
0x100d   :  { %v8365_v46 = vpack.c.bf16 %v8353_v15, %v8350_v23 }
0x10c7   :  { %v13987_v58 = vpop.f32.mrb[216].mxu1 }
0x10c8   :  { %v7957_v49 = vpop.f32.mrb[217].mxu1 }
0x10c9   :  { %v13988_v11 = vpop.f32.mrb[218].mxu1 }
0x10ca   :  { %v7973_v17 = vpack.c.bf16 %v13988_v11, %v13987_v58  ;;  %v7960_v56 = vpop.f32.mrb[219].mxu1 }
0x10cb   :  { %v7972_v63 = vpack.c.bf16 %v7960_v56, %v7957_v49 }
0x10cd   :  { %13993 = vmatprep.mubr.msk.bf16.mxu1 %vm1929_vm0, %v7972_v63 }
0x10ce   :  { %13994 = vmatmul.mubr.msk.bf16.vlgmr.msra.gmra.mrb[212].mxu1 %vm1929_vm0, %v7973_v17 }
0x10cf   :  { %14013 = vmatprep.mubr.msk.bf16.mxu1 %vm1929_vm0, %v8103_v41  ;;  %14010 = vmatpush3.bf16.msra.mxu1 %v18690_v9 }
0x10d0   :  { %14011 = vmatprep.subr.bf16.mxu1 %v18700_v33 }
0x10d3   :  { %14012 = vmatpush3.bf16.msra.mxu1 %v18700_v33 }
0x10d4   :  { %14029 = vmatprep.subr.bf16.mxu1 %v18707_v35 }
0x10da   :  { %14014 = vmatmul.mubr.msk.bf16.vlgmr.msra.gmra.mrb[212].mxu1 %vm1929_vm0, %v8104_v30 }
0x10db   :  { %14030 = vmatpush3.bf16.msra.mxu1 %v18707_v35  ;;  %14033 = vmatprep.mubr.msk.bf16.mxu1 %vm1929_vm0, %v8234_v38 }
0x10dc   :  { %14031 = vmatprep.subr.bf16.mxu1 %v18716_v60 }
0x10df   :  { %14032 = vmatpush3.bf16.msra.mxu1 %v18716_v60 }
0x10e0   :  { %14049 = vmatprep.subr.bf16.mxu1 %v18723_v5 }
0x10e6   :  { %14034 = vmatmul.mubr.msk.bf16.vlgmr.msra.gmra.mrb[212].mxu1 %vm1929_vm0, %v8235_v47 }
0x10e7   :  { %14050 = vmatpush3.bf16.msra.mxu1 %v18723_v5  ;;  %14053 = vmatprep.mubr.msk.bf16.mxu1 %vm1929_vm0, %v8365_v46 }
0x10e8   :  { %14051 = vmatprep.subr.bf16.mxu1 %v18732_v13 }
0x10eb   :  { %14052 = vmatpush3.bf16.msra.mxu1 %v18732_v13 }
0x10ec   :  { %14057 = vmatprep.subr.bf16.mxu1 %v18490_v62 }
0x10f2   :  { %14054 = vmatmul.mubr.msk.bf16.vlgmr.msra.gmra.mrb[212].mxu1 %vm1929_vm0, %v8366_v12 }
0x10f3   :  { %14058 = vmatpush3.bf16.msra.mxu1 %v18490_v62  ;;  %14065 = vmatprep.mubr.msk.bf16.mxu1 %vm7400_vm1, %v15094_v19  ;;  %v18755_v62 = vld [vmem:[%s19269_s6 + $0x80] sm:$0xff]  }
0x10f4   :  { %14059 = vmatprep.subr.bf16.mxu1 %v18494_v10 }
0x10f7   :  { %14060 = vmatpush3.bf16.msra.mxu1 %v18494_v10  ;;  %v18763_v10 = vld [vmem:[%s19269_s6 + $0x88] sm:$0xff]  }
0x10f8   :  { %14061 = vmatprep.subr.bf16.mxu1 %v18500_v0 }
0x10fb   :  { %14062 = vmatpush3.bf16.msra.mxu1 %v18500_v0 }
0x10fc   :  { %14063 = vmatprep.subr.bf16.mxu1 %v18504_v4 }
0x10ff   :  { %14064 = vmatpush3.bf16.msra.mxu1 %v18504_v4 }
0x1100   :  { %14069 = vmatprep.subr.bf16.mxu1 %v18755_v62 }
0x1102   :  { %14066 = vmatmul.mubr.msk.bf16.vlgmr.msra.gmra.mrb[220].mxu1 %vm7400_vm1, %v15095_v18 }
0x1103   :  { %14070 = vmatpush3.bf16.msra.mxu1 %v18755_v62 }
0x1104   :  { %14071 = vmatprep.subr.bf16.mxu1 %v18763_v10 }
0x1107   :  { %14072 = vmatpush3.bf16.msra.mxu1 %v18763_v10 }
0x11d5   :  { %v14067_v0 = vpop.f32.mrb[220].mxu1 }
0x11d6   :  { %v8481_v4 = vpop.f32.mrb[221].mxu1 }
0x11d7   :  { %v14068_v29 = vpop.f32.mrb[222].mxu1 }
0x11d8   :  { %v8497_v7 = vpack.c.bf16 %v14068_v29, %v14067_v0  ;;  %v8484_v44 = vpop.f32.mrb[223].mxu1 }
0x11d9   :  { %v8496_v43 = vpack.c.bf16 %v8484_v44, %v8481_v4 }
0x11db   :  { %14073 = vmatprep.mubr.msk.bf16.mxu1 %vm1929_vm0, %v8496_v43 }
0x11dc   :  { %14074 = vmatmul.mubr.msk.bf16.vlgmr.msra.gmra.mrb[212].mxu1 %vm1929_vm0, %v8497_v7 }
0x12af   :  { %v18769_v40 = vpop.f32.mrb[212].mxu1 }
0x12b0   :  { %v18771_v24 = vpop.f32.mrb[213].mxu1  ;;  %v8567_v28 = vsel %vm1929_vm0, %v18769_v40, 0.0  ;;  %v8575_v20 = vmul.f32 %v18769_v40, %v18769_v40 }
0x12b1   :  { %8568 = vadd.xlane.f32.xlu0 %v8567_v28  ;;  %v18775_v39 = vpop.f32.mrb[214].mxu1  ;;  %v8573_v32 = vmul.f32 %v18771_v24, %v18771_v24  ;;  %v8561_v54 = vsel %vm1929_vm0, %v18771_v24, 0.0 }
0x12b2   :  { %v18777_v31 = vpop.f32.mrb[215].mxu1  ;;  %v8576_v25 = vmul.f32 %v18775_v39, %v18775_v39  ;;  %v8570_v48 = vsel %vm1929_vm0, %v18775_v39, 0.0  ;;  %v8583_v14 = vsel %vm1929_vm0, %v8575_v20, 0.0  ;;  %v8558_v20 = vld [vmem:[%s19274_s11 + $0x8] sm:$0xff] }
0x12b3   :  { %v8564_v55 = vsel %vm1929_vm0, %v18777_v31, 0.0  ;;  %v8574_v45 = vmul.f32 %v18777_v31, %v18777_v31  ;;  %v8577_v21 = vsel %vm1929_vm0, %v8573_v32, 0.0  ;;  %v8557_v32 = vld [vmem:[%s19274_s11] sm:$0xff] }
0x12b4   :  { %8565 = vadd.xlane.f32.xlu1 %v8564_v55  ;;  %v8586_v22 = vsel %vm1929_vm0, %v8576_v25, 0.0 }
0x12b5   :  { %8562 = vadd.xlane.f32.xlu0 %v8561_v54  ;;  %v8580_v34 = vsel %vm1929_vm0, %v8574_v45, 0.0  ;;  %v8559_v45 = vld [vmem:[%s19274_s11 + $0x10] sm:$0xff] }
0x12b8   :  { %8571 = vadd.xlane.f32.xlu1 %v8570_v48 }
0x12b9   :  { %8578 = vadd.xlane.f32.xlu0 %v8577_v21 }
0x12bc   :  { %8587 = vadd.xlane.f32.xlu1 %v8586_v22 }
0x12bd   :  { %8581 = vadd.xlane.f32.xlu0 %v8580_v34 }
0x12c1   :  { %8584 = vadd.xlane.f32.xlu0 %v8583_v14 }
0x133e   :  { %v8569_v61 = vpop.xlane.xlu0 %8568 }
0x133f   :  { %v8591_v51 = vmul.f32 0.03125, %v8569_v61 }
0x1341   :  { %v8566_v16 = vpop.xlane.xlu1 %8565  ;;  %v8599_v63 = vmul.f32 %v8591_v51, %v8591_v51 }
0x1342   :  { %v8563_v30 = vpop.xlane.xlu0 %8562  ;;  %v8590_v3 = vmul.f32 0.03125, %v8566_v16 }
0x1343   :  { %v8589_v41 = vmul.f32 0.03125, %v8563_v30  ;;  %v8560_v30 = vld [vmem:[%s19274_s11 + $0x18] sm:$0xff] }
0x1344   :  { %v8598_v15 = vmul.f32 %v8590_v3, %v8590_v3 }
0x1345   :  { %v8572_v27 = vpop.xlane.xlu1 %8571  ;;  %v8597_v47 = vmul.f32 %v8589_v41, %v8589_v41 }
0x1346   :  { %v8579_v8 = vpop.xlane.xlu0 %8578  ;;  %v8592_v38 = vmul.f32 0.03125, %v8572_v27 }
0x1347   :  { %v8593_v53 = vmul.f32 0.03125, %v8579_v8 }
0x1348   :  { %v8600_v11 = vmul.f32 %v8592_v38, %v8592_v38 }
0x1349   :  { %v8601_v50 = vsub.f32 %v8593_v53, %v8597_v47  ;;  %v8588_v23 = vpop.xlane.xlu1 %8587 }
0x134a   :  { %v8582_v12 = vpop.xlane.xlu0 %8581  ;;  %v8596_v58 = vmul.f32 0.03125, %v8588_v23 }
0x134b   :  { %v8605_v46 = vmax.f32 %v8601_v50, 0.0  ;;  %v8594_v49 = vmul.f32 0.03125, %v8582_v12 }
0x134c   :  { %v8604_v18 = vsub.f32 %v8596_v58, %v8600_v11 }
0x134d   :  { %v8609_v17 = vadd.f32 1e-05, %v8605_v46  ;;  %v8602_v56 = vsub.f32 %v8594_v49, %v8598_v15 }
0x134e   :  { %v8585_v19 = vpop.xlane.xlu0 %8584  ;;  %v8608_v44 = vmax.f32 %v8604_v18, 0.0 }
0x134f   :  { %15219 = vrsqrt.f32 %v8609_v17  ;;  %v8606_v0 = vmax.f32 %v8602_v56, 0.0  ;;  %v8595_v4 = vmul.f32 0.03125, %v8585_v19 }
0x1350   :  { %v8612_v55 = vadd.f32 1e-05, %v8608_v44 }
0x1351   :  { %v8603_v29 = vsub.f32 %v8595_v4, %v8599_v63  ;;  %v8610_v7 = vadd.f32 1e-05, %v8606_v0 }
0x1353   :  { %v8607_v43 = vmax.f32 %v8603_v29, 0.0  ;;  %15221 = vrsqrt.f32 %v8610_v7 }
0x1355   :  { %v8611_v28 = vadd.f32 1e-05, %v8607_v43 }
0x1357   :  { %15223 = vrsqrt.f32 %v8611_v28 }
0x1358   :  { %15225 = vrsqrt.f32 %v8612_v55 }
0x1359   :  { %v15220_v54 = vpop.eup %15219 }
0x135a   :  { %v8617_v25 = vmul.f32 %v15220_v54, %v8557_v32 }
0x135c   :  { %v8621_v48 = vmul.f32 %v8617_v25, %v8589_v41 }
0x135d   :  { %v15222_v21 = vpop.eup %15221 }
0x135e   :  { %8629 = vrot.lane.b32.xlu0 %v8621_v48, %s15332_s8  ;;  %v8618_v61 = vmul.f32 %v15222_v21, %v8558_v20 }
0x1360   :  { %v8622_v41 = vmul.f32 %v8618_v61, %v8590_v3 }
0x1361   :  { %v15224_v22 = vpop.eup %15223 }
0x1362   :  { %8647 = vperm.xlu0 %14785, %v8617_v25   ;;  %v8619_v34 = vmul.f32 %v15224_v22, %v8559_v45  ;;  %v15226_v16 = vpop.eup %15225 }
0x1363   :  { %v8620_v27 = vmul.f32 %v15226_v16, %v8560_v30 }
0x1364   :  { %v8623_v14 = vmul.f32 %v8619_v34, %v8591_v51 }
0x1365   :  { %v8624_v8 = vmul.f32 %v8620_v27, %v8592_v38  ;;  %v15334_v38 = vmov 0.0  }
0x1366   :  { %8633 = vrot.lane.b32.xlu1 %v8623_v14, %s15332_s8  ;;  %14788 = vset.pattern.permute.xlu0 %v15333_v2 }
0x1367   :  { %14077 = vmatprep.subr.bf16.mxu0 %v15334_v38  ;;  %14109 = vmatprep.subr.bf16.mxu1 %v15334_v38 }
0x1368   :  { %14081 = vmatprep.mubr.msk.bf16.mxu0 %vm15335_vm2, %v15334_v38  ;;  %14113 = vmatprep.mubr.msk.bf16.mxu1 %vm15335_vm2, %v15334_v38 }
0x136a   :  { %8631 = vrot.lane.b32.xlu1 %v8622_v41, %s15332_s8 }
0x136e   :  { %8635 = vrot.lane.b32.xlu1 %v8624_v8, %s15332_s8 }
0x1372   :  { %8652 = vperm.xlu1 %14786, %v8618_v61  }
0x1376   :  { %8657 = vperm.xlu1 %14786, %v8619_v34  }
0x137a   :  { %8662 = vperm.xlu1 %14786, %v8620_v27  }
0x137e   :  { %14787 = vset.pattern.permute.xlu1 %v15333_v2 }
0x13d0   :  { %v8630_v47 = vpop.permute.xlu0 %8629 }
0x13d1   :  { %v8641_v53 = vsub.f32 %v8557_v32, %v8630_v47 }
0x13d3   :  { %8671 = vperm.xlu1 %14787, %v8641_v53  }
0x13d8   :  { %v8634_v50 = vpop.permute.xlu1 %8633 }
0x13d9   :  { %v8643_v3 = vsub.f32 %v8559_v45, %v8634_v50 }
0x13dc   :  { %v8632_v23 = vpop.permute.xlu1 %8631 }
0x13dd   :  { %v8642_v51 = vsub.f32 %v8558_v20, %v8632_v23 }
0x13df   :  { %8676 = vperm.xlu0 %14788, %v8642_v51  }
0x13e0   :  { %v8636_v12 = vpop.permute.xlu1 %8635 }
0x13e1   :  { %v8644_v15 = vsub.f32 %v8560_v30, %v8636_v12  ;;  %v8648_v49 = vpop.permute.xlu0 %8647 }
0x13e2   :  { %v8665_v17 = vmul.f32 %v8648_v49, %v18771_v24 }
0x13e3   :  { %8681 = vperm.xlu0 %14788, %v8643_v3   ;;  %8686 = vperm.xlu1 %14787, %v8644_v15  }
0x13e7   :  { %14789 = vset.pattern.permute.xlu1 %v15331_v59 }
0x13f1   :  { %v8653_v46 = vpop.permute.xlu1 %8652 }
0x13f2   :  { %v8666_v4 = vmul.f32 %v8653_v46, %v18777_v31 }
0x13f5   :  { %v8658_v58 = vpop.permute.xlu1 %8657 }
0x13f6   :  { %v8667_v43 = vmul.f32 %v18769_v40, %v8658_v58 }
0x13f9   :  { %v8663_v11 = vpop.permute.xlu1 %8662 }
0x13fa   :  { %v8668_v28 = vmul.f32 %v18775_v39, %v8663_v11 }
0x1452   :  { %v8672_v56 = vpop.permute.xlu1 %8671 }
0x1453   :  { %v8689_v63 = vadd.f32 %v8672_v56, %v8665_v17 }
0x1455   :  { %v8697_v19 = vmul.f32 0.044715, %v8689_v63  ;;  %v8693_v50 = vmul.f32 0.5, %v8689_v63 }
0x1457   :  { %v8701_v18 = vmul.f32 %v8697_v19, %v8689_v63 }
0x1459   :  { %v8705_v0 = vmul.f32 %v8701_v18, %v8689_v63 }
0x145b   :  { %v8709_v7 = vadd.f32 %v8705_v0, %v8689_v63  ;;  %v15096_v0 = vld [vmem:[%s19267_s4] sm:$0xff]  }
0x145d   :  { %v8713_v25 = vmul.f32 0.7978846, %v8709_v7  ;;  %v15099_v7 = vld [vmem:[%s19267_s4 + $0x18] sm:$0xff]  }
0x145e   :  { %v8677_v29 = vpop.permute.xlu0 %8676 }
0x145f   :  { %v8690_v44 = vadd.f32 %v8677_v29, %v8666_v4  ;;  %15227 = vtanh.f32 %v8713_v25  ;;  %v15097_v4 = vld [vmem:[%s19267_s4 + $0x10] sm:$0xff]   ;;  %v15098_v29 = vld [vmem:[%s19267_s4 + $0x8] sm:$0xff]   ;;  %v15104_v25 = vld [vmem:[%s19267_s4 + $0x40] sm:$0xff]  }
0x1461   :  { %v8698_v55 = vmul.f32 0.044715, %v8690_v44  ;;  %v8694_v23 = vmul.f32 0.5, %v8690_v44 }
0x1462   :  { %v8682_v32 = vpop.permute.xlu0 %8681  ;;  %v8687_v54 = vpop.permute.xlu1 %8686 }
0x1463   :  { %v8702_v48 = vmul.f32 %v8698_v55, %v8690_v44  ;;  %v8691_v24 = vadd.f32 %v8682_v32, %v8667_v43  ;;  %v8692_v45 = vadd.f32 %v8687_v54, %v8668_v28  ;;  %v15100_v43 = vld [vmem:[%s19267_s4 + $0x20] sm:$0xff]   ;;  %v15314_v28 = vld [vmem:[%s19269_s6 + $0x18] sm:$0xff]   ;;  %v15101_v55 = vld [vmem:[%s19267_s4 + $0x28] sm:$0xff]  }
0x1464   :  { %v15102_v32 = vld [vmem:[%s19267_s4 + $0x30] sm:$0xff]   ;;  %v15103_v54 = vld [vmem:[%s19267_s4 + $0x38] sm:$0xff]  }
0x1465   :  { %v8706_v21 = vmul.f32 %v8702_v48, %v8690_v44  ;;  %v8699_v22 = vmul.f32 0.044715, %v8691_v24  ;;  %v8700_v20 = vmul.f32 0.044715, %v8692_v45  ;;  %v8695_v49 = vmul.f32 0.5, %v8691_v24 }
0x1466   :  { %v8696_v17 = vmul.f32 0.5, %v8692_v45 }
0x1467   :  { %v8710_v34 = vadd.f32 %v8706_v21, %v8690_v44  ;;  %v8703_v31 = vmul.f32 %v8699_v22, %v8691_v24  ;;  %v8704_v14 = vmul.f32 %v8700_v20, %v8692_v45  ;;  %v15313_v44 = vld [vmem:[%s19269_s6 + $0x10] sm:$0xff]  }
0x1469   :  { %v8714_v61 = vmul.f32 0.7978846, %v8710_v34  ;;  %v8707_v16 = vmul.f32 %v8703_v31, %v8691_v24  ;;  %v8708_v30 = vmul.f32 %v8704_v14, %v8692_v45  ;;  %v15228_v8 = vpop.eup %15227 }
0x146a   :  { %v8721_v47 = vadd.f32 1.0, %v15228_v8 }
0x146b   :  { %15229 = vtanh.f32 %v8714_v61  ;;  %v8711_v40 = vadd.f32 %v8707_v16, %v8691_v24  ;;  %v8712_v39 = vadd.f32 %v8708_v30, %v8692_v45 }
0x146c   :  { %v8725_v12 = vmul.f32 %v8721_v47, %v8693_v50 }
0x146d   :  { %v8715_v41 = vmul.f32 0.7978846, %v8711_v40  ;;  %v8716_v27 = vmul.f32 0.7978846, %v8712_v39 }
0x146f   :  { %15231 = vtanh.f32 %v8715_v41 }
0x1470   :  { %15233 = vtanh.f32 %v8716_v27 }
0x1475   :  { %v15230_v53 = vpop.eup %15229 }
0x1476   :  { %v8722_v51 = vadd.f32 1.0, %v15230_v53 }
0x1478   :  { %v8726_v3 = vmul.f32 %v8722_v51, %v8694_v23 }
0x1479   :  { %v15232_v15 = vpop.eup %15231 }
0x147a   :  { %v15234_v46 = vpop.eup %15233  ;;  %v18826_v58 = vpack.c.bf16 %v8726_v3, %v8725_v12  ;;  %v8723_v11 = vadd.f32 1.0, %v15232_v15 }
0x147b   :  { %v8724_v56 = vadd.f32 1.0, %v15234_v46 }
0x147c   :  { %v8727_v19 = vmul.f32 %v8723_v11, %v8695_v49  ;;  %14078 = vmatpush3.bf16.msra.mxu0 %v18826_v58  ;;  %14110 = vmatpush3.bf16.msra.mxu1 %v18826_v58 }
0x147d   :  { %v8728_v18 = vmul.f32 %v8724_v56, %v8696_v17  ;;  %14079 = vmatprep.subr.bf16.mxu0 %v15334_v38  ;;  %14111 = vmatprep.subr.bf16.mxu1 %v15334_v38 }
0x147f   :  { %v8730_v63 = vpack.c.bf16 %v8728_v18, %v8727_v19 }
0x1481   :  { %14080 = vmatpush3.bf16.msra.mxu0 %v8730_v63  ;;  %14112 = vmatpush3.bf16.msra.mxu1 %v8730_v63 }
0x1482   :  { %14085 = vmatprep.subr.bf16.mxu0 %v15334_v38  ;;  %14125 = vmatprep.subr.bf16.mxu1 %v15334_v38 }
0x1484   :  { %14082 = vmatmul.mubr.msk.bf16.vlgmr.msra.gmra.mrb[216].mxu0 %vm1929_vm0, %v15096_v0  ;;  %14114 = vmatmul.mubr.msk.bf16.vlgmr.msra.gmra.mrb[224].mxu1 %vm1929_vm0, %v15097_v4 }
0x1485   :  { %14086 = vmatpush3.bf16.msra.mxu0 %v18826_v58  ;;  %14126 = vmatpush3.bf16.msra.mxu1 %v18826_v58 }
0x1486   :  { %14087 = vmatprep.subr.bf16.mxu0 %v15334_v38  ;;  %14127 = vmatprep.subr.bf16.mxu1 %v15334_v38 }
0x1487   :  { %14089 = vmatprep.mubr.msk.bf16.mxu0 %vm15335_vm2, %v15334_v38  ;;  %14129 = vmatprep.mubr.msk.bf16.mxu1 %vm15335_vm2, %v15334_v38 }
0x1489   :  { %14088 = vmatpush3.bf16.msra.mxu0 %v8730_v63  ;;  %14128 = vmatpush3.bf16.msra.mxu1 %v8730_v63 }
0x148a   :  { %14141 = vmatprep.subr.bf16.mxu1 %v15334_v38  ;;  %14093 = vmatprep.subr.bf16.mxu0 %v15334_v38 }
0x148c   :  { %14090 = vmatmul.mubr.msk.bf16.vlgmr.msra.gmra.mrb[220].mxu0 %vm1929_vm0, %v15098_v29  ;;  %14130 = vmatmul.mubr.msk.bf16.vlgmr.msra.gmra.mrb[228].mxu1 %vm1929_vm0, %v15099_v7 }
0x148d   :  { %14142 = vmatpush3.bf16.msra.mxu1 %v18826_v58  ;;  %14145 = vmatprep.mubr.msk.bf16.mxu1 %vm15335_vm2, %v15334_v38 }
0x148e   :  { %14143 = vmatprep.subr.bf16.mxu1 %v15334_v38  ;;  %14094 = vmatpush3.bf16.msra.mxu0 %v15313_v44 }
0x148f   :  { %14095 = vmatprep.subr.bf16.mxu0 %v15334_v38  ;;  %14097 = vmatprep.mubr.msk.bf16.mxu0 %vm15335_vm2, %v15334_v38 }
0x1491   :  { %14144 = vmatpush3.bf16.msra.mxu1 %v8730_v63 }
0x1492   :  { %14157 = vmatprep.subr.bf16.mxu1 %v15334_v38  ;;  %14096 = vmatpush3.bf16.msra.mxu0 %v15314_v28 }
0x1493   :  { %14101 = vmatprep.subr.bf16.mxu0 %v15334_v38 }
0x1494   :  { %14146 = vmatmul.mubr.msk.bf16.vlgmr.msra.gmra.mrb[232].mxu1 %vm1929_vm0, %v15100_v43 }
0x1495   :  { %14158 = vmatpush3.bf16.msra.mxu1 %v18826_v58  ;;  %14161 = vmatprep.mubr.msk.bf16.mxu1 %vm15335_vm2, %v15334_v38 }
0x1496   :  { %14159 = vmatprep.subr.bf16.mxu1 %v15334_v38 }
0x1499   :  { %14160 = vmatpush3.bf16.msra.mxu1 %v8730_v63 }
0x149a   :  { %14173 = vmatprep.subr.bf16.mxu1 %v15334_v38 }
0x149c   :  { %14162 = vmatmul.mubr.msk.bf16.vlgmr.msra.gmra.mrb[236].mxu1 %vm1929_vm0, %v15101_v55 }
0x149d   :  { %14174 = vmatpush3.bf16.msra.mxu1 %v18826_v58  ;;  %14177 = vmatprep.mubr.msk.bf16.mxu1 %vm15335_vm2, %v15334_v38 }
0x149e   :  { %14175 = vmatprep.subr.bf16.mxu1 %v15334_v38 }
0x14a1   :  { %14176 = vmatpush3.bf16.msra.mxu1 %v8730_v63 }
0x14a2   :  { %14189 = vmatprep.subr.bf16.mxu1 %v15334_v38 }
0x14a4   :  { %14178 = vmatmul.mubr.msk.bf16.vlgmr.msra.gmra.mrb[240].mxu1 %vm1929_vm0, %v15102_v32 }
0x14a5   :  { %14190 = vmatpush3.bf16.msra.mxu1 %v18826_v58  ;;  %14193 = vmatprep.mubr.msk.bf16.mxu1 %vm15335_vm2, %v15334_v38 }
0x14a6   :  { %14191 = vmatprep.subr.bf16.mxu1 %v15334_v38 }
0x14a9   :  { %14192 = vmatpush3.bf16.msra.mxu1 %v8730_v63 }
0x14aa   :  { %14205 = vmatprep.subr.bf16.mxu1 %v15334_v38 }
0x14ac   :  { %14194 = vmatmul.mubr.msk.bf16.vlgmr.msra.gmra.mrb[244].mxu1 %vm1929_vm0, %v15103_v54 }
0x14ad   :  { %14206 = vmatpush3.bf16.msra.mxu1 %v18826_v58  ;;  %14209 = vmatprep.mubr.msk.bf16.mxu1 %vm15335_vm2, %v15334_v38 }
0x14ae   :  { %14207 = vmatprep.subr.bf16.mxu1 %v15334_v38 }
0x14b1   :  { %14208 = vmatpush3.bf16.msra.mxu1 %v8730_v63 }
0x14b2   :  { %14221 = vmatprep.subr.bf16.mxu1 %v15334_v38 }
0x14b4   :  { %14210 = vmatmul.mubr.msk.bf16.vlgmr.msra.gmra.mrb[248].mxu1 %vm1929_vm0, %v15104_v25 }
0x14b5   :  { %14223 = vmatprep.mubr.msk.bf16.mxu1 %vm15335_vm2, %v15334_v38 }
0x1557   :  { %v8775_v48 = vpop.f32.mrb[216].mxu0  ;;  %v8969_v24 = vpop.f32.mrb[224].mxu1 }
0x1558   :  { %v14083_v45 = vpop.f32.mrb[217].mxu0  ;;  %v14115_v21 = vpop.f32.mrb[225].mxu1 }
0x1559   :  { %v8778_v22 = vpop.f32.mrb[218].mxu0  ;;  %v8972_v20 = vpop.f32.mrb[226].mxu1 }
0x155a   :  { %v8782_v34 = vpack.c.bf16 %v8778_v22, %v8775_v48  ;;  %v14084_v31 = vpop.f32.mrb[219].mxu0  ;;  %v8976_v14 = vpack.c.bf16 %v8972_v20, %v8969_v24  ;;  %v14116_v61 = vpop.f32.mrb[227].mxu1 }
0x155f   :  { %v8828_v16 = vpop.f32.mrb[220].mxu0  ;;  %v9068_v30 = vpop.f32.mrb[228].mxu1 }
0x1560   :  { %v14091_v40 = vpop.f32.mrb[221].mxu0  ;;  %v14131_v39 = vpop.f32.mrb[229].mxu1 }
0x1561   :  { %v8831_v41 = vpop.f32.mrb[222].mxu0  ;;  %v9071_v27 = vpop.f32.mrb[230].mxu1  ;;  %v9618_v39 = vld [vmem:[%s19275_s12 + $0x8] sm:$0xff] }
0x1562   :  { %v8835_v8 = vpack.c.bf16 %v8831_v41, %v8828_v16  ;;  %v14092_v47 = vpop.f32.mrb[223].mxu0  ;;  %v9075_v53 = vpack.c.bf16 %v9071_v27, %v9068_v30  ;;  %v14132_v50 = vpop.f32.mrb[231].mxu1  ;;  %v9617_v16 = vld [vmem:[%s19275_s12] sm:$0xff] }
0x1564   :  { %14098 = vmatmul.mubr.msk.bf16.vlgmr.msra.gmra.mrb[224].mxu0 %vm1929_vm0, %v8835_v8 }
0x1565   :  { %14102 = vmatpush3.bf16.msra.mxu0 %v18614_v37  ;;  %14105 = vmatprep.mubr.msk.bf16.mxu0 %vm15335_vm2, %v15334_v38 }
0x1566   :  { %14103 = vmatprep.subr.bf16.mxu0 %v15334_v38 }
0x1567   :  { %v9167_v23 = vpop.f32.mrb[232].mxu1 }
0x1568   :  { %v14147_v51 = vpop.f32.mrb[233].mxu1 }
0x1569   :  { %14104 = vmatpush3.bf16.msra.mxu0 %v18620_v57  ;;  %v9170_v12 = vpop.f32.mrb[234].mxu1 }
0x156a   :  { %14117 = vmatprep.subr.bf16.mxu0 %v15334_v38  ;;  %v9174_v3 = vpack.c.bf16 %v9170_v12, %v9167_v23  ;;  %v14148_v15 = vpop.f32.mrb[235].mxu1 }
0x156f   :  { %v9266_v46 = vpop.f32.mrb[236].mxu1 }
0x1570   :  { %14106 = vmatmul.mubr.msk.bf16.vlgmr.msra.gmra.mrb[224].mxu0 %vm1929_vm0, %v8782_v34  ;;  %v14163_v58 = vpop.f32.mrb[237].mxu1 }
0x1571   :  { %14118 = vmatpush3.bf16.msra.mxu0 %v18627_v6  ;;  %14121 = vmatprep.mubr.msk.bf16.mxu0 %vm15335_vm2, %v15334_v38  ;;  %v9269_v37 = vpop.f32.mrb[238].mxu1 }
0x1572   :  { %14119 = vmatprep.subr.bf16.mxu0 %v15334_v38  ;;  %v9273_v49 = vpack.c.bf16 %v9269_v37, %v9266_v46  ;;  %v14164_v11 = vpop.f32.mrb[239].mxu1 }
0x1575   :  { %14120 = vmatpush3.bf16.msra.mxu0 %v18635_v1 }
0x1576   :  { %14133 = vmatprep.subr.bf16.mxu0 %v15334_v38 }
0x1577   :  { %v9365_v57 = vpop.f32.mrb[240].mxu1 }
0x1578   :  { %v14179_v17 = vpop.f32.mrb[241].mxu1 }
0x1579   :  { %v9368_v56 = vpop.f32.mrb[242].mxu1 }
0x157a   :  { %v9372_v19 = vpack.c.bf16 %v9368_v56, %v9365_v57  ;;  %v14180_v18 = vpop.f32.mrb[243].mxu1 }
0x157c   :  { %14122 = vmatmul.mubr.msk.bf16.vlgmr.msra.gmra.mrb[224].mxu0 %vm1929_vm0, %v8976_v14 }
0x157d   :  { %14134 = vmatpush3.bf16.msra.mxu0 %v18643_v26  ;;  %14137 = vmatprep.mubr.msk.bf16.mxu0 %vm15335_vm2, %v15334_v38 }
0x157e   :  { %14135 = vmatprep.subr.bf16.mxu0 %v15334_v38 }
0x157f   :  { %v9464_v6 = vpop.f32.mrb[244].mxu1 }
0x1580   :  { %v14195_v63 = vpop.f32.mrb[245].mxu1 }
0x1581   :  { %14136 = vmatpush3.bf16.msra.mxu0 %v18651_v36  ;;  %v9467_v1 = vpop.f32.mrb[246].mxu1 }
0x1582   :  { %14149 = vmatprep.subr.bf16.mxu0 %v15334_v38  ;;  %v9471_v0 = vpack.c.bf16 %v9467_v1, %v9464_v6  ;;  %v14196_v4 = vpop.f32.mrb[247].mxu1 }
0x1587   :  { %v9563_v29 = vpop.f32.mrb[248].mxu1 }
0x1588   :  { %14138 = vmatmul.mubr.msk.bf16.vlgmr.msra.gmra.mrb[224].mxu0 %vm1929_vm0, %v9075_v53  ;;  %v14211_v7 = vpop.f32.mrb[249].mxu1 }
0x1589   :  { %14150 = vmatpush3.bf16.msra.mxu0 %v18675_v52  ;;  %14153 = vmatprep.mubr.msk.bf16.mxu0 %vm15335_vm2, %v15334_v38  ;;  %v9566_v26 = vpop.f32.mrb[250].mxu1 }
0x158a   :  { %14151 = vmatprep.subr.bf16.mxu0 %v15334_v38  ;;  %v9570_v44 = vpack.c.bf16 %v9566_v26, %v9563_v29  ;;  %v14212_v43 = vpop.f32.mrb[251].mxu1 }
0x158d   :  { %14152 = vmatpush3.bf16.msra.mxu0 %v18683_v42 }
0x158e   :  { %14165 = vmatprep.subr.bf16.mxu0 %v15334_v38 }
0x1594   :  { %14154 = vmatmul.mubr.msk.bf16.vlgmr.msra.gmra.mrb[224].mxu0 %vm1929_vm0, %v9174_v3 }
0x1595   :  { %14166 = vmatpush3.bf16.msra.mxu0 %v18690_v9  ;;  %14169 = vmatprep.mubr.msk.bf16.mxu0 %vm15335_vm2, %v15334_v38 }
0x1596   :  { %14167 = vmatprep.subr.bf16.mxu0 %v15334_v38 }
0x1599   :  { %14168 = vmatpush3.bf16.msra.mxu0 %v18700_v33 }
0x159a   :  { %14181 = vmatprep.subr.bf16.mxu0 %v15334_v38 }
0x15a0   :  { %14170 = vmatmul.mubr.msk.bf16.vlgmr.msra.gmra.mrb[224].mxu0 %vm1929_vm0, %v9273_v49 }
0x15a1   :  { %14182 = vmatpush3.bf16.msra.mxu0 %v18707_v35  ;;  %14185 = vmatprep.mubr.msk.bf16.mxu0 %vm15335_vm2, %v15334_v38 }
0x15a2   :  { %14183 = vmatprep.subr.bf16.mxu0 %v15334_v38 }
0x15a5   :  { %14184 = vmatpush3.bf16.msra.mxu0 %v18716_v60 }
0x15a6   :  { %14197 = vmatprep.subr.bf16.mxu0 %v15334_v38 }
0x15ac   :  { %14186 = vmatmul.mubr.msk.bf16.vlgmr.msra.gmra.mrb[224].mxu0 %vm1929_vm0, %v9372_v19 }
0x15ad   :  { %14198 = vmatpush3.bf16.msra.mxu0 %v18723_v5  ;;  %14201 = vmatprep.mubr.msk.bf16.mxu0 %vm15335_vm2, %v15334_v38 }
0x15ae   :  { %14199 = vmatprep.subr.bf16.mxu0 %v15334_v38 }
0x15b1   :  { %14200 = vmatpush3.bf16.msra.mxu0 %v18732_v13 }
0x15b2   :  { %14213 = vmatprep.subr.bf16.mxu0 %v15334_v38 }
0x15b8   :  { %14202 = vmatmul.mubr.msk.bf16.vlgmr.msra.gmra.mrb[224].mxu0 %vm1929_vm0, %v9471_v0 }
0x15b9   :  { %14214 = vmatpush3.bf16.msra.mxu0 %v18755_v62  ;;  %14217 = vmatprep.mubr.msk.bf16.mxu0 %vm15335_vm2, %v15334_v38 }
0x15ba   :  { %14215 = vmatprep.subr.bf16.mxu0 %v15334_v38 }
0x15bd   :  { %14216 = vmatpush3.bf16.msra.mxu0 %v18763_v10 }
0x15be   :  { %14233 = vmatprep.subr.bf16.mxu0 %v15334_v38 }
0x15c4   :  { %14218 = vmatmul.mubr.msk.bf16.vlgmr.msra.gmra.mrb[224].mxu0 %vm1929_vm0, %v9570_v44 }
0x15c5   :  { %14237 = vmatprep.mubr.msk.bf16.mxu0 %vm15335_vm2, %v15334_v38 }
0x1697   :  { %v9608_v36 = vpop.f32.mrb[224].mxu0 }
0x1698   :  { %v9625_v52 = vmul.f32 %v9608_v36, %v9608_v36  ;;  %v14219_v42 = vpop.f32.mrb[225].mxu0  ;;  %v9619_v9 = vsel %vm1929_vm0, %v9608_v36, 0.0 }
0x1699   :  { %9620 = vadd.xlane.f32.xlu0 %v9619_v9  ;;  %v9611_v33 = vpop.f32.mrb[226].mxu0 }
0x169a   :  { %v14220_v35 = vpop.f32.mrb[227].mxu0  ;;  %v9622_v60 = vsel %vm1929_vm0, %v9611_v33, 0.0  ;;  %v9626_v5 = vmul.f32 %v9611_v33, %v9611_v33  ;;  %v9627_v13 = vsel %vm1929_vm0, %v9625_v52, 0.0 }
0x169b   :  { %9623 = vadd.xlane.f32.xlu1 %v9622_v60  ;;  %v12264_v35 = vld [vmem:[%s19268_s5 + $0x2] sm:$0x3]  ;;  %v12276_v60 = vld [vmem:[%s19268_s5 + $0x4] sm:$0x3] }
0x169c   :  { %v9630_v62 = vsel %vm1929_vm0, %v9626_v5, 0.0  ;;  %v12285_v5 = vld [vmem:[%s19268_s5 + $0x6] sm:$0x3] }
0x169d   :  { %9628 = vadd.xlane.f32.xlu0 %v9627_v13  ;;  %v12294_v13 = vld [vmem:[%s19268_s5 + $0x8] sm:$0x3] }
0x16a1   :  { %9631 = vadd.xlane.f32.xlu0 %v9630_v62  ;;  %v12303_v62 = vld [vmem:[%s19268_s5 + $0xa] sm:$0x3] }
0x1726   :  { %v9621_v10 = vpop.xlane.xlu0 %9620 }
0x1727   :  { %v9633_v28 = vmul.f32 0.03125, %v9621_v10  ;;  %v12312_v10 = vld [vmem:[%s19268_s5 + $0xc] sm:$0x3] }
0x1728   :  { %v9624_v55 = vpop.xlane.xlu1 %9623 }
0x1729   :  { %v9637_v54 = vmul.f32 %v9633_v28, %v9633_v28  ;;  %v9634_v25 = vmul.f32 0.03125, %v9624_v55  ;;  %v12330_v55 = vld [vmem:[%s19268_s5 + $0x10] sm:$0x3] }
0x172a   :  { %v9629_v32 = vpop.xlane.xlu0 %9628 }
0x172b   :  { %v9635_v48 = vmul.f32 0.03125, %v9629_v32  ;;  %v9638_v21 = vmul.f32 %v9634_v25, %v9634_v25  ;;  %v15105_v32 = vld [vmem:[%s19270_s7 + $0x10] sm:$0xff]  }
0x172c   :  { %14234 = vmatpush3.bf16.msra.mxu0 %v15105_v32  ;;  %v15122_v32 = vld [vmem:[%s19270_s7 + $0x88] sm:$0xff]  }
0x172d   :  { %v9639_v24 = vsub.f32 %v9635_v48, %v9637_v54  ;;  %14235 = vmatprep.subr.bf16.mxu0 %v15334_v38  ;;  %v15106_v54 = vld [vmem:[%s19270_s7 + $0x18] sm:$0xff]  }
0x172e   :  { %v9632_v45 = vpop.xlane.xlu0 %9631 }
0x172f   :  { %v9641_v22 = vmax.f32 %v9639_v24, 0.0  ;;  %v9636_v20 = vmul.f32 0.03125, %v9632_v45 }
0x1730   :  { %14236 = vmatpush3.bf16.msra.mxu0 %v15106_v54 }
0x1731   :  { %v9643_v34 = vadd.f32 1e-05, %v9641_v22  ;;  %v9640_v31 = vsub.f32 %v9636_v20, %v9638_v21  ;;  %14241 = vmatprep.subr.bf16.mxu0 %v15334_v38  ;;  %v15107_v22 = vld [vmem:[%s19270_s7] sm:$0xff]  }
0x1733   :  { %15235 = vrsqrt.f32 %v9643_v34  ;;  %v9642_v14 = vmax.f32 %v9640_v31, 0.0 }
0x1735   :  { %v9644_v61 = vadd.f32 1e-05, %v9642_v14 }
0x1737   :  { %15237 = vrsqrt.f32 %v9644_v61  ;;  %v15108_v61 = vld [vmem:[%s19270_s7 + $0x8] sm:$0xff]  }
0x173d   :  { %v15236_v30 = vpop.eup %15235 }
0x173e   :  { %v9647_v40 = vmul.f32 %v15236_v30, %v9617_v16 }
0x1740   :  { %v9649_v41 = vmul.f32 %v9647_v40, %v9633_v28  ;;  %v12321_v28 = vld [vmem:[%s19268_s5 + $0xe] sm:$0x3] }
0x1741   :  { %v15238_v27 = vpop.eup %15237 }
0x1742   :  { %9653 = vrot.lane.b32.xlu0 %v9649_v41, %s15332_s8  ;;  %v9648_v8 = vmul.f32 %v15238_v27, %v9618_v39  ;;  %v15109_v41 = vld [vmem:[%s19270_s7 + $0x20] sm:$0xff]  }
0x1744   :  { %v9650_v47 = vmul.f32 %v9648_v8, %v9634_v25 }
0x1746   :  { %9655 = vrot.lane.b32.xlu1 %v9650_v47, %s15332_s8 }
0x174a   :  { %9663 = vperm.xlu1 %14789, %v9647_v40  }
0x174e   :  { %9668 = vperm.xlu1 %14789, %v9648_v8   ;;  %v15110_v8 = vld [vmem:[%s19270_s7 + $0x28] sm:$0xff]  }
0x1752   :  { %14790 = vset.pattern.permute.xlu1 %v15333_v2 }
0x17b4   :  { %v9654_v53 = vpop.permute.xlu0 %9653 }
0x17b5   :  { %v9659_v50 = vsub.f32 %v9617_v16, %v9654_v53 }
0x17b7   :  { %9675 = vperm.xlu0 %14788, %v9659_v50  }
0x17b8   :  { %v9656_v23 = vpop.permute.xlu1 %9655 }
0x17b9   :  { %v9660_v51 = vsub.f32 %v9618_v39, %v9656_v23 }
0x17bb   :  { %9680 = vperm.xlu1 %14790, %v9660_v51  }
0x17bf   :  { %14791 = vset.pattern.permute.xlu1 %v15331_v59 }
0x17c9   :  { %v9664_v12 = vpop.permute.xlu1 %9663 }
0x17ca   :  { %v9671_v3 = vmul.f32 %v9664_v12, %v9608_v36  ;;  %v15111_v12 = vld [vmem:[%s19270_s7 + $0x30] sm:$0xff]  }
0x17cd   :  { %v9669_v15 = vpop.permute.xlu1 %9668 }
0x17ce   :  { %v9672_v37 = vmul.f32 %v9669_v15, %v9611_v33  ;;  %v9704_v33 = vld [vmem:[%s19268_s5] sm:$0x3] }
0x1836   :  { %v9676_v46 = vpop.permute.xlu0 %9675 }
0x1837   :  { %v9683_v58 = vadd.f32 %v9676_v46, %v9671_v3 }
0x1839   :  { %v9687_v49 = vmul.f32 0.044715, %v9683_v58  ;;  %v9685_v44 = vmul.f32 0.5, %v9683_v58 }
0x183a   :  { %v9681_v11 = vpop.permute.xlu1 %9680 }
0x183b   :  { %v9689_v57 = vmul.f32 %v9687_v49, %v9683_v58  ;;  %v9684_v17 = vadd.f32 %v9681_v11, %v9672_v37  ;;  %v15112_v37 = vld [vmem:[%s19270_s7 + $0x38] sm:$0xff]  }
0x183d   :  { %v9691_v56 = vmul.f32 %v9689_v57, %v9683_v58  ;;  %v9688_v19 = vmul.f32 0.044715, %v9684_v17  ;;  %v9686_v43 = vmul.f32 0.5, %v9684_v17 }
0x183f   :  { %v9693_v18 = vadd.f32 %v9691_v56, %v9683_v58  ;;  %v9690_v6 = vmul.f32 %v9688_v19, %v9684_v17  ;;  %v15113_v19 = vld [vmem:[%s19270_s7 + $0x40] sm:$0xff]  }
0x1841   :  { %v9695_v63 = vmul.f32 0.7978846, %v9693_v18  ;;  %v9692_v1 = vmul.f32 %v9690_v6, %v9684_v17  ;;  %v15114_v18 = vld [vmem:[%s19270_s7 + $0x48] sm:$0xff]  }
0x1843   :  { %15239 = vtanh.f32 %v9695_v63  ;;  %v9694_v0 = vadd.f32 %v9692_v1, %v9684_v17 }
0x1845   :  { %v9696_v4 = vmul.f32 0.7978846, %v9694_v0 }
0x1847   :  { %15241 = vtanh.f32 %v9696_v4 }
0x184d   :  { %v15240_v29 = vpop.eup %15239 }
0x184e   :  { %v9699_v7 = vadd.f32 1.0, %v15240_v29  ;;  %v15115_v29 = vld [vmem:[%s19270_s7 + $0x50] sm:$0xff]  }
0x1850   :  { %v9701_v52 = vmul.f32 %v9699_v7, %v9685_v44 }
0x1851   :  { %v15242_v26 = vpop.eup %15241 }
0x1852   :  { %v9700_v36 = vadd.f32 1.0, %v15242_v26 }
0x1854   :  { %v9702_v42 = vmul.f32 %v9700_v36, %v9686_v43  ;;  %v15116_v36 = vld [vmem:[%s19270_s7 + $0x58] sm:$0xff]  }
0x1856   :  { %v9703_v9 = vpack.c.bf16 %v9702_v42, %v9701_v52 }
0x1858   :  { %14222 = vmatpush3.bf16.msra.mxu1 %v9703_v9 }
0x1859   :  { %14227 = vmatprep.subr.bf16.mxu1 %v15334_v38 }
0x185b   :  { %14224 = vmatmul.mubr.msk.bf16.vlgmr.msra.gmra.mrb[252].mxu1 %vm9705_vm3, %v9704_v33 }
0x185c   :  { %14228 = vmatpush3.bf16.msra.mxu1 %v9703_v9  ;;  %14229 = vmatprep.mubr.msk.bf16.mxu1 %vm15335_vm2, %v15334_v38 }
0x185d   :  { %14249 = vmatprep.subr.bf16.mxu1 %v15334_v38 }
0x1863   :  { %14230 = vmatmul.mubr.msk.bf16.vlgmr.msra.gmra.mrb[0].mxu1 %vm9705_vm3, %v12264_v35 }
0x1864   :  { %14250 = vmatpush3.bf16.msra.mxu1 %v9703_v9  ;;  %14251 = vmatprep.mubr.msk.bf16.mxu1 %vm15335_vm2, %v15334_v38 }
0x1865   :  { %14263 = vmatprep.subr.bf16.mxu1 %v15334_v38 }
0x186b   :  { %14252 = vmatmul.mubr.msk.bf16.vlgmr.msra.gmra.mrb[4].mxu1 %vm9705_vm3, %v12276_v60  ;;  %v15117_v60 = vld [vmem:[%s19270_s7 + $0x60] sm:$0xff]  }
0x186c   :  { %14264 = vmatpush3.bf16.msra.mxu1 %v9703_v9  ;;  %14265 = vmatprep.mubr.msk.bf16.mxu1 %vm15335_vm2, %v15334_v38 }
0x186d   :  { %14277 = vmatprep.subr.bf16.mxu1 %v15334_v38 }
0x1873   :  { %14266 = vmatmul.mubr.msk.bf16.vlgmr.msra.gmra.mrb[8].mxu1 %vm9705_vm3, %v12285_v5  ;;  %v15118_v5 = vld [vmem:[%s19270_s7 + $0x68] sm:$0xff]  }
0x1874   :  { %14278 = vmatpush3.bf16.msra.mxu1 %v9703_v9  ;;  %14279 = vmatprep.mubr.msk.bf16.mxu1 %vm15335_vm2, %v15334_v38 }
0x1875   :  { %14291 = vmatprep.subr.bf16.mxu1 %v15334_v38 }
0x187b   :  { %14280 = vmatmul.mubr.msk.bf16.vlgmr.msra.gmra.mrb[12].mxu1 %vm9705_vm3, %v12294_v13 }
0x187c   :  { %14292 = vmatpush3.bf16.msra.mxu1 %v9703_v9  ;;  %14293 = vmatprep.mubr.msk.bf16.mxu1 %vm15335_vm2, %v15334_v38 }
0x187d   :  { %14305 = vmatprep.subr.bf16.mxu1 %v15334_v38 }
0x1883   :  { %14294 = vmatmul.mubr.msk.bf16.vlgmr.msra.gmra.mrb[16].mxu1 %vm9705_vm3, %v12303_v62  ;;  %v15119_v62 = vld [vmem:[%s19270_s7 + $0x70] sm:$0xff]  }
0x1884   :  { %14306 = vmatpush3.bf16.msra.mxu1 %v9703_v9  ;;  %14307 = vmatprep.mubr.msk.bf16.mxu1 %vm15335_vm2, %v15334_v38 }
0x1885   :  { %14319 = vmatprep.subr.bf16.mxu1 %v15334_v38 }
0x188b   :  { %14308 = vmatmul.mubr.msk.bf16.vlgmr.msra.gmra.mrb[20].mxu1 %vm9705_vm3, %v12312_v10  ;;  %v15120_v10 = vld [vmem:[%s19270_s7 + $0x78] sm:$0xff]  }
0x188c   :  { %14320 = vmatpush3.bf16.msra.mxu1 %v9703_v9  ;;  %14321 = vmatprep.mubr.msk.bf16.mxu1 %vm15335_vm2, %v15334_v38 }
0x188d   :  { %14333 = vmatprep.subr.bf16.mxu1 %v15334_v38 }
0x1893   :  { %14322 = vmatmul.mubr.msk.bf16.vlgmr.msra.gmra.mrb[24].mxu1 %vm9705_vm3, %v12321_v28 }
0x1894   :  { %14334 = vmatpush3.bf16.msra.mxu1 %v9703_v9  ;;  %14335 = vmatprep.mubr.msk.bf16.mxu1 %vm15335_vm2, %v15334_v38 }
0x189b   :  { %14336 = vmatmul.mubr.msk.bf16.vlgmr.msra.gmra.mrb[28].mxu1 %vm9705_vm3, %v12330_v55  ;;  %v15121_v55 = vld [vmem:[%s19270_s7 + $0x80] sm:$0xff]  }
0x192e   :  { %v9743_v25 = vpop.f32.mrb[252].mxu1 }
0x192f   :  { %v14225_v48 = vpop.f32.mrb[253].mxu1  ;;  %v9749_v27 = vpack.c.bf16 %v9743_v25, %v9743_v25 }
0x1930   :  { %v9746_v24 = vpop.f32.mrb[254].mxu1 }
0x1931   :  { %v14226_v45 = vpop.f32.mrb[255].mxu1 }
0x1936   :  { %v9793_v21 = vpop.f32.mrb[0].mxu1 }
0x1937   :  { %v9799_v20 = vpack.c.bf16 %v9793_v21, %v9793_v21  ;;  %v14231_v34 = vpop.f32.mrb[1].mxu1 }
0x1938   :  { %v9796_v31 = vpop.f32.mrb[2].mxu1 }
0x1939   :  { %14238 = vmatmul.mubr.msk.bf16.vlgmr.msra.gmra.mrb[228].mxu0 %vm1929_vm0, %v9799_v20  ;;  %v14232_v14 = vpop.f32.mrb[3].mxu1 }
0x193a   :  { %14242 = vmatpush3.bf16.msra.mxu0 %v15107_v22  ;;  %14245 = vmatprep.mubr.msk.bf16.mxu0 %vm15335_vm2, %v15334_v38 }
0x193b   :  { %14243 = vmatprep.subr.bf16.mxu0 %v15334_v38 }
0x193e   :  { %14244 = vmatpush3.bf16.msra.mxu0 %v15108_v61  ;;  %v9954_v16 = vpop.f32.mrb[4].mxu1 }
0x193f   :  { %14255 = vmatprep.subr.bf16.mxu0 %v15334_v38  ;;  %v14253_v30 = vpop.f32.mrb[5].mxu1  ;;  %v9960_v51 = vpack.c.bf16 %v9954_v16, %v9954_v16 }
0x1940   :  { %v9957_v40 = vpop.f32.mrb[6].mxu1 }
0x1941   :  { %v14254_v39 = vpop.f32.mrb[7].mxu1 }
0x1945   :  { %14246 = vmatmul.mubr.msk.bf16.vlgmr.msra.gmra.mrb[228].mxu0 %vm1929_vm0, %v9749_v27 }
0x1946   :  { %14256 = vmatpush3.bf16.msra.mxu0 %v15109_v41  ;;  %14259 = vmatprep.mubr.msk.bf16.mxu0 %vm15335_vm2, %v15334_v38  ;;  %v10061_v47 = vpop.f32.mrb[8].mxu1  ;;  %v10664_v41 = vld [vmem:[%s19276_s13] sm:$0xf] }
0x1947   :  { %14257 = vmatprep.subr.bf16.mxu0 %v15334_v38  ;;  %v14267_v53 = vpop.f32.mrb[9].mxu1  ;;  %v10067_v17 = vpack.c.bf16 %v10061_v47, %v10061_v47 }
0x1948   :  { %v10064_v50 = vpop.f32.mrb[10].mxu1 }
0x1949   :  { %v14268_v23 = vpop.f32.mrb[11].mxu1 }
0x194a   :  { %14258 = vmatpush3.bf16.msra.mxu0 %v15110_v8 }
0x194b   :  { %14269 = vmatprep.subr.bf16.mxu0 %v15334_v38 }
0x194e   :  { %v10168_v3 = vpop.f32.mrb[12].mxu1 }
0x194f   :  { %v14281_v15 = vpop.f32.mrb[13].mxu1  ;;  %v10174_v4 = vpack.c.bf16 %v10168_v3, %v10168_v3 }
0x1950   :  { %v10171_v46 = vpop.f32.mrb[14].mxu1 }
0x1951   :  { %14260 = vmatmul.mubr.msk.bf16.vlgmr.msra.gmra.mrb[228].mxu0 %vm1929_vm0, %v9960_v51  ;;  %v14282_v58 = vpop.f32.mrb[15].mxu1 }
0x1952   :  { %14270 = vmatpush3.bf16.msra.mxu0 %v15111_v12  ;;  %14273 = vmatprep.mubr.msk.bf16.mxu0 %vm15335_vm2, %v15334_v38 }
0x1953   :  { %14271 = vmatprep.subr.bf16.mxu0 %v15334_v38 }
0x1956   :  { %14272 = vmatpush3.bf16.msra.mxu0 %v15112_v37  ;;  %v10275_v49 = vpop.f32.mrb[16].mxu1 }
0x1957   :  { %14283 = vmatprep.subr.bf16.mxu0 %v15334_v38  ;;  %v14295_v11 = vpop.f32.mrb[17].mxu1  ;;  %v10281_v33 = vpack.c.bf16 %v10275_v49, %v10275_v49 }
0x1958   :  { %v10278_v57 = vpop.f32.mrb[18].mxu1 }
0x1959   :  { %v14296_v56 = vpop.f32.mrb[19].mxu1 }
0x195d   :  { %14274 = vmatmul.mubr.msk.bf16.vlgmr.msra.gmra.mrb[228].mxu0 %vm1929_vm0, %v10067_v17 }
0x195e   :  { %14284 = vmatpush3.bf16.msra.mxu0 %v15113_v19  ;;  %14287 = vmatprep.mubr.msk.bf16.mxu0 %vm15335_vm2, %v15334_v38  ;;  %v10382_v6 = vpop.f32.mrb[20].mxu1 }
0x195f   :  { %14285 = vmatprep.subr.bf16.mxu0 %v15334_v38  ;;  %v14309_v63 = vpop.f32.mrb[21].mxu1  ;;  %v10388_v13 = vpack.c.bf16 %v10382_v6, %v10382_v6 }
0x1960   :  { %v10385_v1 = vpop.f32.mrb[22].mxu1 }
0x1961   :  { %v14310_v0 = vpop.f32.mrb[23].mxu1 }
0x1962   :  { %14286 = vmatpush3.bf16.msra.mxu0 %v15114_v18 }
0x1963   :  { %14297 = vmatprep.subr.bf16.mxu0 %v15334_v38 }
0x1966   :  { %v10489_v7 = vpop.f32.mrb[24].mxu1 }
0x1967   :  { %v14323_v26 = vpop.f32.mrb[25].mxu1  ;;  %v10495_v28 = vpack.c.bf16 %v10489_v7, %v10489_v7 }
0x1968   :  { %v10492_v44 = vpop.f32.mrb[26].mxu1 }
0x1969   :  { %14288 = vmatmul.mubr.msk.bf16.vlgmr.msra.gmra.mrb[228].mxu0 %vm1929_vm0, %v10174_v4  ;;  %v14324_v43 = vpop.f32.mrb[27].mxu1 }
0x196a   :  { %14298 = vmatpush3.bf16.msra.mxu0 %v15115_v29  ;;  %14301 = vmatprep.mubr.msk.bf16.mxu0 %vm15335_vm2, %v15334_v38 }
0x196b   :  { %14299 = vmatprep.subr.bf16.mxu0 %v15334_v38 }
0x196e   :  { %14300 = vmatpush3.bf16.msra.mxu0 %v15116_v36  ;;  %v10596_v52 = vpop.f32.mrb[28].mxu1 }
0x196f   :  { %14311 = vmatprep.subr.bf16.mxu0 %v15334_v38  ;;  %v14337_v42 = vpop.f32.mrb[29].mxu1  ;;  %v10602_v54 = vpack.c.bf16 %v10596_v52, %v10596_v52 }
0x1970   :  { %v10599_v9 = vpop.f32.mrb[30].mxu1 }
0x1971   :  { %v14338_v35 = vpop.f32.mrb[31].mxu1 }
0x1975   :  { %14302 = vmatmul.mubr.msk.bf16.vlgmr.msra.gmra.mrb[228].mxu0 %vm1929_vm0, %v10281_v33 }
0x1976   :  { %14312 = vmatpush3.bf16.msra.mxu0 %v15117_v60  ;;  %14315 = vmatprep.mubr.msk.bf16.mxu0 %vm15335_vm2, %v15334_v38 }
0x1977   :  { %14313 = vmatprep.subr.bf16.mxu0 %v15334_v38 }
0x197a   :  { %14314 = vmatpush3.bf16.msra.mxu0 %v15118_v5 }
0x197b   :  { %14325 = vmatprep.subr.bf16.mxu0 %v15334_v38 }
0x1981   :  { %14316 = vmatmul.mubr.msk.bf16.vlgmr.msra.gmra.mrb[228].mxu0 %vm1929_vm0, %v10388_v13 }
0x1982   :  { %14326 = vmatpush3.bf16.msra.mxu0 %v15119_v62  ;;  %14329 = vmatprep.mubr.msk.bf16.mxu0 %vm15335_vm2, %v15334_v38 }
0x1983   :  { %14327 = vmatprep.subr.bf16.mxu0 %v15334_v38 }
0x1986   :  { %14328 = vmatpush3.bf16.msra.mxu0 %v15120_v10 }
0x1987   :  { %14339 = vmatprep.subr.bf16.mxu0 %v15334_v38 }
0x198d   :  { %14330 = vmatmul.mubr.msk.bf16.vlgmr.msra.gmra.mrb[228].mxu0 %vm1929_vm0, %v10495_v28 }
0x198e   :  { %14340 = vmatpush3.bf16.msra.mxu0 %v15121_v55  ;;  %14343 = vmatprep.mubr.msk.bf16.mxu0 %vm15335_vm2, %v15334_v38 }
0x198f   :  { %14341 = vmatprep.subr.bf16.mxu0 %v15334_v38 }
0x1992   :  { %14342 = vmatpush3.bf16.msra.mxu0 %v15122_v32 }
0x1999   :  { %14344 = vmatmul.mubr.msk.bf16.vlgmr.msra.gmra.mrb[228].mxu0 %vm1929_vm0, %v10602_v54 }
0x1a6c   :  { %v10657_v25 = vpop.f32.mrb[228].mxu0 }
0x1a6d   :  { %v10669_v48 = vmul.f32 %v10657_v25, %v10657_v25  ;;  %v14345_v24 = vpop.f32.mrb[229].mxu0  ;;  %v10666_v45 = vsel %vm10665_vm4, %v10657_v25, 0.0 }
0x1a6e   :  { %10667 = vadd.xlane.f32.xlu0 %v10666_v45  ;;  %v10660_v21 = vpop.f32.mrb[230].mxu0 }
0x1a6f   :  { %v14346_v22 = vpop.f32.mrb[231].mxu0  ;;  %v10670_v20 = vsel %vm10665_vm4, %v10669_v48, 0.0 }
0x1a70   :  { %10671 = vadd.xlane.f32.xlu1 %v10670_v20 }
0x1afb   :  { %v10668_v34 = vpop.xlane.xlu0 %10667 }
0x1afc   :  { %v10673_v31 = vmul.f32 0.0078125, %v10668_v34 }
0x1afd   :  { %v10672_v14 = vpop.xlane.xlu1 %10671 }
0x1afe   :  { %v10675_v61 = vmul.f32 %v10673_v31, %v10673_v31  ;;  %v10674_v16 = vmul.f32 0.0078125, %v10672_v14 }
0x1b00   :  { %v10676_v30 = vsub.f32 %v10674_v16, %v10675_v61 }
0x1b02   :  { %v10677_v40 = vmax.f32 %v10676_v30, 0.0 }
0x1b04   :  { %v10678_v39 = vadd.f32 1e-05, %v10677_v40 }
0x1b06   :  { %15243 = vrsqrt.f32 %v10678_v39 }
0x1b10   :  { %v15244_v27 = vpop.eup %15243 }
0x1b11   :  { %v10680_v8 = vmul.f32 %v15244_v27, %v10664_v41 }
0x1b13   :  { %10689 = vperm.xlu1 %14791, %v10680_v8   ;;  %v10681_v47 = vmul.f32 %v10680_v8, %v10673_v31 }
0x1b15   :  { %10683 = vrot.lane.b32.xlu0 %v10681_v47, %s15332_s8 }
0x1b87   :  { %v10684_v53 = vpop.permute.xlu0 %10683 }
0x1b88   :  { %v10686_v50 = vsub.f32 %v10664_v41, %v10684_v53 }
0x1b8a   :  { %10695 = vperm.xlu0 %14788, %v10686_v50  }
0x1b92   :  { %v10690_v23 = vpop.permute.xlu1 %10689 }
0x1b93   :  { %v10692_v51 = vmul.f32 %v10690_v23, %v10657_v25 }
0x1c09   :  { %v10696_v12 = vpop.permute.xlu0 %10695 }
0x1c0a   :  { %v10698_v3 = vadd.f32 %v10696_v12, %v10692_v51 }
0x1c0c   :  { %v10700_v15 = vmul.f32 0.044715, %v10698_v3  ;;  %v10699_v57 = vmul.f32 0.5, %v10698_v3 }
0x1c0e   :  { %v10701_v46 = vmul.f32 %v10700_v15, %v10698_v3 }
0x1c10   :  { %v10702_v58 = vmul.f32 %v10701_v46, %v10698_v3 }
0x1c12   :  { %v10703_v37 = vadd.f32 %v10702_v58, %v10698_v3 }
0x1c14   :  { %v10704_v49 = vmul.f32 0.7978846, %v10703_v37 }
0x1c16   :  { %15245 = vtanh.f32 %v10704_v49 }
0x1c20   :  { %v15246_v11 = vpop.eup %15245 }
0x1c21   :  { %v10706_v17 = vadd.f32 1.0, %v15246_v11 }
0x1c23   :  { %v10707_v56 = vmul.f32 %v10706_v17, %v10699_v57 }
0x1c25   :  { %v19150_v19 = vpack.c.bf16 %v10707_v56, %v10707_v56 }
0x1c26   :  { %15329 = dma.done.wait [#allocation3], 20480 }
0x1c27   :  { %15330 = vsyncadd [#allocation3], 4294946816  ;;  %10831 = vmatprep.mubr.bf16.mxu1 %v15331_v59  ;;  %10872 = vmatprep.mubr.bf16.mxu0 %v15331_v59  ;;  %v10756_v18 = vld [vmem:[#allocation2 + $0x148] sm:$0xff]  ;;  %v10755_v6 = vld [vmem:[#allocation2 + $0x140] sm:$0xff]  ;;  %v19157_v21 = vshrl.u32 %v19150_v19, 16  ;;  %vm11385_vm5 = vcmask 1040384  }
0x1c28   :  { %15315 = vset.pattern.permute.xlu1 %v15331_v59  ;;  %15316 = vset.pattern.permute.xlu0 %v15333_v2  ;;  %v10761_v63 = vld [vmem:[#allocation2 + $0x170] sm:$0xff]  ;;  %v10760_v1 = vld [vmem:[#allocation2 + $0x168] sm:$0xff]  ;;  %v10766_v0 = vld [vmem:[#allocation2 + $0x198] sm:$0xff] }
0x1c29   :  { %10799 = vmatprep.subr.bf16.mxu1 %v10756_v18  ;;  %v10758_v4 = vld [vmem:[#allocation2 + $0x158] sm:$0xff]  ;;  %v10757_v29 = vld [vmem:[#allocation2 + $0x150] sm:$0xff]  ;;  %v10763_v7 = vld [vmem:[#allocation2 + $0x180] sm:$0xff] }
0x1c2a   :  { %10800 = vmatpush1.bf16.msra.mxu1 %v10755_v6  ;;  %10840 = vmatprep.subr.bf16.mxu0 %v10758_v4  ;;  %v10765_v26 = vld [vmem:[#allocation2 + $0x190] sm:$0xff]  ;;  %v10762_v44 = vld [vmem:[#allocation2 + $0x178] sm:$0xff]  ;;  %v10771_v43 = vld [vmem:[#allocation2 + $0x1c0] sm:$0xff] }
0x1c2b   :  { %10801 = vmatprep.subr.bf16.mxu1 %v10761_v63  ;;  %10841 = vmatpush1.bf16.msra.mxu0 %v10757_v29  ;;  %v10768_v2 = vld [vmem:[#allocation2 + $0x1a8] sm:$0xff]  ;;  %v10770_v36 = vld [vmem:[#allocation2 + $0x1b8] sm:$0xff]  ;;  %v10767_v52 = vld [vmem:[#allocation2 + $0x1a0] sm:$0xff] }
0x1c2c   :  { %10842 = vmatprep.subr.bf16.mxu0 %v10763_v7  ;;  %v10776_v42 = vld [vmem:[#allocation2 + $0x1e8] sm:$0xff]  ;;  %v10773_v9 = vld [vmem:[#allocation2 + $0x1d0] sm:$0xff]  ;;  %v10775_v33 = vld [vmem:[#allocation2 + $0x1e0] sm:$0xff] }
0x1c2d   :  { %v10772_v35 = vld [vmem:[#allocation2 + $0x1c8] sm:$0xff]  ;;  %v10781_v60 = vld [vmem:[#allocation2 + $0x210] sm:$0xff]  ;;  %v10778_v5 = vld [vmem:[#allocation2 + $0x1f8] sm:$0xff] }
0x1c2e   :  { %10802 = vmatpush1.bf16.msra.mxu1 %v10760_v1  ;;  %v10780_v13 = vld [vmem:[#allocation2 + $0x208] sm:$0xff]  ;;  %v10777_v62 = vld [vmem:[#allocation2 + $0x1f0] sm:$0xff]  ;;  %v10786_v10 = vld [vmem:[#allocation2 + $0x238] sm:$0xff] }
0x1c2f   :  { %10803 = vmatprep.subr.bf16.mxu1 %v10766_v0  ;;  %10843 = vmatpush1.bf16.msra.mxu0 %v10762_v44  ;;  %v10783_v28 = vld [vmem:[#allocation2 + $0x220] sm:$0xff]  ;;  %v10785_v55 = vld [vmem:[#allocation2 + $0x230] sm:$0xff]  ;;  %v10782_v32 = vld [vmem:[#allocation2 + $0x218] sm:$0xff] }
0x1c30   :  { %10844 = vmatprep.subr.bf16.mxu0 %v10768_v2  ;;  %v10791_v54 = vld [vmem:[#allocation2 + $0x260] sm:$0xff]  ;;  %v10788_v25 = vld [vmem:[#allocation2 + $0x248] sm:$0xff]  ;;  %v10790_v48 = vld [vmem:[#allocation2 + $0x258] sm:$0xff] }
0x1c31   :  { %v10787_v24 = vld [vmem:[#allocation2 + $0x240] sm:$0xff]  ;;  %v10793_v45 = vld [vmem:[#allocation2 + $0x270] sm:$0xff]  ;;  %v10792_v20 = vld [vmem:[#allocation2 + $0x268] sm:$0xff] }
0x1c32   :  { %10804 = vmatpush1.bf16.msra.mxu1 %v10765_v26  ;;  %v10759_v22 = vld [vmem:[#allocation2 + $0x160] sm:$0xff]  ;;  %v10717_v34 = vld [vmem:[#allocation2 + $0x18] sm:$0xff]  ;;  %v10764_v31 = vld [vmem:[#allocation2 + $0x188] sm:$0xff] }
0x1c33   :  { %10805 = vmatprep.subr.bf16.mxu1 %v10771_v43  ;;  %10845 = vmatpush1.bf16.msra.mxu0 %v10767_v52  ;;  %v10716_v14 = vld [vmem:[#allocation2 + $0x10] sm:$0xff]  ;;  %v10722_v61 = vld [vmem:[#allocation2 + $0x40] sm:$0xff]  ;;  %v10721_v30 = vld [vmem:[#allocation2 + $0x38] sm:$0xff] }
0x1c34   :  { %10846 = vmatprep.subr.bf16.mxu0 %v10773_v9  ;;  %v10769_v16 = vld [vmem:[#allocation2 + $0x1b0] sm:$0xff]  ;;  %v10727_v40 = vld [vmem:[#allocation2 + $0x68] sm:$0xff]  ;;  %v10774_v39 = vld [vmem:[#allocation2 + $0x1d8] sm:$0xff] }
0x1c35   :  { %v10726_v41 = vld [vmem:[#allocation2 + $0x60] sm:$0xff]  ;;  %v10732_v27 = vld [vmem:[#allocation2 + $0x90] sm:$0xff]  ;;  %v10731_v47 = vld [vmem:[#allocation2 + $0x88] sm:$0xff] }
0x1c36   :  { %10806 = vmatpush1.bf16.msra.mxu1 %v10770_v36  ;;  %v10779_v8 = vld [vmem:[#allocation2 + $0x200] sm:$0xff]  ;;  %v10737_v53 = vld [vmem:[#allocation2 + $0xb8] sm:$0xff]  ;;  %v10784_v50 = vld [vmem:[#allocation2 + $0x228] sm:$0xff] }
0x1c37   :  { %10807 = vmatprep.subr.bf16.mxu1 %v10776_v42  ;;  %10847 = vmatpush1.bf16.msra.mxu0 %v10772_v35  ;;  %v10736_v23 = vld [vmem:[#allocation2 + $0xb0] sm:$0xff]  ;;  %v10742_v51 = vld [vmem:[#allocation2 + $0xe0] sm:$0xff]  ;;  %v10741_v3 = vld [vmem:[#allocation2 + $0xd8] sm:$0xff] }
0x1c38   :  { %10848 = vmatprep.subr.bf16.mxu0 %v10778_v5  ;;  %v10789_v12 = vld [vmem:[#allocation2 + $0x250] sm:$0xff]  ;;  %v10747_v15 = vld [vmem:[#allocation2 + $0x108] sm:$0xff]  ;;  %v10794_v46 = vld [vmem:[#allocation2 + $0x278] sm:$0xff] }
0x1c39   :  { %v10746_v58 = vld [vmem:[#allocation2 + $0x100] sm:$0xff]  ;;  %v10715_v37 = vld [vmem:[#allocation2 + $0x8] sm:$0xff]  ;;  %v10752_v49 = vld [vmem:[#allocation2 + $0x130] sm:$0xff] }
0x1c3a   :  { %10808 = vmatpush1.bf16.msra.mxu1 %v10775_v33  ;;  %v10714_v11 = vld [vmem:[#allocation2] sm:$0xff]  ;;  %v10751_v57 = vld [vmem:[#allocation2 + $0x128] sm:$0xff]  ;;  %v10720_v17 = vld [vmem:[#allocation2 + $0x30] sm:$0xff] }
0x1c3b   :  { %10809 = vmatprep.subr.bf16.mxu1 %v10781_v60  ;;  %10849 = vmatpush1.bf16.msra.mxu0 %v10777_v62  ;;  %v11047_v56 = vld [vmem:[#allocation2 + $0x298] sm:$0xff]  ;;  %v10719_v18 = vld [vmem:[#allocation2 + $0x28] sm:$0xff]  ;;  %v11046_v6 = vld [vmem:[#allocation2 + $0x290] sm:$0xff] }
0x1c3c   :  { %10850 = vmatprep.subr.bf16.mxu0 %v10783_v28  ;;  %v10725_v63 = vld [vmem:[#allocation2 + $0x58] sm:$0xff]  ;;  %v11052_v1 = vld [vmem:[#allocation2 + $0x2c0] sm:$0xff]  ;;  %v10724_v0 = vld [vmem:[#allocation2 + $0x50] sm:$0xff] }
0x1c3d   :  { %v11051_v4 = vld [vmem:[#allocation2 + $0x2b8] sm:$0xff]  ;;  %v10730_v29 = vld [vmem:[#allocation2 + $0x80] sm:$0xff]  ;;  %v11057_v7 = vld [vmem:[#allocation2 + $0x2e8] sm:$0xff] }
0x1c3e   :  { %10810 = vmatpush1.bf16.msra.mxu1 %v10780_v13  ;;  %v10729_v26 = vld [vmem:[#allocation2 + $0x78] sm:$0xff]  ;;  %v11056_v44 = vld [vmem:[#allocation2 + $0x2e0] sm:$0xff]  ;;  %v10735_v43 = vld [vmem:[#allocation2 + $0xa8] sm:$0xff] }
0x1c3f   :  { %10811 = vmatprep.subr.bf16.mxu1 %v10786_v10  ;;  %10851 = vmatpush1.bf16.msra.mxu0 %v10782_v32  ;;  %v11062_v2 = vld [vmem:[#allocation2 + $0x310] sm:$0xff]  ;;  %v10734_v36 = vld [vmem:[#allocation2 + $0xa0] sm:$0xff]  ;;  %v11061_v52 = vld [vmem:[#allocation2 + $0x308] sm:$0xff] }
0x1c40   :  { %10852 = vmatprep.subr.bf16.mxu0 %v10788_v25  ;;  %v10740_v42 = vld [vmem:[#allocation2 + $0xd0] sm:$0xff]  ;;  %v11067_v9 = vld [vmem:[#allocation2 + $0x338] sm:$0xff]  ;;  %v10739_v33 = vld [vmem:[#allocation2 + $0xc8] sm:$0xff] }
0x1c41   :  { %v11066_v35 = vld [vmem:[#allocation2 + $0x330] sm:$0xff]  ;;  %v10745_v60 = vld [vmem:[#allocation2 + $0xf8] sm:$0xff]  ;;  %v11072_v5 = vld [vmem:[#allocation2 + $0x360] sm:$0xff] }
0x1c42   :  { %10812 = vmatpush1.bf16.msra.mxu1 %v10785_v55  ;;  %v10744_v13 = vld [vmem:[#allocation2 + $0xf0] sm:$0xff]  ;;  %v11071_v62 = vld [vmem:[#allocation2 + $0x358] sm:$0xff]  ;;  %v10750_v10 = vld [vmem:[#allocation2 + $0x120] sm:$0xff] }
0x1c43   :  { %10813 = vmatprep.subr.bf16.mxu1 %v10791_v54  ;;  %10853 = vmatpush1.bf16.msra.mxu0 %v10787_v24  ;;  %v11077_v28 = vld [vmem:[#allocation2 + $0x388] sm:$0xff]  ;;  %v10749_v55 = vld [vmem:[#allocation2 + $0x118] sm:$0xff]  ;;  %v11076_v32 = vld [vmem:[#allocation2 + $0x380] sm:$0xff] }
0x1c44   :  { %10854 = vmatprep.subr.bf16.mxu0 %v10793_v45  ;;  %v11082_v54 = vld [vmem:[#allocation2 + $0x3b0] sm:$0xff]  ;;  %v10718_v25 = vld [vmem:[#allocation2 + $0x20] sm:$0xff]  ;;  %v11218_v24 = vld [vmem:[#allocation2 + $0x3d8] sm:$0xff]  ;;  %v19179_v45 = vrot.slane %v19150_v19, 1 }
0x1c46   :  { %10814 = vmatpush1.bf16.msra.mxu1 %v10790_v48  ;;  %v11081_v48 = vld [vmem:[#allocation2 + $0x3a8] sm:$0xff] }
0x1c47   :  { %14347 = vmatprep.subr.bf16.mxu1 %v15334_v38  ;;  %10855 = vmatpush1.bf16.msra.mxu0 %v10792_v20  ;;  %v11217_v20 = vld [vmem:[#allocation2 + $0x3d0] sm:$0xff] }
0x1c48   :  { %10962 = vmatprep.subr.bf16.mxu0 %v10717_v34  ;;  %v11223_v34 = vld [vmem:[#allocation2 + $0x400] sm:$0xff] }
0x1c49   :  { %10832 = vmatmul.mubr.bf16.vlgmr.msra.gmra.mrb[32].mxu1 %v19157_v21 }
0x1c4a   :  { %14348 = vmatpush3.bf16.msra.mxu1 %v10759_v22  ;;  %14363 = vmatprep.mubr.msk.bf16.mxu1 %vm15335_vm2, %v15334_v38  ;;  %v10723_v22 = vld [vmem:[#allocation2 + $0x48] sm:$0xff] }
0x1c4b   :  { %14349 = vmatprep.subr.bf16.mxu1 %v15334_v38  ;;  %10873 = vmatmul.mubr.bf16.vlgmr.msra.gmra.mrb[232].mxu0 %v19157_v21 }
0x1c4c   :  { %10963 = vmatpush1.bf16.msra.mxu0 %v10716_v14  ;;  %10994 = vmatprep.mubr.bf16.mxu0 %v15331_v59  ;;  %v11222_v14 = vld [vmem:[#allocation2 + $0x3f8] sm:$0xff] }
0x1c4d   :  { %10964 = vmatprep.subr.bf16.mxu0 %v10722_v61  ;;  %v11228_v61 = vld [vmem:[#allocation2 + $0x428] sm:$0xff] }
0x1c4e   :  { %14350 = vmatpush3.bf16.msra.mxu1 %v10764_v31  ;;  %v10728_v31 = vld [vmem:[#allocation2 + $0x70] sm:$0xff] }
0x1c4f   :  { %14351 = vmatprep.subr.bf16.mxu1 %v15334_v38 }
0x1c50   :  { %10965 = vmatpush1.bf16.msra.mxu0 %v10721_v30  ;;  %v11227_v30 = vld [vmem:[#allocation2 + $0x420] sm:$0xff] }
0x1c51   :  { %10966 = vmatprep.subr.bf16.mxu0 %v10727_v40  ;;  %v11233_v40 = vld [vmem:[#allocation2 + $0x450] sm:$0xff] }
0x1c52   :  { %14352 = vmatpush3.bf16.msra.mxu1 %v10769_v16  ;;  %v10733_v16 = vld [vmem:[#allocation2 + $0x98] sm:$0xff] }
0x1c53   :  { %14353 = vmatprep.subr.bf16.mxu1 %v15334_v38 }
0x1c54   :  { %10967 = vmatpush1.bf16.msra.mxu0 %v10726_v41  ;;  %v11232_v41 = vld [vmem:[#allocation2 + $0x448] sm:$0xff] }
0x1c55   :  { %10968 = vmatprep.subr.bf16.mxu0 %v10732_v27  ;;  %v11238_v27 = vld [vmem:[#allocation2 + $0x478] sm:$0xff] }
0x1c56   :  { %14354 = vmatpush3.bf16.msra.mxu1 %v10774_v39  ;;  %v10738_v39 = vld [vmem:[#allocation2 + $0xc0] sm:$0xff] }
0x1c57   :  { %14355 = vmatprep.subr.bf16.mxu1 %v15334_v38 }
0x1c58   :  { %10969 = vmatpush1.bf16.msra.mxu0 %v10731_v47  ;;  %v11237_v47 = vld [vmem:[#allocation2 + $0x470] sm:$0xff] }
0x1c59   :  { %10970 = vmatprep.subr.bf16.mxu0 %v10737_v53  ;;  %v11243_v53 = vld [vmem:[#allocation2 + $0x4a0] sm:$0xff] }
0x1c5a   :  { %14356 = vmatpush3.bf16.msra.mxu1 %v10779_v8  ;;  %v10743_v8 = vld [vmem:[#allocation2 + $0xe8] sm:$0xff] }
0x1c5b   :  { %14357 = vmatprep.subr.bf16.mxu1 %v15334_v38 }
0x1c5c   :  { %10971 = vmatpush1.bf16.msra.mxu0 %v10736_v23  ;;  %v11242_v23 = vld [vmem:[#allocation2 + $0x498] sm:$0xff] }
0x1c5d   :  { %10972 = vmatprep.subr.bf16.mxu0 %v10742_v51  ;;  %v11248_v51 = vld [vmem:[#allocation2 + $0x4c8] sm:$0xff] }
0x1c5e   :  { %14358 = vmatpush3.bf16.msra.mxu1 %v10784_v50  ;;  %v10748_v50 = vld [vmem:[#allocation2 + $0x110] sm:$0xff] }
0x1c5f   :  { %14359 = vmatprep.subr.bf16.mxu1 %v15334_v38 }
0x1c60   :  { %10973 = vmatpush1.bf16.msra.mxu0 %v10741_v3  ;;  %v11247_v3 = vld [vmem:[#allocation2 + $0x4c0] sm:$0xff] }
0x1c61   :  { %10974 = vmatprep.subr.bf16.mxu0 %v10747_v15  ;;  %v11045_v15 = vld [vmem:[#allocation2 + $0x288] sm:$0xff] }
0x1c62   :  { %14360 = vmatpush3.bf16.msra.mxu1 %v10789_v12  ;;  %v10753_v12 = vld [vmem:[#allocation2 + $0x138] sm:$0xff] }
0x1c63   :  { %14361 = vmatprep.subr.bf16.mxu1 %v15334_v38 }
0x1c64   :  { %10975 = vmatpush1.bf16.msra.mxu0 %v10746_v58  ;;  %v11044_v58 = vld [vmem:[#allocation2 + $0x280] sm:$0xff] }
0x1c65   :  { %10976 = vmatprep.subr.bf16.mxu0 %v10752_v49  ;;  %v11050_v49 = vld [vmem:[#allocation2 + $0x2b0] sm:$0xff] }
0x1c66   :  { %14362 = vmatpush3.bf16.msra.mxu1 %v10794_v46  ;;  %v11253_v46 = vld [vmem:[#allocation2 + $0x4f0] sm:$0xff] }
0x1c67   :  { %10921 = vmatprep.subr.bf16.mxu1 %v10715_v37  ;;  %v11252_v37 = vld [vmem:[#allocation2 + $0x4e8] sm:$0xff] }
0x1c68   :  { %10977 = vmatpush1.bf16.msra.mxu0 %v10751_v57  ;;  %v11049_v57 = vld [vmem:[#allocation2 + $0x2a8] sm:$0xff] }
0x1c69   :  { %14364 = vmatmul.mubr.bf16.vlgmr.msra.gmra.mrb[36].mxu1 %v19157_v21  ;;  %11128 = vmatprep.subr.bf16.mxu0 %v11047_v56  ;;  %v11054_v56 = vld [vmem:[#allocation2 + $0x2d0] sm:$0xff] }
0x1c6a   :  { %10922 = vmatpush1.bf16.msra.mxu1 %v10714_v11  ;;  %10953 = vmatprep.mubr.bf16.mxu1 %v15331_v59  ;;  %v19194_v11 = vrot.slane %v19157_v21, 1  ;;  %v11064_v21 = vld [vmem:[#allocation2 + $0x320] sm:$0xff] }
0x1c6b   :  { %10923 = vmatprep.subr.bf16.mxu1 %v10720_v17  ;;  %10995 = vmatmul.mubr.bf16.vlgmr.msra.gmra.mrb[232].mxu0 %v19150_v19  ;;  %v11055_v17 = vld [vmem:[#allocation2 + $0x2d8] sm:$0xff] }
0x1c6c   :  { %11129 = vmatpush1.bf16.msra.mxu0 %v11046_v6  ;;  %11160 = vmatprep.mubr.bf16.mxu0 %v15331_v59  ;;  %v11059_v6 = vld [vmem:[#allocation2 + $0x2f8] sm:$0xff] }
0x1c6d   :  { %11130 = vmatprep.subr.bf16.mxu0 %v11052_v1  ;;  %v11069_v1 = vld [vmem:[#allocation2 + $0x348] sm:$0xff] }
0x1c6e   :  { %10924 = vmatpush1.bf16.msra.mxu1 %v10719_v18  ;;  %v11060_v18 = vld [vmem:[#allocation2 + $0x300] sm:$0xff] }
0x1c6f   :  { %10925 = vmatprep.subr.bf16.mxu1 %v10725_v63  ;;  %v11070_v63 = vld [vmem:[#allocation2 + $0x350] sm:$0xff] }
0x1c70   :  { %11131 = vmatpush1.bf16.msra.mxu0 %v11051_v4  ;;  %v11074_v4 = vld [vmem:[#allocation2 + $0x370] sm:$0xff] }
0x1c71   :  { %11132 = vmatprep.subr.bf16.mxu0 %v11057_v7  ;;  %v11079_v7 = vld [vmem:[#allocation2 + $0x398] sm:$0xff] }
0x1c72   :  { %10926 = vmatpush1.bf16.msra.mxu1 %v10724_v0  ;;  %v11075_v0 = vld [vmem:[#allocation2 + $0x378] sm:$0xff] }
0x1c73   :  { %10927 = vmatprep.subr.bf16.mxu1 %v10730_v29  ;;  %v11080_v29 = vld [vmem:[#allocation2 + $0x3a0] sm:$0xff] }
0x1c74   :  { %11133 = vmatpush1.bf16.msra.mxu0 %v11056_v44  ;;  %v11053_v44 = vld [vmem:[#allocation2 + $0x2c8] sm:$0xff] }
0x1c75   :  { %11134 = vmatprep.subr.bf16.mxu0 %v11062_v2  ;;  %v11063_v2 = vld [vmem:[#allocation2 + $0x318] sm:$0xff] }
0x1c76   :  { %10928 = vmatpush1.bf16.msra.mxu1 %v10729_v26  ;;  %v11048_v26 = vld [vmem:[#allocation2 + $0x2a0] sm:$0xff] }
0x1c77   :  { %10929 = vmatprep.subr.bf16.mxu1 %v10735_v43  ;;  %v11058_v43 = vld [vmem:[#allocation2 + $0x2f0] sm:$0xff] }
0x1c78   :  { %11135 = vmatpush1.bf16.msra.mxu0 %v11061_v52  ;;  %v11073_v52 = vld [vmem:[#allocation2 + $0x368] sm:$0xff] }
0x1c79   :  { %11136 = vmatprep.subr.bf16.mxu0 %v11067_v9  ;;  %v11083_v9 = vld [vmem:[#allocation2 + $0x3b8] sm:$0xff] }
0x1c7a   :  { %10930 = vmatpush1.bf16.msra.mxu1 %v10734_v36  ;;  %v11068_v36 = vld [vmem:[#allocation2 + $0x340] sm:$0xff] }
0x1c7b   :  { %10931 = vmatprep.subr.bf16.mxu1 %v10740_v42  ;;  %v11078_v42 = vld [vmem:[#allocation2 + $0x390] sm:$0xff] }
0x1c7c   :  { %11137 = vmatpush1.bf16.msra.mxu0 %v11066_v35  ;;  %v11215_v35 = vld [vmem:[#allocation2 + $0x3c0] sm:$0xff] }
0x1c7d   :  { %11138 = vmatprep.subr.bf16.mxu0 %v11072_v5  ;;  %v11220_v5 = vld [vmem:[#allocation2 + $0x3e8] sm:$0xff] }
0x1c7e   :  { %10932 = vmatpush1.bf16.msra.mxu1 %v10739_v33  ;;  %v11216_v33 = vld [vmem:[#allocation2 + $0x3c8] sm:$0xff] }
0x1c7f   :  { %10933 = vmatprep.subr.bf16.mxu1 %v10745_v60  ;;  %v11221_v60 = vld [vmem:[#allocation2 + $0x3f0] sm:$0xff] }
0x1c80   :  { %11139 = vmatpush1.bf16.msra.mxu0 %v11071_v62  ;;  %v11225_v62 = vld [vmem:[#allocation2 + $0x410] sm:$0xff] }
0x1c81   :  { %11140 = vmatprep.subr.bf16.mxu0 %v11077_v28  ;;  %v11230_v28 = vld [vmem:[#allocation2 + $0x438] sm:$0xff] }
0x1c82   :  { %10934 = vmatpush1.bf16.msra.mxu1 %v10744_v13  ;;  %v11226_v13 = vld [vmem:[#allocation2 + $0x418] sm:$0xff] }
0x1c83   :  { %10935 = vmatprep.subr.bf16.mxu1 %v10750_v10  ;;  %v11231_v10 = vld [vmem:[#allocation2 + $0x440] sm:$0xff] }
0x1c84   :  { %11141 = vmatpush1.bf16.msra.mxu0 %v11076_v32  ;;  %v11235_v32 = vld [vmem:[#allocation2 + $0x460] sm:$0xff] }
0x1c85   :  { %11142 = vmatprep.subr.bf16.mxu0 %v11082_v54  ;;  %v11241_v54 = vld [vmem:[#allocation2 + $0x490] sm:$0xff] }
0x1c86   :  { %10936 = vmatpush1.bf16.msra.mxu1 %v10749_v55  ;;  %v11236_v55 = vld [vmem:[#allocation2 + $0x468] sm:$0xff] }
0x1c87   :  { %14367 = vmatprep.subr.bf16.mxu1 %v15334_v38 }
0x1c88   :  { %11143 = vmatpush1.bf16.msra.mxu0 %v11081_v48  ;;  %v11246_v48 = vld [vmem:[#allocation2 + $0x4b8] sm:$0xff] }
0x1c89   :  { %10954 = vmatmul.mubr.bf16.vlgmr.msra.gmra.mrb[32].mxu1 %v19150_v19  ;;  %11298 = vmatprep.subr.bf16.mxu0 %v11218_v24  ;;  %v11251_v24 = vld [vmem:[#allocation2 + $0x4e0] sm:$0xff] }
0x1c8a   :  { %14368 = vmatpush3.bf16.msra.mxu1 %v10718_v25  ;;  %14383 = vmatprep.mubr.msk.bf16.mxu1 %vm15335_vm2, %v15334_v38  ;;  %v11240_v25 = vld [vmem:[#allocation2 + $0x488] sm:$0xff] }
0x1c8b   :  { %14369 = vmatprep.subr.bf16.mxu1 %v15334_v38  ;;  %11161 = vmatmul.mubr.bf16.vlgmr.msra.gmra.mrb[232].mxu0 %v19179_v45 }
0x1c8c   :  { %11299 = vmatpush1.bf16.msra.mxu0 %v11217_v20  ;;  %11330 = vmatprep.mubr.bf16.mxu0 %v15331_v59  ;;  %v11224_v20 = vld [vmem:[#allocation2 + $0x408] sm:$0xff] }
0x1c8d   :  { %11300 = vmatprep.subr.bf16.mxu0 %v11223_v34  ;;  %v11229_v34 = vld [vmem:[#allocation2 + $0x430] sm:$0xff] }
0x1c8e   :  { %14370 = vmatpush3.bf16.msra.mxu1 %v10723_v22  ;;  %v11219_v22 = vld [vmem:[#allocation2 + $0x3e0] sm:$0xff] }
0x1c8f   :  { %14371 = vmatprep.subr.bf16.mxu1 %v15334_v38 }
0x1c90   :  { %11301 = vmatpush1.bf16.msra.mxu0 %v11222_v14  ;;  %v11239_v14 = vld [vmem:[#allocation2 + $0x480] sm:$0xff] }
0x1c91   :  { %11302 = vmatprep.subr.bf16.mxu0 %v11228_v61  ;;  %v11244_v61 = vld [vmem:[#allocation2 + $0x4a8] sm:$0xff] }
0x1c92   :  { %14372 = vmatpush3.bf16.msra.mxu1 %v10728_v31  ;;  %v11234_v31 = vld [vmem:[#allocation2 + $0x458] sm:$0xff] }
0x1c93   :  { %14373 = vmatprep.subr.bf16.mxu1 %v15334_v38 }
0x1c94   :  { %11303 = vmatpush1.bf16.msra.mxu0 %v11227_v30  ;;  %v11254_v30 = vld [vmem:[#allocation2 + $0x4f8] sm:$0xff] }
0x1c95   :  { %11304 = vmatprep.subr.bf16.mxu0 %v11233_v40 }
0x1c96   :  { %14374 = vmatpush3.bf16.msra.mxu1 %v10733_v16  ;;  %v11249_v16 = vld [vmem:[#allocation2 + $0x4d0] sm:$0xff] }
0x1c97   :  { %14375 = vmatprep.subr.bf16.mxu1 %v15334_v38 }
0x1c98   :  { %11305 = vmatpush1.bf16.msra.mxu0 %v11232_v41 }
0x1c99   :  { %11306 = vmatprep.subr.bf16.mxu0 %v11238_v27 }
0x1c9a   :  { %14376 = vmatpush3.bf16.msra.mxu1 %v10738_v39 }
0x1c9b   :  { %14377 = vmatprep.subr.bf16.mxu1 %v15334_v38 }
0x1c9c   :  { %11307 = vmatpush1.bf16.msra.mxu0 %v11237_v47 }
0x1c9d   :  { %11308 = vmatprep.subr.bf16.mxu0 %v11243_v53 }
0x1c9e   :  { %14378 = vmatpush3.bf16.msra.mxu1 %v10743_v8 }
0x1c9f   :  { %14379 = vmatprep.subr.bf16.mxu1 %v15334_v38 }
0x1ca0   :  { %11309 = vmatpush1.bf16.msra.mxu0 %v11242_v23 }
0x1ca1   :  { %11310 = vmatprep.subr.bf16.mxu0 %v11248_v51 }
0x1ca2   :  { %14380 = vmatpush3.bf16.msra.mxu1 %v10748_v50 }
0x1ca3   :  { %14381 = vmatprep.subr.bf16.mxu1 %v15334_v38 }
0x1ca4   :  { %11311 = vmatpush1.bf16.msra.mxu0 %v11247_v3 }
0x1ca5   :  { %11312 = vmatprep.subr.bf16.mxu0 %v11253_v46 }
0x1ca6   :  { %14382 = vmatpush3.bf16.msra.mxu1 %v10753_v12 }
0x1ca7   :  { %11087 = vmatprep.subr.bf16.mxu1 %v11045_v15 }
0x1ca8   :  { %11313 = vmatpush1.bf16.msra.mxu0 %v11252_v37 }
0x1ca9   :  { %14384 = vmatmul.mubr.bf16.vlgmr.msra.gmra.mrb[36].mxu1 %v19150_v19  ;;  %v11065_v19 = vld [vmem:[#allocation2 + $0x328] sm:$0xff] }
0x1caa   :  { %11088 = vmatpush1.bf16.msra.mxu1 %v11044_v58  ;;  %11119 = vmatprep.mubr.bf16.mxu1 %v15331_v59 }
0x1cab   :  { %11089 = vmatprep.subr.bf16.mxu1 %v11050_v49  ;;  %11331 = vmatmul.mubr.bf16.vlgmr.msra.gmra.mrb[232].mxu0 %v19194_v11 }
0x1cae   :  { %11090 = vmatpush1.bf16.msra.mxu1 %v11049_v57 }
0x1caf   :  { %11091 = vmatprep.subr.bf16.mxu1 %v11055_v17 }
0x1cb2   :  { %11092 = vmatpush1.bf16.msra.mxu1 %v11054_v56 }
0x1cb3   :  { %11093 = vmatprep.subr.bf16.mxu1 %v11060_v18 }
0x1cb6   :  { %11094 = vmatpush1.bf16.msra.mxu1 %v11059_v6 }
0x1cb7   :  { %11095 = vmatprep.subr.bf16.mxu1 %v11065_v19 }
0x1cba   :  { %11096 = vmatpush1.bf16.msra.mxu1 %v11064_v21 }
0x1cbb   :  { %11097 = vmatprep.subr.bf16.mxu1 %v11070_v63 }
0x1cbe   :  { %11098 = vmatpush1.bf16.msra.mxu1 %v11069_v1 }
0x1cbf   :  { %11099 = vmatprep.subr.bf16.mxu1 %v11075_v0 }
0x1cc2   :  { %11100 = vmatpush1.bf16.msra.mxu1 %v11074_v4 }
0x1cc3   :  { %11101 = vmatprep.subr.bf16.mxu1 %v11080_v29 }
0x1cc6   :  { %11102 = vmatpush1.bf16.msra.mxu1 %v11079_v7 }
0x1cc7   :  { %14387 = vmatprep.subr.bf16.mxu1 %v15334_v38 }
0x1cc9   :  { %11120 = vmatmul.mubr.bf16.vlgmr.msra.gmra.mrb[32].mxu1 %v19179_v45 }
0x1cca   :  { %14388 = vmatpush3.bf16.msra.mxu1 %v11048_v26  ;;  %14403 = vmatprep.mubr.msk.bf16.mxu1 %vm15335_vm2, %v15334_v38 }
0x1ccb   :  { %14389 = vmatprep.subr.bf16.mxu1 %v15334_v38 }
0x1cce   :  { %14390 = vmatpush3.bf16.msra.mxu1 %v11053_v44 }
0x1ccf   :  { %14391 = vmatprep.subr.bf16.mxu1 %v15334_v38 }
0x1cd2   :  { %14392 = vmatpush3.bf16.msra.mxu1 %v11058_v43 }
0x1cd3   :  { %14393 = vmatprep.subr.bf16.mxu1 %v15334_v38 }
0x1cd6   :  { %14394 = vmatpush3.bf16.msra.mxu1 %v11063_v2 }
0x1cd7   :  { %14395 = vmatprep.subr.bf16.mxu1 %v15334_v38 }
0x1cda   :  { %14396 = vmatpush3.bf16.msra.mxu1 %v11068_v36 }
0x1cdb   :  { %14397 = vmatprep.subr.bf16.mxu1 %v15334_v38 }
0x1cde   :  { %14398 = vmatpush3.bf16.msra.mxu1 %v11073_v52 }
0x1cdf   :  { %14399 = vmatprep.subr.bf16.mxu1 %v15334_v38 }
0x1ce2   :  { %14400 = vmatpush3.bf16.msra.mxu1 %v11078_v42 }
0x1ce3   :  { %14401 = vmatprep.subr.bf16.mxu1 %v15334_v38 }
0x1ce6   :  { %14402 = vmatpush3.bf16.msra.mxu1 %v11083_v9 }
0x1ce7   :  { %11257 = vmatprep.subr.bf16.mxu1 %v11216_v33 }
0x1ce9   :  { %14404 = vmatmul.mubr.bf16.vlgmr.msra.gmra.mrb[36].mxu1 %v19179_v45  ;;  %v11250_v45 = vld [vmem:[#allocation2 + $0x4d8] sm:$0xff] }
0x1cea   :  { %11258 = vmatpush1.bf16.msra.mxu1 %v11215_v35  ;;  %11289 = vmatprep.mubr.bf16.mxu1 %v15331_v59  ;;  %v11245_v59 = vld [vmem:[#allocation2 + $0x4b0] sm:$0xff] }
0x1ceb   :  { %11259 = vmatprep.subr.bf16.mxu1 %v11221_v60 }
0x1cee   :  { %11260 = vmatpush1.bf16.msra.mxu1 %v11220_v5  ;;  %v15336_v5 = vmov 1966171168  }
0x1cef   :  { %11261 = vmatprep.subr.bf16.mxu1 %v11226_v13  ;;  %v11424_v13 = vunpack.c.l.s4 %v15336_v5 }
0x1cf2   :  { %11262 = vmatpush1.bf16.msra.mxu1 %v11225_v62  ;;  %v11426_v62 = vlaneseq }
0x1cf3   :  { %11263 = vmatprep.subr.bf16.mxu1 %v11231_v10  ;;  %v11425_v10 = vunpack.c.0.s8 %v11424_v13 }
0x1cf4   :  { %vm11561_vm6 = vcmp.lt.s32.totalorder %v11426_v62, 640 }
0x1cf6   :  { %11264 = vmatpush1.bf16.msra.mxu1 %v11230_v28  ;;  %v11427_v28 = vshrl.u32 %v11426_v62, 7 }
0x1cf7   :  { %11265 = vmatprep.subr.bf16.mxu1 %v11236_v55  ;;  %v11384_v55 = vld [vmem:[%s19277_s14] sm:$0x1] }
0x1cfa   :  { %11266 = vmatpush1.bf16.msra.mxu1 %v11235_v32 }
0x1cfb   :  { %11267 = vmatprep.subr.bf16.mxu1 %v11241_v54 }
0x1cfe   :  { %11268 = vmatpush1.bf16.msra.mxu1 %v11240_v25  ;;  %v19247_v25 = vsub.s32 %v11425_v10, %v11427_v28 }
0x1cff   :  { %11269 = vmatprep.subr.bf16.mxu1 %v11246_v48 }
0x1d02   :  { %11270 = vmatpush1.bf16.msra.mxu1 %v11245_v59 }
0x1d03   :  { %11271 = vmatprep.subr.bf16.mxu1 %v11251_v24 }
0x1d06   :  { %11272 = vmatpush1.bf16.msra.mxu1 %v11250_v45 }
0x1d07   :  { %14407 = vmatprep.subr.bf16.mxu1 %v15334_v38 }
0x1d09   :  { %11290 = vmatmul.mubr.bf16.vlgmr.msra.gmra.mrb[32].mxu1 %v19194_v11 }
0x1d0a   :  { %14408 = vmatpush3.bf16.msra.mxu1 %v11219_v22  ;;  %14423 = vmatprep.mubr.msk.bf16.mxu1 %vm15335_vm2, %v15334_v38 }
0x1d0b   :  { %14409 = vmatprep.subr.bf16.mxu1 %v15334_v38 }
0x1d0e   :  { %14410 = vmatpush3.bf16.msra.mxu1 %v11224_v20  ;;  %v11448_v20 = vsub.s32 0, %v11427_v28 }
0x1d0f   :  { %14411 = vmatprep.subr.bf16.mxu1 %v15334_v38 }
0x1d12   :  { %14412 = vmatpush3.bf16.msra.mxu1 %v11229_v34 }
0x1d13   :  { %14413 = vmatprep.subr.bf16.mxu1 %v15334_v38 }
0x1d16   :  { %14414 = vmatpush3.bf16.msra.mxu1 %v11234_v31 }
0x1d17   :  { %14415 = vmatprep.subr.bf16.mxu1 %v15334_v38 }
0x1d1a   :  { %14416 = vmatpush3.bf16.msra.mxu1 %v11239_v14 }
0x1d1b   :  { %14417 = vmatprep.subr.bf16.mxu1 %v15334_v38 }
0x1d1e   :  { %14418 = vmatpush3.bf16.msra.mxu1 %v11244_v61 }
0x1d1f   :  { %14419 = vmatprep.subr.bf16.mxu1 %v15334_v38 }
0x1d22   :  { %14420 = vmatpush3.bf16.msra.mxu1 %v11249_v16 }
0x1d23   :  { %14421 = vmatprep.subr.bf16.mxu1 %v15334_v38 }
0x1d26   :  { %14422 = vmatpush3.bf16.msra.mxu1 %v11254_v30 }
0x1d29   :  { %14424 = vmatmul.mubr.bf16.vlgmr.msra.gmra.mrb[36].mxu1 %v19194_v11 }
0x1d7e   :  { %v19223_v40 = vpop.f32.mrb[232].mxu0 }
0x1d7f   :  { %v19225_v39 = vpop.f32.mrb[233].mxu0  ;;  %v11399_v23 = vmul.f32 %v19223_v40, %v19223_v40  ;;  %v11389_v58 = vsel %vm11385_vm5, %v19223_v40, 0.0 }
0x1d80   :  { %v11336_v41 = vpop.f32.mrb[234].mxu0  ;;  %v11400_v37 = vmul.f32 %v19225_v39, %v19225_v39  ;;  %v11391_v56 = vsel %vm11385_vm5, %v19225_v39, 0.0 }
0x1d81   :  { %v11337_v27 = vpop.f32.mrb[235].mxu0  ;;  %v11405_v17 = vsel %vm11385_vm5, %v11399_v23, 0.0 }
0x1d82   :  { %v11407_v19 = vsel %vm11385_vm5, %v11400_v37, 0.0 }
0x1ddc   :  { %v11291_v8 = vpop.f32.mrb[32].mxu1 }
0x1ddd   :  { %v11386_v47 = vsel %vm11385_vm5, %v11291_v8, 0.0  ;;  %v11397_v53 = vmul.f32 %v11291_v8, %v11291_v8  ;;  %v11293_v50 = vpop.f32.mrb[33].mxu1 }
0x1dde   :  { %v11387_v38 = vsel %vm11385_vm5, %v11293_v50, 0.0  ;;  %v11398_v51 = vmul.f32 %v11293_v50, %v11293_v50  ;;  %v11295_v12 = vpop.f32.mrb[34].mxu1 }
0x1ddf   :  { %v11402_v3 = vsel %vm11385_vm5, %v11397_v53, 0.0  ;;  %v11388_v15 = vadd.f32 %v11387_v38, %v11386_v47  ;;  %v11296_v46 = vpop.f32.mrb[35].mxu1 }
0x1de0   :  { %v11403_v49 = vsel %vm11385_vm5, %v11398_v51, 0.0 }
0x1de1   :  { %v11404_v11 = vadd.f32 %v11403_v49, %v11402_v3  ;;  %v11390_v57 = vadd.f32 %v11389_v58, %v11388_v15 }
0x1de3   :  { %v11392_v18 = vadd.f32 %v11391_v56, %v11390_v57  ;;  %v11406_v6 = vadd.f32 %v11405_v17, %v11404_v11 }
0x1de5   :  { %v11408_v21 = vadd.f32 %v11407_v19, %v11406_v6 }
0x1dfc   :  { %v11373_v63 = vpop.f32.mrb[36].mxu1 }
0x1dfd   :  { %v11401_v1 = vmul.f32 %v11373_v63, %v11373_v63  ;;  %v14425_v0 = vpop.f32.mrb[37].mxu1  ;;  %v11393_v4 = vsel %vm11385_vm5, %v11373_v63, 0.0 }
0x1dfe   :  { %v11376_v29 = vpop.f32.mrb[38].mxu1  ;;  %v11394_v7 = vadd.f32 %v11393_v4, %v11392_v18 }
0x1dff   :  { %v14426_v26 = vpop.f32.mrb[39].mxu1  ;;  %v11409_v44 = vsel %vm11385_vm5, %v11401_v1, 0.0 }
0x1e00   :  { %11395 = vadd.xlane.f32.xlu0 %v11394_v7  ;;  %v11410_v43 = vadd.f32 %v11409_v44, %v11408_v21 }
0x1e04   :  { %11411 = vadd.xlane.f32.xlu0 %v11410_v43 }
0x1e8d   :  { %v11396_v2 = vpop.xlane.xlu0 %11395 }
0x1e8e   :  { %v11413_v36 = vmul.f32 0.0015625, %v11396_v2 }
0x1e90   :  { %v11415_v42 = vmul.f32 %v11413_v36, %v11413_v36 }
0x1e91   :  { %v11412_v52 = vpop.xlane.xlu0 %11411 }
0x1e92   :  { %v11414_v9 = vmul.f32 0.0015625, %v11412_v52 }
0x1e94   :  { %v11416_v33 = vsub.f32 %v11414_v9, %v11415_v42 }
0x1e96   :  { %v11417_v35 = vmax.f32 %v11416_v33, 0.0 }
0x1e98   :  { %v11418_v60 = vadd.f32 1e-05, %v11417_v35 }
0x1e9a   :  { %15317 = vrsqrt.f32 %v11418_v60 }
0x1ea4   :  { %v15318_v32 = vpop.eup %15317 }
0x1ea5   :  { %v11420_v54 = vmul.f32 %v15318_v32, %v11384_v55 }
0x1ea7   :  { %v11421_v48 = vmul.f32 %v11420_v54, %v11413_v36 }
0x1ea9   :  { %v11429_v59 = vrot.slane %v11421_v48, %v19247_v25 }
0x1eab   :  { %v11436_v24 = vrot.slane %v11429_v59, %v19247_v25 }
0x1ead   :  { %11437 = vrot.lane.b32.xlu1 %v11436_v24, %s15332_s8 }
0x1eb1   :  { %11443 = vperm.xlu1 %15315, %v11420_v54  }
0x1f1f   :  { %v11438_v45 = vpop.permute.xlu1 %11437 }
0x1f20   :  { %v11440_v22 = vsub.f32 %v11384_v55, %v11438_v45 }
0x1f22   :  { %11457 = vperm.xlu0 %15316, %v11440_v22  }
0x1f30   :  { %v11444_v34 = vpop.permute.xlu1 %11443 }
0x1f31   :  { %v11449_v31 = vrot.slane %v11444_v34, %v11448_v20 }
0x1f33   :  { %v11450_v14 = vmul.f32 %v11449_v31, %v11291_v8  ;;  %v11451_v16 = vmul.f32 %v11449_v31, %v11293_v50  ;;  %v11452_v30 = vmul.f32 %v11449_v31, %v19223_v40  ;;  %v11453_v41 = vmul.f32 %v11449_v31, %v19225_v39 }
0x1f34   :  { %v11454_v47 = vmul.f32 %v11449_v31, %v11373_v63 }
0x1fa1   :  { %v11458_v61 = vpop.permute.xlu0 %11457 }
0x1fa2   :  { %v11463_v27 = vrot.slane %v11458_v61, %v11448_v20 }
0x1fa4   :  { %v11464_v53 = vadd.f32 %v11463_v27, %v11450_v14  ;;  %v11465_v23 = vadd.f32 %v11463_v27, %v11451_v16  ;;  %v11466_v38 = vadd.f32 %v11463_v27, %v11452_v30  ;;  %v11467_v51 = vadd.f32 %v11463_v27, %v11453_v41 }
0x1fa5   :  { %v11468_v12 = vadd.f32 %v11463_v27, %v11454_v47 }
0x1fa6   :  { %v11474_v3 = vmul.f32 0.044715, %v11464_v53  ;;  %v11475_v15 = vmul.f32 0.044715, %v11465_v23  ;;  %v11476_v46 = vmul.f32 0.044715, %v11466_v38 }
0x1fa7   :  { %v11477_v58 = vmul.f32 0.044715, %v11467_v51  ;;  %v11478_v37 = vmul.f32 0.044715, %v11468_v12  ;;  %v11469_v2 = vmul.f32 0.5, %v11464_v53  ;;  %v11470_v42 = vmul.f32 0.5, %v11465_v23 }
0x1fa8   :  { %v11479_v49 = vmul.f32 %v11474_v3, %v11464_v53  ;;  %v11480_v8 = vmul.f32 %v11475_v15, %v11465_v23  ;;  %v11481_v11 = vmul.f32 %v11476_v46, %v11466_v38  ;;  %v11471_v35 = vmul.f32 0.5, %v11466_v38 }
0x1fa9   :  { %v11482_v50 = vmul.f32 %v11477_v58, %v11467_v51  ;;  %v11483_v57 = vmul.f32 %v11478_v37, %v11468_v12  ;;  %v11472_v10 = vmul.f32 0.5, %v11467_v51  ;;  %v11473_v32 = vmul.f32 0.5, %v11468_v12 }
0x1faa   :  { %v11484_v40 = vmul.f32 %v11479_v49, %v11464_v53  ;;  %v11485_v17 = vmul.f32 %v11480_v8, %v11465_v23  ;;  %v11486_v39 = vmul.f32 %v11481_v11, %v11466_v38 }
0x1fab   :  { %v11487_v56 = vmul.f32 %v11482_v50, %v11467_v51  ;;  %v11488_v18 = vmul.f32 %v11483_v57, %v11468_v12 }
0x1fac   :  { %v11489_v6 = vadd.f32 %v11484_v40, %v11464_v53  ;;  %v11490_v19 = vadd.f32 %v11485_v17, %v11465_v23  ;;  %v11491_v21 = vadd.f32 %v11486_v39, %v11466_v38 }
0x1fad   :  { %v11492_v63 = vadd.f32 %v11487_v56, %v11467_v51  ;;  %v11493_v1 = vadd.f32 %v11488_v18, %v11468_v12 }
0x1fae   :  { %v11494_v0 = vmul.f32 0.7978846, %v11489_v6  ;;  %v11495_v4 = vmul.f32 0.7978846, %v11490_v19  ;;  %v11496_v29 = vmul.f32 0.7978846, %v11491_v21 }
0x1faf   :  { %v11497_v7 = vmul.f32 0.7978846, %v11492_v63  ;;  %v11498_v26 = vmul.f32 0.7978846, %v11493_v1 }
0x1fb0   :  { %15319 = vtanh.f32 %v11494_v0 }
0x1fb1   :  { %15321 = vtanh.f32 %v11495_v4 }
0x1fb2   :  { %15323 = vtanh.f32 %v11496_v29 }
0x1fb3   :  { %15325 = vtanh.f32 %v11497_v7 }
0x1fb4   :  { %15327 = vtanh.f32 %v11498_v26 }
0x1fba   :  { %v15320_v44 = vpop.eup %15319 }
0x1fbb   :  { %v15322_v43 = vpop.eup %15321  ;;  %v11504_v36 = vadd.f32 1.0, %v15320_v44 }
0x1fbc   :  { %v15324_v52 = vpop.eup %15323  ;;  %v11505_v9 = vadd.f32 1.0, %v15322_v43 }
0x1fbd   :  { %v15326_v33 = vpop.eup %15325  ;;  %v11506_v60 = vadd.f32 1.0, %v15324_v52  ;;  %v11509_v5 = vmul.f32 %v11504_v36, %v11469_v2 }
0x1fbe   :  { %v15328_v13 = vpop.eup %15327  ;;  %v11507_v28 = vadd.f32 1.0, %v15326_v33  ;;  %v11510_v55 = vmul.f32 %v11505_v9, %v11470_v42 }
0x1fbf   :  { %v11508_v54 = vadd.f32 1.0, %v15328_v13  ;;  %v11511_v48 = vmul.f32 %v11506_v60, %v11471_v35 }
0x1fc0   :  { %v11512_v59 = vmul.f32 %v11507_v28, %v11472_v10  ;;  %v11519_v24 = vcombine.low %v11509_v5, %v11510_v55 }
0x1fc1   :  { %v11513_v45 = vmul.f32 %v11508_v54, %v11473_v32 }
0x1fc2   :  { %v11520_v22 = vcombine.low %v11511_v48, %v11512_v59  ;;  %v11527_v20 = vrot.slane %v11519_v24, %v19247_v25 }
0x1fc3   :  { %v11541_v31 = vrot.slane %v11513_v45, %v19247_v25 }
0x1fc4   :  { %v11534_v34 = vrot.slane %v11520_v22, %v19247_v25 }
0x1fc5   :  { %v11556_v16 = vrot.slane %v11541_v31, %v19247_v25 }
0x1fc6   :  { %v11542_v14 = vcombine.low %v11527_v20, %v11534_v34 }
0x1fc8   :  { %v11549_v61 = vrot.slane %v11542_v14, %v19247_v25 }
0x1fca   :  { %v11557_v30 = vcombine.low %v11549_v61, %v11556_v16 }
0x1fcc   :  { %11563 = vst.msk [vmem:[%s19278_s15] sm:$0x1f] %vm11561_vm6, %v11557_v30 }
0x1fcd   :  { %11568 = vsyncmov [#allocation3] }
0x1fd0   :  { %s11569_s0 = vpop.sfrf %11568 }
0x1fd1   :  { %p12339_p0 = scmp.ne.s32.totalorder %s11569_s0, 0 }
0x1fd3   :  { %11573 = shalt.err (%p12339_p0)  }

</bundles_post_ra>
